<compile_context>
chip_gen: v7x
topology: tpu7x:2x2x1
jax: 0.10.0
libtpu: 0.0.40
codegen_flags: <defaults>
</compile_context>

<pallas_src>
from functools import partial

import jax
import jax.numpy as jnp
from jax.experimental import pallas as pl
from jax.experimental.pallas import tpu as pltpu


# ----------------------------------------------------------------------------
# Pallas kernels
# ----------------------------------------------------------------------------

def _fused_mm_kernel(do_relu, has_res, x_ref, w_ref, sc_ref, sh_ref, *rest):
    """Tiled matmul with fused BN scale/shift, optional residual, optional ReLU.

    Grid = (M tiles, OC tiles, K tiles); K is innermost/"arbitrary".
    acc (f32, tile-sized) accumulates over K; finalize on the last K step.
    """
    if has_res:
        res_ref, o_ref, acc_ref = rest
    else:
        o_ref, acc_ref = rest

    k = pl.program_id(2)

    @pl.when(k == 0)
    def _():
        acc_ref[...] = jnp.zeros_like(acc_ref)

    acc_ref[...] += jnp.dot(x_ref[...], w_ref[...],
                            preferred_element_type=jnp.float32)

    @pl.when(k == pl.num_programs(2) - 1)
    def _():
        y = acc_ref[...] * sc_ref[...] + sh_ref[...]
        if has_res:
            y = y + res_ref[...].astype(jnp.float32)
        if do_relu:
            y = jnp.maximum(y, 0.0)
        o_ref[...] = y.astype(o_ref.dtype)


def _maxpool_kernel(x_ref, o_ref):
    """VPU maximum-tree over the 9 shifted 3x3 windows (leading axis)."""
    m = x_ref[0]
    for i in range(1, 9):
        m = jnp.maximum(m, x_ref[i])
    o_ref[...] = m


# ----------------------------------------------------------------------------
# Tiling helpers
# ----------------------------------------------------------------------------

def _round_up(x, m):
    return ((x + m - 1) // m) * m


def _k_tiling(K):
    """Pick K tile (multiple of 128, <= 512) and padded K = tk * num_steps."""
    k128 = _round_up(K, 128)
    steps = -(-k128 // 512)
    tk = _round_up(-(-k128 // steps), 128)
    return tk * steps, tk


# ----------------------------------------------------------------------------
# Fused matmul wrapper
# ----------------------------------------------------------------------------

def fused_matmul(x, wp, scale_p, shift_p, oc, *, relu=False, residual=None,
                 out_dtype=jnp.bfloat16):
    """y = relu?( (x @ wp) * scale + shift [+ residual] ).

    x: (M, K) any float dtype (cast to bf16).
    wp: (Kp, OCp) bf16, pre-padded (Kp = tk * steps, OCp = round_up(OC, 128)).
    scale_p / shift_p: (1, OCp) f32.  residual: (M, oc) or None.
    Returns (M, oc) in out_dtype.
    """
    M, K = x.shape
    Kp, OCp = wp.shape
    kp_chk, tk = _k_tiling(K)
    assert kp_chk == Kp, (K, kp_chk, Kp)

    tn = 256 if OCp % 256 == 0 else 128
    tm = 256 if M >= 256 else _round_up(M, 16)
    Mp = _round_up(M, tm)

    xp = jnp.pad(x.astype(jnp.bfloat16), ((0, Mp - M), (0, Kp - K)))

    has_res = residual is not None
    inputs = [xp, wp, scale_p, shift_p]
    in_specs = [
        pl.BlockSpec((tm, tk), lambda i, j, k: (i, k)),
        pl.BlockSpec((tk, tn), lambda i, j, k: (k, j)),
        pl.BlockSpec((1, tn), lambda i, j, k: (0, j)),
        pl.BlockSpec((1, tn), lambda i, j, k: (0, j)),
    ]
    if has_res:
        resp = jnp.pad(residual.astype(jnp.bfloat16),
                       ((0, Mp - M), (0, OCp - oc)))
        inputs.append(resp)
        in_specs.append(pl.BlockSpec((tm, tn), lambda i, j, k: (i, j)))

    out = pl.pallas_call(
        partial(_fused_mm_kernel, relu, has_res),
        out_shape=jax.ShapeDtypeStruct((Mp, OCp), out_dtype),
        grid_spec=pltpu.PrefetchScalarGridSpec(
            num_scalar_prefetch=0,
            grid=(Mp // tm, OCp // tn, Kp // tk),
            in_specs=in_specs,
            out_specs=pl.BlockSpec((tm, tn), lambda i, j, k: (i, j)),
            scratch_shapes=[pltpu.VMEM((tm, tn), jnp.float32)],
        ),
        compiler_params=pltpu.CompilerParams(
            dimension_semantics=("parallel", "parallel", "arbitrary")),
    )(*inputs)
    return out[:M, :oc]


# ----------------------------------------------------------------------------
# Conv / maxpool wrappers (NHWC)
# ----------------------------------------------------------------------------

def conv_bn(x, cp, *, relu, residual=None):
    """Conv2d(no bias) + folded eval-mode BN (+ residual) (+ ReLU), NHWC."""
    N, H, W, C = x.shape
    kh, kw, s, p, oc = cp["kh"], cp["kw"], cp["stride"], cp["pad"], cp["oc"]
    OH = (H + 2 * p - kh) // s + 1
    OW = (W + 2 * p - kw) // s + 1

    if kh == 1 and kw == 1 and p == 0:
        cols = x[:, ::s, ::s, :].reshape(N * OH * OW, C)
    else:
        xp = jnp.pad(x, ((0, 0), (p, p), (p, p), (0, 0)))
        patches = [xp[:, i:i + s * OH:s, j:j + s * OW:s, :]
                   for i in range(kh) for j in range(kw)]
        cols = jnp.concatenate(patches, axis=-1).reshape(N * OH * OW,
                                                         kh * kw * C)

    res2d = None
    if residual is not None:
        res2d = residual.reshape(N * OH * OW, oc)

    out2d = fused_matmul(cols, cp["w"], cp["scale"], cp["shift"], oc,
                         relu=relu, residual=res2d, out_dtype=jnp.bfloat16)
    return out2d.reshape(N, OH, OW, oc)


def maxpool_3x3_s2_p1(x):
    """nn.MaxPool2d(kernel_size=3, stride=2, padding=1), NHWC."""
    N, H, W, C = x.shape
    OH = (H + 2 - 3) // 2 + 1
    OW = (W + 2 - 3) // 2 + 1
    pad_val = float(jnp.finfo(x.dtype).min)

    xp = jnp.pad(x, ((0, 0), (1, 1), (1, 1), (0, 0)), constant_values=pad_val)
    wins = [xp[:, i:i + 2 * OH:2, j:j + 2 * OW:2, :]
            for i in range(3) for j in range(3)]
    stacked = jnp.stack(wins, axis=0).reshape(9, N * OH, OW * C)

    R, L = N * OH, OW * C
    tr = 256 if R >= 256 else _round_up(R, 16)
    Rp = _round_up(R, tr)
    Lp = _round_up(L, 128)
    tl = next(c for c in (1024, 512, 256, 128) if Lp % c == 0)
    stacked = jnp.pad(stacked, ((0, 0), (0, Rp - R), (0, Lp - L)),
                      constant_values=pad_val)

    out = pl.pallas_call(
        _maxpool_kernel,
        out_shape=jax.ShapeDtypeStruct((Rp, Lp), x.dtype),
        grid_spec=pltpu.PrefetchScalarGridSpec(
            num_scalar_prefetch=0,
            grid=(Rp // tr, Lp // tl),
            in_specs=[pl.BlockSpec((9, tr, tl), lambda r, c: (0, r, c))],
            out_specs=pl.BlockSpec((tr, tl), lambda r, c: (r, c)),
        ),
        compiler_params=pltpu.CompilerParams(
            dimension_semantics=("parallel", "parallel")),
    )(stacked)
    return out[:R, :L].reshape(N, OH, OW, C)


# ----------------------------------------------------------------------------
# Parameters (kernel-ready layouts, deterministic init matching the module)
# ----------------------------------------------------------------------------

_BN_EPS = 1e-5


def _prep_conv(w_oihw, *, stride, padding):
    """PyTorch (OC, IC, KH, KW) weight -> padded (Kp, OCp) bf16 + folded BN."""
    OC, IC, KH, KW = w_oihw.shape
    K = KH * KW * IC
    Kp, _ = _k_tiling(K)
    OCp = _round_up(OC, 128)
    wk = jnp.transpose(w_oihw, (2, 3, 1, 0)).reshape(K, OC)   # (kh,kw,ic) major
    wk = jnp.pad(wk, ((0, Kp - K), (0, OCp - OC))).astype(jnp.bfloat16)
    # eval-mode BN with gamma=1, beta=0, running_mean=0, running_var=1
    scale = jnp.full((1, OCp), 1.0 / (1.0 + _BN_EPS) ** 0.5, jnp.float32)
    shift = jnp.zeros((1, OCp), jnp.float32)
    return dict(w=wk, scale=scale, shift=shift,
                kh=KH, kw=KW, stride=stride, pad=padding, oc=OC)


def make_params(key, in_dim, num_classes, layers=(2, 2, 2, 2)):
    keys = iter(jax.random.split(key, 64))

    def conv_w(k, oc, ic, kh, kw):
        n = kh * kw * oc
        return jax.random.normal(k, (oc, ic, kh, kw),
                                 jnp.float32) * (2.0 / n) ** 0.5

    params = {"conv1": _prep_conv(conv_w(next(keys), 64, in_dim, 7, 7),
                                  stride=1, padding=3)}

    inplanes = 64
    all_layers = []
    for planes, nblocks, stride in zip((64, 128, 256, 512), layers,
                                       (1, 2, 2, 2)):
        layer = []
        for bi in range(nblocks):
            s = stride if bi == 0 else 1
            blk = {
                "c1": _prep_conv(conv_w(next(keys), planes, inplanes, 3, 3),
                                 stride=s, padding=1),
                "c2": _prep_conv(conv_w(next(keys), planes, planes, 3, 3),
                                 stride=1, padding=1),
            }
            if s != 1 or inplanes != planes:
                blk["down"] = _prep_conv(
                    conv_w(next(keys), planes, inplanes, 1, 1),
                    stride=s, padding=0)
            inplanes = planes
            layer.append(blk)
        all_layers.append(layer)
    params["layers"] = all_layers

    fan_in = 512  # see TODO(synk) above re: Linear(64*expansion) vs view(.,512)
    bound = 1.0 / fan_in ** 0.5
    fc_w = jax.random.uniform(next(keys), (num_classes, fan_in), jnp.float32,
                              -bound, bound)
    fc_b = jax.random.uniform(next(keys), (num_classes,), jnp.float32,
                              -bound, bound)
    Kp, _ = _k_tiling(fan_in)
    OCp = _round_up(num_classes, 128)
    params["fc"] = dict(
        w=jnp.pad(fc_w.T, ((0, Kp - fan_in),
                           (0, OCp - num_classes))).astype(jnp.bfloat16),
        scale=jnp.ones((1, OCp), jnp.float32),
        shift=jnp.pad(fc_b, (0, OCp - num_classes)).reshape(1, OCp),
        oc=num_classes,
    )
    return params


# ----------------------------------------------------------------------------
# Forward pass
# ----------------------------------------------------------------------------

def _basic_block(x, blk):
    if "down" in blk:
        identity = conv_bn(x, blk["down"], relu=False)
    else:
        identity = x
    out = conv_bn(x, blk["c1"], relu=True)
    # residual add + final ReLU fused into the second conv's Pallas kernel
    out = conv_bn(out, blk["c2"], relu=True, residual=identity)
    return out


def mnist_resnet_forward(params, x_nchw):
    # single layout change at the boundary: NCHW -> NHWC, bf16 activations
    x = jnp.transpose(x_nchw, (0, 2, 3, 1)).astype(jnp.bfloat16)
    x = conv_bn(x, params["conv1"], relu=True)
    x = maxpool_3x3_s2_p1(x)
    for layer in params["layers"]:
        for blk in layer:
            x = _basic_block(x, blk)
    # AdaptiveAvgPool2d((1,1)): spatial mean is glue
    feat = jnp.mean(x.astype(jnp.float32), axis=(1, 2))          # (N, 512)
    fc = params["fc"]
    logits = fused_matmul(feat, fc["w"], fc["scale"], fc["shift"], fc["oc"],
                          relu=False, residual=None, out_dtype=jnp.float32)
    return logits


# ----------------------------------------------------------------------------
# Main
# ----------------------------------------------------------------------------

if __name__ == "__main__":
    key = jax.random.PRNGKey(0)
    k_param, k_x = jax.random.split(key)

    N, IN_DIM, H, W = 2, 3, 16, 16
    NUM_CLASSES = 10

    params = make_params(k_param, IN_DIM, NUM_CLASSES, layers=(2, 2, 2, 2))
    x = jax.random.normal(k_x, (N, IN_DIM, H, W), jnp.float32)

    fwd = jax.jit(partial(mnist_resnet_forward, params))
    logits = fwd(x)
    jax.block_until_ready(logits)

    assert logits.shape == (N, NUM_CLASSES), logits.shape
    assert bool(jnp.all(jnp.isfinite(logits)))
    print("KERNEL_OK")
</pallas_src>

<mosaic_0001>
module attributes {stable_mosaic.version = 11 : i64} {
  func.func @_fused_mm_kernel(%arg0: i32, %arg1: i32, %arg2: i32, %arg3: memref<256x256xbf16, #tpu.memory_space<vmem>>, %arg4: memref<256x128xbf16, #tpu.memory_space<vmem>>, %arg5: memref<1x128xf32, #tpu.memory_space<vmem>>, %arg6: memref<1x128xf32, #tpu.memory_space<vmem>>, %arg7: memref<256x128xbf16, #tpu.memory_space<vmem>>, %arg8: memref<256x128xf32, #tpu.memory_space<vmem>>) attributes {dimension_semantics = [#tpu.dimension_semantics<parallel>, #tpu.dimension_semantics<parallel>, #tpu.dimension_semantics<arbitrary>], iteration_bounds = array<i64: 2, 1, 1>, scalar_prefetch = 0 : i64, scratch_operands = 1 : i64, tpu.core_type = #tpu.core_type<tc>, window_params = [{transform_indices = @transform_0, window_bounds = array<i64: 256, 256>}, {transform_indices = @transform_1, window_bounds = array<i64: 256, 128>}, {transform_indices = @transform_2, window_bounds = array<i64: 1, 128>}, {transform_indices = @transform_3, window_bounds = array<i64: 1, 128>}, {transform_indices = @transform_4, window_bounds = array<i64: 256, 128>}]} {
    %c0_i32 = arith.constant 0 : i32
    %0 = arith.cmpi eq, %arg2, %c0_i32 : i32
    %1 = arith.extui %0 : i1 to i32
    %c0_i32_0 = arith.constant 0 : i32
    %2 = arith.cmpi ne, %1, %c0_i32_0 : i32
    scf.if %2 {
      %cst_10 = arith.constant 0.000000e+00 : f32
      %12 = vector.broadcast %cst_10 : f32 to vector<256x128xf32>
      %c0_11 = arith.constant 0 : index
      %c0_12 = arith.constant 0 : index
      %13 = vector.load %arg8[%c0_11, %c0_12] : memref<256x128xf32, #tpu.memory_space<vmem>>, vector<256x128xf32>
      tpu.vector_store %arg8[%c0_11, %c0_12], %12 {strides = array<i32>} : memref<256x128xf32, #tpu.memory_space<vmem>>, vector<256x128xf32>,
    } else {
    }
    %c0 = arith.constant 0 : index
    %c0_1 = arith.constant 0 : index
    %3 = vector.load %arg8[%c0, %c0_1] : memref<256x128xf32, #tpu.memory_space<vmem>>, vector<256x128xf32>
    %c0_2 = arith.constant 0 : index
    %c0_3 = arith.constant 0 : index
    %4 = vector.load %arg3[%c0_2, %c0_3] : memref<256x256xbf16, #tpu.memory_space<vmem>>, vector<256x256xbf16>
    %c0_4 = arith.constant 0 : index
    %c0_5 = arith.constant 0 : index
    %5 = vector.load %arg4[%c0_4, %c0_5] : memref<256x128xbf16, #tpu.memory_space<vmem>>, vector<256x128xbf16>
    %cst = arith.constant dense<0.000000e+00> : vector<256x128xf32>
    %6 = tpu.matmul %4, %5, %cst {dimension_numbers = #tpu.dot_dimension_numbers<[1], [0], [0], [1], [0, 0, 1, 1], [], []>} : vector<256x256xbf16>, vector<256x128xbf16>, vector<256x128xf32> -> vector<256x128xf32>
    %7 = arith.addf %3, %6 : vector<256x128xf32>
    %c0_6 = arith.constant 0 : index
    %c0_7 = arith.constant 0 : index
    %8 = vector.load %arg8[%c0_6, %c0_7] : memref<256x128xf32, #tpu.memory_space<vmem>>, vector<256x128xf32>
    tpu.vector_store %arg8[%c0_6, %c0_7], %7 {strides = array<i32>} : memref<256x128xf32, #tpu.memory_space<vmem>>, vector<256x128xf32>,
    %c0_i32_8 = arith.constant 0 : i32
    %9 = arith.cmpi eq, %arg2, %c0_i32_8 : i32
    %10 = arith.extui %9 : i1 to i32
    %c0_i32_9 = arith.constant 0 : i32
    %11 = arith.cmpi ne, %10, %c0_i32_9 : i32
    scf.if %11 {
      %c0_10 = arith.constant 0 : index
      %c0_11 = arith.constant 0 : index
      %12 = vector.load %arg8[%c0_10, %c0_11] : memref<256x128xf32, #tpu.memory_space<vmem>>, vector<256x128xf32>
      %c0_12 = arith.constant 0 : index
      %c0_13 = arith.constant 0 : index
      %13 = vector.load %arg5[%c0_12, %c0_13] : memref<1x128xf32, #tpu.memory_space<vmem>>, vector<1x128xf32>
      %14 = vector.broadcast %13 : vector<1x128xf32> to vector<256x128xf32>
      %15 = arith.mulf %12, %14 : vector<256x128xf32>
      %c0_14 = arith.constant 0 : index
      %c0_15 = arith.constant 0 : index
      %16 = vector.load %arg6[%c0_14, %c0_15] : memref<1x128xf32, #tpu.memory_space<vmem>>, vector<1x128xf32>
      %17 = vector.broadcast %16 : vector<1x128xf32> to vector<256x128xf32>
      %18 = arith.addf %15, %17 : vector<256x128xf32>
      %cst_16 = arith.constant 0.000000e+00 : f32
      %19 = vector.broadcast %cst_16 : f32 to vector<256x128xf32>
      %20 = arith.maximumf %18, %19 : vector<256x128xf32>
      %21 = arith.truncf %20 : vector<256x128xf32> to vector<256x128xbf16>
      %c0_17 = arith.constant 0 : index
      %c0_18 = arith.constant 0 : index
      %22 = vector.load %arg7[%c0_17, %c0_18] : memref<256x128xbf16, #tpu.memory_space<vmem>>, vector<256x128xbf16>
      tpu.vector_store %arg7[%c0_17, %c0_18], %21 {strides = array<i32>} : memref<256x128xbf16, #tpu.memory_space<vmem>>, vector<256x128xbf16>,
    } else {
    }
    return
  }
  func.func @transform_0(%arg0: i32, %arg1: i32, %arg2: i32) -> (i32, i32) {
    %c0_i32 = arith.constant 0 : i32
    return %arg0, %arg2 : i32, i32
  }
  func.func @transform_1(%arg0: i32, %arg1: i32, %arg2: i32) -> (i32, i32) {
    %c0_i32 = arith.constant 0 : i32
    return %arg2, %arg1 : i32, i32
  }
  func.func @transform_2(%arg0: i32, %arg1: i32, %arg2: i32) -> (i32, i32) {
    %c0_i32 = arith.constant 0 : i32
    %c0_i32_0 = arith.constant 0 : i32
    return %c0_i32, %arg1 : i32, i32
  }
  func.func @transform_3(%arg0: i32, %arg1: i32, %arg2: i32) -> (i32, i32) {
    %c0_i32 = arith.constant 0 : i32
    %c0_i32_0 = arith.constant 0 : i32
    return %c0_i32, %arg1 : i32, i32
  }
  func.func @transform_4(%arg0: i32, %arg1: i32, %arg2: i32) -> (i32, i32) {
    %c0_i32 = arith.constant 0 : i32
    return %arg0, %arg1 : i32, i32
  }
}

module attributes {stable_mosaic.version = 11 : i64} {
  func.func @_maxpool_kernel(%arg0: i32, %arg1: i32, %arg2: memref<9x16x512xbf16, #tpu.memory_space<vmem>>, %arg3: memref<16x512xbf16, #tpu.memory_space<vmem>>) attributes {dimension_semantics = [#tpu.dimension_semantics<parallel>, #tpu.dimension_semantics<parallel>], iteration_bounds = array<i64: 1, 1>, scalar_prefetch = 0 : i64, scratch_operands = 0 : i64, tpu.core_type = #tpu.core_type<tc>, window_params = [{transform_indices = @transform_0, window_bounds = array<i64: 9, 16, 512>}, {transform_indices = @transform_1, window_bounds = array<i64: 16, 512>}]} {
    %c0 = arith.constant 0 : index
    %c0_0 = arith.constant 0 : index
    %c0_1 = arith.constant 0 : index
    %0 = vector.load %arg2[%c0, %c0_0, %c0_1] : memref<9x16x512xbf16, #tpu.memory_space<vmem>>, vector<1x16x512xbf16>
    %1 = vector.shape_cast %0 : vector<1x16x512xbf16> to vector<16x512xbf16>
    %c1 = arith.constant 1 : index
    %c0_2 = arith.constant 0 : index
    %c0_3 = arith.constant 0 : index
    %2 = vector.load %arg2[%c1, %c0_2, %c0_3] : memref<9x16x512xbf16, #tpu.memory_space<vmem>>, vector<1x16x512xbf16>
    %3 = vector.shape_cast %2 : vector<1x16x512xbf16> to vector<16x512xbf16>
    %4 = arith.maximumf %1, %3 : vector<16x512xbf16>
    %c2 = arith.constant 2 : index
    %c0_4 = arith.constant 0 : index
    %c0_5 = arith.constant 0 : index
    %5 = vector.load %arg2[%c2, %c0_4, %c0_5] : memref<9x16x512xbf16, #tpu.memory_space<vmem>>, vector<1x16x512xbf16>
    %6 = vector.shape_cast %5 : vector<1x16x512xbf16> to vector<16x512xbf16>
    %7 = arith.maximumf %4, %6 : vector<16x512xbf16>
    %c3 = arith.constant 3 : index
    %c0_6 = arith.constant 0 : index
    %c0_7 = arith.constant 0 : index
    %8 = vector.load %arg2[%c3, %c0_6, %c0_7] : memref<9x16x512xbf16, #tpu.memory_space<vmem>>, vector<1x16x512xbf16>
    %9 = vector.shape_cast %8 : vector<1x16x512xbf16> to vector<16x512xbf16>
    %10 = arith.maximumf %7, %9 : vector<16x512xbf16>
    %c4 = arith.constant 4 : index
    %c0_8 = arith.constant 0 : index
    %c0_9 = arith.constant 0 : index
    %11 = vector.load %arg2[%c4, %c0_8, %c0_9] : memref<9x16x512xbf16, #tpu.memory_space<vmem>>, vector<1x16x512xbf16>
    %12 = vector.shape_cast %11 : vector<1x16x512xbf16> to vector<16x512xbf16>
    %13 = arith.maximumf %10, %12 : vector<16x512xbf16>
    %c5 = arith.constant 5 : index
    %c0_10 = arith.constant 0 : index
    %c0_11 = arith.constant 0 : index
    %14 = vector.load %arg2[%c5, %c0_10, %c0_11] : memref<9x16x512xbf16, #tpu.memory_space<vmem>>, vector<1x16x512xbf16>
    %15 = vector.shape_cast %14 : vector<1x16x512xbf16> to vector<16x512xbf16>
    %16 = arith.maximumf %13, %15 : vector<16x512xbf16>
    %c6 = arith.constant 6 : index
    %c0_12 = arith.constant 0 : index
    %c0_13 = arith.constant 0 : index
    %17 = vector.load %arg2[%c6, %c0_12, %c0_13] : memref<9x16x512xbf16, #tpu.memory_space<vmem>>, vector<1x16x512xbf16>
    %18 = vector.shape_cast %17 : vector<1x16x512xbf16> to vector<16x512xbf16>
    %19 = arith.maximumf %16, %18 : vector<16x512xbf16>
    %c7 = arith.constant 7 : index
    %c0_14 = arith.constant 0 : index
    %c0_15 = arith.constant 0 : index
    %20 = vector.load %arg2[%c7, %c0_14, %c0_15] : memref<9x16x512xbf16, #tpu.memory_space<vmem>>, vector<1x16x512xbf16>
    %21 = vector.shape_cast %20 : vector<1x16x512xbf16> to vector<16x512xbf16>
    %22 = arith.maximumf %19, %21 : vector<16x512xbf16>
    %c8 = arith.constant 8 : index
    %c0_16 = arith.constant 0 : index
    %c0_17 = arith.constant 0 : index
    %23 = vector.load %arg2[%c8, %c0_16, %c0_17] : memref<9x16x512xbf16, #tpu.memory_space<vmem>>, vector<1x16x512xbf16>
    %24 = vector.shape_cast %23 : vector<1x16x512xbf16> to vector<16x512xbf16>
    %25 = arith.maximumf %22, %24 : vector<16x512xbf16>
    %c0_18 = arith.constant 0 : index
    %c0_19 = arith.constant 0 : index
    %26 = vector.load %arg3[%c0_18, %c0_19] : memref<16x512xbf16, #tpu.memory_space<vmem>>, vector<16x512xbf16>
    tpu.vector_store %arg3[%c0_18, %c0_19], %25 {strides = array<i32>} : memref<16x512xbf16, #tpu.memory_space<vmem>>, vector<16x512xbf16>,
    return
  }
  func.func @transform_0(%arg0: i32, %arg1: i32) -> (i32, i32, i32) {
    %c0_i32 = arith.constant 0 : i32
    %c0_i32_0 = arith.constant 0 : i32
    return %c0_i32, %arg0, %arg1 : i32, i32, i32
  }
  func.func @transform_1(%arg0: i32, %arg1: i32) -> (i32, i32) {
    %c0_i32 = arith.constant 0 : i32
    return %arg0, %arg1 : i32, i32
  }
}

module attributes {stable_mosaic.version = 11 : i64} {
  func.func @_fused_mm_kernel(%arg0: i32, %arg1: i32, %arg2: i32, %arg3: memref<128x384xbf16, #tpu.memory_space<vmem>>, %arg4: memref<384x128xbf16, #tpu.memory_space<vmem>>, %arg5: memref<1x128xf32, #tpu.memory_space<vmem>>, %arg6: memref<1x128xf32, #tpu.memory_space<vmem>>, %arg7: memref<128x128xbf16, #tpu.memory_space<vmem>>, %arg8: memref<128x128xf32, #tpu.memory_space<vmem>>) attributes {dimension_semantics = [#tpu.dimension_semantics<parallel>, #tpu.dimension_semantics<parallel>, #tpu.dimension_semantics<arbitrary>], iteration_bounds = array<i64: 1, 1, 2>, scalar_prefetch = 0 : i64, scratch_operands = 1 : i64, tpu.core_type = #tpu.core_type<tc>, window_params = [{transform_indices = @transform_0, window_bounds = array<i64: 128, 384>}, {transform_indices = @transform_1, window_bounds = array<i64: 384, 128>}, {transform_indices = @transform_2, window_bounds = array<i64: 1, 128>}, {transform_indices = @transform_3, window_bounds = array<i64: 1, 128>}, {transform_indices = @transform_4, window_bounds = array<i64: 128, 128>}]} {
    %c0_i32 = arith.constant 0 : i32
    %0 = arith.cmpi eq, %arg2, %c0_i32 : i32
    %1 = arith.extui %0 : i1 to i32
    %c0_i32_0 = arith.constant 0 : i32
    %2 = arith.cmpi ne, %1, %c0_i32_0 : i32
    scf.if %2 {
      %cst_9 = arith.constant 0.000000e+00 : f32
      %12 = vector.broadcast %cst_9 : f32 to vector<128x128xf32>
      %c0_10 = arith.constant 0 : index
      %c0_11 = arith.constant 0 : index
      %13 = vector.load %arg8[%c0_10, %c0_11] : memref<128x128xf32, #tpu.memory_space<vmem>>, vector<128x128xf32>
      tpu.vector_store %arg8[%c0_10, %c0_11], %12 {strides = array<i32>} : memref<128x128xf32, #tpu.memory_space<vmem>>, vector<128x128xf32>,
    } else {
    }
    %c0 = arith.constant 0 : index
    %c0_1 = arith.constant 0 : index
    %3 = vector.load %arg8[%c0, %c0_1] : memref<128x128xf32, #tpu.memory_space<vmem>>, vector<128x128xf32>
    %c0_2 = arith.constant 0 : index
    %c0_3 = arith.constant 0 : index
    %4 = vector.load %arg3[%c0_2, %c0_3] : memref<128x384xbf16, #tpu.memory_space<vmem>>, vector<128x384xbf16>
    %c0_4 = arith.constant 0 : index
    %c0_5 = arith.constant 0 : index
    %5 = vector.load %arg4[%c0_4, %c0_5] : memref<384x128xbf16, #tpu.memory_space<vmem>>, vector<384x128xbf16>
    %cst = arith.constant dense<0.000000e+00> : vector<128x128xf32>
    %6 = tpu.matmul %4, %5, %cst {dimension_numbers = #tpu.dot_dimension_numbers<[1], [0], [0], [1], [0, 0, 1, 1], [], []>} : vector<128x384xbf16>, vector<384x128xbf16>, vector<128x128xf32> -> vector<128x128xf32>
    %7 = arith.addf %3, %6 : vector<128x128xf32>
    %c0_6 = arith.constant 0 : index
    %c0_7 = arith.constant 0 : index
    %8 = vector.load %arg8[%c0_6, %c0_7] : memref<128x128xf32, #tpu.memory_space<vmem>>, vector<128x128xf32>
    tpu.vector_store %arg8[%c0_6, %c0_7], %7 {strides = array<i32>} : memref<128x128xf32, #tpu.memory_space<vmem>>, vector<128x128xf32>,
    %c1_i32 = arith.constant 1 : i32
    %9 = arith.cmpi eq, %arg2, %c1_i32 : i32
    %10 = arith.extui %9 : i1 to i32
    %c0_i32_8 = arith.constant 0 : i32
    %11 = arith.cmpi ne, %10, %c0_i32_8 : i32
    scf.if %11 {
      %c0_9 = arith.constant 0 : index
      %c0_10 = arith.constant 0 : index
      %12 = vector.load %arg8[%c0_9, %c0_10] : memref<128x128xf32, #tpu.memory_space<vmem>>, vector<128x128xf32>
      %c0_11 = arith.constant 0 : index
      %c0_12 = arith.constant 0 : index
      %13 = vector.load %arg5[%c0_11, %c0_12] : memref<1x128xf32, #tpu.memory_space<vmem>>, vector<1x128xf32>
      %14 = vector.broadcast %13 : vector<1x128xf32> to vector<128x128xf32>
      %15 = arith.mulf %12, %14 : vector<128x128xf32>
      %c0_13 = arith.constant 0 : index
      %c0_14 = arith.constant 0 : index
      %16 = vector.load %arg6[%c0_13, %c0_14] : memref<1x128xf32, #tpu.memory_space<vmem>>, vector<1x128xf32>
      %17 = vector.broadcast %16 : vector<1x128xf32> to vector<128x128xf32>
      %18 = arith.addf %15, %17 : vector<128x128xf32>
      %cst_15 = arith.constant 0.000000e+00 : f32
      %19 = vector.broadcast %cst_15 : f32 to vector<128x128xf32>
      %20 = arith.maximumf %18, %19 : vector<128x128xf32>
      %21 = arith.truncf %20 : vector<128x128xf32> to vector<128x128xbf16>
      %c0_16 = arith.constant 0 : index
      %c0_17 = arith.constant 0 : index
      %22 = vector.load %arg7[%c0_16, %c0_17] : memref<128x128xbf16, #tpu.memory_space<vmem>>, vector<128x128xbf16>
      tpu.vector_store %arg7[%c0_16, %c0_17], %21 {strides = array<i32>} : memref<128x128xbf16, #tpu.memory_space<vmem>>, vector<128x128xbf16>,
    } else {
    }
    return
  }
  func.func @transform_0(%arg0: i32, %arg1: i32, %arg2: i32) -> (i32, i32) {
    %c0_i32 = arith.constant 0 : i32
    return %arg0, %arg2 : i32, i32
  }
  func.func @transform_1(%arg0: i32, %arg1: i32, %arg2: i32) -> (i32, i32) {
    %c0_i32 = arith.constant 0 : i32
    return %arg2, %arg1 : i32, i32
  }
  func.func @transform_2(%arg0: i32, %arg1: i32, %arg2: i32) -> (i32, i32) {
    %c0_i32 = arith.constant 0 : i32
    %c0_i32_0 = arith.constant 0 : i32
    return %c0_i32, %arg1 : i32, i32
  }
  func.func @transform_3(%arg0: i32, %arg1: i32, %arg2: i32) -> (i32, i32) {
    %c0_i32 = arith.constant 0 : i32
    %c0_i32_0 = arith.constant 0 : i32
    return %c0_i32, %arg1 : i32, i32
  }
  func.func @transform_4(%arg0: i32, %arg1: i32, %arg2: i32) -> (i32, i32) {
    %c0_i32 = arith.constant 0 : i32
    return %arg0, %arg1 : i32, i32
  }
}

module attributes {stable_mosaic.version = 11 : i64} {
  func.func @_fused_mm_kernel(%arg0: i32, %arg1: i32, %arg2: i32, %arg3: memref<128x384xbf16, #tpu.memory_space<vmem>>, %arg4: memref<384x128xbf16, #tpu.memory_space<vmem>>, %arg5: memref<1x128xf32, #tpu.memory_space<vmem>>, %arg6: memref<1x128xf32, #tpu.memory_space<vmem>>, %arg7: memref<128x128xbf16, #tpu.memory_space<vmem>>, %arg8: memref<128x128xbf16, #tpu.memory_space<vmem>>, %arg9: memref<128x128xf32, #tpu.memory_space<vmem>>) attributes {dimension_semantics = [#tpu.dimension_semantics<parallel>, #tpu.dimension_semantics<parallel>, #tpu.dimension_semantics<arbitrary>], iteration_bounds = array<i64: 1, 1, 2>, scalar_prefetch = 0 : i64, scratch_operands = 1 : i64, tpu.core_type = #tpu.core_type<tc>, window_params = [{transform_indices = @transform_0, window_bounds = array<i64: 128, 384>}, {transform_indices = @transform_1, window_bounds = array<i64: 384, 128>}, {transform_indices = @transform_2, window_bounds = array<i64: 1, 128>}, {transform_indices = @transform_3, window_bounds = array<i64: 1, 128>}, {transform_indices = @transform_4, window_bounds = array<i64: 128, 128>}, {transform_indices = @transform_5, window_bounds = array<i64: 128, 128>}]} {
    %c0_i32 = arith.constant 0 : i32
    %0 = arith.cmpi eq, %arg2, %c0_i32 : i32
    %1 = arith.extui %0 : i1 to i32
    %c0_i32_0 = arith.constant 0 : i32
    %2 = arith.cmpi ne, %1, %c0_i32_0 : i32
    scf.if %2 {
      %cst_9 = arith.constant 0.000000e+00 : f32
      %12 = vector.broadcast %cst_9 : f32 to vector<128x128xf32>
      %c0_10 = arith.constant 0 : index
      %c0_11 = arith.constant 0 : index
      %13 = vector.load %arg9[%c0_10, %c0_11] : memref<128x128xf32, #tpu.memory_space<vmem>>, vector<128x128xf32>
      tpu.vector_store %arg9[%c0_10, %c0_11], %12 {strides = array<i32>} : memref<128x128xf32, #tpu.memory_space<vmem>>, vector<128x128xf32>,
    } else {
    }
    %c0 = arith.constant 0 : index
    %c0_1 = arith.constant 0 : index
    %3 = vector.load %arg9[%c0, %c0_1] : memref<128x128xf32, #tpu.memory_space<vmem>>, vector<128x128xf32>
    %c0_2 = arith.constant 0 : index
    %c0_3 = arith.constant 0 : index
    %4 = vector.load %arg3[%c0_2, %c0_3] : memref<128x384xbf16, #tpu.memory_space<vmem>>, vector<128x384xbf16>
    %c0_4 = arith.constant 0 : index
    %c0_5 = arith.constant 0 : index
    %5 = vector.load %arg4[%c0_4, %c0_5] : memref<384x128xbf16, #tpu.memory_space<vmem>>, vector<384x128xbf16>
    %cst = arith.constant dense<0.000000e+00> : vector<128x128xf32>
    %6 = tpu.matmul %4, %5, %cst {dimension_numbers = #tpu.dot_dimension_numbers<[1], [0], [0], [1], [0, 0, 1, 1], [], []>} : vector<128x384xbf16>, vector<384x128xbf16>, vector<128x128xf32> -> vector<128x128xf32>
    %7 = arith.addf %3, %6 : vector<128x128xf32>
    %c0_6 = arith.constant 0 : index
    %c0_7 = arith.constant 0 : index
    %8 = vector.load %arg9[%c0_6, %c0_7] : memref<128x128xf32, #tpu.memory_space<vmem>>, vector<128x128xf32>
    tpu.vector_store %arg9[%c0_6, %c0_7], %7 {strides = array<i32>} : memref<128x128xf32, #tpu.memory_space<vmem>>, vector<128x128xf32>,
    %c1_i32 = arith.constant 1 : i32
    %9 = arith.cmpi eq, %arg2, %c1_i32 : i32
    %10 = arith.extui %9 : i1 to i32
    %c0_i32_8 = arith.constant 0 : i32
    %11 = arith.cmpi ne, %10, %c0_i32_8 : i32
    scf.if %11 {
      %c0_9 = arith.constant 0 : index
      %c0_10 = arith.constant 0 : index
      %12 = vector.load %arg9[%c0_9, %c0_10] : memref<128x128xf32, #tpu.memory_space<vmem>>, vector<128x128xf32>
      %c0_11 = arith.constant 0 : index
      %c0_12 = arith.constant 0 : index
      %13 = vector.load %arg5[%c0_11, %c0_12] : memref<1x128xf32, #tpu.memory_space<vmem>>, vector<1x128xf32>
      %14 = vector.broadcast %13 : vector<1x128xf32> to vector<128x128xf32>
      %15 = arith.mulf %12, %14 : vector<128x128xf32>
      %c0_13 = arith.constant 0 : index
      %c0_14 = arith.constant 0 : index
      %16 = vector.load %arg6[%c0_13, %c0_14] : memref<1x128xf32, #tpu.memory_space<vmem>>, vector<1x128xf32>
      %17 = vector.broadcast %16 : vector<1x128xf32> to vector<128x128xf32>
      %18 = arith.addf %15, %17 : vector<128x128xf32>
      %c0_15 = arith.constant 0 : index
      %c0_16 = arith.constant 0 : index
      %19 = vector.load %arg7[%c0_15, %c0_16] : memref<128x128xbf16, #tpu.memory_space<vmem>>, vector<128x128xbf16>
      %20 = arith.extf %19 : vector<128x128xbf16> to vector<128x128xf32>
      %21 = arith.addf %18, %20 : vector<128x128xf32>
      %cst_17 = arith.constant 0.000000e+00 : f32
      %22 = vector.broadcast %cst_17 : f32 to vector<128x128xf32>
      %23 = arith.maximumf %21, %22 : vector<128x128xf32>
      %24 = arith.truncf %23 : vector<128x128xf32> to vector<128x128xbf16>
      %c0_18 = arith.constant 0 : index
      %c0_19 = arith.constant 0 : index
      %25 = vector.load %arg8[%c0_18, %c0_19] : memref<128x128xbf16, #tpu.memory_space<vmem>>, vector<128x128xbf16>
      tpu.vector_store %arg8[%c0_18, %c0_19], %24 {strides = array<i32>} : memref<128x128xbf16, #tpu.memory_space<vmem>>, vector<128x128xbf16>,
    } else {
    }
    return
  }
  func.func @transform_0(%arg0: i32, %arg1: i32, %arg2: i32) -> (i32, i32) {
    %c0_i32 = arith.constant 0 : i32
    return %arg0, %arg2 : i32, i32
  }
  func.func @transform_1(%arg0: i32, %arg1: i32, %arg2: i32) -> (i32, i32) {
    %c0_i32 = arith.constant 0 : i32
    return %arg2, %arg1 : i32, i32
  }
  func.func @transform_2(%arg0: i32, %arg1: i32, %arg2: i32) -> (i32, i32) {
    %c0_i32 = arith.constant 0 : i32
    %c0_i32_0 = arith.constant 0 : i32
    return %c0_i32, %arg1 : i32, i32
  }
  func.func @transform_3(%arg0: i32, %arg1: i32, %arg2: i32) -> (i32, i32) {
    %c0_i32 = arith.constant 0 : i32
    %c0_i32_0 = arith.constant 0 : i32
    return %c0_i32, %arg1 : i32, i32
  }
  func.func @transform_4(%arg0: i32, %arg1: i32, %arg2: i32) -> (i32, i32) {
    %c0_i32 = arith.constant 0 : i32
    return %arg0, %arg1 : i32, i32
  }
  func.func @transform_5(%arg0: i32, %arg1: i32, %arg2: i32) -> (i32, i32) {
    %c0_i32 = arith.constant 0 : i32
    return %arg0, %arg1 : i32, i32
  }
}

module attributes {stable_mosaic.version = 11 : i64} {
  func.func @_fused_mm_kernel(%arg0: i32, %arg1: i32, %arg2: i32, %arg3: memref<32x384xbf16, #tpu.memory_space<vmem>>, %arg4: memref<384x128xbf16, #tpu.memory_space<vmem>>, %arg5: memref<1x128xf32, #tpu.memory_space<vmem>>, %arg6: memref<1x128xf32, #tpu.memory_space<vmem>>, %arg7: memref<32x128xbf16, #tpu.memory_space<vmem>>, %arg8: memref<32x128xf32, #tpu.memory_space<vmem>>) attributes {dimension_semantics = [#tpu.dimension_semantics<parallel>, #tpu.dimension_semantics<parallel>, #tpu.dimension_semantics<arbitrary>], iteration_bounds = array<i64: 1, 1, 2>, scalar_prefetch = 0 : i64, scratch_operands = 1 : i64, tpu.core_type = #tpu.core_type<tc>, window_params = [{transform_indices = @transform_0, window_bounds = array<i64: 32, 384>}, {transform_indices = @transform_1, window_bounds = array<i64: 384, 128>}, {transform_indices = @transform_2, window_bounds = array<i64: 1, 128>}, {transform_indices = @transform_3, window_bounds = array<i64: 1, 128>}, {transform_indices = @transform_4, window_bounds = array<i64: 32, 128>}]} {
    %c0_i32 = arith.constant 0 : i32
    %0 = arith.cmpi eq, %arg2, %c0_i32 : i32
    %1 = arith.extui %0 : i1 to i32
    %c0_i32_0 = arith.constant 0 : i32
    %2 = arith.cmpi ne, %1, %c0_i32_0 : i32
    scf.if %2 {
      %cst_9 = arith.constant 0.000000e+00 : f32
      %12 = vector.broadcast %cst_9 : f32 to vector<32x128xf32>
      %c0_10 = arith.constant 0 : index
      %c0_11 = arith.constant 0 : index
      %13 = vector.load %arg8[%c0_10, %c0_11] : memref<32x128xf32, #tpu.memory_space<vmem>>, vector<32x128xf32>
      tpu.vector_store %arg8[%c0_10, %c0_11], %12 {strides = array<i32>} : memref<32x128xf32, #tpu.memory_space<vmem>>, vector<32x128xf32>,
    } else {
    }
    %c0 = arith.constant 0 : index
    %c0_1 = arith.constant 0 : index
    %3 = vector.load %arg8[%c0, %c0_1] : memref<32x128xf32, #tpu.memory_space<vmem>>, vector<32x128xf32>
    %c0_2 = arith.constant 0 : index
    %c0_3 = arith.constant 0 : index
    %4 = vector.load %arg3[%c0_2, %c0_3] : memref<32x384xbf16, #tpu.memory_space<vmem>>, vector<32x384xbf16>
    %c0_4 = arith.constant 0 : index
    %c0_5 = arith.constant 0 : index
    %5 = vector.load %arg4[%c0_4, %c0_5] : memref<384x128xbf16, #tpu.memory_space<vmem>>, vector<384x128xbf16>
    %cst = arith.constant dense<0.000000e+00> : vector<32x128xf32>
    %6 = tpu.matmul %4, %5, %cst {dimension_numbers = #tpu.dot_dimension_numbers<[1], [0], [0], [1], [0, 0, 1, 1], [], []>} : vector<32x384xbf16>, vector<384x128xbf16>, vector<32x128xf32> -> vector<32x128xf32>
    %7 = arith.addf %3, %6 : vector<32x128xf32>
    %c0_6 = arith.constant 0 : index
    %c0_7 = arith.constant 0 : index
    %8 = vector.load %arg8[%c0_6, %c0_7] : memref<32x128xf32, #tpu.memory_space<vmem>>, vector<32x128xf32>
    tpu.vector_store %arg8[%c0_6, %c0_7], %7 {strides = array<i32>} : memref<32x128xf32, #tpu.memory_space<vmem>>, vector<32x128xf32>,
    %c1_i32 = arith.constant 1 : i32
    %9 = arith.cmpi eq, %arg2, %c1_i32 : i32
    %10 = arith.extui %9 : i1 to i32
    %c0_i32_8 = arith.constant 0 : i32
    %11 = arith.cmpi ne, %10, %c0_i32_8 : i32
    scf.if %11 {
      %c0_9 = arith.constant 0 : index
      %c0_10 = arith.constant 0 : index
      %12 = vector.load %arg8[%c0_9, %c0_10] : memref<32x128xf32, #tpu.memory_space<vmem>>, vector<32x128xf32>
      %c0_11 = arith.constant 0 : index
      %c0_12 = arith.constant 0 : index
      %13 = vector.load %arg5[%c0_11, %c0_12] : memref<1x128xf32, #tpu.memory_space<vmem>>, vector<1x128xf32>
      %14 = vector.broadcast %13 : vector<1x128xf32> to vector<32x128xf32>
      %15 = arith.mulf %12, %14 : vector<32x128xf32>
      %c0_13 = arith.constant 0 : index
      %c0_14 = arith.constant 0 : index
      %16 = vector.load %arg6[%c0_13, %c0_14] : memref<1x128xf32, #tpu.memory_space<vmem>>, vector<1x128xf32>
      %17 = vector.broadcast %16 : vector<1x128xf32> to vector<32x128xf32>
      %18 = arith.addf %15, %17 : vector<32x128xf32>
      %cst_15 = arith.constant 0.000000e+00 : f32
      %19 = vector.broadcast %cst_15 : f32 to vector<32x128xf32>
      %20 = arith.maximumf %18, %19 : vector<32x128xf32>
      %21 = arith.truncf %20 : vector<32x128xf32> to vector<32x128xbf16>
      %c0_16 = arith.constant 0 : index
      %c0_17 = arith.constant 0 : index
      %22 = vector.load %arg7[%c0_16, %c0_17] : memref<32x128xbf16, #tpu.memory_space<vmem>>, vector<32x128xbf16>
      tpu.vector_store %arg7[%c0_16, %c0_17], %21 {strides = array<i32>} : memref<32x128xbf16, #tpu.memory_space<vmem>>, vector<32x128xbf16>,
    } else {
    }
    return
  }
  func.func @transform_0(%arg0: i32, %arg1: i32, %arg2: i32) -> (i32, i32) {
    %c0_i32 = arith.constant 0 : i32
    return %arg0, %arg2 : i32, i32
  }
  func.func @transform_1(%arg0: i32, %arg1: i32, %arg2: i32) -> (i32, i32) {
    %c0_i32 = arith.constant 0 : i32
    return %arg2, %arg1 : i32, i32
  }
  func.func @transform_2(%arg0: i32, %arg1: i32, %arg2: i32) -> (i32, i32) {
    %c0_i32 = arith.constant 0 : i32
    %c0_i32_0 = arith.constant 0 : i32
    return %c0_i32, %arg1 : i32, i32
  }
  func.func @transform_3(%arg0: i32, %arg1: i32, %arg2: i32) -> (i32, i32) {
    %c0_i32 = arith.constant 0 : i32
    %c0_i32_0 = arith.constant 0 : i32
    return %c0_i32, %arg1 : i32, i32
  }
  func.func @transform_4(%arg0: i32, %arg1: i32, %arg2: i32) -> (i32, i32) {
    %c0_i32 = arith.constant 0 : i32
    return %arg0, %arg1 : i32, i32
  }
}

module attributes {stable_mosaic.version = 11 : i64} {
  func.func @_fused_mm_kernel(%arg0: i32, %arg1: i32, %arg2: i32, %arg3: memref<32x128xbf16, #tpu.memory_space<vmem>>, %arg4: memref<128x128xbf16, #tpu.memory_space<vmem>>, %arg5: memref<1x128xf32, #tpu.memory_space<vmem>>, %arg6: memref<1x128xf32, #tpu.memory_space<vmem>>, %arg7: memref<32x128xbf16, #tpu.memory_space<vmem>>, %arg8: memref<32x128xf32, #tpu.memory_space<vmem>>) attributes {dimension_semantics = [#tpu.dimension_semantics<parallel>, #tpu.dimension_semantics<parallel>, #tpu.dimension_semantics<arbitrary>], iteration_bounds = array<i64: 1, 1, 1>, scalar_prefetch = 0 : i64, scratch_operands = 1 : i64, tpu.core_type = #tpu.core_type<tc>, window_params = [{transform_indices = @transform_0, window_bounds = array<i64: 32, 128>}, {transform_indices = @transform_1, window_bounds = array<i64: 128, 128>}, {transform_indices = @transform_2, window_bounds = array<i64: 1, 128>}, {transform_indices = @transform_3, window_bounds = array<i64: 1, 128>}, {transform_indices = @transform_4, window_bounds = array<i64: 32, 128>}]} {
    %c0_i32 = arith.constant 0 : i32
    %0 = arith.cmpi eq, %arg2, %c0_i32 : i32
    %1 = arith.extui %0 : i1 to i32
    %c0_i32_0 = arith.constant 0 : i32
    %2 = arith.cmpi ne, %1, %c0_i32_0 : i32
    scf.if %2 {
      %cst_10 = arith.constant 0.000000e+00 : f32
      %12 = vector.broadcast %cst_10 : f32 to vector<32x128xf32>
      %c0_11 = arith.constant 0 : index
      %c0_12 = arith.constant 0 : index
      %13 = vector.load %arg8[%c0_11, %c0_12] : memref<32x128xf32, #tpu.memory_space<vmem>>, vector<32x128xf32>
      tpu.vector_store %arg8[%c0_11, %c0_12], %12 {strides = array<i32>} : memref<32x128xf32, #tpu.memory_space<vmem>>, vector<32x128xf32>,
    } else {
    }
    %c0 = arith.constant 0 : index
    %c0_1 = arith.constant 0 : index
    %3 = vector.load %arg8[%c0, %c0_1] : memref<32x128xf32, #tpu.memory_space<vmem>>, vector<32x128xf32>
    %c0_2 = arith.constant 0 : index
    %c0_3 = arith.constant 0 : index
    %4 = vector.load %arg3[%c0_2, %c0_3] : memref<32x128xbf16, #tpu.memory_space<vmem>>, vector<32x128xbf16>
    %c0_4 = arith.constant 0 : index
    %c0_5 = arith.constant 0 : index
    %5 = vector.load %arg4[%c0_4, %c0_5] : memref<128x128xbf16, #tpu.memory_space<vmem>>, vector<128x128xbf16>
    %cst = arith.constant dense<0.000000e+00> : vector<32x128xf32>
    %6 = tpu.matmul %4, %5, %cst {dimension_numbers = #tpu.dot_dimension_numbers<[1], [0], [0], [1], [0, 0, 1, 1], [], []>} : vector<32x128xbf16>, vector<128x128xbf16>, vector<32x128xf32> -> vector<32x128xf32>
    %7 = arith.addf %3, %6 : vector<32x128xf32>
    %c0_6 = arith.constant 0 : index
    %c0_7 = arith.constant 0 : index
    %8 = vector.load %arg8[%c0_6, %c0_7] : memref<32x128xf32, #tpu.memory_space<vmem>>, vector<32x128xf32>
    tpu.vector_store %arg8[%c0_6, %c0_7], %7 {strides = array<i32>} : memref<32x128xf32, #tpu.memory_space<vmem>>, vector<32x128xf32>,
    %c0_i32_8 = arith.constant 0 : i32
    %9 = arith.cmpi eq, %arg2, %c0_i32_8 : i32
    %10 = arith.extui %9 : i1 to i32
    %c0_i32_9 = arith.constant 0 : i32
    %11 = arith.cmpi ne, %10, %c0_i32_9 : i32
    scf.if %11 {
      %c0_10 = arith.constant 0 : index
      %c0_11 = arith.constant 0 : index
      %12 = vector.load %arg8[%c0_10, %c0_11] : memref<32x128xf32, #tpu.memory_space<vmem>>, vector<32x128xf32>
      %c0_12 = arith.constant 0 : index
      %c0_13 = arith.constant 0 : index
      %13 = vector.load %arg5[%c0_12, %c0_13] : memref<1x128xf32, #tpu.memory_space<vmem>>, vector<1x128xf32>
      %14 = vector.broadcast %13 : vector<1x128xf32> to vector<32x128xf32>
      %15 = arith.mulf %12, %14 : vector<32x128xf32>
      %c0_14 = arith.constant 0 : index
      %c0_15 = arith.constant 0 : index
      %16 = vector.load %arg6[%c0_14, %c0_15] : memref<1x128xf32, #tpu.memory_space<vmem>>, vector<1x128xf32>
      %17 = vector.broadcast %16 : vector<1x128xf32> to vector<32x128xf32>
      %18 = arith.addf %15, %17 : vector<32x128xf32>
      %19 = arith.truncf %18 : vector<32x128xf32> to vector<32x128xbf16>
      %c0_16 = arith.constant 0 : index
      %c0_17 = arith.constant 0 : index
      %20 = vector.load %arg7[%c0_16, %c0_17] : memref<32x128xbf16, #tpu.memory_space<vmem>>, vector<32x128xbf16>
      tpu.vector_store %arg7[%c0_16, %c0_17], %19 {strides = array<i32>} : memref<32x128xbf16, #tpu.memory_space<vmem>>, vector<32x128xbf16>,
    } else {
    }
    return
  }
  func.func @transform_0(%arg0: i32, %arg1: i32, %arg2: i32) -> (i32, i32) {
    %c0_i32 = arith.constant 0 : i32
    return %arg0, %arg2 : i32, i32
  }
  func.func @transform_1(%arg0: i32, %arg1: i32, %arg2: i32) -> (i32, i32) {
    %c0_i32 = arith.constant 0 : i32
    return %arg2, %arg1 : i32, i32
  }
  func.func @transform_2(%arg0: i32, %arg1: i32, %arg2: i32) -> (i32, i32) {
    %c0_i32 = arith.constant 0 : i32
    %c0_i32_0 = arith.constant 0 : i32
    return %c0_i32, %arg1 : i32, i32
  }
  func.func @transform_3(%arg0: i32, %arg1: i32, %arg2: i32) -> (i32, i32) {
    %c0_i32 = arith.constant 0 : i32
    %c0_i32_0 = arith.constant 0 : i32
    return %c0_i32, %arg1 : i32, i32
  }
  func.func @transform_4(%arg0: i32, %arg1: i32, %arg2: i32) -> (i32, i32) {
    %c0_i32 = arith.constant 0 : i32
    return %arg0, %arg1 : i32, i32
  }
}

module attributes {stable_mosaic.version = 11 : i64} {
  func.func @_fused_mm_kernel(%arg0: i32, %arg1: i32, %arg2: i32, %arg3: memref<32x384xbf16, #tpu.memory_space<vmem>>, %arg4: memref<384x128xbf16, #tpu.memory_space<vmem>>, %arg5: memref<1x128xf32, #tpu.memory_space<vmem>>, %arg6: memref<1x128xf32, #tpu.memory_space<vmem>>, %arg7: memref<32x128xbf16, #tpu.memory_space<vmem>>, %arg8: memref<32x128xbf16, #tpu.memory_space<vmem>>, %arg9: memref<32x128xf32, #tpu.memory_space<vmem>>) attributes {dimension_semantics = [#tpu.dimension_semantics<parallel>, #tpu.dimension_semantics<parallel>, #tpu.dimension_semantics<arbitrary>], iteration_bounds = array<i64: 1, 1, 3>, scalar_prefetch = 0 : i64, scratch_operands = 1 : i64, tpu.core_type = #tpu.core_type<tc>, window_params = [{transform_indices = @transform_0, window_bounds = array<i64: 32, 384>}, {transform_indices = @transform_1, window_bounds = array<i64: 384, 128>}, {transform_indices = @transform_2, window_bounds = array<i64: 1, 128>}, {transform_indices = @transform_3, window_bounds = array<i64: 1, 128>}, {transform_indices = @transform_4, window_bounds = array<i64: 32, 128>}, {transform_indices = @transform_5, window_bounds = array<i64: 32, 128>}]} {
    %c0_i32 = arith.constant 0 : i32
    %0 = arith.cmpi eq, %arg2, %c0_i32 : i32
    %1 = arith.extui %0 : i1 to i32
    %c0_i32_0 = arith.constant 0 : i32
    %2 = arith.cmpi ne, %1, %c0_i32_0 : i32
    scf.if %2 {
      %cst_9 = arith.constant 0.000000e+00 : f32
      %12 = vector.broadcast %cst_9 : f32 to vector<32x128xf32>
      %c0_10 = arith.constant 0 : index
      %c0_11 = arith.constant 0 : index
      %13 = vector.load %arg9[%c0_10, %c0_11] : memref<32x128xf32, #tpu.memory_space<vmem>>, vector<32x128xf32>
      tpu.vector_store %arg9[%c0_10, %c0_11], %12 {strides = array<i32>} : memref<32x128xf32, #tpu.memory_space<vmem>>, vector<32x128xf32>,
    } else {
    }
    %c0 = arith.constant 0 : index
    %c0_1 = arith.constant 0 : index
    %3 = vector.load %arg9[%c0, %c0_1] : memref<32x128xf32, #tpu.memory_space<vmem>>, vector<32x128xf32>
    %c0_2 = arith.constant 0 : index
    %c0_3 = arith.constant 0 : index
    %4 = vector.load %arg3[%c0_2, %c0_3] : memref<32x384xbf16, #tpu.memory_space<vmem>>, vector<32x384xbf16>
    %c0_4 = arith.constant 0 : index
    %c0_5 = arith.constant 0 : index
    %5 = vector.load %arg4[%c0_4, %c0_5] : memref<384x128xbf16, #tpu.memory_space<vmem>>, vector<384x128xbf16>
    %cst = arith.constant dense<0.000000e+00> : vector<32x128xf32>
    %6 = tpu.matmul %4, %5, %cst {dimension_numbers = #tpu.dot_dimension_numbers<[1], [0], [0], [1], [0, 0, 1, 1], [], []>} : vector<32x384xbf16>, vector<384x128xbf16>, vector<32x128xf32> -> vector<32x128xf32>
    %7 = arith.addf %3, %6 : vector<32x128xf32>
    %c0_6 = arith.constant 0 : index
    %c0_7 = arith.constant 0 : index
    %8 = vector.load %arg9[%c0_6, %c0_7] : memref<32x128xf32, #tpu.memory_space<vmem>>, vector<32x128xf32>
    tpu.vector_store %arg9[%c0_6, %c0_7], %7 {strides = array<i32>} : memref<32x128xf32, #tpu.memory_space<vmem>>, vector<32x128xf32>,
    %c2_i32 = arith.constant 2 : i32
    %9 = arith.cmpi eq, %arg2, %c2_i32 : i32
    %10 = arith.extui %9 : i1 to i32
    %c0_i32_8 = arith.constant 0 : i32
    %11 = arith.cmpi ne, %10, %c0_i32_8 : i32
    scf.if %11 {
      %c0_9 = arith.constant 0 : index
      %c0_10 = arith.constant 0 : index
      %12 = vector.load %arg9[%c0_9, %c0_10] : memref<32x128xf32, #tpu.memory_space<vmem>>, vector<32x128xf32>
      %c0_11 = arith.constant 0 : index
      %c0_12 = arith.constant 0 : index
      %13 = vector.load %arg5[%c0_11, %c0_12] : memref<1x128xf32, #tpu.memory_space<vmem>>, vector<1x128xf32>
      %14 = vector.broadcast %13 : vector<1x128xf32> to vector<32x128xf32>
      %15 = arith.mulf %12, %14 : vector<32x128xf32>
      %c0_13 = arith.constant 0 : index
      %c0_14 = arith.constant 0 : index
      %16 = vector.load %arg6[%c0_13, %c0_14] : memref<1x128xf32, #tpu.memory_space<vmem>>, vector<1x128xf32>
      %17 = vector.broadcast %16 : vector<1x128xf32> to vector<32x128xf32>
      %18 = arith.addf %15, %17 : vector<32x128xf32>
      %c0_15 = arith.constant 0 : index
      %c0_16 = arith.constant 0 : index
      %19 = vector.load %arg7[%c0_15, %c0_16] : memref<32x128xbf16, #tpu.memory_space<vmem>>, vector<32x128xbf16>
      %20 = arith.extf %19 : vector<32x128xbf16> to vector<32x128xf32>
      %21 = arith.addf %18, %20 : vector<32x128xf32>
      %cst_17 = arith.constant 0.000000e+00 : f32
      %22 = vector.broadcast %cst_17 : f32 to vector<32x128xf32>
      %23 = arith.maximumf %21, %22 : vector<32x128xf32>
      %24 = arith.truncf %23 : vector<32x128xf32> to vector<32x128xbf16>
      %c0_18 = arith.constant 0 : index
      %c0_19 = arith.constant 0 : index
      %25 = vector.load %arg8[%c0_18, %c0_19] : memref<32x128xbf16, #tpu.memory_space<vmem>>, vector<32x128xbf16>
      tpu.vector_store %arg8[%c0_18, %c0_19], %24 {strides = array<i32>} : memref<32x128xbf16, #tpu.memory_space<vmem>>, vector<32x128xbf16>,
    } else {
    }
    return
  }
  func.func @transform_0(%arg0: i32, %arg1: i32, %arg2: i32) -> (i32, i32) {
    %c0_i32 = arith.constant 0 : i32
    return %arg0, %arg2 : i32, i32
  }
  func.func @transform_1(%arg0: i32, %arg1: i32, %arg2: i32) -> (i32, i32) {
    %c0_i32 = arith.constant 0 : i32
    return %arg2, %arg1 : i32, i32
  }
  func.func @transform_2(%arg0: i32, %arg1: i32, %arg2: i32) -> (i32, i32) {
    %c0_i32 = arith.constant 0 : i32
    %c0_i32_0 = arith.constant 0 : i32
    return %c0_i32, %arg1 : i32, i32
  }
  func.func @transform_3(%arg0: i32, %arg1: i32, %arg2: i32) -> (i32, i32) {
    %c0_i32 = arith.constant 0 : i32
    %c0_i32_0 = arith.constant 0 : i32
    return %c0_i32, %arg1 : i32, i32
  }
  func.func @transform_4(%arg0: i32, %arg1: i32, %arg2: i32) -> (i32, i32) {
    %c0_i32 = arith.constant 0 : i32
    return %arg0, %arg1 : i32, i32
  }
  func.func @transform_5(%arg0: i32, %arg1: i32, %arg2: i32) -> (i32, i32) {
    %c0_i32 = arith.constant 0 : i32
    return %arg0, %arg1 : i32, i32
  }
}

module attributes {stable_mosaic.version = 11 : i64} {
  func.func @_fused_mm_kernel(%arg0: i32, %arg1: i32, %arg2: i32, %arg3: memref<32x384xbf16, #tpu.memory_space<vmem>>, %arg4: memref<384x128xbf16, #tpu.memory_space<vmem>>, %arg5: memref<1x128xf32, #tpu.memory_space<vmem>>, %arg6: memref<1x128xf32, #tpu.memory_space<vmem>>, %arg7: memref<32x128xbf16, #tpu.memory_space<vmem>>, %arg8: memref<32x128xf32, #tpu.memory_space<vmem>>) attributes {dimension_semantics = [#tpu.dimension_semantics<parallel>, #tpu.dimension_semantics<parallel>, #tpu.dimension_semantics<arbitrary>], iteration_bounds = array<i64: 1, 1, 3>, scalar_prefetch = 0 : i64, scratch_operands = 1 : i64, tpu.core_type = #tpu.core_type<tc>, window_params = [{transform_indices = @transform_0, window_bounds = array<i64: 32, 384>}, {transform_indices = @transform_1, window_bounds = array<i64: 384, 128>}, {transform_indices = @transform_2, window_bounds = array<i64: 1, 128>}, {transform_indices = @transform_3, window_bounds = array<i64: 1, 128>}, {transform_indices = @transform_4, window_bounds = array<i64: 32, 128>}]} {
    %c0_i32 = arith.constant 0 : i32
    %0 = arith.cmpi eq, %arg2, %c0_i32 : i32
    %1 = arith.extui %0 : i1 to i32
    %c0_i32_0 = arith.constant 0 : i32
    %2 = arith.cmpi ne, %1, %c0_i32_0 : i32
    scf.if %2 {
      %cst_9 = arith.constant 0.000000e+00 : f32
      %12 = vector.broadcast %cst_9 : f32 to vector<32x128xf32>
      %c0_10 = arith.constant 0 : index
      %c0_11 = arith.constant 0 : index
      %13 = vector.load %arg8[%c0_10, %c0_11] : memref<32x128xf32, #tpu.memory_space<vmem>>, vector<32x128xf32>
      tpu.vector_store %arg8[%c0_10, %c0_11], %12 {strides = array<i32>} : memref<32x128xf32, #tpu.memory_space<vmem>>, vector<32x128xf32>,
    } else {
    }
    %c0 = arith.constant 0 : index
    %c0_1 = arith.constant 0 : index
    %3 = vector.load %arg8[%c0, %c0_1] : memref<32x128xf32, #tpu.memory_space<vmem>>, vector<32x128xf32>
    %c0_2 = arith.constant 0 : index
    %c0_3 = arith.constant 0 : index
    %4 = vector.load %arg3[%c0_2, %c0_3] : memref<32x384xbf16, #tpu.memory_space<vmem>>, vector<32x384xbf16>
    %c0_4 = arith.constant 0 : index
    %c0_5 = arith.constant 0 : index
    %5 = vector.load %arg4[%c0_4, %c0_5] : memref<384x128xbf16, #tpu.memory_space<vmem>>, vector<384x128xbf16>
    %cst = arith.constant dense<0.000000e+00> : vector<32x128xf32>
    %6 = tpu.matmul %4, %5, %cst {dimension_numbers = #tpu.dot_dimension_numbers<[1], [0], [0], [1], [0, 0, 1, 1], [], []>} : vector<32x384xbf16>, vector<384x128xbf16>, vector<32x128xf32> -> vector<32x128xf32>
    %7 = arith.addf %3, %6 : vector<32x128xf32>
    %c0_6 = arith.constant 0 : index
    %c0_7 = arith.constant 0 : index
    %8 = vector.load %arg8[%c0_6, %c0_7] : memref<32x128xf32, #tpu.memory_space<vmem>>, vector<32x128xf32>
    tpu.vector_store %arg8[%c0_6, %c0_7], %7 {strides = array<i32>} : memref<32x128xf32, #tpu.memory_space<vmem>>, vector<32x128xf32>,
    %c2_i32 = arith.constant 2 : i32
    %9 = arith.cmpi eq, %arg2, %c2_i32 : i32
    %10 = arith.extui %9 : i1 to i32
    %c0_i32_8 = arith.constant 0 : i32
    %11 = arith.cmpi ne, %10, %c0_i32_8 : i32
    scf.if %11 {
      %c0_9 = arith.constant 0 : index
      %c0_10 = arith.constant 0 : index
      %12 = vector.load %arg8[%c0_9, %c0_10] : memref<32x128xf32, #tpu.memory_space<vmem>>, vector<32x128xf32>
      %c0_11 = arith.constant 0 : index
      %c0_12 = arith.constant 0 : index
      %13 = vector.load %arg5[%c0_11, %c0_12] : memref<1x128xf32, #tpu.memory_space<vmem>>, vector<1x128xf32>
      %14 = vector.broadcast %13 : vector<1x128xf32> to vector<32x128xf32>
      %15 = arith.mulf %12, %14 : vector<32x128xf32>
      %c0_13 = arith.constant 0 : index
      %c0_14 = arith.constant 0 : index
      %16 = vector.load %arg6[%c0_13, %c0_14] : memref<1x128xf32, #tpu.memory_space<vmem>>, vector<1x128xf32>
      %17 = vector.broadcast %16 : vector<1x128xf32> to vector<32x128xf32>
      %18 = arith.addf %15, %17 : vector<32x128xf32>
      %cst_15 = arith.constant 0.000000e+00 : f32
      %19 = vector.broadcast %cst_15 : f32 to vector<32x128xf32>
      %20 = arith.maximumf %18, %19 : vector<32x128xf32>
      %21 = arith.truncf %20 : vector<32x128xf32> to vector<32x128xbf16>
      %c0_16 = arith.constant 0 : index
      %c0_17 = arith.constant 0 : index
      %22 = vector.load %arg7[%c0_16, %c0_17] : memref<32x128xbf16, #tpu.memory_space<vmem>>, vector<32x128xbf16>
      tpu.vector_store %arg7[%c0_16, %c0_17], %21 {strides = array<i32>} : memref<32x128xbf16, #tpu.memory_space<vmem>>, vector<32x128xbf16>,
    } else {
    }
    return
  }
  func.func @transform_0(%arg0: i32, %arg1: i32, %arg2: i32) -> (i32, i32) {
    %c0_i32 = arith.constant 0 : i32
    return %arg0, %arg2 : i32, i32
  }
  func.func @transform_1(%arg0: i32, %arg1: i32, %arg2: i32) -> (i32, i32) {
    %c0_i32 = arith.constant 0 : i32
    return %arg2, %arg1 : i32, i32
  }
  func.func @transform_2(%arg0: i32, %arg1: i32, %arg2: i32) -> (i32, i32) {
    %c0_i32 = arith.constant 0 : i32
    %c0_i32_0 = arith.constant 0 : i32
    return %c0_i32, %arg1 : i32, i32
  }
  func.func @transform_3(%arg0: i32, %arg1: i32, %arg2: i32) -> (i32, i32) {
    %c0_i32 = arith.constant 0 : i32
    %c0_i32_0 = arith.constant 0 : i32
    return %c0_i32, %arg1 : i32, i32
  }
  func.func @transform_4(%arg0: i32, %arg1: i32, %arg2: i32) -> (i32, i32) {
    %c0_i32 = arith.constant 0 : i32
    return %arg0, %arg1 : i32, i32
  }
}

module attributes {stable_mosaic.version = 11 : i64} {
  func.func @_fused_mm_kernel(%arg0: i32, %arg1: i32, %arg2: i32, %arg3: memref<16x384xbf16, #tpu.memory_space<vmem>>, %arg4: memref<384x256xbf16, #tpu.memory_space<vmem>>, %arg5: memref<1x256xf32, #tpu.memory_space<vmem>>, %arg6: memref<1x256xf32, #tpu.memory_space<vmem>>, %arg7: memref<16x256xbf16, #tpu.memory_space<vmem>>, %arg8: memref<16x256xf32, #tpu.memory_space<vmem>>) attributes {dimension_semantics = [#tpu.dimension_semantics<parallel>, #tpu.dimension_semantics<parallel>, #tpu.dimension_semantics<arbitrary>], iteration_bounds = array<i64: 1, 1, 3>, scalar_prefetch = 0 : i64, scratch_operands = 1 : i64, tpu.core_type = #tpu.core_type<tc>, window_params = [{transform_indices = @transform_0, window_bounds = array<i64: 16, 384>}, {transform_indices = @transform_1, window_bounds = array<i64: 384, 256>}, {transform_indices = @transform_2, window_bounds = array<i64: 1, 256>}, {transform_indices = @transform_3, window_bounds = array<i64: 1, 256>}, {transform_indices = @transform_4, window_bounds = array<i64: 16, 256>}]} {
    %c0_i32 = arith.constant 0 : i32
    %0 = arith.cmpi eq, %arg2, %c0_i32 : i32
    %1 = arith.extui %0 : i1 to i32
    %c0_i32_0 = arith.constant 0 : i32
    %2 = arith.cmpi ne, %1, %c0_i32_0 : i32
    scf.if %2 {
      %cst_9 = arith.constant 0.000000e+00 : f32
      %12 = vector.broadcast %cst_9 : f32 to vector<16x256xf32>
      %c0_10 = arith.constant 0 : index
      %c0_11 = arith.constant 0 : index
      %13 = vector.load %arg8[%c0_10, %c0_11] : memref<16x256xf32, #tpu.memory_space<vmem>>, vector<16x256xf32>
      tpu.vector_store %arg8[%c0_10, %c0_11], %12 {strides = array<i32>} : memref<16x256xf32, #tpu.memory_space<vmem>>, vector<16x256xf32>,
    } else {
    }
    %c0 = arith.constant 0 : index
    %c0_1 = arith.constant 0 : index
    %3 = vector.load %arg8[%c0, %c0_1] : memref<16x256xf32, #tpu.memory_space<vmem>>, vector<16x256xf32>
    %c0_2 = arith.constant 0 : index
    %c0_3 = arith.constant 0 : index
    %4 = vector.load %arg3[%c0_2, %c0_3] : memref<16x384xbf16, #tpu.memory_space<vmem>>, vector<16x384xbf16>
    %c0_4 = arith.constant 0 : index
    %c0_5 = arith.constant 0 : index
    %5 = vector.load %arg4[%c0_4, %c0_5] : memref<384x256xbf16, #tpu.memory_space<vmem>>, vector<384x256xbf16>
    %cst = arith.constant dense<0.000000e+00> : vector<16x256xf32>
    %6 = tpu.matmul %4, %5, %cst {dimension_numbers = #tpu.dot_dimension_numbers<[1], [0], [0], [1], [0, 0, 1, 1], [], []>} : vector<16x384xbf16>, vector<384x256xbf16>, vector<16x256xf32> -> vector<16x256xf32>
    %7 = arith.addf %3, %6 : vector<16x256xf32>
    %c0_6 = arith.constant 0 : index
    %c0_7 = arith.constant 0 : index
    %8 = vector.load %arg8[%c0_6, %c0_7] : memref<16x256xf32, #tpu.memory_space<vmem>>, vector<16x256xf32>
    tpu.vector_store %arg8[%c0_6, %c0_7], %7 {strides = array<i32>} : memref<16x256xf32, #tpu.memory_space<vmem>>, vector<16x256xf32>,
    %c2_i32 = arith.constant 2 : i32
    %9 = arith.cmpi eq, %arg2, %c2_i32 : i32
    %10 = arith.extui %9 : i1 to i32
    %c0_i32_8 = arith.constant 0 : i32
    %11 = arith.cmpi ne, %10, %c0_i32_8 : i32
    scf.if %11 {
      %c0_9 = arith.constant 0 : index
      %c0_10 = arith.constant 0 : index
      %12 = vector.load %arg8[%c0_9, %c0_10] : memref<16x256xf32, #tpu.memory_space<vmem>>, vector<16x256xf32>
      %c0_11 = arith.constant 0 : index
      %c0_12 = arith.constant 0 : index
      %13 = vector.load %arg5[%c0_11, %c0_12] : memref<1x256xf32, #tpu.memory_space<vmem>>, vector<1x256xf32>
      %14 = vector.broadcast %13 : vector<1x256xf32> to vector<16x256xf32>
      %15 = arith.mulf %12, %14 : vector<16x256xf32>
      %c0_13 = arith.constant 0 : index
      %c0_14 = arith.constant 0 : index
      %16 = vector.load %arg6[%c0_13, %c0_14] : memref<1x256xf32, #tpu.memory_space<vmem>>, vector<1x256xf32>
      %17 = vector.broadcast %16 : vector<1x256xf32> to vector<16x256xf32>
      %18 = arith.addf %15, %17 : vector<16x256xf32>
      %cst_15 = arith.constant 0.000000e+00 : f32
      %19 = vector.broadcast %cst_15 : f32 to vector<16x256xf32>
      %20 = arith.maximumf %18, %19 : vector<16x256xf32>
      %21 = arith.truncf %20 : vector<16x256xf32> to vector<16x256xbf16>
      %c0_16 = arith.constant 0 : index
      %c0_17 = arith.constant 0 : index
      %22 = vector.load %arg7[%c0_16, %c0_17] : memref<16x256xbf16, #tpu.memory_space<vmem>>, vector<16x256xbf16>
      tpu.vector_store %arg7[%c0_16, %c0_17], %21 {strides = array<i32>} : memref<16x256xbf16, #tpu.memory_space<vmem>>, vector<16x256xbf16>,
    } else {
    }
    return
  }
  func.func @transform_0(%arg0: i32, %arg1: i32, %arg2: i32) -> (i32, i32) {
    %c0_i32 = arith.constant 0 : i32
    return %arg0, %arg2 : i32, i32
  }
  func.func @transform_1(%arg0: i32, %arg1: i32, %arg2: i32) -> (i32, i32) {
    %c0_i32 = arith.constant 0 : i32
    return %arg2, %arg1 : i32, i32
  }
  func.func @transform_2(%arg0: i32, %arg1: i32, %arg2: i32) -> (i32, i32) {
    %c0_i32 = arith.constant 0 : i32
    %c0_i32_0 = arith.constant 0 : i32
    return %c0_i32, %arg1 : i32, i32
  }
  func.func @transform_3(%arg0: i32, %arg1: i32, %arg2: i32) -> (i32, i32) {
    %c0_i32 = arith.constant 0 : i32
    %c0_i32_0 = arith.constant 0 : i32
    return %c0_i32, %arg1 : i32, i32
  }
  func.func @transform_4(%arg0: i32, %arg1: i32, %arg2: i32) -> (i32, i32) {
    %c0_i32 = arith.constant 0 : i32
    return %arg0, %arg1 : i32, i32
  }
}

module attributes {stable_mosaic.version = 11 : i64} {
  func.func @_fused_mm_kernel(%arg0: i32, %arg1: i32, %arg2: i32, %arg3: memref<16x128xbf16, #tpu.memory_space<vmem>>, %arg4: memref<128x256xbf16, #tpu.memory_space<vmem>>, %arg5: memref<1x256xf32, #tpu.memory_space<vmem>>, %arg6: memref<1x256xf32, #tpu.memory_space<vmem>>, %arg7: memref<16x256xbf16, #tpu.memory_space<vmem>>, %arg8: memref<16x256xf32, #tpu.memory_space<vmem>>) attributes {dimension_semantics = [#tpu.dimension_semantics<parallel>, #tpu.dimension_semantics<parallel>, #tpu.dimension_semantics<arbitrary>], iteration_bounds = array<i64: 1, 1, 1>, scalar_prefetch = 0 : i64, scratch_operands = 1 : i64, tpu.core_type = #tpu.core_type<tc>, window_params = [{transform_indices = @transform_0, window_bounds = array<i64: 16, 128>}, {transform_indices = @transform_1, window_bounds = array<i64: 128, 256>}, {transform_indices = @transform_2, window_bounds = array<i64: 1, 256>}, {transform_indices = @transform_3, window_bounds = array<i64: 1, 256>}, {transform_indices = @transform_4, window_bounds = array<i64: 16, 256>}]} {
    %c0_i32 = arith.constant 0 : i32
    %0 = arith.cmpi eq, %arg2, %c0_i32 : i32
    %1 = arith.extui %0 : i1 to i32
    %c0_i32_0 = arith.constant 0 : i32
    %2 = arith.cmpi ne, %1, %c0_i32_0 : i32
    scf.if %2 {
      %cst_10 = arith.constant 0.000000e+00 : f32
      %12 = vector.broadcast %cst_10 : f32 to vector<16x256xf32>
      %c0_11 = arith.constant 0 : index
      %c0_12 = arith.constant 0 : index
      %13 = vector.load %arg8[%c0_11, %c0_12] : memref<16x256xf32, #tpu.memory_space<vmem>>, vector<16x256xf32>
      tpu.vector_store %arg8[%c0_11, %c0_12], %12 {strides = array<i32>} : memref<16x256xf32, #tpu.memory_space<vmem>>, vector<16x256xf32>,
    } else {
    }
    %c0 = arith.constant 0 : index
    %c0_1 = arith.constant 0 : index
    %3 = vector.load %arg8[%c0, %c0_1] : memref<16x256xf32, #tpu.memory_space<vmem>>, vector<16x256xf32>
    %c0_2 = arith.constant 0 : index
    %c0_3 = arith.constant 0 : index
    %4 = vector.load %arg3[%c0_2, %c0_3] : memref<16x128xbf16, #tpu.memory_space<vmem>>, vector<16x128xbf16>
    %c0_4 = arith.constant 0 : index
    %c0_5 = arith.constant 0 : index
    %5 = vector.load %arg4[%c0_4, %c0_5] : memref<128x256xbf16, #tpu.memory_space<vmem>>, vector<128x256xbf16>
    %cst = arith.constant dense<0.000000e+00> : vector<16x256xf32>
    %6 = tpu.matmul %4, %5, %cst {dimension_numbers = #tpu.dot_dimension_numbers<[1], [0], [0], [1], [0, 0, 1, 1], [], []>} : vector<16x128xbf16>, vector<128x256xbf16>, vector<16x256xf32> -> vector<16x256xf32>
    %7 = arith.addf %3, %6 : vector<16x256xf32>
    %c0_6 = arith.constant 0 : index
    %c0_7 = arith.constant 0 : index
    %8 = vector.load %arg8[%c0_6, %c0_7] : memref<16x256xf32, #tpu.memory_space<vmem>>, vector<16x256xf32>
    tpu.vector_store %arg8[%c0_6, %c0_7], %7 {strides = array<i32>} : memref<16x256xf32, #tpu.memory_space<vmem>>, vector<16x256xf32>,
    %c0_i32_8 = arith.constant 0 : i32
    %9 = arith.cmpi eq, %arg2, %c0_i32_8 : i32
    %10 = arith.extui %9 : i1 to i32
    %c0_i32_9 = arith.constant 0 : i32
    %11 = arith.cmpi ne, %10, %c0_i32_9 : i32
    scf.if %11 {
      %c0_10 = arith.constant 0 : index
      %c0_11 = arith.constant 0 : index
      %12 = vector.load %arg8[%c0_10, %c0_11] : memref<16x256xf32, #tpu.memory_space<vmem>>, vector<16x256xf32>
      %c0_12 = arith.constant 0 : index
      %c0_13 = arith.constant 0 : index
      %13 = vector.load %arg5[%c0_12, %c0_13] : memref<1x256xf32, #tpu.memory_space<vmem>>, vector<1x256xf32>
      %14 = vector.broadcast %13 : vector<1x256xf32> to vector<16x256xf32>
      %15 = arith.mulf %12, %14 : vector<16x256xf32>
      %c0_14 = arith.constant 0 : index
      %c0_15 = arith.constant 0 : index
      %16 = vector.load %arg6[%c0_14, %c0_15] : memref<1x256xf32, #tpu.memory_space<vmem>>, vector<1x256xf32>
      %17 = vector.broadcast %16 : vector<1x256xf32> to vector<16x256xf32>
      %18 = arith.addf %15, %17 : vector<16x256xf32>
      %19 = arith.truncf %18 : vector<16x256xf32> to vector<16x256xbf16>
      %c0_16 = arith.constant 0 : index
      %c0_17 = arith.constant 0 : index
      %20 = vector.load %arg7[%c0_16, %c0_17] : memref<16x256xbf16, #tpu.memory_space<vmem>>, vector<16x256xbf16>
      tpu.vector_store %arg7[%c0_16, %c0_17], %19 {strides = array<i32>} : memref<16x256xbf16, #tpu.memory_space<vmem>>, vector<16x256xbf16>,
    } else {
    }
    return
  }
  func.func @transform_0(%arg0: i32, %arg1: i32, %arg2: i32) -> (i32, i32) {
    %c0_i32 = arith.constant 0 : i32
    return %arg0, %arg2 : i32, i32
  }
  func.func @transform_1(%arg0: i32, %arg1: i32, %arg2: i32) -> (i32, i32) {
    %c0_i32 = arith.constant 0 : i32
    return %arg2, %arg1 : i32, i32
  }
  func.func @transform_2(%arg0: i32, %arg1: i32, %arg2: i32) -> (i32, i32) {
    %c0_i32 = arith.constant 0 : i32
    %c0_i32_0 = arith.constant 0 : i32
    return %c0_i32, %arg1 : i32, i32
  }
  func.func @transform_3(%arg0: i32, %arg1: i32, %arg2: i32) -> (i32, i32) {
    %c0_i32 = arith.constant 0 : i32
    %c0_i32_0 = arith.constant 0 : i32
    return %c0_i32, %arg1 : i32, i32
  }
  func.func @transform_4(%arg0: i32, %arg1: i32, %arg2: i32) -> (i32, i32) {
    %c0_i32 = arith.constant 0 : i32
    return %arg0, %arg1 : i32, i32
  }
}

module attributes {stable_mosaic.version = 11 : i64} {
  func.func @_fused_mm_kernel(%arg0: i32, %arg1: i32, %arg2: i32, %arg3: memref<16x512xbf16, #tpu.memory_space<vmem>>, %arg4: memref<512x256xbf16, #tpu.memory_space<vmem>>, %arg5: memref<1x256xf32, #tpu.memory_space<vmem>>, %arg6: memref<1x256xf32, #tpu.memory_space<vmem>>, %arg7: memref<16x256xbf16, #tpu.memory_space<vmem>>, %arg8: memref<16x256xbf16, #tpu.memory_space<vmem>>, %arg9: memref<16x256xf32, #tpu.memory_space<vmem>>) attributes {dimension_semantics = [#tpu.dimension_semantics<parallel>, #tpu.dimension_semantics<parallel>, #tpu.dimension_semantics<arbitrary>], iteration_bounds = array<i64: 1, 1, 5>, scalar_prefetch = 0 : i64, scratch_operands = 1 : i64, tpu.core_type = #tpu.core_type<tc>, window_params = [{transform_indices = @transform_0, window_bounds = array<i64: 16, 512>}, {transform_indices = @transform_1, window_bounds = array<i64: 512, 256>}, {transform_indices = @transform_2, window_bounds = array<i64: 1, 256>}, {transform_indices = @transform_3, window_bounds = array<i64: 1, 256>}, {transform_indices = @transform_4, window_bounds = array<i64: 16, 256>}, {transform_indices = @transform_5, window_bounds = array<i64: 16, 256>}]} {
    %c0_i32 = arith.constant 0 : i32
    %0 = arith.cmpi eq, %arg2, %c0_i32 : i32
    %1 = arith.extui %0 : i1 to i32
    %c0_i32_0 = arith.constant 0 : i32
    %2 = arith.cmpi ne, %1, %c0_i32_0 : i32
    scf.if %2 {
      %cst_9 = arith.constant 0.000000e+00 : f32
      %12 = vector.broadcast %cst_9 : f32 to vector<16x256xf32>
      %c0_10 = arith.constant 0 : index
      %c0_11 = arith.constant 0 : index
      %13 = vector.load %arg9[%c0_10, %c0_11] : memref<16x256xf32, #tpu.memory_space<vmem>>, vector<16x256xf32>
      tpu.vector_store %arg9[%c0_10, %c0_11], %12 {strides = array<i32>} : memref<16x256xf32, #tpu.memory_space<vmem>>, vector<16x256xf32>,
    } else {
    }
    %c0 = arith.constant 0 : index
    %c0_1 = arith.constant 0 : index
    %3 = vector.load %arg9[%c0, %c0_1] : memref<16x256xf32, #tpu.memory_space<vmem>>, vector<16x256xf32>
    %c0_2 = arith.constant 0 : index
    %c0_3 = arith.constant 0 : index
    %4 = vector.load %arg3[%c0_2, %c0_3] : memref<16x512xbf16, #tpu.memory_space<vmem>>, vector<16x512xbf16>
    %c0_4 = arith.constant 0 : index
    %c0_5 = arith.constant 0 : index
    %5 = vector.load %arg4[%c0_4, %c0_5] : memref<512x256xbf16, #tpu.memory_space<vmem>>, vector<512x256xbf16>
    %cst = arith.constant dense<0.000000e+00> : vector<16x256xf32>
    %6 = tpu.matmul %4, %5, %cst {dimension_numbers = #tpu.dot_dimension_numbers<[1], [0], [0], [1], [0, 0, 1, 1], [], []>} : vector<16x512xbf16>, vector<512x256xbf16>, vector<16x256xf32> -> vector<16x256xf32>
    %7 = arith.addf %3, %6 : vector<16x256xf32>
    %c0_6 = arith.constant 0 : index
    %c0_7 = arith.constant 0 : index
    %8 = vector.load %arg9[%c0_6, %c0_7] : memref<16x256xf32, #tpu.memory_space<vmem>>, vector<16x256xf32>
    tpu.vector_store %arg9[%c0_6, %c0_7], %7 {strides = array<i32>} : memref<16x256xf32, #tpu.memory_space<vmem>>, vector<16x256xf32>,
    %c4_i32 = arith.constant 4 : i32
    %9 = arith.cmpi eq, %arg2, %c4_i32 : i32
    %10 = arith.extui %9 : i1 to i32
    %c0_i32_8 = arith.constant 0 : i32
    %11 = arith.cmpi ne, %10, %c0_i32_8 : i32
    scf.if %11 {
      %c0_9 = arith.constant 0 : index
      %c0_10 = arith.constant 0 : index
      %12 = vector.load %arg9[%c0_9, %c0_10] : memref<16x256xf32, #tpu.memory_space<vmem>>, vector<16x256xf32>
      %c0_11 = arith.constant 0 : index
      %c0_12 = arith.constant 0 : index
      %13 = vector.load %arg5[%c0_11, %c0_12] : memref<1x256xf32, #tpu.memory_space<vmem>>, vector<1x256xf32>
      %14 = vector.broadcast %13 : vector<1x256xf32> to vector<16x256xf32>
      %15 = arith.mulf %12, %14 : vector<16x256xf32>
      %c0_13 = arith.constant 0 : index
      %c0_14 = arith.constant 0 : index
      %16 = vector.load %arg6[%c0_13, %c0_14] : memref<1x256xf32, #tpu.memory_space<vmem>>, vector<1x256xf32>
      %17 = vector.broadcast %16 : vector<1x256xf32> to vector<16x256xf32>
      %18 = arith.addf %15, %17 : vector<16x256xf32>
      %c0_15 = arith.constant 0 : index
      %c0_16 = arith.constant 0 : index
      %19 = vector.load %arg7[%c0_15, %c0_16] : memref<16x256xbf16, #tpu.memory_space<vmem>>, vector<16x256xbf16>
      %20 = arith.extf %19 : vector<16x256xbf16> to vector<16x256xf32>
      %21 = arith.addf %18, %20 : vector<16x256xf32>
      %cst_17 = arith.constant 0.000000e+00 : f32
      %22 = vector.broadcast %cst_17 : f32 to vector<16x256xf32>
      %23 = arith.maximumf %21, %22 : vector<16x256xf32>
      %24 = arith.truncf %23 : vector<16x256xf32> to vector<16x256xbf16>
      %c0_18 = arith.constant 0 : index
      %c0_19 = arith.constant 0 : index
      %25 = vector.load %arg8[%c0_18, %c0_19] : memref<16x256xbf16, #tpu.memory_space<vmem>>, vector<16x256xbf16>
      tpu.vector_store %arg8[%c0_18, %c0_19], %24 {strides = array<i32>} : memref<16x256xbf16, #tpu.memory_space<vmem>>, vector<16x256xbf16>,
    } else {
    }
    return
  }
  func.func @transform_0(%arg0: i32, %arg1: i32, %arg2: i32) -> (i32, i32) {
    %c0_i32 = arith.constant 0 : i32
    return %arg0, %arg2 : i32, i32
  }
  func.func @transform_1(%arg0: i32, %arg1: i32, %arg2: i32) -> (i32, i32) {
    %c0_i32 = arith.constant 0 : i32
    return %arg2, %arg1 : i32, i32
  }
  func.func @transform_2(%arg0: i32, %arg1: i32, %arg2: i32) -> (i32, i32) {
    %c0_i32 = arith.constant 0 : i32
    %c0_i32_0 = arith.constant 0 : i32
    return %c0_i32, %arg1 : i32, i32
  }
  func.func @transform_3(%arg0: i32, %arg1: i32, %arg2: i32) -> (i32, i32) {
    %c0_i32 = arith.constant 0 : i32
    %c0_i32_0 = arith.constant 0 : i32
    return %c0_i32, %arg1 : i32, i32
  }
  func.func @transform_4(%arg0: i32, %arg1: i32, %arg2: i32) -> (i32, i32) {
    %c0_i32 = arith.constant 0 : i32
    return %arg0, %arg1 : i32, i32
  }
  func.func @transform_5(%arg0: i32, %arg1: i32, %arg2: i32) -> (i32, i32) {
    %c0_i32 = arith.constant 0 : i32
    return %arg0, %arg1 : i32, i32
  }
}

module attributes {stable_mosaic.version = 11 : i64} {
  func.func @_fused_mm_kernel(%arg0: i32, %arg1: i32, %arg2: i32, %arg3: memref<16x512xbf16, #tpu.memory_space<vmem>>, %arg4: memref<512x256xbf16, #tpu.memory_space<vmem>>, %arg5: memref<1x256xf32, #tpu.memory_space<vmem>>, %arg6: memref<1x256xf32, #tpu.memory_space<vmem>>, %arg7: memref<16x256xbf16, #tpu.memory_space<vmem>>, %arg8: memref<16x256xf32, #tpu.memory_space<vmem>>) attributes {dimension_semantics = [#tpu.dimension_semantics<parallel>, #tpu.dimension_semantics<parallel>, #tpu.dimension_semantics<arbitrary>], iteration_bounds = array<i64: 1, 1, 5>, scalar_prefetch = 0 : i64, scratch_operands = 1 : i64, tpu.core_type = #tpu.core_type<tc>, window_params = [{transform_indices = @transform_0, window_bounds = array<i64: 16, 512>}, {transform_indices = @transform_1, window_bounds = array<i64: 512, 256>}, {transform_indices = @transform_2, window_bounds = array<i64: 1, 256>}, {transform_indices = @transform_3, window_bounds = array<i64: 1, 256>}, {transform_indices = @transform_4, window_bounds = array<i64: 16, 256>}]} {
    %c0_i32 = arith.constant 0 : i32
    %0 = arith.cmpi eq, %arg2, %c0_i32 : i32
    %1 = arith.extui %0 : i1 to i32
    %c0_i32_0 = arith.constant 0 : i32
    %2 = arith.cmpi ne, %1, %c0_i32_0 : i32
    scf.if %2 {
      %cst_9 = arith.constant 0.000000e+00 : f32
      %12 = vector.broadcast %cst_9 : f32 to vector<16x256xf32>
      %c0_10 = arith.constant 0 : index
      %c0_11 = arith.constant 0 : index
      %13 = vector.load %arg8[%c0_10, %c0_11] : memref<16x256xf32, #tpu.memory_space<vmem>>, vector<16x256xf32>
      tpu.vector_store %arg8[%c0_10, %c0_11], %12 {strides = array<i32>} : memref<16x256xf32, #tpu.memory_space<vmem>>, vector<16x256xf32>,
    } else {
    }
    %c0 = arith.constant 0 : index
    %c0_1 = arith.constant 0 : index
    %3 = vector.load %arg8[%c0, %c0_1] : memref<16x256xf32, #tpu.memory_space<vmem>>, vector<16x256xf32>
    %c0_2 = arith.constant 0 : index
    %c0_3 = arith.constant 0 : index
    %4 = vector.load %arg3[%c0_2, %c0_3] : memref<16x512xbf16, #tpu.memory_space<vmem>>, vector<16x512xbf16>
    %c0_4 = arith.constant 0 : index
    %c0_5 = arith.constant 0 : index
    %5 = vector.load %arg4[%c0_4, %c0_5] : memref<512x256xbf16, #tpu.memory_space<vmem>>, vector<512x256xbf16>
    %cst = arith.constant dense<0.000000e+00> : vector<16x256xf32>
    %6 = tpu.matmul %4, %5, %cst {dimension_numbers = #tpu.dot_dimension_numbers<[1], [0], [0], [1], [0, 0, 1, 1], [], []>} : vector<16x512xbf16>, vector<512x256xbf16>, vector<16x256xf32> -> vector<16x256xf32>
    %7 = arith.addf %3, %6 : vector<16x256xf32>
    %c0_6 = arith.constant 0 : index
    %c0_7 = arith.constant 0 : index
    %8 = vector.load %arg8[%c0_6, %c0_7] : memref<16x256xf32, #tpu.memory_space<vmem>>, vector<16x256xf32>
    tpu.vector_store %arg8[%c0_6, %c0_7], %7 {strides = array<i32>} : memref<16x256xf32, #tpu.memory_space<vmem>>, vector<16x256xf32>,
    %c4_i32 = arith.constant 4 : i32
    %9 = arith.cmpi eq, %arg2, %c4_i32 : i32
    %10 = arith.extui %9 : i1 to i32
    %c0_i32_8 = arith.constant 0 : i32
    %11 = arith.cmpi ne, %10, %c0_i32_8 : i32
    scf.if %11 {
      %c0_9 = arith.constant 0 : index
      %c0_10 = arith.constant 0 : index
      %12 = vector.load %arg8[%c0_9, %c0_10] : memref<16x256xf32, #tpu.memory_space<vmem>>, vector<16x256xf32>
      %c0_11 = arith.constant 0 : index
      %c0_12 = arith.constant 0 : index
      %13 = vector.load %arg5[%c0_11, %c0_12] : memref<1x256xf32, #tpu.memory_space<vmem>>, vector<1x256xf32>
      %14 = vector.broadcast %13 : vector<1x256xf32> to vector<16x256xf32>
      %15 = arith.mulf %12, %14 : vector<16x256xf32>
      %c0_13 = arith.constant 0 : index
      %c0_14 = arith.constant 0 : index
      %16 = vector.load %arg6[%c0_13, %c0_14] : memref<1x256xf32, #tpu.memory_space<vmem>>, vector<1x256xf32>
      %17 = vector.broadcast %16 : vector<1x256xf32> to vector<16x256xf32>
      %18 = arith.addf %15, %17 : vector<16x256xf32>
      %cst_15 = arith.constant 0.000000e+00 : f32
      %19 = vector.broadcast %cst_15 : f32 to vector<16x256xf32>
      %20 = arith.maximumf %18, %19 : vector<16x256xf32>
      %21 = arith.truncf %20 : vector<16x256xf32> to vector<16x256xbf16>
      %c0_16 = arith.constant 0 : index
      %c0_17 = arith.constant 0 : index
      %22 = vector.load %arg7[%c0_16, %c0_17] : memref<16x256xbf16, #tpu.memory_space<vmem>>, vector<16x256xbf16>
      tpu.vector_store %arg7[%c0_16, %c0_17], %21 {strides = array<i32>} : memref<16x256xbf16, #tpu.memory_space<vmem>>, vector<16x256xbf16>,
    } else {
    }
    return
  }
  func.func @transform_0(%arg0: i32, %arg1: i32, %arg2: i32) -> (i32, i32) {
    %c0_i32 = arith.constant 0 : i32
    return %arg0, %arg2 : i32, i32
  }
  func.func @transform_1(%arg0: i32, %arg1: i32, %arg2: i32) -> (i32, i32) {
    %c0_i32 = arith.constant 0 : i32
    return %arg2, %arg1 : i32, i32
  }
  func.func @transform_2(%arg0: i32, %arg1: i32, %arg2: i32) -> (i32, i32) {
    %c0_i32 = arith.constant 0 : i32
    %c0_i32_0 = arith.constant 0 : i32
    return %c0_i32, %arg1 : i32, i32
  }
  func.func @transform_3(%arg0: i32, %arg1: i32, %arg2: i32) -> (i32, i32) {
    %c0_i32 = arith.constant 0 : i32
    %c0_i32_0 = arith.constant 0 : i32
    return %c0_i32, %arg1 : i32, i32
  }
  func.func @transform_4(%arg0: i32, %arg1: i32, %arg2: i32) -> (i32, i32) {
    %c0_i32 = arith.constant 0 : i32
    return %arg0, %arg1 : i32, i32
  }
}

module attributes {stable_mosaic.version = 11 : i64} {
  func.func @_fused_mm_kernel(%arg0: i32, %arg1: i32, %arg2: i32, %arg3: memref<16x512xbf16, #tpu.memory_space<vmem>>, %arg4: memref<512x256xbf16, #tpu.memory_space<vmem>>, %arg5: memref<1x256xf32, #tpu.memory_space<vmem>>, %arg6: memref<1x256xf32, #tpu.memory_space<vmem>>, %arg7: memref<16x256xbf16, #tpu.memory_space<vmem>>, %arg8: memref<16x256xf32, #tpu.memory_space<vmem>>) attributes {dimension_semantics = [#tpu.dimension_semantics<parallel>, #tpu.dimension_semantics<parallel>, #tpu.dimension_semantics<arbitrary>], iteration_bounds = array<i64: 1, 2, 5>, scalar_prefetch = 0 : i64, scratch_operands = 1 : i64, tpu.core_type = #tpu.core_type<tc>, window_params = [{transform_indices = @transform_0, window_bounds = array<i64: 16, 512>}, {transform_indices = @transform_1, window_bounds = array<i64: 512, 256>}, {transform_indices = @transform_2, window_bounds = array<i64: 1, 256>}, {transform_indices = @transform_3, window_bounds = array<i64: 1, 256>}, {transform_indices = @transform_4, window_bounds = array<i64: 16, 256>}]} {
    %c0_i32 = arith.constant 0 : i32
    %0 = arith.cmpi eq, %arg2, %c0_i32 : i32
    %1 = arith.extui %0 : i1 to i32
    %c0_i32_0 = arith.constant 0 : i32
    %2 = arith.cmpi ne, %1, %c0_i32_0 : i32
    scf.if %2 {
      %cst_9 = arith.constant 0.000000e+00 : f32
      %12 = vector.broadcast %cst_9 : f32 to vector<16x256xf32>
      %c0_10 = arith.constant 0 : index
      %c0_11 = arith.constant 0 : index
      %13 = vector.load %arg8[%c0_10, %c0_11] : memref<16x256xf32, #tpu.memory_space<vmem>>, vector<16x256xf32>
      tpu.vector_store %arg8[%c0_10, %c0_11], %12 {strides = array<i32>} : memref<16x256xf32, #tpu.memory_space<vmem>>, vector<16x256xf32>,
    } else {
    }
    %c0 = arith.constant 0 : index
    %c0_1 = arith.constant 0 : index
    %3 = vector.load %arg8[%c0, %c0_1] : memref<16x256xf32, #tpu.memory_space<vmem>>, vector<16x256xf32>
    %c0_2 = arith.constant 0 : index
    %c0_3 = arith.constant 0 : index
    %4 = vector.load %arg3[%c0_2, %c0_3] : memref<16x512xbf16, #tpu.memory_space<vmem>>, vector<16x512xbf16>
    %c0_4 = arith.constant 0 : index
    %c0_5 = arith.constant 0 : index
    %5 = vector.load %arg4[%c0_4, %c0_5] : memref<512x256xbf16, #tpu.memory_space<vmem>>, vector<512x256xbf16>
    %cst = arith.constant dense<0.000000e+00> : vector<16x256xf32>
    %6 = tpu.matmul %4, %5, %cst {dimension_numbers = #tpu.dot_dimension_numbers<[1], [0], [0], [1], [0, 0, 1, 1], [], []>} : vector<16x512xbf16>, vector<512x256xbf16>, vector<16x256xf32> -> vector<16x256xf32>
    %7 = arith.addf %3, %6 : vector<16x256xf32>
    %c0_6 = arith.constant 0 : index
    %c0_7 = arith.constant 0 : index
    %8 = vector.load %arg8[%c0_6, %c0_7] : memref<16x256xf32, #tpu.memory_space<vmem>>, vector<16x256xf32>
    tpu.vector_store %arg8[%c0_6, %c0_7], %7 {strides = array<i32>} : memref<16x256xf32, #tpu.memory_space<vmem>>, vector<16x256xf32>,
    %c4_i32 = arith.constant 4 : i32
    %9 = arith.cmpi eq, %arg2, %c4_i32 : i32
    %10 = arith.extui %9 : i1 to i32
    %c0_i32_8 = arith.constant 0 : i32
    %11 = arith.cmpi ne, %10, %c0_i32_8 : i32
    scf.if %11 {
      %c0_9 = arith.constant 0 : index
      %c0_10 = arith.constant 0 : index
      %12 = vector.load %arg8[%c0_9, %c0_10] : memref<16x256xf32, #tpu.memory_space<vmem>>, vector<16x256xf32>
      %c0_11 = arith.constant 0 : index
      %c0_12 = arith.constant 0 : index
      %13 = vector.load %arg5[%c0_11, %c0_12] : memref<1x256xf32, #tpu.memory_space<vmem>>, vector<1x256xf32>
      %14 = vector.broadcast %13 : vector<1x256xf32> to vector<16x256xf32>
      %15 = arith.mulf %12, %14 : vector<16x256xf32>
      %c0_13 = arith.constant 0 : index
      %c0_14 = arith.constant 0 : index
      %16 = vector.load %arg6[%c0_13, %c0_14] : memref<1x256xf32, #tpu.memory_space<vmem>>, vector<1x256xf32>
      %17 = vector.broadcast %16 : vector<1x256xf32> to vector<16x256xf32>
      %18 = arith.addf %15, %17 : vector<16x256xf32>
      %cst_15 = arith.constant 0.000000e+00 : f32
      %19 = vector.broadcast %cst_15 : f32 to vector<16x256xf32>
      %20 = arith.maximumf %18, %19 : vector<16x256xf32>
      %21 = arith.truncf %20 : vector<16x256xf32> to vector<16x256xbf16>
      %c0_16 = arith.constant 0 : index
      %c0_17 = arith.constant 0 : index
      %22 = vector.load %arg7[%c0_16, %c0_17] : memref<16x256xbf16, #tpu.memory_space<vmem>>, vector<16x256xbf16>
      tpu.vector_store %arg7[%c0_16, %c0_17], %21 {strides = array<i32>} : memref<16x256xbf16, #tpu.memory_space<vmem>>, vector<16x256xbf16>,
    } else {
    }
    return
  }
  func.func @transform_0(%arg0: i32, %arg1: i32, %arg2: i32) -> (i32, i32) {
    %c0_i32 = arith.constant 0 : i32
    return %arg0, %arg2 : i32, i32
  }
  func.func @transform_1(%arg0: i32, %arg1: i32, %arg2: i32) -> (i32, i32) {
    %c0_i32 = arith.constant 0 : i32
    return %arg2, %arg1 : i32, i32
  }
  func.func @transform_2(%arg0: i32, %arg1: i32, %arg2: i32) -> (i32, i32) {
    %c0_i32 = arith.constant 0 : i32
    %c0_i32_0 = arith.constant 0 : i32
    return %c0_i32, %arg1 : i32, i32
  }
  func.func @transform_3(%arg0: i32, %arg1: i32, %arg2: i32) -> (i32, i32) {
    %c0_i32 = arith.constant 0 : i32
    %c0_i32_0 = arith.constant 0 : i32
    return %c0_i32, %arg1 : i32, i32
  }
  func.func @transform_4(%arg0: i32, %arg1: i32, %arg2: i32) -> (i32, i32) {
    %c0_i32 = arith.constant 0 : i32
    return %arg0, %arg1 : i32, i32
  }
}

module attributes {stable_mosaic.version = 11 : i64} {
  func.func @_fused_mm_kernel(%arg0: i32, %arg1: i32, %arg2: i32, %arg3: memref<16x256xbf16, #tpu.memory_space<vmem>>, %arg4: memref<256x256xbf16, #tpu.memory_space<vmem>>, %arg5: memref<1x256xf32, #tpu.memory_space<vmem>>, %arg6: memref<1x256xf32, #tpu.memory_space<vmem>>, %arg7: memref<16x256xbf16, #tpu.memory_space<vmem>>, %arg8: memref<16x256xf32, #tpu.memory_space<vmem>>) attributes {dimension_semantics = [#tpu.dimension_semantics<parallel>, #tpu.dimension_semantics<parallel>, #tpu.dimension_semantics<arbitrary>], iteration_bounds = array<i64: 1, 2, 1>, scalar_prefetch = 0 : i64, scratch_operands = 1 : i64, tpu.core_type = #tpu.core_type<tc>, window_params = [{transform_indices = @transform_0, window_bounds = array<i64: 16, 256>}, {transform_indices = @transform_1, window_bounds = array<i64: 256, 256>}, {transform_indices = @transform_2, window_bounds = array<i64: 1, 256>}, {transform_indices = @transform_3, window_bounds = array<i64: 1, 256>}, {transform_indices = @transform_4, window_bounds = array<i64: 16, 256>}]} {
    %c0_i32 = arith.constant 0 : i32
    %0 = arith.cmpi eq, %arg2, %c0_i32 : i32
    %1 = arith.extui %0 : i1 to i32
    %c0_i32_0 = arith.constant 0 : i32
    %2 = arith.cmpi ne, %1, %c0_i32_0 : i32
    scf.if %2 {
      %cst_10 = arith.constant 0.000000e+00 : f32
      %12 = vector.broadcast %cst_10 : f32 to vector<16x256xf32>
      %c0_11 = arith.constant 0 : index
      %c0_12 = arith.constant 0 : index
      %13 = vector.load %arg8[%c0_11, %c0_12] : memref<16x256xf32, #tpu.memory_space<vmem>>, vector<16x256xf32>
      tpu.vector_store %arg8[%c0_11, %c0_12], %12 {strides = array<i32>} : memref<16x256xf32, #tpu.memory_space<vmem>>, vector<16x256xf32>,
    } else {
    }
    %c0 = arith.constant 0 : index
    %c0_1 = arith.constant 0 : index
    %3 = vector.load %arg8[%c0, %c0_1] : memref<16x256xf32, #tpu.memory_space<vmem>>, vector<16x256xf32>
    %c0_2 = arith.constant 0 : index
    %c0_3 = arith.constant 0 : index
    %4 = vector.load %arg3[%c0_2, %c0_3] : memref<16x256xbf16, #tpu.memory_space<vmem>>, vector<16x256xbf16>
    %c0_4 = arith.constant 0 : index
    %c0_5 = arith.constant 0 : index
    %5 = vector.load %arg4[%c0_4, %c0_5] : memref<256x256xbf16, #tpu.memory_space<vmem>>, vector<256x256xbf16>
    %cst = arith.constant dense<0.000000e+00> : vector<16x256xf32>
    %6 = tpu.matmul %4, %5, %cst {dimension_numbers = #tpu.dot_dimension_numbers<[1], [0], [0], [1], [0, 0, 1, 1], [], []>} : vector<16x256xbf16>, vector<256x256xbf16>, vector<16x256xf32> -> vector<16x256xf32>
    %7 = arith.addf %3, %6 : vector<16x256xf32>
    %c0_6 = arith.constant 0 : index
    %c0_7 = arith.constant 0 : index
    %8 = vector.load %arg8[%c0_6, %c0_7] : memref<16x256xf32, #tpu.memory_space<vmem>>, vector<16x256xf32>
    tpu.vector_store %arg8[%c0_6, %c0_7], %7 {strides = array<i32>} : memref<16x256xf32, #tpu.memory_space<vmem>>, vector<16x256xf32>,
    %c0_i32_8 = arith.constant 0 : i32
    %9 = arith.cmpi eq, %arg2, %c0_i32_8 : i32
    %10 = arith.extui %9 : i1 to i32
    %c0_i32_9 = arith.constant 0 : i32
    %11 = arith.cmpi ne, %10, %c0_i32_9 : i32
    scf.if %11 {
      %c0_10 = arith.constant 0 : index
      %c0_11 = arith.constant 0 : index
      %12 = vector.load %arg8[%c0_10, %c0_11] : memref<16x256xf32, #tpu.memory_space<vmem>>, vector<16x256xf32>
      %c0_12 = arith.constant 0 : index
      %c0_13 = arith.constant 0 : index
      %13 = vector.load %arg5[%c0_12, %c0_13] : memref<1x256xf32, #tpu.memory_space<vmem>>, vector<1x256xf32>
      %14 = vector.broadcast %13 : vector<1x256xf32> to vector<16x256xf32>
      %15 = arith.mulf %12, %14 : vector<16x256xf32>
      %c0_14 = arith.constant 0 : index
      %c0_15 = arith.constant 0 : index
      %16 = vector.load %arg6[%c0_14, %c0_15] : memref<1x256xf32, #tpu.memory_space<vmem>>, vector<1x256xf32>
      %17 = vector.broadcast %16 : vector<1x256xf32> to vector<16x256xf32>
      %18 = arith.addf %15, %17 : vector<16x256xf32>
      %19 = arith.truncf %18 : vector<16x256xf32> to vector<16x256xbf16>
      %c0_16 = arith.constant 0 : index
      %c0_17 = arith.constant 0 : index
      %20 = vector.load %arg7[%c0_16, %c0_17] : memref<16x256xbf16, #tpu.memory_space<vmem>>, vector<16x256xbf16>
      tpu.vector_store %arg7[%c0_16, %c0_17], %19 {strides = array<i32>} : memref<16x256xbf16, #tpu.memory_space<vmem>>, vector<16x256xbf16>,
    } else {
    }
    return
  }
  func.func @transform_0(%arg0: i32, %arg1: i32, %arg2: i32) -> (i32, i32) {
    %c0_i32 = arith.constant 0 : i32
    return %arg0, %arg2 : i32, i32
  }
  func.func @transform_1(%arg0: i32, %arg1: i32, %arg2: i32) -> (i32, i32) {
    %c0_i32 = arith.constant 0 : i32
    return %arg2, %arg1 : i32, i32
  }
  func.func @transform_2(%arg0: i32, %arg1: i32, %arg2: i32) -> (i32, i32) {
    %c0_i32 = arith.constant 0 : i32
    %c0_i32_0 = arith.constant 0 : i32
    return %c0_i32, %arg1 : i32, i32
  }
  func.func @transform_3(%arg0: i32, %arg1: i32, %arg2: i32) -> (i32, i32) {
    %c0_i32 = arith.constant 0 : i32
    %c0_i32_0 = arith.constant 0 : i32
    return %c0_i32, %arg1 : i32, i32
  }
  func.func @transform_4(%arg0: i32, %arg1: i32, %arg2: i32) -> (i32, i32) {
    %c0_i32 = arith.constant 0 : i32
    return %arg0, %arg1 : i32, i32
  }
}

module attributes {stable_mosaic.version = 11 : i64} {
  func.func @_fused_mm_kernel(%arg0: i32, %arg1: i32, %arg2: i32, %arg3: memref<16x512xbf16, #tpu.memory_space<vmem>>, %arg4: memref<512x256xbf16, #tpu.memory_space<vmem>>, %arg5: memref<1x256xf32, #tpu.memory_space<vmem>>, %arg6: memref<1x256xf32, #tpu.memory_space<vmem>>, %arg7: memref<16x256xbf16, #tpu.memory_space<vmem>>, %arg8: memref<16x256xbf16, #tpu.memory_space<vmem>>, %arg9: memref<16x256xf32, #tpu.memory_space<vmem>>) attributes {dimension_semantics = [#tpu.dimension_semantics<parallel>, #tpu.dimension_semantics<parallel>, #tpu.dimension_semantics<arbitrary>], iteration_bounds = array<i64: 1, 2, 9>, scalar_prefetch = 0 : i64, scratch_operands = 1 : i64, tpu.core_type = #tpu.core_type<tc>, window_params = [{transform_indices = @transform_0, window_bounds = array<i64: 16, 512>}, {transform_indices = @transform_1, window_bounds = array<i64: 512, 256>}, {transform_indices = @transform_2, window_bounds = array<i64: 1, 256>}, {transform_indices = @transform_3, window_bounds = array<i64: 1, 256>}, {transform_indices = @transform_4, window_bounds = array<i64: 16, 256>}, {transform_indices = @transform_5, window_bounds = array<i64: 16, 256>}]} {
    %c0_i32 = arith.constant 0 : i32
    %0 = arith.cmpi eq, %arg2, %c0_i32 : i32
    %1 = arith.extui %0 : i1 to i32
    %c0_i32_0 = arith.constant 0 : i32
    %2 = arith.cmpi ne, %1, %c0_i32_0 : i32
    scf.if %2 {
      %cst_9 = arith.constant 0.000000e+00 : f32
      %12 = vector.broadcast %cst_9 : f32 to vector<16x256xf32>
      %c0_10 = arith.constant 0 : index
      %c0_11 = arith.constant 0 : index
      %13 = vector.load %arg9[%c0_10, %c0_11] : memref<16x256xf32, #tpu.memory_space<vmem>>, vector<16x256xf32>
      tpu.vector_store %arg9[%c0_10, %c0_11], %12 {strides = array<i32>} : memref<16x256xf32, #tpu.memory_space<vmem>>, vector<16x256xf32>,
    } else {
    }
    %c0 = arith.constant 0 : index
    %c0_1 = arith.constant 0 : index
    %3 = vector.load %arg9[%c0, %c0_1] : memref<16x256xf32, #tpu.memory_space<vmem>>, vector<16x256xf32>
    %c0_2 = arith.constant 0 : index
    %c0_3 = arith.constant 0 : index
    %4 = vector.load %arg3[%c0_2, %c0_3] : memref<16x512xbf16, #tpu.memory_space<vmem>>, vector<16x512xbf16>
    %c0_4 = arith.constant 0 : index
    %c0_5 = arith.constant 0 : index
    %5 = vector.load %arg4[%c0_4, %c0_5] : memref<512x256xbf16, #tpu.memory_space<vmem>>, vector<512x256xbf16>
    %cst = arith.constant dense<0.000000e+00> : vector<16x256xf32>
    %6 = tpu.matmul %4, %5, %cst {dimension_numbers = #tpu.dot_dimension_numbers<[1], [0], [0], [1], [0, 0, 1, 1], [], []>} : vector<16x512xbf16>, vector<512x256xbf16>, vector<16x256xf32> -> vector<16x256xf32>
    %7 = arith.addf %3, %6 : vector<16x256xf32>
    %c0_6 = arith.constant 0 : index
    %c0_7 = arith.constant 0 : index
    %8 = vector.load %arg9[%c0_6, %c0_7] : memref<16x256xf32, #tpu.memory_space<vmem>>, vector<16x256xf32>
    tpu.vector_store %arg9[%c0_6, %c0_7], %7 {strides = array<i32>} : memref<16x256xf32, #tpu.memory_space<vmem>>, vector<16x256xf32>,
    %c8_i32 = arith.constant 8 : i32
    %9 = arith.cmpi eq, %arg2, %c8_i32 : i32
    %10 = arith.extui %9 : i1 to i32
    %c0_i32_8 = arith.constant 0 : i32
    %11 = arith.cmpi ne, %10, %c0_i32_8 : i32
    scf.if %11 {
      %c0_9 = arith.constant 0 : index
      %c0_10 = arith.constant 0 : index
      %12 = vector.load %arg9[%c0_9, %c0_10] : memref<16x256xf32, #tpu.memory_space<vmem>>, vector<16x256xf32>
      %c0_11 = arith.constant 0 : index
      %c0_12 = arith.constant 0 : index
      %13 = vector.load %arg5[%c0_11, %c0_12] : memref<1x256xf32, #tpu.memory_space<vmem>>, vector<1x256xf32>
      %14 = vector.broadcast %13 : vector<1x256xf32> to vector<16x256xf32>
      %15 = arith.mulf %12, %14 : vector<16x256xf32>
      %c0_13 = arith.constant 0 : index
      %c0_14 = arith.constant 0 : index
      %16 = vector.load %arg6[%c0_13, %c0_14] : memref<1x256xf32, #tpu.memory_space<vmem>>, vector<1x256xf32>
      %17 = vector.broadcast %16 : vector<1x256xf32> to vector<16x256xf32>
      %18 = arith.addf %15, %17 : vector<16x256xf32>
      %c0_15 = arith.constant 0 : index
      %c0_16 = arith.constant 0 : index
      %19 = vector.load %arg7[%c0_15, %c0_16] : memref<16x256xbf16, #tpu.memory_space<vmem>>, vector<16x256xbf16>
      %20 = arith.extf %19 : vector<16x256xbf16> to vector<16x256xf32>
      %21 = arith.addf %18, %20 : vector<16x256xf32>
      %cst_17 = arith.constant 0.000000e+00 : f32
      %22 = vector.broadcast %cst_17 : f32 to vector<16x256xf32>
      %23 = arith.maximumf %21, %22 : vector<16x256xf32>
      %24 = arith.truncf %23 : vector<16x256xf32> to vector<16x256xbf16>
      %c0_18 = arith.constant 0 : index
      %c0_19 = arith.constant 0 : index
      %25 = vector.load %arg8[%c0_18, %c0_19] : memref<16x256xbf16, #tpu.memory_space<vmem>>, vector<16x256xbf16>
      tpu.vector_store %arg8[%c0_18, %c0_19], %24 {strides = array<i32>} : memref<16x256xbf16, #tpu.memory_space<vmem>>, vector<16x256xbf16>,
    } else {
    }
    return
  }
  func.func @transform_0(%arg0: i32, %arg1: i32, %arg2: i32) -> (i32, i32) {
    %c0_i32 = arith.constant 0 : i32
    return %arg0, %arg2 : i32, i32
  }
  func.func @transform_1(%arg0: i32, %arg1: i32, %arg2: i32) -> (i32, i32) {
    %c0_i32 = arith.constant 0 : i32
    return %arg2, %arg1 : i32, i32
  }
  func.func @transform_2(%arg0: i32, %arg1: i32, %arg2: i32) -> (i32, i32) {
    %c0_i32 = arith.constant 0 : i32
    %c0_i32_0 = arith.constant 0 : i32
    return %c0_i32, %arg1 : i32, i32
  }
  func.func @transform_3(%arg0: i32, %arg1: i32, %arg2: i32) -> (i32, i32) {
    %c0_i32 = arith.constant 0 : i32
    %c0_i32_0 = arith.constant 0 : i32
    return %c0_i32, %arg1 : i32, i32
  }
  func.func @transform_4(%arg0: i32, %arg1: i32, %arg2: i32) -> (i32, i32) {
    %c0_i32 = arith.constant 0 : i32
    return %arg0, %arg1 : i32, i32
  }
  func.func @transform_5(%arg0: i32, %arg1: i32, %arg2: i32) -> (i32, i32) {
    %c0_i32 = arith.constant 0 : i32
    return %arg0, %arg1 : i32, i32
  }
}

module attributes {stable_mosaic.version = 11 : i64} {
  func.func @_fused_mm_kernel(%arg0: i32, %arg1: i32, %arg2: i32, %arg3: memref<16x512xbf16, #tpu.memory_space<vmem>>, %arg4: memref<512x256xbf16, #tpu.memory_space<vmem>>, %arg5: memref<1x256xf32, #tpu.memory_space<vmem>>, %arg6: memref<1x256xf32, #tpu.memory_space<vmem>>, %arg7: memref<16x256xbf16, #tpu.memory_space<vmem>>, %arg8: memref<16x256xf32, #tpu.memory_space<vmem>>) attributes {dimension_semantics = [#tpu.dimension_semantics<parallel>, #tpu.dimension_semantics<parallel>, #tpu.dimension_semantics<arbitrary>], iteration_bounds = array<i64: 1, 2, 9>, scalar_prefetch = 0 : i64, scratch_operands = 1 : i64, tpu.core_type = #tpu.core_type<tc>, window_params = [{transform_indices = @transform_0, window_bounds = array<i64: 16, 512>}, {transform_indices = @transform_1, window_bounds = array<i64: 512, 256>}, {transform_indices = @transform_2, window_bounds = array<i64: 1, 256>}, {transform_indices = @transform_3, window_bounds = array<i64: 1, 256>}, {transform_indices = @transform_4, window_bounds = array<i64: 16, 256>}]} {
    %c0_i32 = arith.constant 0 : i32
    %0 = arith.cmpi eq, %arg2, %c0_i32 : i32
    %1 = arith.extui %0 : i1 to i32
    %c0_i32_0 = arith.constant 0 : i32
    %2 = arith.cmpi ne, %1, %c0_i32_0 : i32
    scf.if %2 {
      %cst_9 = arith.constant 0.000000e+00 : f32
      %12 = vector.broadcast %cst_9 : f32 to vector<16x256xf32>
      %c0_10 = arith.constant 0 : index
      %c0_11 = arith.constant 0 : index
      %13 = vector.load %arg8[%c0_10, %c0_11] : memref<16x256xf32, #tpu.memory_space<vmem>>, vector<16x256xf32>
      tpu.vector_store %arg8[%c0_10, %c0_11], %12 {strides = array<i32>} : memref<16x256xf32, #tpu.memory_space<vmem>>, vector<16x256xf32>,
    } else {
    }
    %c0 = arith.constant 0 : index
    %c0_1 = arith.constant 0 : index
    %3 = vector.load %arg8[%c0, %c0_1] : memref<16x256xf32, #tpu.memory_space<vmem>>, vector<16x256xf32>
    %c0_2 = arith.constant 0 : index
    %c0_3 = arith.constant 0 : index
    %4 = vector.load %arg3[%c0_2, %c0_3] : memref<16x512xbf16, #tpu.memory_space<vmem>>, vector<16x512xbf16>
    %c0_4 = arith.constant 0 : index
    %c0_5 = arith.constant 0 : index
    %5 = vector.load %arg4[%c0_4, %c0_5] : memref<512x256xbf16, #tpu.memory_space<vmem>>, vector<512x256xbf16>
    %cst = arith.constant dense<0.000000e+00> : vector<16x256xf32>
    %6 = tpu.matmul %4, %5, %cst {dimension_numbers = #tpu.dot_dimension_numbers<[1], [0], [0], [1], [0, 0, 1, 1], [], []>} : vector<16x512xbf16>, vector<512x256xbf16>, vector<16x256xf32> -> vector<16x256xf32>
    %7 = arith.addf %3, %6 : vector<16x256xf32>
    %c0_6 = arith.constant 0 : index
    %c0_7 = arith.constant 0 : index
    %8 = vector.load %arg8[%c0_6, %c0_7] : memref<16x256xf32, #tpu.memory_space<vmem>>, vector<16x256xf32>
    tpu.vector_store %arg8[%c0_6, %c0_7], %7 {strides = array<i32>} : memref<16x256xf32, #tpu.memory_space<vmem>>, vector<16x256xf32>,
    %c8_i32 = arith.constant 8 : i32
    %9 = arith.cmpi eq, %arg2, %c8_i32 : i32
    %10 = arith.extui %9 : i1 to i32
    %c0_i32_8 = arith.constant 0 : i32
    %11 = arith.cmpi ne, %10, %c0_i32_8 : i32
    scf.if %11 {
      %c0_9 = arith.constant 0 : index
      %c0_10 = arith.constant 0 : index
      %12 = vector.load %arg8[%c0_9, %c0_10] : memref<16x256xf32, #tpu.memory_space<vmem>>, vector<16x256xf32>
      %c0_11 = arith.constant 0 : index
      %c0_12 = arith.constant 0 : index
      %13 = vector.load %arg5[%c0_11, %c0_12] : memref<1x256xf32, #tpu.memory_space<vmem>>, vector<1x256xf32>
      %14 = vector.broadcast %13 : vector<1x256xf32> to vector<16x256xf32>
      %15 = arith.mulf %12, %14 : vector<16x256xf32>
      %c0_13 = arith.constant 0 : index
      %c0_14 = arith.constant 0 : index
      %16 = vector.load %arg6[%c0_13, %c0_14] : memref<1x256xf32, #tpu.memory_space<vmem>>, vector<1x256xf32>
      %17 = vector.broadcast %16 : vector<1x256xf32> to vector<16x256xf32>
      %18 = arith.addf %15, %17 : vector<16x256xf32>
      %cst_15 = arith.constant 0.000000e+00 : f32
      %19 = vector.broadcast %cst_15 : f32 to vector<16x256xf32>
      %20 = arith.maximumf %18, %19 : vector<16x256xf32>
      %21 = arith.truncf %20 : vector<16x256xf32> to vector<16x256xbf16>
      %c0_16 = arith.constant 0 : index
      %c0_17 = arith.constant 0 : index
      %22 = vector.load %arg7[%c0_16, %c0_17] : memref<16x256xbf16, #tpu.memory_space<vmem>>, vector<16x256xbf16>
      tpu.vector_store %arg7[%c0_16, %c0_17], %21 {strides = array<i32>} : memref<16x256xbf16, #tpu.memory_space<vmem>>, vector<16x256xbf16>,
    } else {
    }
    return
  }
  func.func @transform_0(%arg0: i32, %arg1: i32, %arg2: i32) -> (i32, i32) {
    %c0_i32 = arith.constant 0 : i32
    return %arg0, %arg2 : i32, i32
  }
  func.func @transform_1(%arg0: i32, %arg1: i32, %arg2: i32) -> (i32, i32) {
    %c0_i32 = arith.constant 0 : i32
    return %arg2, %arg1 : i32, i32
  }
  func.func @transform_2(%arg0: i32, %arg1: i32, %arg2: i32) -> (i32, i32) {
    %c0_i32 = arith.constant 0 : i32
    %c0_i32_0 = arith.constant 0 : i32
    return %c0_i32, %arg1 : i32, i32
  }
  func.func @transform_3(%arg0: i32, %arg1: i32, %arg2: i32) -> (i32, i32) {
    %c0_i32 = arith.constant 0 : i32
    %c0_i32_0 = arith.constant 0 : i32
    return %c0_i32, %arg1 : i32, i32
  }
  func.func @transform_4(%arg0: i32, %arg1: i32, %arg2: i32) -> (i32, i32) {
    %c0_i32 = arith.constant 0 : i32
    return %arg0, %arg1 : i32, i32
  }
}

module attributes {stable_mosaic.version = 11 : i64} {
  func.func @_fused_mm_kernel(%arg0: i32, %arg1: i32, %arg2: i32, %arg3: memref<16x512xbf16, #tpu.memory_space<vmem>>, %arg4: memref<512x128xbf16, #tpu.memory_space<vmem>>, %arg5: memref<1x128xf32, #tpu.memory_space<vmem>>, %arg6: memref<1x128xf32, #tpu.memory_space<vmem>>, %arg7: memref<16x128xf32, #tpu.memory_space<vmem>>, %arg8: memref<16x128xf32, #tpu.memory_space<vmem>>) attributes {dimension_semantics = [#tpu.dimension_semantics<parallel>, #tpu.dimension_semantics<parallel>, #tpu.dimension_semantics<arbitrary>], iteration_bounds = array<i64: 1, 1, 1>, scalar_prefetch = 0 : i64, scratch_operands = 1 : i64, tpu.core_type = #tpu.core_type<tc>, window_params = [{transform_indices = @transform_0, window_bounds = array<i64: 16, 512>}, {transform_indices = @transform_1, window_bounds = array<i64: 512, 128>}, {transform_indices = @transform_2, window_bounds = array<i64: 1, 128>}, {transform_indices = @transform_3, window_bounds = array<i64: 1, 128>}, {transform_indices = @transform_4, window_bounds = array<i64: 16, 128>}]} {
    %c0_i32 = arith.constant 0 : i32
    %0 = arith.cmpi eq, %arg2, %c0_i32 : i32
    %1 = arith.extui %0 : i1 to i32
    %c0_i32_0 = arith.constant 0 : i32
    %2 = arith.cmpi ne, %1, %c0_i32_0 : i32
    scf.if %2 {
      %cst_10 = arith.constant 0.000000e+00 : f32
      %12 = vector.broadcast %cst_10 : f32 to vector<16x128xf32>
      %c0_11 = arith.constant 0 : index
      %c0_12 = arith.constant 0 : index
      %13 = vector.load %arg8[%c0_11, %c0_12] : memref<16x128xf32, #tpu.memory_space<vmem>>, vector<16x128xf32>
      tpu.vector_store %arg8[%c0_11, %c0_12], %12 {strides = array<i32>} : memref<16x128xf32, #tpu.memory_space<vmem>>, vector<16x128xf32>,
    } else {
    }
    %c0 = arith.constant 0 : index
    %c0_1 = arith.constant 0 : index
    %3 = vector.load %arg8[%c0, %c0_1] : memref<16x128xf32, #tpu.memory_space<vmem>>, vector<16x128xf32>
    %c0_2 = arith.constant 0 : index
    %c0_3 = arith.constant 0 : index
    %4 = vector.load %arg3[%c0_2, %c0_3] : memref<16x512xbf16, #tpu.memory_space<vmem>>, vector<16x512xbf16>
    %c0_4 = arith.constant 0 : index
    %c0_5 = arith.constant 0 : index
    %5 = vector.load %arg4[%c0_4, %c0_5] : memref<512x128xbf16, #tpu.memory_space<vmem>>, vector<512x128xbf16>
    %cst = arith.constant dense<0.000000e+00> : vector<16x128xf32>
    %6 = tpu.matmul %4, %5, %cst {dimension_numbers = #tpu.dot_dimension_numbers<[1], [0], [0], [1], [0, 0, 1, 1], [], []>} : vector<16x512xbf16>, vector<512x128xbf16>, vector<16x128xf32> -> vector<16x128xf32>
    %7 = arith.addf %3, %6 : vector<16x128xf32>
    %c0_6 = arith.constant 0 : index
    %c0_7 = arith.constant 0 : index
    %8 = vector.load %arg8[%c0_6, %c0_7] : memref<16x128xf32, #tpu.memory_space<vmem>>, vector<16x128xf32>
    tpu.vector_store %arg8[%c0_6, %c0_7], %7 {strides = array<i32>} : memref<16x128xf32, #tpu.memory_space<vmem>>, vector<16x128xf32>,
    %c0_i32_8 = arith.constant 0 : i32
    %9 = arith.cmpi eq, %arg2, %c0_i32_8 : i32
    %10 = arith.extui %9 : i1 to i32
    %c0_i32_9 = arith.constant 0 : i32
    %11 = arith.cmpi ne, %10, %c0_i32_9 : i32
    scf.if %11 {
      %c0_10 = arith.constant 0 : index
      %c0_11 = arith.constant 0 : index
      %12 = vector.load %arg8[%c0_10, %c0_11] : memref<16x128xf32, #tpu.memory_space<vmem>>, vector<16x128xf32>
      %c0_12 = arith.constant 0 : index
      %c0_13 = arith.constant 0 : index
      %13 = vector.load %arg5[%c0_12, %c0_13] : memref<1x128xf32, #tpu.memory_space<vmem>>, vector<1x128xf32>
      %14 = vector.broadcast %13 : vector<1x128xf32> to vector<16x128xf32>
      %15 = arith.mulf %12, %14 : vector<16x128xf32>
      %c0_14 = arith.constant 0 : index
      %c0_15 = arith.constant 0 : index
      %16 = vector.load %arg6[%c0_14, %c0_15] : memref<1x128xf32, #tpu.memory_space<vmem>>, vector<1x128xf32>
      %17 = vector.broadcast %16 : vector<1x128xf32> to vector<16x128xf32>
      %18 = arith.addf %15, %17 : vector<16x128xf32>
      %c0_16 = arith.constant 0 : index
      %c0_17 = arith.constant 0 : index
      %19 = vector.load %arg7[%c0_16, %c0_17] : memref<16x128xf32, #tpu.memory_space<vmem>>, vector<16x128xf32>
      tpu.vector_store %arg7[%c0_16, %c0_17], %18 {strides = array<i32>} : memref<16x128xf32, #tpu.memory_space<vmem>>, vector<16x128xf32>,
    } else {
    }
    return
  }
  func.func @transform_0(%arg0: i32, %arg1: i32, %arg2: i32) -> (i32, i32) {
    %c0_i32 = arith.constant 0 : i32
    return %arg0, %arg2 : i32, i32
  }
  func.func @transform_1(%arg0: i32, %arg1: i32, %arg2: i32) -> (i32, i32) {
    %c0_i32 = arith.constant 0 : i32
    return %arg2, %arg1 : i32, i32
  }
  func.func @transform_2(%arg0: i32, %arg1: i32, %arg2: i32) -> (i32, i32) {
    %c0_i32 = arith.constant 0 : i32
    %c0_i32_0 = arith.constant 0 : i32
    return %c0_i32, %arg1 : i32, i32
  }
  func.func @transform_3(%arg0: i32, %arg1: i32, %arg2: i32) -> (i32, i32) {
    %c0_i32 = arith.constant 0 : i32
    %c0_i32_0 = arith.constant 0 : i32
    return %c0_i32, %arg1 : i32, i32
  }
  func.func @transform_4(%arg0: i32, %arg1: i32, %arg2: i32) -> (i32, i32) {
    %c0_i32 = arith.constant 0 : i32
    return %arg0, %arg1 : i32, i32
  }
}

</mosaic_0001>

<bundles_post_ra>
// kernel: mnist_resnet_forward.22
= control target key start
LH: loop header
LB: loop body
LE: loop exit
PB: predicated region body
PF: predicated region fallthrough
CT: control target
= control target key end

     0   :  { %s1843_s15 = smov 0   ;;  %s1845_s16 = smov 0   ;;  %s2054_s0 = inlined_call_operand.vmem [shape: bf16[512,256], index: 0, kind: input, shape index: {}]   ;;  %s2055_s1 = inlined_call_operand.vmem [shape: bf16[256,128], index: 1, kind: input, shape index: {}]   ;;  %s2056_s2 = inlined_call_operand.vmem [shape: f32[1,128], index: 2, kind: input, shape index: {}]   ;;  %s2057_s3 = inlined_call_operand.vmem [shape: f32[1,128], index: 3, kind: input, shape index: {}]   ;;  %s2058_s4 = inlined_call_operand.vmem [shape: bf16[512,128], index: 4, kind: output, shape index: {}]  }
   0x1   :  { %s1847_s17 = smov 0  }
   0x2 LB: > { %s33_s18 = sadd.s32 1, %s1812_s16  ;;  %p1360_p0 = scmp.ge.s32.totalorder %s1816_s17, 1  ;;  %s1816_s17 = sphi %s1847_s17, %s14_s17   ;;  %s1812_s16 = sphi %s1845_s16, %s2060_s16   ;;  %s1808_s15 = sphi %s1843_s15, %s2059_s15  }
   0x3   : > { %p35_p1 = scmp.ge.s32.totalorder %s33_s18, 2  ;;  %p224_p2 = scmp.lt.s32.totalorder %s1816_s17, 3 }
   0x5   : > { %s2062_s18 = smov (%p35_p1, %s33_s18), 0  ;;  %p225_p3 = pnand %p1360_p0, %p224_p2 }
   0x6   : > { %v1730_v0 = vld [vmem:[%s2055_s1 + $0x40] sm:$0xff] (!%p225_p3)   ;;  %s1361_s21 = sshll.u32 (!%p225_p3), %s1808_s15, 5  ;;  %v1732_v2 = vld [vmem:[%s2055_s1 + $0x48] sm:$0xff] (!%p225_p3)   ;;  %v1734_v4 = vld [vmem:[%s2055_s1 + $0x50] sm:$0xff] (!%p225_p3)  }
   0x7   : > { %228 = sbr.rel (%p225_p3) target bundleno = 322 (0x142), region = 36  ;;  %v1731_v1 = vld [vmem:[%s2055_s1] sm:$0xff] (!%p225_p3)   ;;  %1578 = vmatprep.subr.bf16.mxu0 (!%p225_p3), %v1730_v0  ;;  %1690 = vmatprep.subr.bf16.mxu1 (!%p225_p3), %v1730_v0  ;;  %v1733_v3 = vld [vmem:[%s2055_s1 + $0x8] sm:$0xff] (!%p225_p3)   ;;  %p274_p4 = scmp.lt.s32.totalorder (!%p225_p3), %s1361_s21, 63  ;;  %v1735_v5 = vld [vmem:[%s2055_s1 + $0x10] sm:$0xff] (!%p225_p3)  }
   0x8   : > { %1579 = vmatpush3.bf16.msra.mxu0 (!%p225_p3), %v1731_v1  ;;  %1698 = vmatpush3.bf16.msra.mxu1 (!%p225_p3), %v1731_v1  ;;  %v1736_v6 = vld [vmem:[%s2055_s1 + $0x58] sm:$0xff] (!%p225_p3)   ;;  %v1738_v8 = vld [vmem:[%s2055_s1 + $0x60] sm:$0xff] (!%p225_p3)   ;;  %v1740_v10 = vld [vmem:[%s2055_s1 + $0x68] sm:$0xff] (!%p225_p3)  }
   0x9   : > { %1580 = vmatprep.subr.bf16.mxu0 (!%p225_p3), %v1732_v2  ;;  %1691 = vmatprep.subr.bf16.mxu1 (!%p225_p3), %v1732_v2  ;;  %v1737_v7 = vld [vmem:[%s2055_s1 + $0x18] sm:$0xff] (!%p225_p3)   ;;  %v1739_v9 = vld [vmem:[%s2055_s1 + $0x20] sm:$0xff] (!%p225_p3)   ;;  %v1741_v13 = vld [vmem:[%s2055_s1 + $0x28] sm:$0xff] (!%p225_p3)  }
   0xa   : > { %v1742_v14 = vld [vmem:[%s2055_s1 + $0x70] sm:$0xff] (!%p225_p3)   ;;  %v1744_v16 = vld [vmem:[%s2055_s1 + $0x78] sm:$0xff] (!%p225_p3)   ;;  %v1952_v51 = vld [vmem:[%s2056_s2] ss:$0 sm:$0xff] (!%p225_p3) }
   0xb   : > { %v1743_v15 = vld [vmem:[%s2055_s1 + $0x30] sm:$0xff] (!%p225_p3)   ;;  %v1745_v17 = vld [vmem:[%s2055_s1 + $0x38] sm:$0xff] (!%p225_p3)   ;;  %v1957_v57 = vld [vmem:[%s2057_s3] ss:$0 sm:$0xff] (!%p225_p3) }
   0xc   : > { %1581 = vmatpush3.bf16.msra.mxu0 (!%p225_p3), %v1733_v3  ;;  %1699 = vmatpush3.bf16.msra.mxu1 (!%p225_p3), %v1733_v3 }
   0xd   : > { %1582 = vmatprep.subr.bf16.mxu0 (!%p225_p3), %v1734_v4  ;;  %1692 = vmatprep.subr.bf16.mxu1 (!%p225_p3), %v1734_v4 }
   0xe   : > { %s2064_s21 = smov (!%p274_p4, %s1361_s21), 63 }
   0xf   : > { %s1450_s10 = sshll.u32 %s2064_s21, 3  ;;  %s1365_s12 = sshll.u32 %s2064_s21, 2 }
  0x10   : > { %1583 = vmatpush3.bf16.msra.mxu0 %v1735_v5  ;;  %1700 = vmatpush3.bf16.msra.mxu1 %v1735_v5  ;;  %s1894_s15 = scalar_lea.vmem %s2054_s0, %s1450_s10  ;;  %s1971_s21 = scalar_lea.vmem %s2058_s4, %s1365_s12 }
  0x11   : > { %1584 = vmatprep.subr.bf16.mxu0 %v1736_v6  ;;  %1693 = vmatprep.subr.bf16.mxu1 %v1736_v6  ;;  %v1748_v11 = vld [vmem:[%s1894_s15 + $0x4] ss:$8 sps:$4 sm:$0xff]   ;;  %v1746_v18 = vld [vmem:[%s1894_s15] ss:$8 sps:$4 sm:$0xff]   ;;  %v1752_v20 = vld [vmem:[%s1894_s15 + $0x14] ss:$8 sps:$4 sm:$0xff]  }
  0x12   : > { %v1751_v12 = vld [vmem:[%s1894_s15 + $0x84] ss:$8 sps:$4 sm:$0xff]   ;;  %729 = vmatprep.mubr.bf16.mxu0 %v1748_v11  ;;  %v1749_v19 = vld [vmem:[%s1894_s15 + $0x80] ss:$8 sps:$4 sm:$0xff]   ;;  %v1754_v21 = vld [vmem:[%s1894_s15 + $0x94] ss:$8 sps:$4 sm:$0xff]  }
  0x13   : > { %793 = vmatprep.mubr.bf16.mxu1 %v1751_v12  ;;  %v1756_v22 = vld [vmem:[%s1894_s15 + $0x10] ss:$8 sps:$4 sm:$0xff]   ;;  %v1758_v24 = vld [vmem:[%s1894_s15 + $0x24] ss:$8 sps:$4 sm:$0xff]   ;;  %v1762_v26 = vld [vmem:[%s1894_s15 + $0x20] ss:$8 sps:$4 sm:$0xff]  }
  0x14   : > { %1585 = vmatpush3.bf16.msra.mxu0 %v1737_v7  ;;  %1701 = vmatpush3.bf16.msra.mxu1 %v1737_v7  ;;  %v1757_v23 = vld [vmem:[%s1894_s15 + $0x90] ss:$8 sps:$4 sm:$0xff]   ;;  %v1760_v25 = vld [vmem:[%s1894_s15 + $0xa4] ss:$8 sps:$4 sm:$0xff]   ;;  %v1763_v27 = vld [vmem:[%s1894_s15 + $0xa0] ss:$8 sps:$4 sm:$0xff]  }
  0x15   : > { %1586 = vmatprep.subr.bf16.mxu0 %v1738_v8  ;;  %1694 = vmatprep.subr.bf16.mxu1 %v1738_v8  ;;  %v1764_v28 = vld [vmem:[%s1894_s15 + $0x34] ss:$8 sps:$4 sm:$0xff]   ;;  %v1768_v30 = vld [vmem:[%s1894_s15 + $0x30] ss:$8 sps:$4 sm:$0xff]   ;;  %v1770_v32 = vld [vmem:[%s1894_s15 + $0x44] ss:$8 sps:$4 sm:$0xff]  }
  0x16   : > { %v1766_v29 = vld [vmem:[%s1894_s15 + $0xb4] ss:$8 sps:$4 sm:$0xff]   ;;  %v1769_v31 = vld [vmem:[%s1894_s15 + $0xb0] ss:$8 sps:$4 sm:$0xff]   ;;  %v1772_v33 = vld [vmem:[%s1894_s15 + $0xc4] ss:$8 sps:$4 sm:$0xff]  }
  0x17   : > { %v1774_v34 = vld [vmem:[%s1894_s15 + $0x40] ss:$8 sps:$4 sm:$0xff]   ;;  %v1776_v36 = vld [vmem:[%s1894_s15 + $0x54] ss:$8 sps:$4 sm:$0xff]   ;;  %v1780_v38 = vld [vmem:[%s1894_s15 + $0x50] ss:$8 sps:$4 sm:$0xff]  }
  0x18   : > { %1587 = vmatpush3.bf16.msra.mxu0 %v1739_v9  ;;  %1702 = vmatpush3.bf16.msra.mxu1 %v1739_v9  ;;  %v1775_v35 = vld [vmem:[%s1894_s15 + $0xc0] ss:$8 sps:$4 sm:$0xff]   ;;  %v1778_v37 = vld [vmem:[%s1894_s15 + $0xd4] ss:$8 sps:$4 sm:$0xff]   ;;  %v1781_v39 = vld [vmem:[%s1894_s15 + $0xd0] ss:$8 sps:$4 sm:$0xff]  }
  0x19   : > { %1588 = vmatprep.subr.bf16.mxu0 %v1740_v10  ;;  %1695 = vmatprep.subr.bf16.mxu1 %v1740_v10  ;;  %v1782_v40 = vld [vmem:[%s1894_s15 + $0x64] ss:$8 sps:$4 sm:$0xff]   ;;  %v1786_v42 = vld [vmem:[%s1894_s15 + $0x60] ss:$8 sps:$4 sm:$0xff]   ;;  %v1788_v44 = vld [vmem:[%s1894_s15 + $0x74] ss:$8 sps:$4 sm:$0xff]  }
  0x1a   : > { %v1784_v41 = vld [vmem:[%s1894_s15 + $0xe4] ss:$8 sps:$4 sm:$0xff]   ;;  %v1787_v43 = vld [vmem:[%s1894_s15 + $0xe0] ss:$8 sps:$4 sm:$0xff]   ;;  %v1790_v45 = vld [vmem:[%s1894_s15 + $0xf4] ss:$8 sps:$4 sm:$0xff]  }
  0x1b   : > { %v1792_v46 = vld [vmem:[%s1894_s15 + $0x70] ss:$8 sps:$4 sm:$0xff]  }
  0x1c   : > { %1589 = vmatpush3.bf16.msra.mxu0 %v1741_v13  ;;  %1703 = vmatpush3.bf16.msra.mxu1 %v1741_v13  ;;  %v1793_v47 = vld [vmem:[%s1894_s15 + $0xf0] ss:$8 sps:$4 sm:$0xff]  }
  0x1d   : > { %1590 = vmatprep.subr.bf16.mxu0 %v1742_v14  ;;  %1696 = vmatprep.subr.bf16.mxu1 %v1742_v14 }
  0x20   : > { %1591 = vmatpush3.bf16.msra.mxu0 %v1743_v15  ;;  %1704 = vmatpush3.bf16.msra.mxu1 %v1743_v15 }
  0x21   : > { %1592 = vmatprep.subr.bf16.mxu0 %v1744_v16  ;;  %1697 = vmatprep.subr.bf16.mxu1 %v1744_v16 }
  0x24   : > { %1593 = vmatpush3.bf16.msra.mxu0 %v1745_v17  ;;  %1705 = vmatpush3.bf16.msra.mxu1 %v1745_v17 }
  0x27   : > { %730 = vmatmul.mubr.bf16.vlgmr.msra.gmra.mrb[0].mxu0 %v1746_v18  ;;  %794 = vmatmul.mubr.bf16.vlgmr.msra.gmra.mrb[0].mxu1 %v1749_v19 }
  0x28   : > { %737 = vmatprep.mubr.bf16.mxu0 %v1752_v20  ;;  %801 = vmatprep.mubr.bf16.mxu1 %v1754_v21 }
  0x2f   : > { %738 = vmatmul.mubr.bf16.gmra.mrb[4].mxu0 %v1756_v22  ;;  %802 = vmatmul.mubr.bf16.gmra.mrb[4].mxu1 %v1757_v23 }
  0x30   : > { %745 = vmatprep.mubr.bf16.mxu0 %v1758_v24  ;;  %809 = vmatprep.mubr.bf16.mxu1 %v1760_v25 }
  0x37   : > { %746 = vmatmul.mubr.bf16.gmra.mrb[8].mxu0 %v1762_v26  ;;  %810 = vmatmul.mubr.bf16.gmra.mrb[8].mxu1 %v1763_v27 }
  0x38   : > { %753 = vmatprep.mubr.bf16.mxu0 %v1764_v28  ;;  %817 = vmatprep.mubr.bf16.mxu1 %v1766_v29 }
  0x3f   : > { %754 = vmatmul.mubr.bf16.gmra.mrb[12].mxu0 %v1768_v30  ;;  %818 = vmatmul.mubr.bf16.gmra.mrb[12].mxu1 %v1769_v31 }
  0x40   : > { %761 = vmatprep.mubr.bf16.mxu0 %v1770_v32  ;;  %825 = vmatprep.mubr.bf16.mxu1 %v1772_v33 }
  0x47   : > { %762 = vmatmul.mubr.bf16.gmra.mrb[16].mxu0 %v1774_v34  ;;  %826 = vmatmul.mubr.bf16.gmra.mrb[16].mxu1 %v1775_v35 }
  0x48   : > { %769 = vmatprep.mubr.bf16.mxu0 %v1776_v36  ;;  %833 = vmatprep.mubr.bf16.mxu1 %v1778_v37 }
  0x4f   : > { %770 = vmatmul.mubr.bf16.gmra.mrb[20].mxu0 %v1780_v38  ;;  %834 = vmatmul.mubr.bf16.gmra.mrb[20].mxu1 %v1781_v39 }
  0x50   : > { %777 = vmatprep.mubr.bf16.mxu0 %v1782_v40  ;;  %841 = vmatprep.mubr.bf16.mxu1 %v1784_v41 }
  0x57   : > { %778 = vmatmul.mubr.bf16.gmra.mrb[24].mxu0 %v1786_v42  ;;  %842 = vmatmul.mubr.bf16.gmra.mrb[24].mxu1 %v1787_v43 }
  0x58   : > { %785 = vmatprep.mubr.bf16.mxu0 %v1788_v44  ;;  %849 = vmatprep.mubr.bf16.mxu1 %v1790_v45 }
  0x5f   : > { %786 = vmatmul.mubr.bf16.gmra.mrb[28].mxu0 %v1792_v46  ;;  %850 = vmatmul.mubr.bf16.gmra.mrb[28].mxu1 %v1793_v47 }
  0xfa   : > { %v1594_v48 = vpop.f32.mrb[0].mxu0  ;;  %v1642_v49 = vpop.f32.mrb[0].mxu1 }
  0xfb   : > { %v1595_v50 = vpop.f32.mrb[1].mxu0  ;;  %v1643_v52 = vpop.f32.mrb[1].mxu1 }
  0xfc   : > { %v1596_v53 = vadd.f32 %v1595_v50, %v1594_v48  ;;  %v1644_v54 = vadd.f32 %v1643_v52, %v1642_v49  ;;  %v1597_v55 = vpop.f32.mrb[2].mxu0  ;;  %v1645_v56 = vpop.f32.mrb[2].mxu1 }
  0xfd   : > { %v1598_v58 = vpop.f32.mrb[3].mxu0  ;;  %v1646_v59 = vpop.f32.mrb[3].mxu1 }
  0xfe   : > { %v964_v60 = vmul.f32 %v1596_v53, %v1952_v51  ;;  %v980_v61 = vmul.f32 %v1644_v54, %v1952_v51  ;;  %v1599_v62 = vadd.f32 %v1598_v58, %v1597_v55  ;;  %v1647_v63 = vadd.f32 %v1646_v59, %v1645_v56 }
 0x100   : > { %v1003_v0 = vadd.f32 %v1957_v57, %v964_v60  ;;  %v1019_v1 = vadd.f32 %v1957_v57, %v980_v61  ;;  %v965_v2 = vmul.f32 %v1599_v62, %v1952_v51  ;;  %v981_v3 = vmul.f32 %v1647_v63, %v1952_v51 }
 0x102   : > { %v1004_v4 = vadd.f32 %v1957_v57, %v965_v2  ;;  %v1020_v5 = vadd.f32 %v1957_v57, %v981_v3  ;;  %v1600_v6 = vpop.f32.mrb[4].mxu0  ;;  %v1648_v7 = vpop.f32.mrb[4].mxu1  ;;  %v1035_v8 = vmax.f32 %v1003_v0, 0.0  ;;  %v1051_v9 = vmax.f32 %v1019_v1, 0.0 }
 0x103   : > { %v1601_v10 = vpop.f32.mrb[5].mxu0  ;;  %v1649_v11 = vpop.f32.mrb[5].mxu1 }
 0x104   : > { %v1036_v12 = vmax.f32 %v1004_v4, 0.0  ;;  %v1052_v13 = vmax.f32 %v1020_v5, 0.0  ;;  %v1602_v14 = vadd.f32 %v1601_v10, %v1600_v6  ;;  %v1650_v15 = vadd.f32 %v1649_v11, %v1648_v7  ;;  %v1603_v16 = vpop.f32.mrb[6].mxu0  ;;  %v1651_v17 = vpop.f32.mrb[6].mxu1 }
 0x105   : > { %v1604_v18 = vpop.f32.mrb[7].mxu0  ;;  %v1652_v19 = vpop.f32.mrb[7].mxu1 }
 0x106   : > { %v1486_v20 = vpack.c.bf16 %v1036_v12, %v1035_v8  ;;  %v1526_v21 = vpack.c.bf16 %v1052_v13, %v1051_v9  ;;  %v966_v22 = vmul.f32 %v1602_v14, %v1952_v51  ;;  %v982_v23 = vmul.f32 %v1650_v15, %v1952_v51 }
 0x107   : > { %v1605_v24 = vadd.f32 %v1604_v18, %v1603_v16  ;;  %v1653_v25 = vadd.f32 %v1652_v19, %v1651_v17 }
 0x108   : > { %1487 = vst [vmem:[%s1971_s21] sm:$0xff] %v1486_v20   ;;  %1570 = vst [vmem:[%s1971_s21 + $0x40] sm:$0xff] %v1526_v21   ;;  %v1005_v26 = vadd.f32 %v1957_v57, %v966_v22  ;;  %v1021_v27 = vadd.f32 %v1957_v57, %v982_v23 }
 0x109   : > { %v967_v28 = vmul.f32 %v1605_v24, %v1952_v51  ;;  %v983_v29 = vmul.f32 %v1653_v25, %v1952_v51 }
 0x10a   : > { %v1606_v30 = vpop.f32.mrb[8].mxu0  ;;  %v1654_v31 = vpop.f32.mrb[8].mxu1  ;;  %v1037_v40 = vmax.f32 %v1005_v26, 0.0  ;;  %v1053_v41 = vmax.f32 %v1021_v27, 0.0 }
 0x10b   : > { %v1006_v32 = vadd.f32 %v1957_v57, %v967_v28  ;;  %v1022_v33 = vadd.f32 %v1957_v57, %v983_v29  ;;  %v1607_v34 = vpop.f32.mrb[9].mxu0  ;;  %v1655_v35 = vpop.f32.mrb[9].mxu1 }
 0x10c   : > { %v1608_v36 = vadd.f32 %v1607_v34, %v1606_v30  ;;  %v1656_v37 = vadd.f32 %v1655_v35, %v1654_v31  ;;  %v1609_v38 = vpop.f32.mrb[10].mxu0  ;;  %v1657_v39 = vpop.f32.mrb[10].mxu1 }
 0x10d   : > { %v1038_v42 = vmax.f32 %v1006_v32, 0.0  ;;  %v1054_v43 = vmax.f32 %v1022_v33, 0.0  ;;  %v1610_v44 = vpop.f32.mrb[11].mxu0  ;;  %v1658_v45 = vpop.f32.mrb[11].mxu1 }
 0x10e   : > { %v968_v46 = vmul.f32 %v1608_v36, %v1952_v51  ;;  %v984_v47 = vmul.f32 %v1656_v37, %v1952_v51  ;;  %v1611_v48 = vadd.f32 %v1610_v44, %v1609_v38  ;;  %v1659_v49 = vadd.f32 %v1658_v45, %v1657_v39 }
 0x10f   : > { %v1491_v50 = vpack.c.bf16 %v1038_v42, %v1037_v40  ;;  %v1531_v52 = vpack.c.bf16 %v1054_v43, %v1053_v41 }
 0x110   : > { %v1007_v53 = vadd.f32 %v1957_v57, %v968_v46  ;;  %v1023_v54 = vadd.f32 %v1957_v57, %v984_v47  ;;  %v969_v55 = vmul.f32 %v1611_v48, %v1952_v51  ;;  %v985_v56 = vmul.f32 %v1659_v49, %v1952_v51 }
 0x111   : > { %1563 = vst [vmem:[%s1971_s21 + $0x8] sm:$0xff] %v1491_v50   ;;  %1571 = vst [vmem:[%s1971_s21 + $0x48] sm:$0xff] %v1531_v52  }
 0x112   : > { %v1008_v58 = vadd.f32 %v1957_v57, %v969_v55  ;;  %v1024_v59 = vadd.f32 %v1957_v57, %v985_v56  ;;  %v1612_v60 = vpop.f32.mrb[12].mxu0  ;;  %v1660_v61 = vpop.f32.mrb[12].mxu1  ;;  %v1039_v62 = vmax.f32 %v1007_v53, 0.0  ;;  %v1055_v63 = vmax.f32 %v1023_v54, 0.0 }
 0x113   : > { %v1613_v0 = vpop.f32.mrb[13].mxu0  ;;  %v1661_v1 = vpop.f32.mrb[13].mxu1 }
 0x114   : > { %v1040_v2 = vmax.f32 %v1008_v58, 0.0  ;;  %v1056_v3 = vmax.f32 %v1024_v59, 0.0  ;;  %v1614_v4 = vadd.f32 %v1613_v0, %v1612_v60  ;;  %v1662_v5 = vadd.f32 %v1661_v1, %v1660_v61  ;;  %v1615_v6 = vpop.f32.mrb[14].mxu0  ;;  %v1663_v7 = vpop.f32.mrb[14].mxu1 }
 0x115   : > { %v1616_v8 = vpop.f32.mrb[15].mxu0  ;;  %v1664_v9 = vpop.f32.mrb[15].mxu1 }
 0x116   : > { %v1496_v10 = vpack.c.bf16 %v1040_v2, %v1039_v62  ;;  %v1536_v11 = vpack.c.bf16 %v1056_v3, %v1055_v63  ;;  %v970_v12 = vmul.f32 %v1614_v4, %v1952_v51  ;;  %v986_v13 = vmul.f32 %v1662_v5, %v1952_v51 }
 0x117   : > { %v1617_v14 = vadd.f32 %v1616_v8, %v1615_v6  ;;  %v1665_v15 = vadd.f32 %v1664_v9, %v1663_v7 }
 0x118   : > { %1564 = vst [vmem:[%s1971_s21 + $0x10] sm:$0xff] %v1496_v10   ;;  %1572 = vst [vmem:[%s1971_s21 + $0x50] sm:$0xff] %v1536_v11   ;;  %v1009_v16 = vadd.f32 %v1957_v57, %v970_v12  ;;  %v1025_v17 = vadd.f32 %v1957_v57, %v986_v13 }
 0x119   : > { %v971_v18 = vmul.f32 %v1617_v14, %v1952_v51  ;;  %v987_v19 = vmul.f32 %v1665_v15, %v1952_v51 }
 0x11a   : > { %v1618_v20 = vpop.f32.mrb[16].mxu0  ;;  %v1666_v21 = vpop.f32.mrb[16].mxu1  ;;  %v1041_v30 = vmax.f32 %v1009_v16, 0.0  ;;  %v1057_v31 = vmax.f32 %v1025_v17, 0.0 }
 0x11b   : > { %v1010_v22 = vadd.f32 %v1957_v57, %v971_v18  ;;  %v1026_v23 = vadd.f32 %v1957_v57, %v987_v19  ;;  %v1619_v24 = vpop.f32.mrb[17].mxu0  ;;  %v1667_v25 = vpop.f32.mrb[17].mxu1 }
 0x11c   : > { %v1620_v26 = vadd.f32 %v1619_v24, %v1618_v20  ;;  %v1668_v27 = vadd.f32 %v1667_v25, %v1666_v21  ;;  %v1621_v28 = vpop.f32.mrb[18].mxu0  ;;  %v1669_v29 = vpop.f32.mrb[18].mxu1 }
 0x11d   : > { %v1042_v32 = vmax.f32 %v1010_v22, 0.0  ;;  %v1058_v33 = vmax.f32 %v1026_v23, 0.0  ;;  %v1622_v34 = vpop.f32.mrb[19].mxu0  ;;  %v1670_v35 = vpop.f32.mrb[19].mxu1 }
 0x11e   : > { %v972_v36 = vmul.f32 %v1620_v26, %v1952_v51  ;;  %v988_v37 = vmul.f32 %v1668_v27, %v1952_v51  ;;  %v1623_v38 = vadd.f32 %v1622_v34, %v1621_v28  ;;  %v1671_v39 = vadd.f32 %v1670_v35, %v1669_v29 }
 0x11f   : > { %v1501_v40 = vpack.c.bf16 %v1042_v32, %v1041_v30  ;;  %v1541_v41 = vpack.c.bf16 %v1058_v33, %v1057_v31 }
 0x120   : > { %v1011_v42 = vadd.f32 %v1957_v57, %v972_v36  ;;  %v1027_v43 = vadd.f32 %v1957_v57, %v988_v37  ;;  %v973_v44 = vmul.f32 %v1623_v38, %v1952_v51  ;;  %v989_v45 = vmul.f32 %v1671_v39, %v1952_v51 }
 0x121   : > { %1565 = vst [vmem:[%s1971_s21 + $0x18] sm:$0xff] %v1501_v40   ;;  %1573 = vst [vmem:[%s1971_s21 + $0x58] sm:$0xff] %v1541_v41  }
 0x122   : > { %v1012_v46 = vadd.f32 %v1957_v57, %v973_v44  ;;  %v1028_v47 = vadd.f32 %v1957_v57, %v989_v45  ;;  %v1624_v48 = vpop.f32.mrb[20].mxu0  ;;  %v1672_v49 = vpop.f32.mrb[20].mxu1  ;;  %v1043_v50 = vmax.f32 %v1011_v42, 0.0  ;;  %v1059_v52 = vmax.f32 %v1027_v43, 0.0 }
 0x123   : > { %v1625_v53 = vpop.f32.mrb[21].mxu0  ;;  %v1673_v54 = vpop.f32.mrb[21].mxu1 }
 0x124   : > { %v1044_v55 = vmax.f32 %v1012_v46, 0.0  ;;  %v1060_v56 = vmax.f32 %v1028_v47, 0.0  ;;  %v1626_v58 = vadd.f32 %v1625_v53, %v1624_v48  ;;  %v1674_v59 = vadd.f32 %v1673_v54, %v1672_v49  ;;  %v1627_v60 = vpop.f32.mrb[22].mxu0  ;;  %v1675_v61 = vpop.f32.mrb[22].mxu1 }
 0x125   : > { %v1628_v62 = vpop.f32.mrb[23].mxu0  ;;  %v1676_v63 = vpop.f32.mrb[23].mxu1 }
 0x126   : > { %v1506_v0 = vpack.c.bf16 %v1044_v55, %v1043_v50  ;;  %v1546_v1 = vpack.c.bf16 %v1060_v56, %v1059_v52  ;;  %v974_v2 = vmul.f32 %v1626_v58, %v1952_v51  ;;  %v990_v3 = vmul.f32 %v1674_v59, %v1952_v51 }
 0x127   : > { %v1629_v4 = vadd.f32 %v1628_v62, %v1627_v60  ;;  %v1677_v5 = vadd.f32 %v1676_v63, %v1675_v61 }
 0x128   : > { %1566 = vst [vmem:[%s1971_s21 + $0x20] sm:$0xff] %v1506_v0   ;;  %1574 = vst [vmem:[%s1971_s21 + $0x60] sm:$0xff] %v1546_v1   ;;  %v1013_v6 = vadd.f32 %v1957_v57, %v974_v2  ;;  %v1029_v7 = vadd.f32 %v1957_v57, %v990_v3 }
 0x129   : > { %v975_v8 = vmul.f32 %v1629_v4, %v1952_v51  ;;  %v991_v9 = vmul.f32 %v1677_v5, %v1952_v51 }
 0x12a   : > { %v1630_v10 = vpop.f32.mrb[24].mxu0  ;;  %v1678_v11 = vpop.f32.mrb[24].mxu1  ;;  %v1045_v20 = vmax.f32 %v1013_v6, 0.0  ;;  %v1061_v21 = vmax.f32 %v1029_v7, 0.0 }
 0x12b   : > { %v1014_v12 = vadd.f32 %v1957_v57, %v975_v8  ;;  %v1030_v13 = vadd.f32 %v1957_v57, %v991_v9  ;;  %v1631_v14 = vpop.f32.mrb[25].mxu0  ;;  %v1679_v15 = vpop.f32.mrb[25].mxu1 }
 0x12c   : > { %v1632_v16 = vadd.f32 %v1631_v14, %v1630_v10  ;;  %v1680_v17 = vadd.f32 %v1679_v15, %v1678_v11  ;;  %v1633_v18 = vpop.f32.mrb[26].mxu0  ;;  %v1681_v19 = vpop.f32.mrb[26].mxu1 }
 0x12d   : > { %v1046_v22 = vmax.f32 %v1014_v12, 0.0  ;;  %v1062_v23 = vmax.f32 %v1030_v13, 0.0  ;;  %v1634_v24 = vpop.f32.mrb[27].mxu0  ;;  %v1682_v25 = vpop.f32.mrb[27].mxu1 }
 0x12e   : > { %v976_v26 = vmul.f32 %v1632_v16, %v1952_v51  ;;  %v992_v27 = vmul.f32 %v1680_v17, %v1952_v51  ;;  %v1635_v28 = vadd.f32 %v1634_v24, %v1633_v18  ;;  %v1683_v29 = vadd.f32 %v1682_v25, %v1681_v19 }
 0x12f   : > { %v1511_v30 = vpack.c.bf16 %v1046_v22, %v1045_v20  ;;  %v1551_v31 = vpack.c.bf16 %v1062_v23, %v1061_v21 }
 0x130   : > { %v1015_v32 = vadd.f32 %v1957_v57, %v976_v26  ;;  %v1031_v33 = vadd.f32 %v1957_v57, %v992_v27  ;;  %v977_v34 = vmul.f32 %v1635_v28, %v1952_v51  ;;  %v993_v35 = vmul.f32 %v1683_v29, %v1952_v51 }
 0x131   : > { %1567 = vst [vmem:[%s1971_s21 + $0x28] sm:$0xff] %v1511_v30   ;;  %1575 = vst [vmem:[%s1971_s21 + $0x68] sm:$0xff] %v1551_v31  }
 0x132   : > { %v1016_v36 = vadd.f32 %v1957_v57, %v977_v34  ;;  %v1032_v37 = vadd.f32 %v1957_v57, %v993_v35  ;;  %v1636_v38 = vpop.f32.mrb[28].mxu0  ;;  %v1684_v39 = vpop.f32.mrb[28].mxu1  ;;  %v1047_v40 = vmax.f32 %v1015_v32, 0.0  ;;  %v1063_v41 = vmax.f32 %v1031_v33, 0.0 }
 0x133   : > { %v1637_v42 = vpop.f32.mrb[29].mxu0  ;;  %v1685_v43 = vpop.f32.mrb[29].mxu1 }
 0x134   : > { %v1048_v44 = vmax.f32 %v1016_v36, 0.0  ;;  %v1064_v45 = vmax.f32 %v1032_v37, 0.0  ;;  %v1638_v46 = vadd.f32 %v1637_v42, %v1636_v38  ;;  %v1686_v47 = vadd.f32 %v1685_v43, %v1684_v39  ;;  %v1639_v48 = vpop.f32.mrb[30].mxu0  ;;  %v1687_v49 = vpop.f32.mrb[30].mxu1 }
 0x135   : > { %v1640_v50 = vpop.f32.mrb[31].mxu0  ;;  %v1688_v52 = vpop.f32.mrb[31].mxu1 }
 0x136   : > { %v1516_v53 = vpack.c.bf16 %v1048_v44, %v1047_v40  ;;  %v1556_v54 = vpack.c.bf16 %v1064_v45, %v1063_v41  ;;  %v978_v55 = vmul.f32 %v1638_v46, %v1952_v51  ;;  %v994_v56 = vmul.f32 %v1686_v47, %v1952_v51 }
 0x137   : > { %v1641_v58 = vadd.f32 %v1640_v50, %v1639_v48  ;;  %v1689_v59 = vadd.f32 %v1688_v52, %v1687_v49 }
 0x138   : > { %1568 = vst [vmem:[%s1971_s21 + $0x30] sm:$0xff] %v1516_v53   ;;  %1576 = vst [vmem:[%s1971_s21 + $0x70] sm:$0xff] %v1556_v54   ;;  %v1017_v60 = vadd.f32 %v1957_v57, %v978_v55  ;;  %v1033_v61 = vadd.f32 %v1957_v57, %v994_v56 }
 0x139   : > { %v979_v62 = vmul.f32 %v1641_v58, %v1952_v51  ;;  %v995_v63 = vmul.f32 %v1689_v59, %v1952_v51 }
 0x13a   : > { %v1049_v2 = vmax.f32 %v1017_v60, 0.0  ;;  %v1065_v3 = vmax.f32 %v1033_v61, 0.0 }
 0x13b   : > { %v1018_v0 = vadd.f32 %v1957_v57, %v979_v62  ;;  %v1034_v1 = vadd.f32 %v1957_v57, %v995_v63 }
 0x13d   : > { %v1050_v4 = vmax.f32 %v1018_v0, 0.0  ;;  %v1066_v5 = vmax.f32 %v1034_v1, 0.0 }
 0x13f   : > { %v1521_v6 = vpack.c.bf16 %v1050_v4, %v1049_v2  ;;  %v1561_v7 = vpack.c.bf16 %v1066_v5, %v1065_v3 }
 0x141   : > { %1569 = vst [vmem:[%s1971_s21 + $0x38] sm:$0xff] %v1521_v6   ;;  %1577 = vst [vmem:[%s1971_s21 + $0x78] sm:$0xff] %v1561_v7  }
 0x142 PF: > { %s14_s17 = sadd.s32 1, %s1816_s17   ;;  %s2059_s15 = smov %s1812_s16 }
 0x143   : > { %p11_p5 = scmp.ge.s32.totalorder %s14_s17, 4   ;;  %s2060_s16 = smov %s2062_s18 }
 0x145   :  { %13 = sbr.rel (!%p11_p5) target bundleno = 2 (0x2), region = 83 }

// kernel: mnist_resnet_forward.23
= control target key start
LH: loop header
LB: loop body
LE: loop exit
PB: predicated region body
PF: predicated region fallthrough
CT: control target
= control target key end

     0   :  { %s254_s0 = inlined_call_operand.vmem [shape: bf16[9,16,512], index: 0, kind: input, shape index: {}]   ;;  %s255_s1 = inlined_call_operand.vmem [shape: bf16[16,512], index: 1, kind: output, shape index: {}]  }
   0x1   :  { %v8_v0 = vld [vmem:[%s254_s0] sm:$0xff]  ;;  %v9_v6 = vld [vmem:[%s254_s0 + $0x8] sm:$0xff]  ;;  %v10_v15 = vld [vmem:[%s254_s0 + $0x10] sm:$0xff] }
   0x2   :  { %v92_v1 = vld [vmem:[%s254_s0 + $0x20] sm:$0xff]  ;;  %v93_v7 = vld [vmem:[%s254_s0 + $0x28] sm:$0xff]  ;;  %v94_v16 = vld [vmem:[%s254_s0 + $0x30] sm:$0xff] }
   0x3   :  { %v96_v2 = vld [vmem:[%s254_s0 + $0x40] sm:$0xff]  ;;  %v17_v3 = vmax.bf16 %v92_v1, %v8_v0  ;;  %v97_v8 = vld [vmem:[%s254_s0 + $0x48] sm:$0xff]  ;;  %v18_v10 = vmax.bf16 %v93_v7, %v9_v6  ;;  %v98_v17 = vld [vmem:[%s254_s0 + $0x50] sm:$0xff]  ;;  %v19_v20 = vmax.bf16 %v94_v16, %v10_v15 }
   0x4   :  { %v100_v4 = vld [vmem:[%s254_s0 + $0x60] sm:$0xff]  ;;  %v101_v13 = vld [vmem:[%s254_s0 + $0x68] sm:$0xff]  ;;  %v102_v24 = vld [vmem:[%s254_s0 + $0x70] sm:$0xff] }
   0x5   :  { %v26_v5 = vmax.bf16 %v96_v2, %v17_v3  ;;  %v104_v9 = vld [vmem:[%s254_s0 + $0x80] sm:$0xff]  ;;  %v27_v14 = vmax.bf16 %v97_v8, %v18_v10  ;;  %v105_v19 = vld [vmem:[%s254_s0 + $0x88] sm:$0xff]  ;;  %v28_v26 = vmax.bf16 %v98_v17, %v19_v20  ;;  %v11_v27 = vld [vmem:[%s254_s0 + $0x18] sm:$0xff] }
   0x6   :  { %v108_v12 = vld [vmem:[%s254_s0 + $0xa0] sm:$0xff]  ;;  %v109_v23 = vld [vmem:[%s254_s0 + $0xa8] sm:$0xff]  ;;  %v95_v28 = vld [vmem:[%s254_s0 + $0x38] sm:$0xff] }
   0x7   :  { %v35_v11 = vmax.bf16 %v100_v4, %v26_v5  ;;  %v112_v21 = vld [vmem:[%s254_s0 + $0xc0] sm:$0xff]  ;;  %v36_v22 = vmax.bf16 %v101_v13, %v27_v14  ;;  %v99_v29 = vld [vmem:[%s254_s0 + $0x58] sm:$0xff]  ;;  %v106_v32 = vld [vmem:[%s254_s0 + $0x90] sm:$0xff]  ;;  %v20_v33 = vmax.bf16 %v95_v28, %v11_v27  ;;  %v37_v36 = vmax.bf16 %v102_v24, %v28_v26 }
   0x8   :  { %v116_v30 = vld [vmem:[%s254_s0 + $0xe0] sm:$0xff]  ;;  %v113_v35 = vld [vmem:[%s254_s0 + $0xc8] sm:$0xff]  ;;  %v103_v37 = vld [vmem:[%s254_s0 + $0x78] sm:$0xff] }
   0x9   :  { %v44_v18 = vmax.bf16 %v104_v9, %v35_v11  ;;  %v45_v31 = vmax.bf16 %v105_v19, %v36_v22  ;;  %v120_v38 = vld [vmem:[%s254_s0 + $0x100] sm:$0xff]  ;;  %v110_v40 = vld [vmem:[%s254_s0 + $0xb0] sm:$0xff]  ;;  %v29_v41 = vmax.bf16 %v99_v29, %v20_v33  ;;  %v117_v43 = vld [vmem:[%s254_s0 + $0xe8] sm:$0xff]  ;;  %v46_v44 = vmax.bf16 %v106_v32, %v37_v36 }
   0xa   :  { %v107_v45 = vld [vmem:[%s254_s0 + $0x98] sm:$0xff]  ;;  %v114_v47 = vld [vmem:[%s254_s0 + $0xd0] sm:$0xff]  ;;  %v121_v50 = vld [vmem:[%s254_s0 + $0x108] sm:$0xff] }
   0xb   :  { %v53_v25 = vmax.bf16 %v108_v12, %v44_v18  ;;  %v54_v39 = vmax.bf16 %v109_v23, %v45_v31  ;;  %v38_v48 = vmax.bf16 %v103_v37, %v29_v41  ;;  %v55_v51 = vmax.bf16 %v110_v40, %v46_v44  ;;  %v111_v52 = vld [vmem:[%s254_s0 + $0xb8] sm:$0xff]  ;;  %v118_v54 = vld [vmem:[%s254_s0 + $0xf0] sm:$0xff] }
   0xc   :  { %v115_v57 = vld [vmem:[%s254_s0 + $0xd8] sm:$0xff]  ;;  %v122_v59 = vld [vmem:[%s254_s0 + $0x110] sm:$0xff] }
   0xd   :  { %v62_v34 = vmax.bf16 %v112_v21, %v53_v25  ;;  %v63_v46 = vmax.bf16 %v113_v35, %v54_v39  ;;  %v47_v55 = vmax.bf16 %v107_v45, %v38_v48  ;;  %v64_v56 = vmax.bf16 %v114_v47, %v55_v51  ;;  %v119_v62 = vld [vmem:[%s254_s0 + $0xf8] sm:$0xff] }
   0xe   :  { %v123_v1 = vld [vmem:[%s254_s0 + $0x118] sm:$0xff] }
   0xf   :  { %v71_v42 = vmax.bf16 %v116_v30, %v62_v34  ;;  %v72_v53 = vmax.bf16 %v117_v43, %v63_v46  ;;  %v56_v60 = vmax.bf16 %v111_v52, %v47_v55  ;;  %v73_v61 = vmax.bf16 %v118_v54, %v64_v56 }
  0x11   :  { %v80_v49 = vmax.bf16 %v120_v38, %v71_v42  ;;  %v81_v58 = vmax.bf16 %v121_v50, %v72_v53  ;;  %v65_v63 = vmax.bf16 %v115_v57, %v56_v60  ;;  %v82_v0 = vmax.bf16 %v122_v59, %v73_v61 }
  0x13   :  { %84 = vst [vmem:[%s255_s1] sm:$0xff] %v80_v49  ;;  %85 = vst [vmem:[%s255_s1 + $0x8] sm:$0xff] %v81_v58  ;;  %v74_v2 = vmax.bf16 %v119_v62, %v65_v63 }
  0x14   :  { %86 = vst [vmem:[%s255_s1 + $0x10] sm:$0xff] %v82_v0 }
  0x15   :  { %v83_v3 = vmax.bf16 %v123_v1, %v74_v2 }
  0x17   :  { %87 = vst [vmem:[%s255_s1 + $0x18] sm:$0xff] %v83_v3 }

// kernel: mnist_resnet_forward.25
= control target key start
LH: loop header
LB: loop body
LE: loop exit
PB: predicated region body
PF: predicated region fallthrough
CT: control target
= control target key end

     0   :  { %s1913_s18 = smov 0   ;;  %s1915_s19 = smov 0   ;;  %s2190_s0 = inlined_call_operand.vmem [shape: bf16[128,768], index: 0, kind: input, shape index: {}]   ;;  %s2191_s1 = inlined_call_operand.vmem [shape: bf16[768,128], index: 1, kind: input, shape index: {}]   ;;  %s2192_s2 = inlined_call_operand.vmem [shape: f32[1,128], index: 2, kind: input, shape index: {}]   ;;  %s2193_s3 = inlined_call_operand.vmem [shape: f32[1,128], index: 3, kind: input, shape index: {}]   ;;  %s2194_s4 = inlined_call_operand.vmem [shape: bf16[128,128], index: 4, kind: input, shape index: {}]   ;;  %s2195_s5 = inlined_call_operand.vmem [shape: bf16[128,128], index: 5, kind: output, shape index: {}]  }
   0x1   :  { %s1917_s20 = smov 0   ;;  %s1919_s21 = smov 0  }
   0x2   :  { %s1921_s22 = smov 0  }
   0x3 LB: > { %s27_s23 = sadd.s32 1, %s1876_s21  ;;  %p50_p1 = scmp.ne.s32.totalorder %s1868_s19, %s1864_s18  ;;  %s1880_s22 = sphi %s1921_s22, %s15_s22   ;;  %s1876_s21 = sphi %s1919_s21, %s2199_s21   ;;  %s1872_s20 = sphi %s1917_s20, %s2198_s20   ;;  %s1868_s19 = sphi %s1915_s19, %s2197_s19   ;;  %s1864_s18 = sphi %s1913_s18, %s2196_s18  }
   0x4   : > { %p28_p0 = scmp.ge.s32.totalorder %s27_s23, 2  ;;  %p51_p2 = scmp.eq.s32.totalorder %s1880_s22, 0 }
   0x5   : > { %s43_s25 = sadd.s32 1, %s1868_s19  ;;  %p1420_p5 = scmp.ge.s32.totalorder %s1880_s22, 2 }
   0x6   : > { %s2201_s23 = smov (%p28_p0, %s27_s23), 0  ;;  %p52_p3 = por %p51_p2, %p50_p1 }
   0x7   : > { %s39_s24 = ssub.s32 %s1876_s21, %s2201_s23  ;;  %236 = sbr.rel (%p1420_p5) target bundleno = 37 (0x25), region = 28 }
   0x8   : > { %p41_p4 = scmp.eq.s32.totalorder %s39_s24, 0 }
   0xa   : > { %s1948_s26 = scalar_select %p41_p4, %s1868_s19, %s43_s25  }
   0xe   : > { %239 = sbr.rel (!%p52_p3) target bundleno = 37 (0x25), region = 32  ;;  %s241_s27 = sand.u32 (%p52_p3), 1, %s1868_s19  }
   0xf   : > { %s1528_s28 = smul.u32 (%p52_p3), 12, %s1876_s21 }
  0x10   : > { %s1743_s29 = smul.u32 (%p52_p3), 192, %s241_s27 }
  0x11   : > { %s1956_s7 = scalar_lea.vmem (%p52_p3), %s2190_s0, %s1528_s28 }
  0x12   : > { %v264_v0 = vld [vmem:[%s1956_s7] sm:$0xff] (%p52_p3)  ;;  %v266_v1 = vld [vmem:[%s1956_s7 + $0x18] sm:$0xff] (%p52_p3)  ;;  %v268_v2 = vld [vmem:[%s1956_s7 + $0x30] sm:$0xff] (%p52_p3)  ;;  %s1961_s8 = scalar_lea.vmem (%p52_p3), [#allocation3], %s1743_s29 }
  0x13   : > { %265 = vst [vmem:[%s1961_s8] sm:$0xff] (%p52_p3), %v264_v0  ;;  %267 = vst [vmem:[%s1961_s8 + $0xc] sm:$0xff] (%p52_p3), %v266_v1  ;;  %v270_v3 = vld [vmem:[%s1956_s7 + $0x48] sm:$0xff] (%p52_p3)  ;;  %v272_v4 = vld [vmem:[%s1956_s7 + $0x60] sm:$0xff] (%p52_p3) }
  0x14   : > { %269 = vst [vmem:[%s1961_s8 + $0x18] sm:$0xff] (%p52_p3), %v268_v2  ;;  %v274_v5 = vld [vmem:[%s1956_s7 + $0x78] sm:$0xff] (%p52_p3)  ;;  %271 = vst [vmem:[%s1961_s8 + $0x24] sm:$0xff] (%p52_p3), %v270_v3  ;;  %v276_v6 = vld [vmem:[%s1956_s7 + $0x90] sm:$0xff] (%p52_p3) }
  0x15   : > { %273 = vst [vmem:[%s1961_s8 + $0x30] sm:$0xff] %v272_v4  ;;  %275 = vst [vmem:[%s1961_s8 + $0x3c] sm:$0xff] %v274_v5  ;;  %v278_v7 = vld [vmem:[%s1956_s7 + $0xa8] sm:$0xff]  ;;  %v280_v8 = vld [vmem:[%s1956_s7 + $0xc0] sm:$0xff] }
  0x16   : > { %277 = vst [vmem:[%s1961_s8 + $0x48] sm:$0xff] %v276_v6  ;;  %279 = vst [vmem:[%s1961_s8 + $0x54] sm:$0xff] %v278_v7  ;;  %v282_v9 = vld [vmem:[%s1956_s7 + $0xd8] sm:$0xff]  ;;  %v284_v10 = vld [vmem:[%s1956_s7 + $0xf0] sm:$0xff] }
  0x17   : > { %281 = vst [vmem:[%s1961_s8 + $0x60] sm:$0xff] %v280_v8  ;;  %v286_v11 = vld [vmem:[%s1956_s7 + $0x108] sm:$0xff]  ;;  %283 = vst [vmem:[%s1961_s8 + $0x6c] sm:$0xff] %v282_v9  ;;  %v288_v12 = vld [vmem:[%s1956_s7 + $0x120] sm:$0xff] }
  0x18   : > { %285 = vst [vmem:[%s1961_s8 + $0x78] sm:$0xff] %v284_v10  ;;  %287 = vst [vmem:[%s1961_s8 + $0x84] sm:$0xff] %v286_v11  ;;  %v290_v13 = vld [vmem:[%s1956_s7 + $0x138] sm:$0xff]  ;;  %v292_v14 = vld [vmem:[%s1956_s7 + $0x150] sm:$0xff] }
  0x19   : > { %289 = vst [vmem:[%s1961_s8 + $0x90] sm:$0xff] %v288_v12  ;;  %291 = vst [vmem:[%s1961_s8 + $0x9c] sm:$0xff] %v290_v13  ;;  %v294_v15 = vld [vmem:[%s1956_s7 + $0x168] sm:$0xff]  ;;  %v1424_v17 = vld [vmem:[%s1956_s7 + $0x20] sm:$0xf] }
  0x1a   : > { %293 = vst [vmem:[%s1961_s8 + $0xa8] sm:$0xff] %v292_v14  ;;  %v1422_v16 = vld [vmem:[%s1956_s7 + $0x8] sm:$0xf]  ;;  %295 = vst [vmem:[%s1961_s8 + $0xb4] sm:$0xff] %v294_v15  ;;  %v1426_v18 = vld [vmem:[%s1956_s7 + $0x38] sm:$0xf] }
  0x1b   : > { %1423 = vst [vmem:[%s1961_s8 + $0x8] sm:$0xf] %v1422_v16  ;;  %1425 = vst [vmem:[%s1961_s8 + $0x14] sm:$0xf] %v1424_v17  ;;  %v1428_v19 = vld [vmem:[%s1956_s7 + $0x50] sm:$0xf] }
  0x1c   : > { %v1430_v20 = vld [vmem:[%s1956_s7 + $0x68] sm:$0xf]  ;;  %1427 = vst [vmem:[%s1961_s8 + $0x20] sm:$0xf] %v1426_v18  ;;  %1429 = vst [vmem:[%s1961_s8 + $0x2c] sm:$0xf] %v1428_v19 }
  0x1d   : > { %1431 = vst [vmem:[%s1961_s8 + $0x38] sm:$0xf] %v1430_v20  ;;  %v1432_v21 = vld [vmem:[%s1956_s7 + $0x80] sm:$0xf]  ;;  %v1434_v22 = vld [vmem:[%s1956_s7 + $0x98] sm:$0xf] }
  0x1e   : > { %v1436_v23 = vld [vmem:[%s1956_s7 + $0xb0] sm:$0xf]  ;;  %1433 = vst [vmem:[%s1961_s8 + $0x44] sm:$0xf] %v1432_v21  ;;  %1435 = vst [vmem:[%s1961_s8 + $0x50] sm:$0xf] %v1434_v22 }
  0x1f   : > { %1437 = vst [vmem:[%s1961_s8 + $0x5c] sm:$0xf] %v1436_v23  ;;  %v1438_v24 = vld [vmem:[%s1956_s7 + $0xc8] sm:$0xf]  ;;  %v1440_v25 = vld [vmem:[%s1956_s7 + $0xe0] sm:$0xf] }
  0x20   : > { %v1442_v26 = vld [vmem:[%s1956_s7 + $0xf8] sm:$0xf]  ;;  %1439 = vst [vmem:[%s1961_s8 + $0x68] sm:$0xf] %v1438_v24  ;;  %1441 = vst [vmem:[%s1961_s8 + $0x74] sm:$0xf] %v1440_v25 }
  0x21   : > { %1443 = vst [vmem:[%s1961_s8 + $0x80] sm:$0xf] %v1442_v26  ;;  %v1444_v27 = vld [vmem:[%s1956_s7 + $0x110] sm:$0xf]  ;;  %v1446_v28 = vld [vmem:[%s1956_s7 + $0x128] sm:$0xf] }
  0x22   : > { %v1448_v29 = vld [vmem:[%s1956_s7 + $0x140] sm:$0xf]  ;;  %1445 = vst [vmem:[%s1961_s8 + $0x8c] sm:$0xf] %v1444_v27  ;;  %1447 = vst [vmem:[%s1961_s8 + $0x98] sm:$0xf] %v1446_v28 }
  0x23   : > { %1449 = vst [vmem:[%s1961_s8 + $0xa4] sm:$0xf] %v1448_v29  ;;  %v1450_v30 = vld [vmem:[%s1956_s7 + $0x158] sm:$0xf]  ;;  %v1452_v31 = vld [vmem:[%s1956_s7 + $0x170] sm:$0xf] }
  0x24   : > { %1451 = vst [vmem:[%s1961_s8 + $0xb0] sm:$0xf] %v1450_v30  ;;  %1453 = vst [vmem:[%s1961_s8 + $0xbc] sm:$0xf] %v1452_v31 }
  0x25 PF: > { %p1454_p6 = scmp.ge.s32.totalorder %s1880_s22, 1  ;;  %p351_p7 = scmp.lt.s32.totalorder %s1880_s22, 3 }
  0x27   : > { %p352_p8 = pnand %p1454_p6, %p351_p7 }
  0x28   : > { %s358_s9 = sand.u32 (!%p352_p8), 1, %s1864_s18   ;;  %s412_s10 = smul.u32 (!%p352_p8), 48, %s1872_s20 }
  0x29   : > { %355 = sbr.rel (%p352_p8) target bundleno = 387 (0x183), region = 62  ;;  %p1456_p10 = scmp.ne.s32.totalorder (!%p352_p8), %s1872_s20, 0 }
  0x2a   : > { %s1744_s11 = smul.u32 (!%p352_p8), 192, %s358_s9  ;;  %p413_p9 = scmp.lt.s32.totalorder (!%p352_p8), %s412_s10, 95 }
  0x2c   : > { %s2033_s16 = scalar_lea.vmem (!%p352_p8), [#allocation3], %s1744_s11 }
  0x30   : > { %s2203_s10 = smov (!%p413_p9, %s412_s10), 95  ;;  %449 = sbr.rel (%p1456_p10) target bundleno = 58 (0x3a), region = 70 }
  0x31   : > { %s1455_s12 = sshll.u32 %s2203_s10, 2  ;;  %v1882_v32 = vmov (!%p1456_p10), 0.0  }
  0x32   : > { %s2031_s15 = scalar_lea.vmem %s2191_s1, %s1455_s12  ;;  %450 = vst [vmem:[#allocation2] sm:$0xff] (!%p1456_p10), %v1882_v32  ;;  %451 = vst [vmem:[#allocation2 + $0x8] sm:$0xff] (!%p1456_p10), %v1882_v32 }
  0x33   : > { %452 = vst [vmem:[#allocation2 + $0x10] sm:$0xff] (!%p1456_p10), %v1882_v32  ;;  %453 = vst [vmem:[#allocation2 + $0x18] sm:$0xff] (!%p1456_p10), %v1882_v32 }
  0x34   : > { %454 = vst [vmem:[#allocation2 + $0x20] sm:$0xff] (!%p1456_p10), %v1882_v32  ;;  %455 = vst [vmem:[#allocation2 + $0x28] sm:$0xff] (!%p1456_p10), %v1882_v32 }
  0x35   : > { %456 = vst [vmem:[#allocation2 + $0x30] sm:$0xff] (!%p1456_p10), %v1882_v32  ;;  %457 = vst [vmem:[#allocation2 + $0x38] sm:$0xff] (!%p1456_p10), %v1882_v32 }
  0x36   : > { %458 = vst [vmem:[#allocation2 + $0x40] sm:$0xff] (!%p1456_p10), %v1882_v32  ;;  %459 = vst [vmem:[#allocation2 + $0x48] sm:$0xff] (!%p1456_p10), %v1882_v32 }
  0x37   : > { %460 = vst [vmem:[#allocation2 + $0x50] sm:$0xff] %v1882_v32  ;;  %461 = vst [vmem:[#allocation2 + $0x58] sm:$0xff] %v1882_v32 }
  0x38   : > { %462 = vst [vmem:[#allocation2 + $0x60] sm:$0xff] %v1882_v32  ;;  %463 = vst [vmem:[#allocation2 + $0x68] sm:$0xff] %v1882_v32 }
  0x39   : > { %464 = vst [vmem:[#allocation2 + $0x70] sm:$0xff] %v1882_v32  ;;  %465 = vst [vmem:[#allocation2 + $0x78] sm:$0xff] %v1882_v32 }
  0x3a PF: > { %v1786_v33 = vld [vmem:[%s2031_s15 + $0x40] sm:$0xff]   ;;  %v1789_v36 = vld [vmem:[%s2031_s15 + $0x48] sm:$0xff]   ;;  %v1792_v39 = vld [vmem:[%s2031_s15 + $0x50] sm:$0xff]   ;;  %p1505_p11 = scmp.ne.s32.totalorder %s1872_s20, 1 }
  0x3b   : > { %v1787_v34 = vld [vmem:[%s2031_s15] sm:$0xff]   ;;  %1631 = vmatprep.subr.bf16.mxu0 %v1786_v33  ;;  %v1790_v37 = vld [vmem:[%s2031_s15 + $0x8] sm:$0xff]   ;;  %v1793_v40 = vld [vmem:[%s2031_s15 + $0x10] sm:$0xff]  }
  0x3c   : > { %v1788_v35 = vld [vmem:[%s2031_s15 + $0x80] sm:$0xff]   ;;  %1632 = vmatpush3.bf16.msra.mxu0 %v1787_v34  ;;  %v1791_v38 = vld [vmem:[%s2031_s15 + $0x88] sm:$0xff]   ;;  %v1794_v41 = vld [vmem:[%s2031_s15 + $0x90] sm:$0xff]  }
  0x3d   : > { %1711 = vmatprep.subr.bf16.mxu1 %v1788_v35  ;;  %1633 = vmatprep.subr.bf16.mxu0 %v1789_v36  ;;  %v1795_v42 = vld [vmem:[%s2031_s15 + $0x58] sm:$0xff]   ;;  %v1798_v45 = vld [vmem:[%s2031_s15 + $0x60] sm:$0xff]   ;;  %v1801_v48 = vld [vmem:[%s2031_s15 + $0x68] sm:$0xff]  }
  0x3e   : > { %1712 = vmatpush3.bf16.msra.mxu1 %v1788_v35  ;;  %v1796_v43 = vld [vmem:[%s2031_s15 + $0x18] sm:$0xff]   ;;  %v1800_v46 = vld [vmem:[%s2031_s15 + $0xa0] sm:$0xff]   ;;  %v1803_v49 = vld [vmem:[%s2031_s15 + $0xa8] sm:$0xff]  }
  0x3f   : > { %1713 = vmatprep.subr.bf16.mxu1 %v1791_v38  ;;  %v1797_v44 = vld [vmem:[%s2031_s15 + $0x98] sm:$0xff]   ;;  %v1799_v47 = vld [vmem:[%s2031_s15 + $0x20] sm:$0xff]   ;;  %v1802_v50 = vld [vmem:[%s2031_s15 + $0x28] sm:$0xff]  }
  0x40   : > { %1634 = vmatpush3.bf16.msra.mxu0 %v1790_v37  ;;  %v1804_v51 = vld [vmem:[%s2031_s15 + $0x70] sm:$0xff]   ;;  %v1807_v54 = vld [vmem:[%s2031_s15 + $0x78] sm:$0xff]   ;;  %v1810_v59 = vld [vmem:[%s2033_s16] ss:$12 sps:$4 sm:$0xff]  }
  0x41   : > { %1635 = vmatprep.subr.bf16.mxu0 %v1792_v39  ;;  %v1805_v52 = vld [vmem:[%s2031_s15 + $0x30] sm:$0xff]   ;;  %v1809_v55 = vld [vmem:[%s2031_s15 + $0xb8] sm:$0xff]   ;;  %v1814_v61 = vld [vmem:[%s2033_s16 + $0x20] ss:$12 sps:$4 sm:$0xff]  }
  0x42   : > { %1714 = vmatpush3.bf16.msra.mxu1 %v1791_v38  ;;  %v1806_v53 = vld [vmem:[%s2031_s15 + $0xb0] sm:$0xff]   ;;  %v1808_v58 = vld [vmem:[%s2031_s15 + $0x38] sm:$0xff]   ;;  %v1830_v5 = vld [vmem:[%s2033_s16 + $0x80] ss:$12 sps:$4 sm:$0xff]  }
  0x43   : > { %1715 = vmatprep.subr.bf16.mxu1 %v1794_v41  ;;  %v1812_v56 = vld [vmem:[%s2033_s16 + $0x4] ss:$12 sps:$4 sm:$0xff]   ;;  %v1813_v57 = vld [vmem:[%s2033_s16 + $0x8] ss:$12 sps:$4 sm:$0xff]   ;;  %v1823_v4 = vld [vmem:[%s2033_s16 + $0x4c] ss:$12 sps:$4 sm:$0xff]  }
  0x44   : > { %1636 = vmatpush3.bf16.msra.mxu0 %v1793_v40  ;;  %866 = vmatprep.mubr.bf16.mxu0 %v1812_v56  ;;  %v1815_v60 = vld [vmem:[%s2033_s16 + $0x1c] ss:$12 sps:$4 sm:$0xff]   ;;  %v1821_v62 = vld [vmem:[%s2033_s16 + $0x38] ss:$12 sps:$4 sm:$0xff]   ;;  %v1818_v0 = vld [vmem:[%s2033_s16 + $0x34] ss:$12 sps:$4 sm:$0xff]  }
  0x45   : > { %1637 = vmatprep.subr.bf16.mxu0 %v1795_v42  ;;  %1727 = vmatprep.mubr.bf16.mxu1 %v1813_v57  ;;  %v1817_v63 = vld [vmem:[%s2033_s16 + $0x18] ss:$12 sps:$4 sm:$0xff]   ;;  %v1822_v1 = vld [vmem:[%s2033_s16 + $0x50] ss:$12 sps:$4 sm:$0xff]   ;;  %v1829_v2 = vld [vmem:[%s2033_s16 + $0x68] ss:$12 sps:$4 sm:$0xff]  }
  0x46   : > { %1716 = vmatpush3.bf16.msra.mxu1 %v1794_v41  ;;  %v1820_v3 = vld [vmem:[%s2033_s16 + $0x30] ss:$12 sps:$4 sm:$0xff]   ;;  %v1837_v6 = vld [vmem:[%s2033_s16 + $0x98] ss:$12 sps:$4 sm:$0xff]   ;;  %v1825_v7 = vld [vmem:[%s2033_s16 + $0x48] ss:$12 sps:$4 sm:$0xff]  }
  0x47   : > { %1717 = vmatprep.subr.bf16.mxu1 %v1797_v44  ;;  %v1826_v8 = vld [vmem:[%s2033_s16 + $0x64] ss:$12 sps:$4 sm:$0xff]   ;;  %v1828_v10 = vld [vmem:[%s2033_s16 + $0x60] ss:$12 sps:$4 sm:$0xff]   ;;  %v1831_v11 = vld [vmem:[%s2033_s16 + $0x7c] ss:$12 sps:$4 sm:$0xff]  }
  0x48   : > { %1638 = vmatpush3.bf16.msra.mxu0 %v1796_v43  ;;  %v1838_v9 = vld [vmem:[%s2033_s16 + $0xb0] ss:$12 sps:$4 sm:$0xff]   ;;  %v1833_v12 = vld [vmem:[%s2033_s16 + $0x78] ss:$12 sps:$4 sm:$0xff]   ;;  %v1834_v13 = vld [vmem:[%s2033_s16 + $0x94] ss:$12 sps:$4 sm:$0xff]  }
  0x49   : > { %1639 = vmatprep.subr.bf16.mxu0 %v1798_v45  ;;  %v1836_v14 = vld [vmem:[%s2033_s16 + $0x90] ss:$12 sps:$4 sm:$0xff]   ;;  %v1839_v15 = vld [vmem:[%s2033_s16 + $0xac] ss:$12 sps:$4 sm:$0xff]   ;;  %v1841_v16 = vld [vmem:[%s2033_s16 + $0xa8] ss:$12 sps:$4 sm:$0xff]  }
  0x4a   : > { %1718 = vmatpush3.bf16.msra.mxu1 %v1797_v44  ;;  %v466_v23 = vld [vmem:[#allocation2] sm:$0xff]  ;;  %v467_v28 = vld [vmem:[#allocation2 + $0x8] sm:$0xff]  ;;  %v468_v38 = vld [vmem:[#allocation2 + $0x10] sm:$0xff] }
  0x4b   : > { %1719 = vmatprep.subr.bf16.mxu1 %v1800_v46  ;;  %v469_v44 = vld [vmem:[#allocation2 + $0x18] sm:$0xff] }
  0x4c   : > { %1640 = vmatpush3.bf16.msra.mxu0 %v1799_v47 }
  0x4d   : > { %1641 = vmatprep.subr.bf16.mxu0 %v1801_v48 }
  0x4e   : > { %1720 = vmatpush3.bf16.msra.mxu1 %v1800_v46 }
  0x4f   : > { %1721 = vmatprep.subr.bf16.mxu1 %v1803_v49 }
  0x50   : > { %1642 = vmatpush3.bf16.msra.mxu0 %v1802_v50 }
  0x51   : > { %1643 = vmatprep.subr.bf16.mxu0 %v1804_v51 }
  0x52   : > { %1722 = vmatpush3.bf16.msra.mxu1 %v1803_v49 }
  0x53   : > { %1723 = vmatprep.subr.bf16.mxu1 %v1806_v53 }
  0x54   : > { %1644 = vmatpush3.bf16.msra.mxu0 %v1805_v52 }
  0x55   : > { %1645 = vmatprep.subr.bf16.mxu0 %v1807_v54 }
  0x56   : > { %1724 = vmatpush3.bf16.msra.mxu1 %v1806_v53 }
  0x57   : > { %1725 = vmatprep.subr.bf16.mxu1 %v1809_v55 }
  0x58   : > { %1646 = vmatpush3.bf16.msra.mxu0 %v1808_v58 }
  0x5a   : > { %1726 = vmatpush3.bf16.msra.mxu1 %v1809_v55  ;;  %v470_v55 = vld [vmem:[#allocation2 + $0x20] sm:$0xff] }
  0x5b   : > { %867 = vmatmul.mubr.bf16.vlgmr.msra.gmra.mrb[0].mxu0 %v1810_v59 }
  0x5c   : > { %874 = vmatprep.mubr.bf16.mxu0 %v1815_v60  ;;  %v471_v60 = vld [vmem:[#allocation2 + $0x28] sm:$0xff] }
  0x5d   : > { %1728 = vmatmul.mubr.bf16.vlgmr.msra.gmra.mrb[0].mxu1 %v1814_v61 }
  0x5e   : > { %1731 = vmatprep.mubr.bf16.mxu1 %v1821_v62 }
  0x63   : > { %875 = vmatmul.mubr.bf16.gmra.mrb[4].mxu0 %v1817_v63 }
  0x64   : > { %882 = vmatprep.mubr.bf16.mxu0 %v1818_v0 }
  0x65   : > { %1732 = vmatmul.mubr.bf16.gmra.mrb[4].mxu1 %v1822_v1 }
  0x66   : > { %1735 = vmatprep.mubr.bf16.mxu1 %v1829_v2 }
  0x6b   : > { %883 = vmatmul.mubr.bf16.gmra.mrb[8].mxu0 %v1820_v3 }
  0x6c   : > { %890 = vmatprep.mubr.bf16.mxu0 %v1823_v4 }
  0x6d   : > { %1736 = vmatmul.mubr.bf16.gmra.mrb[8].mxu1 %v1830_v5 }
  0x6e   : > { %1739 = vmatprep.mubr.bf16.mxu1 %v1837_v6  ;;  %v472_v6 = vld [vmem:[#allocation2 + $0x30] sm:$0xff] }
  0x73   : > { %891 = vmatmul.mubr.bf16.gmra.mrb[12].mxu0 %v1825_v7 }
  0x74   : > { %898 = vmatprep.mubr.bf16.mxu0 %v1826_v8 }
  0x75   : > { %1740 = vmatmul.mubr.bf16.gmra.mrb[12].mxu1 %v1838_v9 }
  0x7b   : > { %899 = vmatmul.mubr.bf16.gmra.mrb[16].mxu0 %v1828_v10 }
  0x7c   : > { %906 = vmatprep.mubr.bf16.mxu0 %v1831_v11 }
  0x83   : > { %907 = vmatmul.mubr.bf16.gmra.mrb[20].mxu0 %v1833_v12  ;;  %v473_v12 = vld [vmem:[#allocation2 + $0x38] sm:$0xff] }
  0x84   : > { %914 = vmatprep.mubr.bf16.mxu0 %v1834_v13 }
  0x8b   : > { %915 = vmatmul.mubr.bf16.gmra.mrb[24].mxu0 %v1836_v14 }
  0x8c   : > { %922 = vmatprep.mubr.bf16.mxu0 %v1839_v15 }
  0x93   : > { %923 = vmatmul.mubr.bf16.gmra.mrb[28].mxu0 %v1841_v16 }
 0x12e   : > { %v1647_v17 = vpop.f32.mrb[0].mxu0 }
 0x12f   : > { %v1648_v18 = vpop.f32.mrb[1].mxu0 }
 0x130   : > { %v1649_v19 = vadd.f32 %v1648_v18, %v1647_v17  ;;  %v1650_v20 = vpop.f32.mrb[2].mxu0  ;;  %v1729_v21 = vpop.f32.mrb[0].mxu1 }
 0x131   : > { %v1651_v22 = vpop.f32.mrb[3].mxu0  ;;  %v965_v24 = vpop.f32.mrb[1].mxu1 }
 0x132   : > { %v1652_v25 = vadd.f32 %v1651_v22, %v1650_v20  ;;  %v966_v26 = vadd.f32 %v1649_v19, %v965_v24  ;;  %v1730_v27 = vpop.f32.mrb[2].mxu1  ;;  %v474_v22 = vld [vmem:[#allocation2 + $0x40] sm:$0xff] }
 0x133   : > { %v968_v29 = vpop.f32.mrb[3].mxu1 }
 0x134   : > { %v1028_v30 = vadd.f32 %v966_v26, %v466_v23  ;;  %v969_v31 = vadd.f32 %v1652_v25, %v968_v29  ;;  %v475_v25 = vld [vmem:[#allocation2 + $0x48] sm:$0xff] }
 0x136   : > { %1044 = vst [vmem:[#allocation2] sm:$0xff] %v1028_v30  ;;  %v1029_v32 = vadd.f32 %v969_v31, %v467_v28  ;;  %v1653_v33 = vpop.f32.mrb[4].mxu0 }
 0x137   : > { %v1654_v34 = vpop.f32.mrb[5].mxu0 }
 0x138   : > { %1045 = vst [vmem:[#allocation2 + $0x8] sm:$0xff] %v1029_v32  ;;  %v1655_v35 = vadd.f32 %v1654_v34, %v1653_v33  ;;  %v1656_v36 = vpop.f32.mrb[6].mxu0  ;;  %v1733_v37 = vpop.f32.mrb[4].mxu1  ;;  %v476_v33 = vld [vmem:[#allocation2 + $0x50] sm:$0xff] }
 0x139   : > { %v1657_v39 = vpop.f32.mrb[7].mxu0  ;;  %v981_v40 = vpop.f32.mrb[5].mxu1 }
 0x13a   : > { %v974_v41 = vadd.f32 %v1729_v21, %v1655_v35  ;;  %v1658_v42 = vadd.f32 %v1657_v39, %v1656_v36  ;;  %v1734_v43 = vpop.f32.mrb[6].mxu1 }
 0x13b   : > { %v984_v45 = vpop.f32.mrb[7].mxu1 }
 0x13c   : > { %v1030_v46 = vadd.f32 %v974_v41, %v468_v38  ;;  %v977_v47 = vadd.f32 %v1730_v27, %v1658_v42 }
 0x13e   : > { %1046 = vst [vmem:[#allocation2 + $0x10] sm:$0xff] %v1030_v46  ;;  %v1031_v48 = vadd.f32 %v977_v47, %v469_v44  ;;  %v1659_v49 = vpop.f32.mrb[8].mxu0  ;;  %v478_v46 = vld [vmem:[#allocation2 + $0x60] sm:$0xff] }
 0x13f   : > { %v1660_v50 = vpop.f32.mrb[9].mxu0 }
 0x140   : > { %1047 = vst [vmem:[#allocation2 + $0x18] sm:$0xff] %v1031_v48  ;;  %v1661_v51 = vadd.f32 %v1660_v50, %v1659_v49  ;;  %v1662_v52 = vpop.f32.mrb[10].mxu0  ;;  %v1737_v53 = vpop.f32.mrb[8].mxu1  ;;  %v479_v49 = vld [vmem:[#allocation2 + $0x68] sm:$0xff] }
 0x141   : > { %v1663_v54 = vpop.f32.mrb[11].mxu0  ;;  %v997_v56 = vpop.f32.mrb[9].mxu1 }
 0x142   : > { %v1664_v57 = vadd.f32 %v1663_v54, %v1662_v52  ;;  %v982_v58 = vadd.f32 %v1661_v51, %v981_v40  ;;  %v1738_v59 = vpop.f32.mrb[10].mxu1 }
 0x143   : > { %v1000_v61 = vpop.f32.mrb[11].mxu1 }
 0x144   : > { %v1032_v62 = vadd.f32 %v982_v58, %v470_v55  ;;  %v985_v63 = vadd.f32 %v1664_v57, %v984_v45  ;;  %v480_v57 = vld [vmem:[#allocation2 + $0x70] sm:$0xff] }
 0x146   : > { %1048 = vst [vmem:[#allocation2 + $0x20] sm:$0xff] %v1032_v62  ;;  %v1033_v0 = vadd.f32 %v985_v63, %v471_v60  ;;  %v1665_v1 = vpop.f32.mrb[12].mxu0 }
 0x147   : > { %v1666_v2 = vpop.f32.mrb[13].mxu0 }
 0x148   : > { %1049 = vst [vmem:[#allocation2 + $0x28] sm:$0xff] %v1033_v0  ;;  %v1667_v3 = vadd.f32 %v1666_v2, %v1665_v1  ;;  %v1668_v4 = vpop.f32.mrb[14].mxu0  ;;  %v1741_v5 = vpop.f32.mrb[12].mxu1  ;;  %v1064_v1 = vld [vmem:[#allocation2] sm:$0xff] (!%p1505_p11)  ;;  %v1065_v2 = vld [vmem:[#allocation2 + $0x8] sm:$0xff] (!%p1505_p11) }
 0x149   : > { %v1669_v7 = vpop.f32.mrb[15].mxu0  ;;  %v1013_v8 = vpop.f32.mrb[13].mxu1 }
 0x14a   : > { %v990_v9 = vadd.f32 %v1733_v37, %v1667_v3  ;;  %v1670_v10 = vadd.f32 %v1669_v7, %v1668_v4  ;;  %v1742_v11 = vpop.f32.mrb[14].mxu1  ;;  %v477_v37 = vld [vmem:[#allocation2 + $0x58] sm:$0xff]  ;;  %v2088_v3 = vld [vmem:[%s2192_s2] ss:$0 sm:$0xff] (!%p1505_p11) }
 0x14b   : > { %v1016_v13 = vpop.f32.mrb[15].mxu1  ;;  %v1087_v4 = vmul.f32 (!%p1505_p11), %v2088_v3, %v1064_v1  ;;  %v1546_v7 = vld [vmem:[%s2194_s4] sm:$0xff] (!%p1505_p11)  }
 0x14c   : > { %v1034_v14 = vadd.f32 %v990_v9, %v472_v6  ;;  %v993_v15 = vadd.f32 %v1734_v43, %v1670_v10  ;;  %v2095_v6 = vld [vmem:[%s2193_s3] ss:$0 sm:$0xff] (!%p1505_p11)  ;;  %v1547_v9 = vunpack.c.l.bf16 (!%p1505_p11), %v1546_v7  ;;  %v1548_v10 = vunpack.c.h.bf16 (!%p1505_p11), %v1546_v7 }
 0x14e   : > { %1050 = vst [vmem:[#allocation2 + $0x30] sm:$0xff] %v1034_v14  ;;  %v1035_v16 = vadd.f32 %v993_v15, %v473_v12  ;;  %v1671_v17 = vpop.f32.mrb[16].mxu0  ;;  %v1068_v14 = vld [vmem:[#allocation2 + $0x20] sm:$0xff] (!%p1505_p11)  ;;  %v1110_v15 = vadd.f32 (!%p1505_p11), %v2095_v6, %v1087_v4 }
 0x14f   : > { %v1672_v18 = vpop.f32.mrb[17].mxu0 }
 0x150   : > { %1051 = vst [vmem:[#allocation2 + $0x38] sm:$0xff] %v1035_v16  ;;  %v1673_v19 = vadd.f32 %v1672_v18, %v1671_v17  ;;  %v1674_v20 = vpop.f32.mrb[18].mxu0 }
 0x151   : > { %v1675_v21 = vpop.f32.mrb[19].mxu0 }
 0x152   : > { %v1676_v23 = vadd.f32 %v1675_v21, %v1674_v20  ;;  %v998_v24 = vadd.f32 %v1673_v19, %v997_v56  ;;  %v1069_v19 = vld [vmem:[#allocation2 + $0x28] sm:$0xff] (!%p1505_p11)  ;;  %v1618_v20 = vld [vmem:[%s2194_s4 + $0x10] sm:$0xff] (!%p1505_p11)  }
 0x154   : > { %v1036_v26 = vadd.f32 %v998_v24, %v474_v22  ;;  %v1001_v27 = vadd.f32 %v1676_v23, %v1000_v61  ;;  %v481_v61 = vld [vmem:[#allocation2 + $0x78] sm:$0xff]  ;;  %v1091_v23 = vmul.f32 (!%p1505_p11), %v2088_v3, %v1068_v14  ;;  %v1092_v24 = vmul.f32 (!%p1505_p11), %v2088_v3, %v1069_v19 }
 0x156   : > { %1052 = vst [vmem:[#allocation2 + $0x40] sm:$0xff] %v1036_v26  ;;  %v1037_v28 = vadd.f32 %v1001_v27, %v475_v25  ;;  %v1677_v29 = vpop.f32.mrb[20].mxu0  ;;  %v1070_v25 = vld [vmem:[#allocation2 + $0x30] sm:$0xff] (!%p1505_p11)  ;;  %v1158_v26 = vadd.f32 (!%p1505_p11), %v1547_v9, %v1110_v15 }
 0x157   : > { %v1678_v30 = vpop.f32.mrb[21].mxu0 }
 0x158   : > { %1053 = vst [vmem:[#allocation2 + $0x48] sm:$0xff] %v1037_v28  ;;  %v1679_v31 = vadd.f32 %v1678_v30, %v1677_v29  ;;  %v1680_v32 = vpop.f32.mrb[22].mxu0  ;;  %v1555_v29 = vunpack.c.l.bf16 (!%p1505_p11), %v1618_v20  ;;  %v1071_v30 = vld [vmem:[#allocation2 + $0x38] sm:$0xff] (!%p1505_p11) }
 0x159   : > { %v1681_v34 = vpop.f32.mrb[23].mxu0 }
 0x15a   : > { %v1006_v35 = vadd.f32 %v1737_v53, %v1679_v31  ;;  %v1682_v36 = vadd.f32 %v1681_v34, %v1680_v32  ;;  %v1114_v32 = vadd.f32 (!%p1505_p11), %v2095_v6, %v1091_v23  ;;  %v1556_v34 = vunpack.c.h.bf16 (!%p1505_p11), %v1618_v20 }
 0x15c   : > { %v1038_v38 = vadd.f32 %v1006_v35, %v476_v33  ;;  %v1009_v39 = vadd.f32 %v1738_v59, %v1682_v36  ;;  %v1115_v33 = vadd.f32 (!%p1505_p11), %v2095_v6, %v1092_v24  ;;  %v1619_v35 = vld [vmem:[%s2194_s4 + $0x18] sm:$0xff] (!%p1505_p11)   ;;  %v1174_v36 = vmax.f32 (!%p1505_p11), %v1158_v26, 0.0 }
 0x15e   : > { %1054 = vst [vmem:[#allocation2 + $0x50] sm:$0xff] %v1038_v38  ;;  %v1039_v40 = vadd.f32 %v1009_v39, %v477_v37  ;;  %v1683_v41 = vpop.f32.mrb[24].mxu0  ;;  %v1093_v39 = vmul.f32 (!%p1505_p11), %v2088_v3, %v1070_v25 }
 0x15f   : > { %v1684_v42 = vpop.f32.mrb[25].mxu0 }
 0x160   : > { %1055 = vst [vmem:[#allocation2 + $0x58] sm:$0xff] %v1039_v40  ;;  %v1685_v43 = vadd.f32 %v1684_v42, %v1683_v41  ;;  %v1686_v44 = vpop.f32.mrb[26].mxu0  ;;  %v1162_v41 = vadd.f32 (!%p1505_p11), %v1555_v29, %v1114_v32  ;;  %v1163_v42 = vadd.f32 (!%p1505_p11), %v1556_v34, %v1115_v33  ;;  %v1623_v29 = vld [vmem:[%s2194_s4 + $0x38] sm:$0xff] (!%p1505_p11)  }
 0x161   : > { %v1687_v45 = vpop.f32.mrb[27].mxu0 }
 0x162   : > { %v1688_v47 = vadd.f32 %v1687_v45, %v1686_v44  ;;  %v1014_v48 = vadd.f32 %v1685_v43, %v1013_v8  ;;  %v1066_v8 = vld [vmem:[#allocation2 + $0x10] sm:$0xff] (!%p1505_p11)  ;;  %v1094_v43 = vmul.f32 (!%p1505_p11), %v2088_v3, %v1071_v30  ;;  %v1072_v44 = vld [vmem:[#allocation2 + $0x40] sm:$0xff] (!%p1505_p11)  ;;  %v1073_v45 = vld [vmem:[#allocation2 + $0x48] sm:$0xff] (!%p1505_p11) }
 0x163   : > { %v1089_v12 = vmul.f32 (!%p1505_p11), %v2088_v3, %v1066_v8 }
 0x164   : > { %v1040_v50 = vadd.f32 %v1014_v48, %v478_v46  ;;  %v1017_v51 = vadd.f32 %v1688_v47, %v1016_v13  ;;  %v1617_v13 = vld [vmem:[%s2194_s4 + $0x8] sm:$0xff] (!%p1505_p11)   ;;  %v1116_v48 = vadd.f32 (!%p1505_p11), %v2095_v6, %v1093_v39 }
 0x165   : > { %v1551_v18 = vunpack.c.l.bf16 (!%p1505_p11), %v1617_v13  ;;  %v1112_v21 = vadd.f32 (!%p1505_p11), %v2095_v6, %v1089_v12  ;;  %v1552_v22 = vunpack.c.h.bf16 (!%p1505_p11), %v1617_v13 }
 0x166   : > { %1056 = vst [vmem:[#allocation2 + $0x60] sm:$0xff] %v1040_v50  ;;  %v1041_v52 = vadd.f32 %v1017_v51, %v479_v49  ;;  %v1689_v53 = vpop.f32.mrb[28].mxu0  ;;  %v1559_v49 = vunpack.c.l.bf16 (!%p1505_p11), %v1619_v35  ;;  %v1620_v50 = vld [vmem:[%s2194_s4 + $0x20] sm:$0xff] (!%p1505_p11)   ;;  %v1178_v51 = vmax.f32 (!%p1505_p11), %v1162_v41, 0.0  ;;  %v1575_v41 = vunpack.c.l.bf16 (!%p1505_p11), %v1623_v29 }
 0x167   : > { %v1690_v54 = vpop.f32.mrb[29].mxu0  ;;  %v1160_v31 = vadd.f32 (!%p1505_p11), %v1551_v18, %v1112_v21  ;;  %v1564_v1 = vunpack.c.h.bf16 (!%p1505_p11), %v1620_v50 }
 0x168   : > { %1057 = vst [vmem:[#allocation2 + $0x68] sm:$0xff] %v1041_v52  ;;  %v1691_v55 = vadd.f32 %v1690_v54, %v1689_v53  ;;  %v1692_v56 = vpop.f32.mrb[30].mxu0  ;;  %v1179_v52 = vmax.f32 (!%p1505_p11), %v1163_v42, 0.0  ;;  %v1117_v53 = vadd.f32 (!%p1505_p11), %v2095_v6, %v1094_v43  ;;  %v1560_v54 = vunpack.c.h.bf16 (!%p1505_p11), %v1619_v35 }
 0x169   : > { %v1693_v58 = vpop.f32.mrb[31].mxu0  ;;  %v1176_v40 = vmax.f32 (!%p1505_p11), %v1160_v31, 0.0 }
 0x16a   : > { %v1022_v59 = vadd.f32 %v1741_v5, %v1691_v55  ;;  %v1694_v60 = vadd.f32 %v1693_v58, %v1692_v56  ;;  %1063 = sbr.rel (%p1505_p11) target bundleno = 387 (0x183), region = 74  ;;  %v1088_v5 = vmul.f32 (!%p1505_p11), %v2088_v3, %v1065_v2  ;;  %v1074_v55 = vld [vmem:[#allocation2 + $0x50] sm:$0xff] (!%p1505_p11)  ;;  %v1095_v58 = vmul.f32 (!%p1505_p11), %v2088_v3, %v1072_v44 }
 0x16b   : > { %v1097_v8 = vmul.f32 (!%p1505_p11), %v2088_v3, %v1074_v55  ;;  %v1576_v44 = vunpack.c.h.bf16 (!%p1505_p11), %v1623_v29 }
 0x16c   : > { %v1042_v62 = vadd.f32 %v1022_v59, %v480_v57  ;;  %v1025_v63 = vadd.f32 %v1742_v11, %v1694_v60  ;;  %v1067_v11 = vld [vmem:[#allocation2 + $0x18] sm:$0xff] (!%p1505_p11)  ;;  %v1111_v16 = vadd.f32 (!%p1505_p11), %v2095_v6, %v1088_v5  ;;  %v1164_v57 = vadd.f32 (!%p1505_p11), %v1559_v49, %v1116_v48 }
 0x16d   : > { %v1090_v17 = vmul.f32 (!%p1505_p11), %v2088_v3, %v1067_v11  ;;  %v1096_v59 = vmul.f32 (!%p1505_p11), %v2088_v3, %v1073_v45  ;;  %v1075_v60 = vld [vmem:[#allocation2 + $0x58] sm:$0xff] (!%p1505_p11)  ;;  %v1076_v2 = vld [vmem:[#allocation2 + $0x60] sm:$0xff] (!%p1505_p11)  ;;  %v1118_v5 = vadd.f32 (!%p1505_p11), %v2095_v6, %v1095_v58 }
 0x16e   : > { %1058 = vst [vmem:[#allocation2 + $0x70] sm:$0xff] %v1042_v62  ;;  %v1043_v0 = vadd.f32 %v1025_v63, %v481_v61  ;;  %v1159_v27 = vadd.f32 (!%p1505_p11), %v1548_v10, %v1111_v16  ;;  %v1621_v61 = vld [vmem:[%s2194_s4 + $0x28] sm:$0xff] (!%p1505_p11)   ;;  %v1590_v62 = vpack.c.bf16 (!%p1505_p11), %v1179_v52, %v1178_v51  ;;  %v1165_v63 = vadd.f32 (!%p1505_p11), %v1560_v54, %v1117_v53  ;;  %v1622_v10 = vld [vmem:[%s2194_s4 + $0x30] sm:$0xff] (!%p1505_p11)  }
 0x16f   : > { %v1113_v28 = vadd.f32 (!%p1505_p11), %v2095_v6, %v1090_v17  ;;  %v1180_v4 = vmax.f32 (!%p1505_p11), %v1164_v57, 0.0  ;;  %v1119_v7 = vadd.f32 (!%p1505_p11), %v2095_v6, %v1096_v59  ;;  %v1077_v9 = vld [vmem:[#allocation2 + $0x68] sm:$0xff] (!%p1505_p11)  ;;  %v1098_v12 = vmul.f32 (!%p1505_p11), %v2088_v3, %v1075_v60 }
 0x170   : > { %1059 = vst [vmem:[#allocation2 + $0x78] sm:$0xff] %v1043_v0  ;;  %v1175_v37 = vmax.f32 (!%p1505_p11), %v1159_v27, 0.0  ;;  %v1563_v0 = vunpack.c.l.bf16 (!%p1505_p11), %v1620_v50  ;;  %1625 = vst [vmem:[%s2195_s5 + $0x10] sm:$0xff] (!%p1505_p11), %v1590_v62   ;;  %v1181_v11 = vmax.f32 (!%p1505_p11), %v1165_v63, 0.0  ;;  %v1567_v13 = vunpack.c.l.bf16 (!%p1505_p11), %v1621_v61 }
 0x171   : > { %v1161_v38 = vadd.f32 %v1552_v22, %v1113_v28  ;;  %v1568_v14 = vunpack.c.h.bf16 %v1621_v61  ;;  %v1167_v16 = vadd.f32 %v1564_v1, %v1119_v7  ;;  %v1120_v17 = vadd.f32 %v2095_v6, %v1097_v8 }
 0x172   : > { %v1580_v46 = vpack.c.bf16 %v1175_v37, %v1174_v36  ;;  %v1166_v15 = vadd.f32 %v1563_v0, %v1118_v5  ;;  %v1099_v18 = vmul.f32 %v2088_v3, %v1076_v2  ;;  %v1595_v20 = vpack.c.bf16 %v1181_v11, %v1180_v4 }
 0x173   : > { %v1177_v47 = vmax.f32 %v1161_v38, 0.0  ;;  %v1121_v21 = vadd.f32 %v2095_v6, %v1098_v12  ;;  %v1100_v22 = vmul.f32 %v2088_v3, %v1077_v9  ;;  %v1571_v23 = vunpack.c.l.bf16 %v1622_v10 }
 0x174   : > { %1581 = vst [vmem:[%s2195_s5] sm:$0xff] %v1580_v46   ;;  %v1182_v25 = vmax.f32 %v1166_v15, 0.0  ;;  %v1183_v26 = vmax.f32 %v1167_v16, 0.0  ;;  %v1168_v27 = vadd.f32 %v1567_v13, %v1120_v17  ;;  %v1122_v28 = vadd.f32 %v2095_v6, %v1099_v18  ;;  %1626 = vst [vmem:[%s2195_s5 + $0x18] sm:$0xff] %v1595_v20  }
 0x175   : > { %v1585_v56 = vpack.c.bf16 %v1177_v47, %v1176_v40  ;;  %v1078_v19 = vld [vmem:[#allocation2 + $0x70] sm:$0xff]  ;;  %v1169_v30 = vadd.f32 %v1568_v14, %v1121_v21  ;;  %v1123_v31 = vadd.f32 %v2095_v6, %v1100_v22  ;;  %v1572_v32 = vunpack.c.h.bf16 %v1622_v10 }
 0x176   : > { %v1101_v33 = vmul.f32 %v2088_v3, %v1078_v19  ;;  %v1600_v34 = vpack.c.bf16 %v1183_v26, %v1182_v25  ;;  %v1184_v35 = vmax.f32 %v1168_v27, 0.0  ;;  %v1170_v36 = vadd.f32 %v1571_v23, %v1122_v28 }
 0x177   : > { %1624 = vst [vmem:[%s2195_s5 + $0x8] sm:$0xff] %v1585_v56   ;;  %v1079_v24 = vld [vmem:[#allocation2 + $0x78] sm:$0xff]  ;;  %v1185_v38 = vmax.f32 %v1169_v30, 0.0  ;;  %v1171_v39 = vadd.f32 %v1572_v32, %v1123_v31 }
 0x178   : > { %v1102_v37 = vmul.f32 %v2088_v3, %v1079_v24  ;;  %v1124_v40 = vadd.f32 %v2095_v6, %v1101_v33  ;;  %1627 = vst [vmem:[%s2195_s5 + $0x20] sm:$0xff] %v1600_v34   ;;  %v1186_v42 = vmax.f32 %v1170_v36, 0.0 }
 0x179   : > { %v1605_v45 = vpack.c.bf16 %v1185_v38, %v1184_v35  ;;  %v1187_v46 = vmax.f32 %v1171_v39, 0.0 }
 0x17a   : > { %v1125_v43 = vadd.f32 %v2095_v6, %v1102_v37  ;;  %v1172_v47 = vadd.f32 %v1575_v41, %v1124_v40 }
 0x17b   : > { %1628 = vst [vmem:[%s2195_s5 + $0x28] sm:$0xff] %v1605_v45   ;;  %v1610_v3 = vpack.c.bf16 %v1187_v46, %v1186_v42 }
 0x17c   : > { %v1173_v48 = vadd.f32 %v1576_v44, %v1125_v43  ;;  %v1188_v49 = vmax.f32 %v1172_v47, 0.0 }
 0x17d   : > { %1629 = vst [vmem:[%s2195_s5 + $0x30] sm:$0xff] %v1610_v3  }
 0x17e   : > { %v1189_v50 = vmax.f32 %v1173_v48, 0.0 }
 0x180   : > { %v1615_v51 = vpack.c.bf16 %v1189_v50, %v1188_v49 }
 0x182   : > { %1630 = vst [vmem:[%s2195_s5 + $0x38] sm:$0xff] %v1615_v51  }
 0x183 PF: > { %s15_s22 = sadd.s32 1, %s1880_s22   ;;  %s2196_s18 = smov %s1868_s19 }
 0x184   : > { %p12_p12 = scmp.ge.s32.totalorder %s15_s22, 4   ;;  %s2197_s19 = smov %s1948_s26 }
 0x185   : > { %s2198_s20 = smov %s1876_s21  ;;  %s2199_s21 = smov %s2201_s23 }
 0x186   :  { %14 = sbr.rel (!%p12_p12) target bundleno = 3 (0x3), region = 127 }

// kernel: mnist_resnet_forward.24
= control target key start
LH: loop header
LB: loop body
LE: loop exit
PB: predicated region body
PF: predicated region fallthrough
CT: control target
= control target key end

     0   :  { %s1742_s15 = smov 0   ;;  %s1744_s16 = smov 0   ;;  %s1995_s0 = inlined_call_operand.vmem [shape: bf16[128,768], index: 0, kind: input, shape index: {}]   ;;  %s1996_s1 = inlined_call_operand.vmem [shape: bf16[768,128], index: 1, kind: input, shape index: {}]   ;;  %s1997_s2 = inlined_call_operand.vmem [shape: f32[1,128], index: 2, kind: input, shape index: {}]   ;;  %s1998_s3 = inlined_call_operand.vmem [shape: f32[1,128], index: 3, kind: input, shape index: {}]   ;;  %s1999_s4 = inlined_call_operand.vmem [shape: bf16[128,128], index: 4, kind: output, shape index: {}]  }
   0x1   :  { %s1746_s17 = smov 0   ;;  %s1748_s18 = smov 0  }
   0x2   :  { %s1750_s19 = smov 0  }
   0x3 LB: > { %s26_s20 = sadd.s32 1, %s1710_s18  ;;  %p49_p1 = scmp.ne.s32.totalorder %s1702_s16, %s1698_s15  ;;  %s1714_s19 = sphi %s1750_s19, %s14_s19   ;;  %s1710_s18 = sphi %s1748_s18, %s2003_s18   ;;  %s1706_s17 = sphi %s1746_s17, %s2002_s17   ;;  %s1702_s16 = sphi %s1744_s16, %s2001_s16   ;;  %s1698_s15 = sphi %s1742_s15, %s2000_s15  }
   0x4   : > { %p27_p0 = scmp.ge.s32.totalorder %s26_s20, 2  ;;  %p50_p2 = scmp.eq.s32.totalorder %s1714_s19, 0 }
   0x5   : > { %s42_s22 = sadd.s32 1, %s1702_s16  ;;  %p1293_p5 = scmp.ge.s32.totalorder %s1714_s19, 2 }
   0x6   : > { %s2005_s20 = smov (%p27_p0, %s26_s20), 0  ;;  %p51_p3 = por %p50_p2, %p49_p1 }
   0x7   : > { %s38_s21 = ssub.s32 %s1710_s18, %s2005_s20  ;;  %195 = sbr.rel (%p1293_p5) target bundleno = 37 (0x25), region = 24 }
   0x8   : > { %p40_p4 = scmp.eq.s32.totalorder %s38_s21, 0 }
   0xa   : > { %s1777_s23 = scalar_select %p40_p4, %s1702_s16, %s42_s22  }
   0xe   : > { %198 = sbr.rel (!%p51_p3) target bundleno = 37 (0x25), region = 28  ;;  %s200_s24 = sand.u32 (%p51_p3), 1, %s1702_s16  }
   0xf   : > { %s1401_s25 = smul.u32 (%p51_p3), 12, %s1710_s18 }
  0x10   : > { %s1577_s26 = smul.u32 (%p51_p3), 192, %s200_s24 }
  0x11   : > { %s1785_s29 = scalar_lea.vmem (%p51_p3), %s1995_s0, %s1401_s25 }
  0x12   : > { %v223_v0 = vld [vmem:[%s1785_s29] sm:$0xff] (%p51_p3)  ;;  %v225_v1 = vld [vmem:[%s1785_s29 + $0x18] sm:$0xff] (%p51_p3)  ;;  %v227_v2 = vld [vmem:[%s1785_s29 + $0x30] sm:$0xff] (%p51_p3)  ;;  %s1790_s30 = scalar_lea.vmem (%p51_p3), [#allocation3], %s1577_s26 }
  0x13   : > { %224 = vst [vmem:[%s1790_s30] sm:$0xff] (%p51_p3), %v223_v0  ;;  %226 = vst [vmem:[%s1790_s30 + $0xc] sm:$0xff] (%p51_p3), %v225_v1  ;;  %v229_v3 = vld [vmem:[%s1785_s29 + $0x48] sm:$0xff] (%p51_p3)  ;;  %v231_v4 = vld [vmem:[%s1785_s29 + $0x60] sm:$0xff] (%p51_p3) }
  0x14   : > { %228 = vst [vmem:[%s1790_s30 + $0x18] sm:$0xff] (%p51_p3), %v227_v2  ;;  %v233_v5 = vld [vmem:[%s1785_s29 + $0x78] sm:$0xff] (%p51_p3)  ;;  %230 = vst [vmem:[%s1790_s30 + $0x24] sm:$0xff] (%p51_p3), %v229_v3  ;;  %v235_v6 = vld [vmem:[%s1785_s29 + $0x90] sm:$0xff] (%p51_p3) }
  0x15   : > { %232 = vst [vmem:[%s1790_s30 + $0x30] sm:$0xff] %v231_v4  ;;  %234 = vst [vmem:[%s1790_s30 + $0x3c] sm:$0xff] %v233_v5  ;;  %v237_v7 = vld [vmem:[%s1785_s29 + $0xa8] sm:$0xff]  ;;  %v239_v8 = vld [vmem:[%s1785_s29 + $0xc0] sm:$0xff] }
  0x16   : > { %236 = vst [vmem:[%s1790_s30 + $0x48] sm:$0xff] %v235_v6  ;;  %238 = vst [vmem:[%s1790_s30 + $0x54] sm:$0xff] %v237_v7  ;;  %v241_v9 = vld [vmem:[%s1785_s29 + $0xd8] sm:$0xff]  ;;  %v243_v10 = vld [vmem:[%s1785_s29 + $0xf0] sm:$0xff] }
  0x17   : > { %240 = vst [vmem:[%s1790_s30 + $0x60] sm:$0xff] %v239_v8  ;;  %v245_v11 = vld [vmem:[%s1785_s29 + $0x108] sm:$0xff]  ;;  %242 = vst [vmem:[%s1790_s30 + $0x6c] sm:$0xff] %v241_v9  ;;  %v247_v12 = vld [vmem:[%s1785_s29 + $0x120] sm:$0xff] }
  0x18   : > { %244 = vst [vmem:[%s1790_s30 + $0x78] sm:$0xff] %v243_v10  ;;  %246 = vst [vmem:[%s1790_s30 + $0x84] sm:$0xff] %v245_v11  ;;  %v249_v13 = vld [vmem:[%s1785_s29 + $0x138] sm:$0xff]  ;;  %v251_v14 = vld [vmem:[%s1785_s29 + $0x150] sm:$0xff] }
  0x19   : > { %248 = vst [vmem:[%s1790_s30 + $0x90] sm:$0xff] %v247_v12  ;;  %250 = vst [vmem:[%s1790_s30 + $0x9c] sm:$0xff] %v249_v13  ;;  %v253_v15 = vld [vmem:[%s1785_s29 + $0x168] sm:$0xff]  ;;  %v1297_v17 = vld [vmem:[%s1785_s29 + $0x20] sm:$0xf] }
  0x1a   : > { %252 = vst [vmem:[%s1790_s30 + $0xa8] sm:$0xff] %v251_v14  ;;  %v1295_v16 = vld [vmem:[%s1785_s29 + $0x8] sm:$0xf]  ;;  %254 = vst [vmem:[%s1790_s30 + $0xb4] sm:$0xff] %v253_v15  ;;  %v1299_v18 = vld [vmem:[%s1785_s29 + $0x38] sm:$0xf] }
  0x1b   : > { %1296 = vst [vmem:[%s1790_s30 + $0x8] sm:$0xf] %v1295_v16  ;;  %1298 = vst [vmem:[%s1790_s30 + $0x14] sm:$0xf] %v1297_v17  ;;  %v1301_v19 = vld [vmem:[%s1785_s29 + $0x50] sm:$0xf] }
  0x1c   : > { %v1303_v20 = vld [vmem:[%s1785_s29 + $0x68] sm:$0xf]  ;;  %1300 = vst [vmem:[%s1790_s30 + $0x20] sm:$0xf] %v1299_v18  ;;  %1302 = vst [vmem:[%s1790_s30 + $0x2c] sm:$0xf] %v1301_v19 }
  0x1d   : > { %1304 = vst [vmem:[%s1790_s30 + $0x38] sm:$0xf] %v1303_v20  ;;  %v1305_v21 = vld [vmem:[%s1785_s29 + $0x80] sm:$0xf]  ;;  %v1307_v22 = vld [vmem:[%s1785_s29 + $0x98] sm:$0xf] }
  0x1e   : > { %v1309_v23 = vld [vmem:[%s1785_s29 + $0xb0] sm:$0xf]  ;;  %1306 = vst [vmem:[%s1790_s30 + $0x44] sm:$0xf] %v1305_v21  ;;  %1308 = vst [vmem:[%s1790_s30 + $0x50] sm:$0xf] %v1307_v22 }
  0x1f   : > { %1310 = vst [vmem:[%s1790_s30 + $0x5c] sm:$0xf] %v1309_v23  ;;  %v1311_v24 = vld [vmem:[%s1785_s29 + $0xc8] sm:$0xf]  ;;  %v1313_v25 = vld [vmem:[%s1785_s29 + $0xe0] sm:$0xf] }
  0x20   : > { %v1315_v26 = vld [vmem:[%s1785_s29 + $0xf8] sm:$0xf]  ;;  %1312 = vst [vmem:[%s1790_s30 + $0x68] sm:$0xf] %v1311_v24  ;;  %1314 = vst [vmem:[%s1790_s30 + $0x74] sm:$0xf] %v1313_v25 }
  0x21   : > { %1316 = vst [vmem:[%s1790_s30 + $0x80] sm:$0xf] %v1315_v26  ;;  %v1317_v27 = vld [vmem:[%s1785_s29 + $0x110] sm:$0xf]  ;;  %v1319_v28 = vld [vmem:[%s1785_s29 + $0x128] sm:$0xf] }
  0x22   : > { %v1321_v29 = vld [vmem:[%s1785_s29 + $0x140] sm:$0xf]  ;;  %1318 = vst [vmem:[%s1790_s30 + $0x8c] sm:$0xf] %v1317_v27  ;;  %1320 = vst [vmem:[%s1790_s30 + $0x98] sm:$0xf] %v1319_v28 }
  0x23   : > { %1322 = vst [vmem:[%s1790_s30 + $0xa4] sm:$0xf] %v1321_v29  ;;  %v1323_v30 = vld [vmem:[%s1785_s29 + $0x158] sm:$0xf]  ;;  %v1325_v31 = vld [vmem:[%s1785_s29 + $0x170] sm:$0xf] }
  0x24   : > { %1324 = vst [vmem:[%s1790_s30 + $0xb0] sm:$0xf] %v1323_v30  ;;  %1326 = vst [vmem:[%s1790_s30 + $0xbc] sm:$0xf] %v1325_v31 }
  0x25 PF: > { %p1327_p6 = scmp.ge.s32.totalorder %s1714_s19, 1  ;;  %p310_p7 = scmp.lt.s32.totalorder %s1714_s19, 3 }
  0x27   : > { %p311_p8 = pnand %p1327_p6, %p310_p7 }
  0x28   : > { %s317_s5 = sand.u32 (!%p311_p8), 1, %s1698_s15   ;;  %s361_s6 = smul.u32 (!%p311_p8), 48, %s1706_s17 }
  0x29   : > { %314 = sbr.rel (%p311_p8) target bundleno = 385 (0x181), region = 58  ;;  %p1329_p10 = scmp.ne.s32.totalorder (!%p311_p8), %s1706_s17, 0 }
  0x2a   : > { %s1578_s7 = smul.u32 (!%p311_p8), 192, %s317_s5  ;;  %p362_p9 = scmp.lt.s32.totalorder (!%p311_p8), %s361_s6, 95 }
  0x2c   : > { %s1862_s12 = scalar_lea.vmem (!%p311_p8), [#allocation3], %s1578_s7 }
  0x30   : > { %s2007_s6 = smov (!%p362_p9, %s361_s6), 95  ;;  %389 = sbr.rel (%p1329_p10) target bundleno = 58 (0x3a), region = 66 }
  0x31   : > { %s1328_s8 = sshll.u32 %s2007_s6, 2  ;;  %v1716_v32 = vmov (!%p1329_p10), 0.0  }
  0x32   : > { %s1860_s11 = scalar_lea.vmem %s1996_s1, %s1328_s8  ;;  %390 = vst [vmem:[#allocation2] sm:$0xff] (!%p1329_p10), %v1716_v32  ;;  %391 = vst [vmem:[#allocation2 + $0x8] sm:$0xff] (!%p1329_p10), %v1716_v32 }
  0x33   : > { %392 = vst [vmem:[#allocation2 + $0x10] sm:$0xff] (!%p1329_p10), %v1716_v32  ;;  %393 = vst [vmem:[#allocation2 + $0x18] sm:$0xff] (!%p1329_p10), %v1716_v32 }
  0x34   : > { %394 = vst [vmem:[#allocation2 + $0x20] sm:$0xff] (!%p1329_p10), %v1716_v32  ;;  %395 = vst [vmem:[#allocation2 + $0x28] sm:$0xff] (!%p1329_p10), %v1716_v32 }
  0x35   : > { %396 = vst [vmem:[#allocation2 + $0x30] sm:$0xff] (!%p1329_p10), %v1716_v32  ;;  %397 = vst [vmem:[#allocation2 + $0x38] sm:$0xff] (!%p1329_p10), %v1716_v32 }
  0x36   : > { %398 = vst [vmem:[#allocation2 + $0x40] sm:$0xff] (!%p1329_p10), %v1716_v32  ;;  %399 = vst [vmem:[#allocation2 + $0x48] sm:$0xff] (!%p1329_p10), %v1716_v32 }
  0x37   : > { %400 = vst [vmem:[#allocation2 + $0x50] sm:$0xff] %v1716_v32  ;;  %401 = vst [vmem:[#allocation2 + $0x58] sm:$0xff] %v1716_v32 }
  0x38   : > { %402 = vst [vmem:[#allocation2 + $0x60] sm:$0xff] %v1716_v32  ;;  %403 = vst [vmem:[#allocation2 + $0x68] sm:$0xff] %v1716_v32 }
  0x39   : > { %404 = vst [vmem:[#allocation2 + $0x70] sm:$0xff] %v1716_v32  ;;  %405 = vst [vmem:[#allocation2 + $0x78] sm:$0xff] %v1716_v32 }
  0x3a PF: > { %v1620_v33 = vld [vmem:[%s1860_s11 + $0x40] sm:$0xff]   ;;  %v1623_v36 = vld [vmem:[%s1860_s11 + $0x48] sm:$0xff]   ;;  %v1626_v39 = vld [vmem:[%s1860_s11 + $0x50] sm:$0xff]   ;;  %p1378_p11 = scmp.ne.s32.totalorder %s1706_s17, 1 }
  0x3b   : > { %v1621_v34 = vld [vmem:[%s1860_s11] sm:$0xff]   ;;  %1465 = vmatprep.subr.bf16.mxu0 %v1620_v33  ;;  %v1624_v37 = vld [vmem:[%s1860_s11 + $0x8] sm:$0xff]   ;;  %v1627_v40 = vld [vmem:[%s1860_s11 + $0x10] sm:$0xff]  }
  0x3c   : > { %v1622_v35 = vld [vmem:[%s1860_s11 + $0x80] sm:$0xff]   ;;  %1466 = vmatpush3.bf16.msra.mxu0 %v1621_v34  ;;  %v1625_v38 = vld [vmem:[%s1860_s11 + $0x88] sm:$0xff]   ;;  %v1628_v41 = vld [vmem:[%s1860_s11 + $0x90] sm:$0xff]  }
  0x3d   : > { %1545 = vmatprep.subr.bf16.mxu1 %v1622_v35  ;;  %1467 = vmatprep.subr.bf16.mxu0 %v1623_v36  ;;  %v1629_v42 = vld [vmem:[%s1860_s11 + $0x58] sm:$0xff]   ;;  %v1632_v45 = vld [vmem:[%s1860_s11 + $0x60] sm:$0xff]   ;;  %v1635_v48 = vld [vmem:[%s1860_s11 + $0x68] sm:$0xff]  }
  0x3e   : > { %1546 = vmatpush3.bf16.msra.mxu1 %v1622_v35  ;;  %v1630_v43 = vld [vmem:[%s1860_s11 + $0x18] sm:$0xff]   ;;  %v1634_v46 = vld [vmem:[%s1860_s11 + $0xa0] sm:$0xff]   ;;  %v1637_v49 = vld [vmem:[%s1860_s11 + $0xa8] sm:$0xff]  }
  0x3f   : > { %1547 = vmatprep.subr.bf16.mxu1 %v1625_v38  ;;  %v1631_v44 = vld [vmem:[%s1860_s11 + $0x98] sm:$0xff]   ;;  %v1633_v47 = vld [vmem:[%s1860_s11 + $0x20] sm:$0xff]   ;;  %v1636_v50 = vld [vmem:[%s1860_s11 + $0x28] sm:$0xff]  }
  0x40   : > { %1468 = vmatpush3.bf16.msra.mxu0 %v1624_v37  ;;  %v1638_v51 = vld [vmem:[%s1860_s11 + $0x70] sm:$0xff]   ;;  %v1641_v54 = vld [vmem:[%s1860_s11 + $0x78] sm:$0xff]   ;;  %v1644_v59 = vld [vmem:[%s1862_s12] ss:$12 sps:$4 sm:$0xff]  }
  0x41   : > { %1469 = vmatprep.subr.bf16.mxu0 %v1626_v39  ;;  %v1639_v52 = vld [vmem:[%s1860_s11 + $0x30] sm:$0xff]   ;;  %v1643_v55 = vld [vmem:[%s1860_s11 + $0xb8] sm:$0xff]   ;;  %v1648_v61 = vld [vmem:[%s1862_s12 + $0x20] ss:$12 sps:$4 sm:$0xff]  }
  0x42   : > { %1548 = vmatpush3.bf16.msra.mxu1 %v1625_v38  ;;  %v1640_v53 = vld [vmem:[%s1860_s11 + $0xb0] sm:$0xff]   ;;  %v1642_v58 = vld [vmem:[%s1860_s11 + $0x38] sm:$0xff]   ;;  %v1664_v5 = vld [vmem:[%s1862_s12 + $0x80] ss:$12 sps:$4 sm:$0xff]  }
  0x43   : > { %1549 = vmatprep.subr.bf16.mxu1 %v1628_v41  ;;  %v1646_v56 = vld [vmem:[%s1862_s12 + $0x4] ss:$12 sps:$4 sm:$0xff]   ;;  %v1647_v57 = vld [vmem:[%s1862_s12 + $0x8] ss:$12 sps:$4 sm:$0xff]   ;;  %v1657_v4 = vld [vmem:[%s1862_s12 + $0x4c] ss:$12 sps:$4 sm:$0xff]  }
  0x44   : > { %1470 = vmatpush3.bf16.msra.mxu0 %v1627_v40  ;;  %806 = vmatprep.mubr.bf16.mxu0 %v1646_v56  ;;  %v1649_v60 = vld [vmem:[%s1862_s12 + $0x1c] ss:$12 sps:$4 sm:$0xff]   ;;  %v1655_v62 = vld [vmem:[%s1862_s12 + $0x38] ss:$12 sps:$4 sm:$0xff]   ;;  %v1652_v0 = vld [vmem:[%s1862_s12 + $0x34] ss:$12 sps:$4 sm:$0xff]  }
  0x45   : > { %1471 = vmatprep.subr.bf16.mxu0 %v1629_v42  ;;  %1561 = vmatprep.mubr.bf16.mxu1 %v1647_v57  ;;  %v1651_v63 = vld [vmem:[%s1862_s12 + $0x18] ss:$12 sps:$4 sm:$0xff]   ;;  %v1656_v1 = vld [vmem:[%s1862_s12 + $0x50] ss:$12 sps:$4 sm:$0xff]   ;;  %v1663_v2 = vld [vmem:[%s1862_s12 + $0x68] ss:$12 sps:$4 sm:$0xff]  }
  0x46   : > { %1550 = vmatpush3.bf16.msra.mxu1 %v1628_v41  ;;  %v1654_v3 = vld [vmem:[%s1862_s12 + $0x30] ss:$12 sps:$4 sm:$0xff]   ;;  %v1671_v6 = vld [vmem:[%s1862_s12 + $0x98] ss:$12 sps:$4 sm:$0xff]   ;;  %v1659_v7 = vld [vmem:[%s1862_s12 + $0x48] ss:$12 sps:$4 sm:$0xff]  }
  0x47   : > { %1551 = vmatprep.subr.bf16.mxu1 %v1631_v44  ;;  %v1660_v8 = vld [vmem:[%s1862_s12 + $0x64] ss:$12 sps:$4 sm:$0xff]   ;;  %v1662_v10 = vld [vmem:[%s1862_s12 + $0x60] ss:$12 sps:$4 sm:$0xff]   ;;  %v1665_v11 = vld [vmem:[%s1862_s12 + $0x7c] ss:$12 sps:$4 sm:$0xff]  }
  0x48   : > { %1472 = vmatpush3.bf16.msra.mxu0 %v1630_v43  ;;  %v1672_v9 = vld [vmem:[%s1862_s12 + $0xb0] ss:$12 sps:$4 sm:$0xff]   ;;  %v1667_v12 = vld [vmem:[%s1862_s12 + $0x78] ss:$12 sps:$4 sm:$0xff]   ;;  %v1668_v13 = vld [vmem:[%s1862_s12 + $0x94] ss:$12 sps:$4 sm:$0xff]  }
  0x49   : > { %1473 = vmatprep.subr.bf16.mxu0 %v1632_v45  ;;  %v1670_v14 = vld [vmem:[%s1862_s12 + $0x90] ss:$12 sps:$4 sm:$0xff]   ;;  %v1673_v15 = vld [vmem:[%s1862_s12 + $0xac] ss:$12 sps:$4 sm:$0xff]   ;;  %v1675_v16 = vld [vmem:[%s1862_s12 + $0xa8] ss:$12 sps:$4 sm:$0xff]  }
  0x4a   : > { %1552 = vmatpush3.bf16.msra.mxu1 %v1631_v44  ;;  %v406_v23 = vld [vmem:[#allocation2] sm:$0xff]  ;;  %v407_v28 = vld [vmem:[#allocation2 + $0x8] sm:$0xff]  ;;  %v408_v38 = vld [vmem:[#allocation2 + $0x10] sm:$0xff] }
  0x4b   : > { %1553 = vmatprep.subr.bf16.mxu1 %v1634_v46  ;;  %v409_v44 = vld [vmem:[#allocation2 + $0x18] sm:$0xff] }
  0x4c   : > { %1474 = vmatpush3.bf16.msra.mxu0 %v1633_v47 }
  0x4d   : > { %1475 = vmatprep.subr.bf16.mxu0 %v1635_v48 }
  0x4e   : > { %1554 = vmatpush3.bf16.msra.mxu1 %v1634_v46 }
  0x4f   : > { %1555 = vmatprep.subr.bf16.mxu1 %v1637_v49 }
  0x50   : > { %1476 = vmatpush3.bf16.msra.mxu0 %v1636_v50 }
  0x51   : > { %1477 = vmatprep.subr.bf16.mxu0 %v1638_v51 }
  0x52   : > { %1556 = vmatpush3.bf16.msra.mxu1 %v1637_v49 }
  0x53   : > { %1557 = vmatprep.subr.bf16.mxu1 %v1640_v53 }
  0x54   : > { %1478 = vmatpush3.bf16.msra.mxu0 %v1639_v52 }
  0x55   : > { %1479 = vmatprep.subr.bf16.mxu0 %v1641_v54 }
  0x56   : > { %1558 = vmatpush3.bf16.msra.mxu1 %v1640_v53 }
  0x57   : > { %1559 = vmatprep.subr.bf16.mxu1 %v1643_v55 }
  0x58   : > { %1480 = vmatpush3.bf16.msra.mxu0 %v1642_v58 }
  0x5a   : > { %1560 = vmatpush3.bf16.msra.mxu1 %v1643_v55  ;;  %v410_v55 = vld [vmem:[#allocation2 + $0x20] sm:$0xff] }
  0x5b   : > { %807 = vmatmul.mubr.bf16.vlgmr.msra.gmra.mrb[0].mxu0 %v1644_v59 }
  0x5c   : > { %814 = vmatprep.mubr.bf16.mxu0 %v1649_v60  ;;  %v411_v60 = vld [vmem:[#allocation2 + $0x28] sm:$0xff] }
  0x5d   : > { %1562 = vmatmul.mubr.bf16.vlgmr.msra.gmra.mrb[0].mxu1 %v1648_v61 }
  0x5e   : > { %1565 = vmatprep.mubr.bf16.mxu1 %v1655_v62 }
  0x63   : > { %815 = vmatmul.mubr.bf16.gmra.mrb[4].mxu0 %v1651_v63 }
  0x64   : > { %822 = vmatprep.mubr.bf16.mxu0 %v1652_v0 }
  0x65   : > { %1566 = vmatmul.mubr.bf16.gmra.mrb[4].mxu1 %v1656_v1 }
  0x66   : > { %1569 = vmatprep.mubr.bf16.mxu1 %v1663_v2 }
  0x6b   : > { %823 = vmatmul.mubr.bf16.gmra.mrb[8].mxu0 %v1654_v3 }
  0x6c   : > { %830 = vmatprep.mubr.bf16.mxu0 %v1657_v4 }
  0x6d   : > { %1570 = vmatmul.mubr.bf16.gmra.mrb[8].mxu1 %v1664_v5 }
  0x6e   : > { %1573 = vmatprep.mubr.bf16.mxu1 %v1671_v6  ;;  %v412_v6 = vld [vmem:[#allocation2 + $0x30] sm:$0xff] }
  0x73   : > { %831 = vmatmul.mubr.bf16.gmra.mrb[12].mxu0 %v1659_v7 }
  0x74   : > { %838 = vmatprep.mubr.bf16.mxu0 %v1660_v8 }
  0x75   : > { %1574 = vmatmul.mubr.bf16.gmra.mrb[12].mxu1 %v1672_v9 }
  0x7b   : > { %839 = vmatmul.mubr.bf16.gmra.mrb[16].mxu0 %v1662_v10 }
  0x7c   : > { %846 = vmatprep.mubr.bf16.mxu0 %v1665_v11 }
  0x83   : > { %847 = vmatmul.mubr.bf16.gmra.mrb[20].mxu0 %v1667_v12  ;;  %v413_v12 = vld [vmem:[#allocation2 + $0x38] sm:$0xff] }
  0x84   : > { %854 = vmatprep.mubr.bf16.mxu0 %v1668_v13 }
  0x8b   : > { %855 = vmatmul.mubr.bf16.gmra.mrb[24].mxu0 %v1670_v14 }
  0x8c   : > { %862 = vmatprep.mubr.bf16.mxu0 %v1673_v15 }
  0x93   : > { %863 = vmatmul.mubr.bf16.gmra.mrb[28].mxu0 %v1675_v16 }
 0x12e   : > { %v1481_v17 = vpop.f32.mrb[0].mxu0 }
 0x12f   : > { %v1482_v18 = vpop.f32.mrb[1].mxu0 }
 0x130   : > { %v1483_v19 = vadd.f32 %v1482_v18, %v1481_v17  ;;  %v1484_v20 = vpop.f32.mrb[2].mxu0  ;;  %v1563_v21 = vpop.f32.mrb[0].mxu1 }
 0x131   : > { %v1485_v22 = vpop.f32.mrb[3].mxu0  ;;  %v905_v24 = vpop.f32.mrb[1].mxu1 }
 0x132   : > { %v1486_v25 = vadd.f32 %v1485_v22, %v1484_v20  ;;  %v906_v26 = vadd.f32 %v1483_v19, %v905_v24  ;;  %v1564_v27 = vpop.f32.mrb[2].mxu1  ;;  %v414_v22 = vld [vmem:[#allocation2 + $0x40] sm:$0xff] }
 0x133   : > { %v908_v29 = vpop.f32.mrb[3].mxu1 }
 0x134   : > { %v968_v30 = vadd.f32 %v906_v26, %v406_v23  ;;  %v909_v31 = vadd.f32 %v1486_v25, %v908_v29  ;;  %v415_v25 = vld [vmem:[#allocation2 + $0x48] sm:$0xff] }
 0x136   : > { %984 = vst [vmem:[#allocation2] sm:$0xff] %v968_v30  ;;  %v969_v32 = vadd.f32 %v909_v31, %v407_v28  ;;  %v1487_v33 = vpop.f32.mrb[4].mxu0 }
 0x137   : > { %v1488_v34 = vpop.f32.mrb[5].mxu0 }
 0x138   : > { %985 = vst [vmem:[#allocation2 + $0x8] sm:$0xff] %v969_v32  ;;  %v1489_v35 = vadd.f32 %v1488_v34, %v1487_v33  ;;  %v1490_v36 = vpop.f32.mrb[6].mxu0  ;;  %v1567_v37 = vpop.f32.mrb[4].mxu1  ;;  %v416_v33 = vld [vmem:[#allocation2 + $0x50] sm:$0xff] }
 0x139   : > { %v1491_v39 = vpop.f32.mrb[7].mxu0  ;;  %v921_v40 = vpop.f32.mrb[5].mxu1 }
 0x13a   : > { %v914_v41 = vadd.f32 %v1563_v21, %v1489_v35  ;;  %v1492_v42 = vadd.f32 %v1491_v39, %v1490_v36  ;;  %v1568_v43 = vpop.f32.mrb[6].mxu1 }
 0x13b   : > { %v924_v45 = vpop.f32.mrb[7].mxu1 }
 0x13c   : > { %v970_v46 = vadd.f32 %v914_v41, %v408_v38  ;;  %v917_v47 = vadd.f32 %v1564_v27, %v1492_v42 }
 0x13e   : > { %986 = vst [vmem:[#allocation2 + $0x10] sm:$0xff] %v970_v46  ;;  %v971_v48 = vadd.f32 %v917_v47, %v409_v44  ;;  %v1493_v49 = vpop.f32.mrb[8].mxu0  ;;  %v418_v46 = vld [vmem:[#allocation2 + $0x60] sm:$0xff] }
 0x13f   : > { %v1494_v50 = vpop.f32.mrb[9].mxu0 }
 0x140   : > { %987 = vst [vmem:[#allocation2 + $0x18] sm:$0xff] %v971_v48  ;;  %v1495_v51 = vadd.f32 %v1494_v50, %v1493_v49  ;;  %v1496_v52 = vpop.f32.mrb[10].mxu0  ;;  %v1571_v53 = vpop.f32.mrb[8].mxu1  ;;  %v419_v49 = vld [vmem:[#allocation2 + $0x68] sm:$0xff] }
 0x141   : > { %v1497_v54 = vpop.f32.mrb[11].mxu0  ;;  %v937_v56 = vpop.f32.mrb[9].mxu1 }
 0x142   : > { %v1498_v57 = vadd.f32 %v1497_v54, %v1496_v52  ;;  %v922_v58 = vadd.f32 %v1495_v51, %v921_v40  ;;  %v1572_v59 = vpop.f32.mrb[10].mxu1 }
 0x143   : > { %v940_v61 = vpop.f32.mrb[11].mxu1 }
 0x144   : > { %v972_v62 = vadd.f32 %v922_v58, %v410_v55  ;;  %v925_v63 = vadd.f32 %v1498_v57, %v924_v45  ;;  %v420_v57 = vld [vmem:[#allocation2 + $0x70] sm:$0xff] }
 0x146   : > { %988 = vst [vmem:[#allocation2 + $0x20] sm:$0xff] %v972_v62  ;;  %v973_v0 = vadd.f32 %v925_v63, %v411_v60  ;;  %v1499_v1 = vpop.f32.mrb[12].mxu0 }
 0x147   : > { %v1500_v2 = vpop.f32.mrb[13].mxu0 }
 0x148   : > { %989 = vst [vmem:[#allocation2 + $0x28] sm:$0xff] %v973_v0  ;;  %v1501_v3 = vadd.f32 %v1500_v2, %v1499_v1  ;;  %v1502_v4 = vpop.f32.mrb[14].mxu0  ;;  %v1575_v5 = vpop.f32.mrb[12].mxu1  ;;  %v1004_v1 = vld [vmem:[#allocation2] sm:$0xff] (!%p1378_p11)  ;;  %v1005_v2 = vld [vmem:[#allocation2 + $0x8] sm:$0xff] (!%p1378_p11) }
 0x149   : > { %v1503_v7 = vpop.f32.mrb[15].mxu0  ;;  %v953_v8 = vpop.f32.mrb[13].mxu1 }
 0x14a   : > { %v930_v9 = vadd.f32 %v1567_v37, %v1501_v3  ;;  %v1504_v10 = vadd.f32 %v1503_v7, %v1502_v4  ;;  %v1576_v11 = vpop.f32.mrb[14].mxu1  ;;  %v417_v37 = vld [vmem:[#allocation2 + $0x58] sm:$0xff]  ;;  %v1917_v3 = vld [vmem:[%s1997_s2] ss:$0 sm:$0xff] (!%p1378_p11)  ;;  %v1006_v7 = vld [vmem:[#allocation2 + $0x10] sm:$0xff] (!%p1378_p11) }
 0x14b   : > { %v956_v13 = vpop.f32.mrb[15].mxu1  ;;  %v1027_v4 = vmul.f32 (!%p1378_p11), %v1917_v3, %v1004_v1 }
 0x14c   : > { %v974_v14 = vadd.f32 %v930_v9, %v412_v6  ;;  %v933_v15 = vadd.f32 %v1568_v43, %v1504_v10  ;;  %v1924_v6 = vld [vmem:[%s1998_s3] ss:$0 sm:$0xff] (!%p1378_p11)  ;;  %v1029_v9 = vmul.f32 (!%p1378_p11), %v1917_v3, %v1006_v7 }
 0x14e   : > { %990 = vst [vmem:[#allocation2 + $0x30] sm:$0xff] %v974_v14  ;;  %v975_v16 = vadd.f32 %v933_v15, %v413_v12  ;;  %v1505_v17 = vpop.f32.mrb[16].mxu0  ;;  %v1050_v14 = vadd.f32 (!%p1378_p11), %v1924_v6, %v1027_v4 }
 0x14f   : > { %v1506_v18 = vpop.f32.mrb[17].mxu0  ;;  %v1009_v12 = vld [vmem:[#allocation2 + $0x28] sm:$0xff] (!%p1378_p11) }
 0x150   : > { %991 = vst [vmem:[#allocation2 + $0x38] sm:$0xff] %v975_v16  ;;  %v1507_v19 = vadd.f32 %v1506_v18, %v1505_v17  ;;  %v1508_v20 = vpop.f32.mrb[18].mxu0  ;;  %v1032_v17 = vmul.f32 (!%p1378_p11), %v1917_v3, %v1009_v12 }
 0x151   : > { %v1509_v21 = vpop.f32.mrb[19].mxu0 }
 0x152   : > { %v1510_v23 = vadd.f32 %v1509_v21, %v1508_v20  ;;  %v938_v24 = vadd.f32 %v1507_v19, %v937_v56  ;;  %v1052_v19 = vadd.f32 (!%p1378_p11), %v1924_v6, %v1029_v9 }
 0x154   : > { %v976_v26 = vadd.f32 %v938_v24, %v414_v22  ;;  %v941_v27 = vadd.f32 %v1510_v23, %v940_v61  ;;  %v421_v61 = vld [vmem:[#allocation2 + $0x78] sm:$0xff]  ;;  %v1066_v24 = vmax.f32 (!%p1378_p11), %v1050_v14, 0.0 }
 0x156   : > { %992 = vst [vmem:[#allocation2 + $0x40] sm:$0xff] %v976_v26  ;;  %v977_v28 = vadd.f32 %v941_v27, %v415_v25  ;;  %v1511_v29 = vpop.f32.mrb[20].mxu0  ;;  %v1055_v27 = vadd.f32 (!%p1378_p11), %v1924_v6, %v1032_v17 }
 0x157   : > { %v1512_v30 = vpop.f32.mrb[21].mxu0  ;;  %v1011_v18 = vld [vmem:[#allocation2 + $0x38] sm:$0xff] (!%p1378_p11) }
 0x158   : > { %993 = vst [vmem:[#allocation2 + $0x48] sm:$0xff] %v977_v28  ;;  %v1513_v31 = vadd.f32 %v1512_v30, %v1511_v29  ;;  %v1514_v32 = vpop.f32.mrb[22].mxu0  ;;  %v1034_v22 = vmul.f32 (!%p1378_p11), %v1917_v3, %v1011_v18  ;;  %v1068_v29 = vmax.f32 (!%p1378_p11), %v1052_v19, 0.0 }
 0x159   : > { %v1515_v34 = vpop.f32.mrb[23].mxu0 }
 0x15a   : > { %v946_v35 = vadd.f32 %v1571_v53, %v1513_v31  ;;  %v1516_v36 = vadd.f32 %v1515_v34, %v1514_v32  ;;  %v1057_v32 = vadd.f32 (!%p1378_p11), %v1924_v6, %v1034_v22 }
 0x15c   : > { %v978_v38 = vadd.f32 %v946_v35, %v416_v33  ;;  %v949_v39 = vadd.f32 %v1572_v59, %v1516_v36 }
 0x15d   : > { %v1012_v23 = vld [vmem:[#allocation2 + $0x40] sm:$0xff] (!%p1378_p11) }
 0x15e   : > { %994 = vst [vmem:[#allocation2 + $0x50] sm:$0xff] %v978_v38  ;;  %v979_v40 = vadd.f32 %v949_v39, %v417_v37  ;;  %v1517_v41 = vpop.f32.mrb[24].mxu0  ;;  %v1071_v37 = vmax.f32 (!%p1378_p11), %v1055_v27, 0.0  ;;  %v1035_v38 = vmul.f32 (!%p1378_p11), %v1917_v3, %v1012_v23 }
 0x15f   : > { %v1518_v42 = vpop.f32.mrb[25].mxu0  ;;  %v1013_v28 = vld [vmem:[#allocation2 + $0x48] sm:$0xff] (!%p1378_p11) }
 0x160   : > { %995 = vst [vmem:[#allocation2 + $0x58] sm:$0xff] %v979_v40  ;;  %v1519_v43 = vadd.f32 %v1518_v42, %v1517_v41  ;;  %v1520_v44 = vpop.f32.mrb[26].mxu0 }
 0x161   : > { %v1521_v45 = vpop.f32.mrb[27].mxu0 }
 0x162   : > { %v1522_v47 = vadd.f32 %v1521_v45, %v1520_v44  ;;  %v954_v48 = vadd.f32 %v1519_v43, %v953_v8  ;;  %v1007_v8 = vld [vmem:[#allocation2 + $0x18] sm:$0xff] (!%p1378_p11)  ;;  %v1073_v43 = vmax.f32 (!%p1378_p11), %v1057_v32, 0.0  ;;  %v1036_v44 = vmul.f32 (!%p1378_p11), %v1917_v3, %v1013_v28 }
 0x163   : > { %v1030_v10 = vmul.f32 (!%p1378_p11), %v1917_v3, %v1007_v8 }
 0x164   : > { %v980_v50 = vadd.f32 %v954_v48, %v418_v46  ;;  %v957_v51 = vadd.f32 %v1522_v47, %v956_v13  ;;  %v1010_v13 = vld [vmem:[#allocation2 + $0x30] sm:$0xff] (!%p1378_p11)  ;;  %v1058_v47 = vadd.f32 (!%p1378_p11), %v1924_v6, %v1035_v38 }
 0x165   : > { %v1053_v20 = vadd.f32 (!%p1378_p11), %v1924_v6, %v1030_v10  ;;  %v1033_v21 = vmul.f32 (!%p1378_p11), %v1917_v3, %v1010_v13  ;;  %v1014_v33 = vld [vmem:[#allocation2 + $0x50] sm:$0xff] (!%p1378_p11) }
 0x166   : > { %996 = vst [vmem:[#allocation2 + $0x60] sm:$0xff] %v980_v50  ;;  %v981_v52 = vadd.f32 %v957_v51, %v419_v49  ;;  %v1523_v53 = vpop.f32.mrb[28].mxu0  ;;  %v1037_v48 = vmul.f32 (!%p1378_p11), %v1917_v3, %v1014_v33 }
 0x167   : > { %v1524_v54 = vpop.f32.mrb[29].mxu0  ;;  %v1069_v30 = vmax.f32 (!%p1378_p11), %v1053_v20, 0.0  ;;  %v1056_v31 = vadd.f32 (!%p1378_p11), %v1924_v6, %v1033_v21  ;;  %v1015_v34 = vld [vmem:[#allocation2 + $0x58] sm:$0xff] (!%p1378_p11) }
 0x168   : > { %997 = vst [vmem:[#allocation2 + $0x68] sm:$0xff] %v981_v52  ;;  %v1525_v55 = vadd.f32 %v1524_v54, %v1523_v53  ;;  %v1526_v56 = vpop.f32.mrb[30].mxu0  ;;  %v1038_v49 = vmul.f32 (!%p1378_p11), %v1917_v3, %v1015_v34  ;;  %v1059_v52 = vadd.f32 (!%p1378_p11), %v1924_v6, %v1036_v44 }
 0x169   : > { %v1527_v58 = vpop.f32.mrb[31].mxu0  ;;  %v1426_v41 = vpack.c.bf16 (!%p1378_p11), %v1069_v30, %v1068_v29  ;;  %v1072_v42 = vmax.f32 (!%p1378_p11), %v1056_v31, 0.0 }
 0x16a   : > { %v962_v59 = vadd.f32 %v1575_v5, %v1525_v55  ;;  %v1528_v60 = vadd.f32 %v1527_v58, %v1526_v56  ;;  %1003 = sbr.rel (%p1378_p11) target bundleno = 385 (0x181), region = 70  ;;  %v1028_v5 = vmul.f32 (!%p1378_p11), %v1917_v3, %v1005_v2  ;;  %v1074_v55 = vmax.f32 (!%p1378_p11), %v1058_v47, 0.0 }
 0x16b   : > { %1458 = vst [vmem:[%s1999_s4 + $0x8] sm:$0xff] (!%p1378_p11), %v1426_v41   ;;  %v1436_v51 = vpack.c.bf16 (!%p1378_p11), %v1073_v43, %v1072_v42  ;;  %v1060_v56 = vadd.f32 (!%p1378_p11), %v1924_v6, %v1037_v48 }
 0x16c   : > { %v982_v62 = vadd.f32 %v962_v59, %v420_v57  ;;  %v965_v63 = vadd.f32 %v1576_v11, %v1528_v60  ;;  %v1008_v11 = vld [vmem:[#allocation2 + $0x20] sm:$0xff] (!%p1378_p11)  ;;  %v1051_v15 = vadd.f32 (!%p1378_p11), %v1924_v6, %v1028_v5  ;;  %v1061_v57 = vadd.f32 (!%p1378_p11), %v1924_v6, %v1038_v49 }
 0x16d   : > { %v1031_v16 = vmul.f32 (!%p1378_p11), %v1917_v3, %v1008_v11  ;;  %v1016_v39 = vld [vmem:[#allocation2 + $0x60] sm:$0xff] (!%p1378_p11)  ;;  %1460 = vst [vmem:[%s1999_s4 + $0x18] sm:$0xff] (!%p1378_p11), %v1436_v51   ;;  %v1075_v59 = vmax.f32 (!%p1378_p11), %v1059_v52, 0.0 }
 0x16e   : > { %998 = vst [vmem:[#allocation2 + $0x70] sm:$0xff] %v982_v62  ;;  %v983_v0 = vadd.f32 %v965_v63, %v421_v61  ;;  %v1067_v25 = vmax.f32 (!%p1378_p11), %v1051_v15, 0.0  ;;  %v1039_v53 = vmul.f32 (!%p1378_p11), %v1917_v3, %v1016_v39  ;;  %v1076_v63 = vmax.f32 (!%p1378_p11), %v1060_v56, 0.0 }
 0x16f   : > { %v1054_v26 = vadd.f32 (!%p1378_p11), %v1924_v6, %v1031_v16  ;;  %v1017_v40 = vld [vmem:[#allocation2 + $0x68] sm:$0xff] (!%p1378_p11)  ;;  %v1441_v2 = vpack.c.bf16 (!%p1378_p11), %v1075_v59, %v1074_v55 }
 0x170   : > { %999 = vst [vmem:[#allocation2 + $0x78] sm:$0xff] %v983_v0  ;;  %v1421_v35 = vpack.c.bf16 (!%p1378_p11), %v1067_v25, %v1066_v24  ;;  %v1040_v54 = vmul.f32 (!%p1378_p11), %v1917_v3, %v1017_v40  ;;  %v1062_v60 = vadd.f32 (!%p1378_p11), %v1924_v6, %v1039_v53  ;;  %v1077_v0 = vmax.f32 (!%p1378_p11), %v1061_v57, 0.0 }
 0x171   : > { %v1070_v36 = vmax.f32 %v1054_v26, 0.0  ;;  %1461 = vst [vmem:[%s1999_s4 + $0x20] sm:$0xff] %v1441_v2  }
 0x172   : > { %1422 = vst [vmem:[%s1999_s4] sm:$0xff] %v1421_v35   ;;  %v1063_v61 = vadd.f32 %v1924_v6, %v1040_v54  ;;  %v1078_v4 = vmax.f32 %v1062_v60, 0.0  ;;  %v1446_v8 = vpack.c.bf16 %v1077_v0, %v1076_v63 }
 0x173   : > { %v1431_v46 = vpack.c.bf16 %v1071_v37, %v1070_v36 }
 0x174   : > { %v1079_v5 = vmax.f32 %v1063_v61, 0.0  ;;  %1462 = vst [vmem:[%s1999_s4 + $0x28] sm:$0xff] %v1446_v8  }
 0x175   : > { %v1018_v45 = vld [vmem:[#allocation2 + $0x70] sm:$0xff]  ;;  %1459 = vst [vmem:[%s1999_s4 + $0x10] sm:$0xff] %v1431_v46  }
 0x176   : > { %v1041_v58 = vmul.f32 %v1917_v3, %v1018_v45  ;;  %v1451_v10 = vpack.c.bf16 %v1079_v5, %v1078_v4 }
 0x177   : > { %v1019_v50 = vld [vmem:[#allocation2 + $0x78] sm:$0xff] }
 0x178   : > { %v1042_v62 = vmul.f32 %v1917_v3, %v1019_v50  ;;  %v1064_v1 = vadd.f32 %v1924_v6, %v1041_v58  ;;  %1463 = vst [vmem:[%s1999_s4 + $0x30] sm:$0xff] %v1451_v10  }
 0x17a   : > { %v1065_v7 = vadd.f32 %v1924_v6, %v1042_v62  ;;  %v1080_v9 = vmax.f32 %v1064_v1, 0.0 }
 0x17c   : > { %v1081_v11 = vmax.f32 %v1065_v7, 0.0 }
 0x17e   : > { %v1456_v3 = vpack.c.bf16 %v1081_v11, %v1080_v9 }
 0x180   : > { %1464 = vst [vmem:[%s1999_s4 + $0x38] sm:$0xff] %v1456_v3  }
 0x181 PF: > { %s14_s19 = sadd.s32 1, %s1714_s19   ;;  %s2000_s15 = smov %s1702_s16 }
 0x182   : > { %p11_p12 = scmp.ge.s32.totalorder %s14_s19, 4   ;;  %s2001_s16 = smov %s1777_s23 }
 0x183   : > { %s2002_s17 = smov %s1710_s18  ;;  %s2003_s18 = smov %s2005_s20 }
 0x184   :  { %13 = sbr.rel (!%p11_p12) target bundleno = 3 (0x3), region = 120 }

// kernel: mnist_resnet_forward.29
= control target key start
LH: loop header
LB: loop body
LE: loop exit
PB: predicated region body
PF: predicated region fallthrough
CT: control target
= control target key end

     0   :  { %s1142_s15 = smov 0   ;;  %s1144_s16 = smov 0   ;;  %s1255_s0 = inlined_call_operand.vmem [shape: bf16[32,768], index: 0, kind: input, shape index: {}]   ;;  %s1256_s1 = inlined_call_operand.vmem [shape: bf16[768,128], index: 1, kind: input, shape index: {}]   ;;  %s1257_s2 = inlined_call_operand.vmem [shape: f32[1,128], index: 2, kind: input, shape index: {}]   ;;  %s1258_s3 = inlined_call_operand.vmem [shape: f32[1,128], index: 3, kind: input, shape index: {}]   ;;  %s1259_s4 = inlined_call_operand.vmem [shape: bf16[32,128], index: 4, kind: output, shape index: {}]  }
   0x1   :  { %s1146_s17 = smov 0   ;;  %s1148_s18 = smov 0  }
   0x2   :  { %s1150_s19 = smov 0  }
   0x3 LB: > { %s26_s20 = sadd.s32 1, %s1110_s18  ;;  %p49_p1 = scmp.ne.s32.totalorder %s1102_s16, %s1098_s15  ;;  %s1114_s19 = sphi %s1150_s19, %s14_s19   ;;  %s1110_s18 = sphi %s1148_s18, %s1263_s18   ;;  %s1106_s17 = sphi %s1146_s17, %s1262_s17   ;;  %s1102_s16 = sphi %s1144_s16, %s1261_s16   ;;  %s1098_s15 = sphi %s1142_s15, %s1260_s15  }
   0x4   : > { %p27_p0 = scmp.ge.s32.totalorder %s26_s20, 2  ;;  %p50_p2 = scmp.eq.s32.totalorder %s1114_s19, 0 }
   0x5   : > { %s42_s22 = sadd.s32 1, %s1102_s16  ;;  %p873_p5 = scmp.ge.s32.totalorder %s1114_s19, 2 }
   0x6   : > { %s1265_s20 = smov (%p27_p0, %s26_s20), 0  ;;  %p51_p3 = por %p50_p2, %p49_p1 }
   0x7   : > { %s38_s21 = ssub.s32 %s1110_s18, %s1265_s20  ;;  %195 = sbr.rel (%p873_p5) target bundleno = 23 (0x17), region = 24 }
   0x8   : > { %p40_p4 = scmp.eq.s32.totalorder %s38_s21, 0 }
   0xa   : > { %s1177_s23 = scalar_select %p40_p4, %s1102_s16, %s42_s22  }
   0xe   : > { %198 = sbr.rel (!%p51_p3) target bundleno = 23 (0x17), region = 28  ;;  %s200_s24 = sand.u32 (%p51_p3), 1, %s1102_s16  }
   0xf   : > { %s927_s25 = smul.u32 (%p51_p3), 12, %s1110_s18 }
  0x10   : > { %s1001_s26 = smul.u32 (%p51_p3), 48, %s200_s24 }
  0x11   : > { %s208_s29 = scalar_lea.vmem (%p51_p3), %s1255_s0, %s927_s25 }
  0x12   : > { %v223_v0 = vld [vmem:[%s208_s29] sm:$0xff] (%p51_p3)  ;;  %v225_v1 = vld [vmem:[%s208_s29 + $0x18] sm:$0xff] (%p51_p3)  ;;  %v227_v2 = vld [vmem:[%s208_s29 + $0x30] sm:$0xff] (%p51_p3)  ;;  %s202_s30 = scalar_lea.vmem (%p51_p3), [#allocation3], %s1001_s26 }
  0x13   : > { %224 = vst [vmem:[%s202_s30] sm:$0xff] (%p51_p3), %v223_v0  ;;  %226 = vst [vmem:[%s202_s30 + $0xc] sm:$0xff] (%p51_p3), %v225_v1  ;;  %v229_v3 = vld [vmem:[%s208_s29 + $0x48] sm:$0xff] (%p51_p3)  ;;  %v877_v5 = vld [vmem:[%s208_s29 + $0x20] sm:$0xf] (%p51_p3) }
  0x14   : > { %228 = vst [vmem:[%s202_s30 + $0x18] sm:$0xff] (%p51_p3), %v227_v2  ;;  %v875_v4 = vld [vmem:[%s208_s29 + $0x8] sm:$0xf] (%p51_p3)  ;;  %230 = vst [vmem:[%s202_s30 + $0x24] sm:$0xff] (%p51_p3), %v229_v3  ;;  %v879_v6 = vld [vmem:[%s208_s29 + $0x38] sm:$0xf] (%p51_p3) }
  0x15   : > { %876 = vst [vmem:[%s202_s30 + $0x8] sm:$0xf] %v875_v4  ;;  %878 = vst [vmem:[%s202_s30 + $0x14] sm:$0xf] %v877_v5  ;;  %v881_v7 = vld [vmem:[%s208_s29 + $0x50] sm:$0xf] }
  0x16   : > { %880 = vst [vmem:[%s202_s30 + $0x20] sm:$0xf] %v879_v6  ;;  %882 = vst [vmem:[%s202_s30 + $0x2c] sm:$0xf] %v881_v7 }
  0x17 PF: > { %p883_p6 = scmp.ge.s32.totalorder %s1114_s19, 1  ;;  %p262_p7 = scmp.lt.s32.totalorder %s1114_s19, 3 }
  0x19   : > { %p263_p8 = pnand %p883_p6, %p262_p7 }
  0x1a   : > { %s269_s5 = sand.u32 (!%p263_p8), 1, %s1098_s15   ;;  %s313_s6 = smul.u32 (!%p263_p8), 48, %s1106_s17 }
  0x1b   : > { %266 = sbr.rel (%p263_p8) target bundleno = 320 (0x140), region = 58  ;;  %p885_p10 = scmp.ne.s32.totalorder (!%p263_p8), %s1106_s17, 0 }
  0x1c   : > { %s1002_s7 = smul.u32 (!%p263_p8), 48, %s269_s5  ;;  %p314_p9 = scmp.lt.s32.totalorder (!%p263_p8), %s313_s6, 95 }
  0x1e   : > { %s1194_s12 = scalar_lea.vmem (!%p263_p8), [#allocation3], %s1002_s7 }
  0x22   : > { %s1267_s6 = smov (!%p314_p9, %s313_s6), 95  ;;  %341 = sbr.rel (%p885_p10) target bundleno = 41 (0x29), region = 66 }
  0x23   : > { %s884_s8 = sshll.u32 %s1267_s6, 2  ;;  %v1116_v8 = vmov (!%p885_p10), 0.0  }
  0x24   : > { %s1192_s11 = scalar_lea.vmem %s1256_s1, %s884_s8  ;;  %342 = vst [vmem:[#allocation2] sm:$0xff] (!%p885_p10), %v1116_v8  ;;  %343 = vst [vmem:[#allocation2 + $0x8] sm:$0xff] (!%p885_p10), %v1116_v8 }
  0x25   : > { %344 = vst [vmem:[#allocation2 + $0x10] sm:$0xff] (!%p885_p10), %v1116_v8  ;;  %345 = vst [vmem:[#allocation2 + $0x18] sm:$0xff] (!%p885_p10), %v1116_v8 }
  0x29 PF: > { %v1044_v9 = vld [vmem:[%s1192_s11 + $0x40] sm:$0xff]   ;;  %v1047_v12 = vld [vmem:[%s1192_s11 + $0x48] sm:$0xff]   ;;  %v1050_v15 = vld [vmem:[%s1192_s11 + $0x50] sm:$0xff]   ;;  %p916_p11 = scmp.ne.s32.totalorder %s1106_s17, 1 }
  0x2a   : > { %v1045_v10 = vld [vmem:[%s1192_s11] sm:$0xff]   ;;  %943 = vmatprep.subr.bf16.mxu0 %v1044_v9  ;;  %v1048_v13 = vld [vmem:[%s1192_s11 + $0x8] sm:$0xff]   ;;  %v1051_v16 = vld [vmem:[%s1192_s11 + $0x10] sm:$0xff]  }
  0x2b   : > { %v1046_v11 = vld [vmem:[%s1192_s11 + $0x80] sm:$0xff]   ;;  %944 = vmatpush3.bf16.msra.mxu0 %v1045_v10  ;;  %v1049_v14 = vld [vmem:[%s1192_s11 + $0x88] sm:$0xff]   ;;  %v1052_v17 = vld [vmem:[%s1192_s11 + $0x90] sm:$0xff]  }
  0x2c   : > { %981 = vmatprep.subr.bf16.mxu1 %v1046_v11  ;;  %945 = vmatprep.subr.bf16.mxu0 %v1047_v12  ;;  %v1053_v18 = vld [vmem:[%s1192_s11 + $0x58] sm:$0xff]   ;;  %v1056_v21 = vld [vmem:[%s1192_s11 + $0x60] sm:$0xff]   ;;  %v1059_v24 = vld [vmem:[%s1192_s11 + $0x68] sm:$0xff]  }
  0x2d   : > { %982 = vmatpush3.bf16.msra.mxu1 %v1046_v11  ;;  %v1054_v19 = vld [vmem:[%s1192_s11 + $0x18] sm:$0xff]   ;;  %v1058_v22 = vld [vmem:[%s1192_s11 + $0xa0] sm:$0xff]   ;;  %v1061_v25 = vld [vmem:[%s1192_s11 + $0xa8] sm:$0xff]  }
  0x2e   : > { %983 = vmatprep.subr.bf16.mxu1 %v1049_v14  ;;  %v1055_v20 = vld [vmem:[%s1192_s11 + $0x98] sm:$0xff]   ;;  %v1057_v23 = vld [vmem:[%s1192_s11 + $0x20] sm:$0xff]   ;;  %v1060_v26 = vld [vmem:[%s1192_s11 + $0x28] sm:$0xff]  }
  0x2f   : > { %946 = vmatpush3.bf16.msra.mxu0 %v1048_v13  ;;  %v1062_v27 = vld [vmem:[%s1192_s11 + $0x70] sm:$0xff]   ;;  %v1065_v30 = vld [vmem:[%s1192_s11 + $0x78] sm:$0xff]   ;;  %v346_v45 = vld [vmem:[#allocation2] sm:$0xff] }
  0x30   : > { %947 = vmatprep.subr.bf16.mxu0 %v1050_v15  ;;  %v1063_v28 = vld [vmem:[%s1192_s11 + $0x30] sm:$0xff]   ;;  %v1067_v31 = vld [vmem:[%s1192_s11 + $0xb8] sm:$0xff]   ;;  %v347_v50 = vld [vmem:[#allocation2 + $0x8] sm:$0xff] }
  0x31   : > { %984 = vmatpush3.bf16.msra.mxu1 %v1049_v14  ;;  %v1064_v29 = vld [vmem:[%s1192_s11 + $0xb0] sm:$0xff]   ;;  %v1066_v34 = vld [vmem:[%s1192_s11 + $0x38] sm:$0xff]   ;;  %v917_v5 = vld [vmem:[%s1257_s2] ss:$0 sm:$0xff] (!%p916_p11) }
  0x32   : > { %985 = vmatprep.subr.bf16.mxu1 %v1052_v17  ;;  %v1070_v32 = vld [vmem:[%s1194_s12 + $0x4] ss:$12 sps:$4 sm:$0xff]   ;;  %v1071_v33 = vld [vmem:[%s1194_s12 + $0x8] ss:$12 sps:$4 sm:$0xff]   ;;  %v1068_v35 = vld [vmem:[%s1194_s12] ss:$12 sps:$4 sm:$0xff]  }
  0x33   : > { %948 = vmatpush3.bf16.msra.mxu0 %v1051_v16  ;;  %614 = vmatprep.mubr.bf16.mxu0 %v1070_v32  ;;  %v1073_v36 = vld [vmem:[%s1194_s12 + $0x1c] ss:$12 sps:$4 sm:$0xff]   ;;  %v1072_v37 = vld [vmem:[%s1194_s12 + $0x20] ss:$12 sps:$4 sm:$0xff]   ;;  %v1075_v38 = vld [vmem:[%s1194_s12 + $0x18] ss:$12 sps:$4 sm:$0xff]  }
  0x34   : > { %949 = vmatprep.subr.bf16.mxu0 %v1053_v18  ;;  %997 = vmatprep.mubr.bf16.mxu1 %v1071_v33  ;;  %v348_v59 = vld [vmem:[#allocation2 + $0x10] sm:$0xff]  ;;  %v349_v63 = vld [vmem:[#allocation2 + $0x18] sm:$0xff]  ;;  %v918_v8 = vld [vmem:[%s1258_s3] ss:$0 sm:$0xff] (!%p916_p11) }
  0x35   : > { %986 = vmatpush3.bf16.msra.mxu1 %v1052_v17 }
  0x36   : > { %987 = vmatprep.subr.bf16.mxu1 %v1055_v20 }
  0x37   : > { %950 = vmatpush3.bf16.msra.mxu0 %v1054_v19 }
  0x38   : > { %951 = vmatprep.subr.bf16.mxu0 %v1056_v21 }
  0x39   : > { %988 = vmatpush3.bf16.msra.mxu1 %v1055_v20 }
  0x3a   : > { %989 = vmatprep.subr.bf16.mxu1 %v1058_v22 }
  0x3b   : > { %952 = vmatpush3.bf16.msra.mxu0 %v1057_v23 }
  0x3c   : > { %953 = vmatprep.subr.bf16.mxu0 %v1059_v24 }
  0x3d   : > { %990 = vmatpush3.bf16.msra.mxu1 %v1058_v22 }
  0x3e   : > { %991 = vmatprep.subr.bf16.mxu1 %v1061_v25 }
  0x3f   : > { %954 = vmatpush3.bf16.msra.mxu0 %v1060_v26 }
  0x40   : > { %955 = vmatprep.subr.bf16.mxu0 %v1062_v27 }
  0x41   : > { %992 = vmatpush3.bf16.msra.mxu1 %v1061_v25 }
  0x42   : > { %993 = vmatprep.subr.bf16.mxu1 %v1064_v29 }
  0x43   : > { %956 = vmatpush3.bf16.msra.mxu0 %v1063_v28 }
  0x44   : > { %957 = vmatprep.subr.bf16.mxu0 %v1065_v30 }
  0x45   : > { %994 = vmatpush3.bf16.msra.mxu1 %v1064_v29 }
  0x46   : > { %995 = vmatprep.subr.bf16.mxu1 %v1067_v31 }
  0x47   : > { %958 = vmatpush3.bf16.msra.mxu0 %v1066_v34 }
  0x49   : > { %996 = vmatpush3.bf16.msra.mxu1 %v1067_v31 }
  0x4a   : > { %615 = vmatmul.mubr.bf16.vlgmr.msra.gmra.mrb[0].mxu0 %v1068_v35 }
  0x4b   : > { %622 = vmatprep.mubr.bf16.mxu0 %v1073_v36 }
  0x4c   : > { %998 = vmatmul.mubr.bf16.vlgmr.msra.gmra.mrb[0].mxu1 %v1072_v37 }
  0x52   : > { %623 = vmatmul.mubr.bf16.gmra.mrb[4].mxu0 %v1075_v38 }
 0x11d   : > { %v959_v39 = vpop.f32.mrb[0].mxu0 }
 0x11e   : > { %v960_v40 = vpop.f32.mrb[1].mxu0 }
 0x11f   : > { %v961_v41 = vadd.f32 %v960_v40, %v959_v39  ;;  %v962_v42 = vpop.f32.mrb[2].mxu0  ;;  %v999_v43 = vpop.f32.mrb[0].mxu1 }
 0x120   : > { %v963_v44 = vpop.f32.mrb[3].mxu0  ;;  %v665_v46 = vpop.f32.mrb[1].mxu1 }
 0x121   : > { %v964_v47 = vadd.f32 %v963_v44, %v962_v42  ;;  %v666_v48 = vadd.f32 %v961_v41, %v665_v46  ;;  %v1000_v49 = vpop.f32.mrb[2].mxu1 }
 0x122   : > { %v668_v51 = vpop.f32.mrb[3].mxu1 }
 0x123   : > { %v680_v52 = vadd.f32 %v666_v48, %v346_v45  ;;  %v669_v53 = vadd.f32 %v964_v47, %v668_v51 }
 0x125   : > { %684 = vst [vmem:[#allocation2] sm:$0xff] %v680_v52  ;;  %v681_v54 = vadd.f32 %v669_v53, %v347_v50  ;;  %v965_v55 = vpop.f32.mrb[4].mxu0 }
 0x126   : > { %v966_v56 = vpop.f32.mrb[5].mxu0 }
 0x127   : > { %685 = vst [vmem:[#allocation2 + $0x8] sm:$0xff] %v681_v54  ;;  %v967_v57 = vadd.f32 %v966_v56, %v965_v55  ;;  %v968_v58 = vpop.f32.mrb[6].mxu0 }
 0x128   : > { %v969_v60 = vpop.f32.mrb[7].mxu0 }
 0x129   : > { %v674_v61 = vadd.f32 %v999_v43, %v967_v57  ;;  %v970_v62 = vadd.f32 %v969_v60, %v968_v58  ;;  %691 = sbr.rel (%p916_p11) target bundleno = 320 (0x140), region = 70 }
 0x12b   : > { %v682_v0 = vadd.f32 %v674_v61, %v348_v59  ;;  %v677_v1 = vadd.f32 %v1000_v49, %v970_v62 }
 0x12c   : > { %v692_v3 = vld [vmem:[#allocation2] sm:$0xff] (!%p916_p11) }
 0x12d   : > { %686 = vst [vmem:[#allocation2 + $0x10] sm:$0xff] %v682_v0  ;;  %v683_v2 = vadd.f32 %v677_v1, %v349_v63  ;;  %v703_v6 = vmul.f32 (!%p916_p11), %v917_v5, %v692_v3 }
 0x12e   : > { %v693_v4 = vld [vmem:[#allocation2 + $0x8] sm:$0xff] (!%p916_p11) }
 0x12f   : > { %687 = vst [vmem:[#allocation2 + $0x18] sm:$0xff] %v683_v2  ;;  %v704_v7 = vmul.f32 (!%p916_p11), %v917_v5, %v693_v4  ;;  %v714_v13 = vadd.f32 (!%p916_p11), %v918_v8, %v703_v6 }
 0x131   : > { %v715_v14 = vadd.f32 %v918_v8, %v704_v7  ;;  %v718_v17 = vmax.f32 %v714_v13, 0.0 }
 0x133   : > { %v719_v18 = vmax.f32 %v715_v14, 0.0 }
 0x134   : > { %v694_v9 = vld [vmem:[#allocation2 + $0x10] sm:$0xff] }
 0x135   : > { %v705_v11 = vmul.f32 %v917_v5, %v694_v9  ;;  %v935_v21 = vpack.c.bf16 %v719_v18, %v718_v17 }
 0x136   : > { %v695_v10 = vld [vmem:[#allocation2 + $0x18] sm:$0xff] }
 0x137   : > { %v706_v12 = vmul.f32 %v917_v5, %v695_v10  ;;  %v716_v15 = vadd.f32 %v918_v8, %v705_v11  ;;  %936 = vst [vmem:[%s1259_s4] sm:$0xff] %v935_v21  }
 0x139   : > { %v717_v16 = vadd.f32 %v918_v8, %v706_v12  ;;  %v720_v19 = vmax.f32 %v716_v15, 0.0 }
 0x13b   : > { %v721_v20 = vmax.f32 %v717_v16, 0.0 }
 0x13d   : > { %v940_v22 = vpack.c.bf16 %v721_v20, %v720_v19 }
 0x13f   : > { %942 = vst [vmem:[%s1259_s4 + $0x8] sm:$0xff] %v940_v22  }
 0x140 PF: > { %s14_s19 = sadd.s32 1, %s1114_s19   ;;  %s1260_s15 = smov %s1102_s16 }
 0x141   : > { %p11_p12 = scmp.ge.s32.totalorder %s14_s19, 4   ;;  %s1261_s16 = smov %s1177_s23 }
 0x142   : > { %s1262_s17 = smov %s1110_s18  ;;  %s1263_s18 = smov %s1265_s20 }
 0x143   :  { %13 = sbr.rel (!%p11_p12) target bundleno = 3 (0x3), region = 120 }

// kernel: mnist_resnet_forward.28
= control target key start
LH: loop header
LB: loop body
LE: loop exit
PB: predicated region body
PF: predicated region fallthrough
CT: control target
= control target key end

     0   :  { %s358_s1 = inlined_call_operand.vmem [shape: bf16[128,128], index: 1, kind: input, shape index: {}]   ;;  %s359_s0 = inlined_call_operand.vmem [shape: bf16[32,128], index: 0, kind: input, shape index: {}]   ;;  %s360_s2 = inlined_call_operand.vmem [shape: f32[1,128], index: 2, kind: input, shape index: {}]   ;;  %s361_s3 = inlined_call_operand.vmem [shape: f32[1,128], index: 3, kind: input, shape index: {}]   ;;  %s362_s4 = inlined_call_operand.vmem [shape: bf16[32,128], index: 4, kind: output, shape index: {}]  }
   0x1   :  { %v281_v0 = vld [vmem:[%s358_s1] sm:$0xff]   ;;  %v282_v1 = vld [vmem:[%s358_s1 + $0x8] sm:$0xff]   ;;  %v283_v2 = vld [vmem:[%s358_s1 + $0x10] sm:$0xff]  }
   0x2   :  { %261 = vmatprep.subr.bf16.mxu0 %v281_v0  ;;  %v284_v3 = vld [vmem:[%s358_s1 + $0x18] sm:$0xff]   ;;  %v289_v4 = vld [vmem:[%s359_s0] sm:$0xff]   ;;  %v286_v6 = vld [vmem:[%s358_s1 + $0x28] sm:$0xff]  }
   0x3   :  { %262 = vmatpush3.bf16.msra.mxu0 %v281_v0  ;;  %277 = vmatprep.mubr.bf16.mxu0 %v289_v4  ;;  %v285_v5 = vld [vmem:[%s358_s1 + $0x20] sm:$0xff]   ;;  %v287_v7 = vld [vmem:[%s358_s1 + $0x30] sm:$0xff]   ;;  %v288_v8 = vld [vmem:[%s358_s1 + $0x38] sm:$0xff]  }
   0x4   :  { %263 = vmatprep.subr.bf16.mxu0 %v282_v1  ;;  %v290_v9 = vld [vmem:[%s359_s0 + $0x8] sm:$0xff]   ;;  %v230_v10 = vld [vmem:[%s360_s2] ss:$0 sm:$0xff] }
   0x5   :  { %v231_v14 = vld [vmem:[%s361_s3] ss:$0 sm:$0xff] }
   0x7   :  { %264 = vmatpush3.bf16.msra.mxu0 %v282_v1 }
   0x8   :  { %265 = vmatprep.subr.bf16.mxu0 %v283_v2 }
   0xb   :  { %266 = vmatpush3.bf16.msra.mxu0 %v283_v2 }
   0xc   :  { %267 = vmatprep.subr.bf16.mxu0 %v284_v3 }
   0xf   :  { %268 = vmatpush3.bf16.msra.mxu0 %v284_v3 }
  0x10   :  { %269 = vmatprep.subr.bf16.mxu0 %v285_v5 }
  0x13   :  { %270 = vmatpush3.bf16.msra.mxu0 %v285_v5 }
  0x14   :  { %271 = vmatprep.subr.bf16.mxu0 %v286_v6 }
  0x17   :  { %272 = vmatpush3.bf16.msra.mxu0 %v286_v6 }
  0x18   :  { %273 = vmatprep.subr.bf16.mxu0 %v287_v7 }
  0x1b   :  { %274 = vmatpush3.bf16.msra.mxu0 %v287_v7 }
  0x1c   :  { %275 = vmatprep.subr.bf16.mxu0 %v288_v8 }
  0x1f   :  { %276 = vmatpush3.bf16.msra.mxu0 %v288_v8 }
  0x22   :  { %278 = vmatmul.mubr.bf16.vlgmr.msra.gmra.mrb[0].mxu0 %v290_v9 }
  0xf5   :  { %v279_v11 = vpop.f32.mrb[0].mxu0 }
  0xf6   :  { %v183_v12 = vmul.f32 %v279_v11, %v230_v10  ;;  %v144_v13 = vpop.f32.mrb[1].mxu0 }
  0xf7   :  { %v181_v15 = vmul.f32 %v230_v10, %v144_v13  ;;  %v280_v16 = vpop.f32.mrb[2].mxu0 }
  0xf8   :  { %v184_v17 = vmul.f32 %v280_v16, %v230_v10  ;;  %v147_v18 = vpop.f32.mrb[3].mxu0  ;;  %v194_v20 = vadd.f32 %v231_v14, %v183_v12 }
  0xf9   :  { %v182_v19 = vmul.f32 %v230_v10, %v147_v18  ;;  %v192_v22 = vadd.f32 %v231_v14, %v181_v15 }
  0xfa   :  { %v195_v21 = vadd.f32 %v231_v14, %v184_v17 }
  0xfb   :  { %v193_v23 = vadd.f32 %v231_v14, %v182_v19 }
  0xfc   :  { %v248_v24 = vpack.c.bf16 %v195_v21, %v194_v20 }
  0xfd   :  { %v243_v25 = vpack.c.bf16 %v193_v23, %v192_v22 }
  0xfe   :  { %250 = vst [vmem:[%s362_s4 + $0x8] sm:$0xff] %v248_v24  }
  0xff   :  { %244 = vst [vmem:[%s362_s4] sm:$0xff] %v243_v25  }

// kernel: mnist_resnet_forward.31
= control target key start
LH: loop header
LB: loop body
LE: loop exit
PB: predicated region body
PF: predicated region fallthrough
CT: control target
= control target key end

     0   :  { %s1142_s15 = smov 0   ;;  %s1144_s16 = smov 0   ;;  %s1255_s0 = inlined_call_operand.vmem [shape: bf16[32,1152], index: 0, kind: input, shape index: {}]   ;;  %s1256_s1 = inlined_call_operand.vmem [shape: bf16[1152,128], index: 1, kind: input, shape index: {}]   ;;  %s1257_s2 = inlined_call_operand.vmem [shape: f32[1,128], index: 2, kind: input, shape index: {}]   ;;  %s1258_s3 = inlined_call_operand.vmem [shape: f32[1,128], index: 3, kind: input, shape index: {}]   ;;  %s1259_s4 = inlined_call_operand.vmem [shape: bf16[32,128], index: 4, kind: output, shape index: {}]  }
   0x1   :  { %s1146_s17 = smov 0   ;;  %s1148_s18 = smov 0  }
   0x2   :  { %s1150_s19 = smov 0  }
   0x3 LB: > { %s26_s20 = sadd.s32 1, %s1110_s18  ;;  %p49_p1 = scmp.ne.s32.totalorder %s1102_s16, %s1098_s15  ;;  %s1114_s19 = sphi %s1150_s19, %s14_s19   ;;  %s1110_s18 = sphi %s1148_s18, %s1263_s18   ;;  %s1106_s17 = sphi %s1146_s17, %s1262_s17   ;;  %s1102_s16 = sphi %s1144_s16, %s1261_s16   ;;  %s1098_s15 = sphi %s1142_s15, %s1260_s15  }
   0x4   : > { %p27_p0 = scmp.ge.s32.totalorder %s26_s20, 3  ;;  %p50_p2 = scmp.eq.s32.totalorder %s1114_s19, 0 }
   0x5   : > { %s42_s22 = sadd.s32 1, %s1102_s16  ;;  %p873_p5 = scmp.ge.s32.totalorder %s1114_s19, 3 }
   0x6   : > { %s1265_s20 = smov (%p27_p0, %s26_s20), 0  ;;  %p51_p3 = por %p50_p2, %p49_p1 }
   0x7   : > { %s38_s21 = ssub.s32 %s1110_s18, %s1265_s20  ;;  %195 = sbr.rel (%p873_p5) target bundleno = 23 (0x17), region = 24 }
   0x8   : > { %p40_p4 = scmp.eq.s32.totalorder %s38_s21, 0 }
   0xa   : > { %s1177_s23 = scalar_select %p40_p4, %s1102_s16, %s42_s22  }
   0xe   : > { %198 = sbr.rel (!%p51_p3) target bundleno = 23 (0x17), region = 28  ;;  %s200_s24 = sand.u32 (%p51_p3), 1, %s1102_s16  }
   0xf   : > { %s927_s25 = smul.u32 (%p51_p3), 12, %s1110_s18 }
  0x10   : > { %s1001_s26 = smul.u32 (%p51_p3), 48, %s200_s24 }
  0x11   : > { %s208_s29 = scalar_lea.vmem (%p51_p3), %s1255_s0, %s927_s25 }
  0x12   : > { %v223_v0 = vld [vmem:[%s208_s29] sm:$0xff] (%p51_p3)  ;;  %v227_v2 = vld [vmem:[%s208_s29 + $0x48] sm:$0xff] (%p51_p3)  ;;  %s202_s30 = scalar_lea.vmem (%p51_p3), [#allocation3], %s1001_s26  ;;  %v879_v6 = vld [vmem:[%s208_s29 + $0x50] sm:$0xf] (%p51_p3) }
  0x13   : > { %v225_v1 = vld [vmem:[%s208_s29 + $0x24] sm:$0xff] (%p51_p3)  ;;  %224 = vst [vmem:[%s202_s30] sm:$0xff] (%p51_p3), %v223_v0  ;;  %228 = vst [vmem:[%s202_s30 + $0x18] sm:$0xff] (%p51_p3), %v227_v2  ;;  %v229_v3 = vld [vmem:[%s208_s29 + $0x6c] sm:$0xff] (%p51_p3) }
  0x14   : > { %226 = vst [vmem:[%s202_s30 + $0xc] sm:$0xff] (%p51_p3), %v225_v1  ;;  %v875_v4 = vld [vmem:[%s208_s29 + $0x8] sm:$0xf] (%p51_p3)  ;;  %v877_v5 = vld [vmem:[%s208_s29 + $0x2c] sm:$0xf] (%p51_p3)  ;;  %230 = vst [vmem:[%s202_s30 + $0x24] sm:$0xff] (%p51_p3), %v229_v3 }
  0x15   : > { %876 = vst [vmem:[%s202_s30 + $0x8] sm:$0xf] %v875_v4  ;;  %878 = vst [vmem:[%s202_s30 + $0x14] sm:$0xf] %v877_v5  ;;  %v881_v7 = vld [vmem:[%s208_s29 + $0x74] sm:$0xf] }
  0x16   : > { %880 = vst [vmem:[%s202_s30 + $0x20] sm:$0xf] %v879_v6  ;;  %882 = vst [vmem:[%s202_s30 + $0x2c] sm:$0xf] %v881_v7 }
  0x17 PF: > { %p883_p6 = scmp.ge.s32.totalorder %s1114_s19, 1  ;;  %p262_p7 = scmp.lt.s32.totalorder %s1114_s19, 4 }
  0x19   : > { %p263_p8 = pnand %p883_p6, %p262_p7 }
  0x1a   : > { %s269_s5 = sand.u32 (!%p263_p8), 1, %s1098_s15   ;;  %s313_s6 = smul.u32 (!%p263_p8), 48, %s1106_s17 }
  0x1b   : > { %266 = sbr.rel (%p263_p8) target bundleno = 320 (0x140), region = 58  ;;  %p885_p10 = scmp.ne.s32.totalorder (!%p263_p8), %s1106_s17, 0 }
  0x1c   : > { %s1002_s7 = smul.u32 (!%p263_p8), 48, %s269_s5  ;;  %p314_p9 = scmp.lt.s32.totalorder (!%p263_p8), %s313_s6, 143 }
  0x1e   : > { %s1194_s12 = scalar_lea.vmem (!%p263_p8), [#allocation3], %s1002_s7 }
  0x22   : > { %s1267_s6 = smov (!%p314_p9, %s313_s6), 143  ;;  %341 = sbr.rel (%p885_p10) target bundleno = 41 (0x29), region = 66 }
  0x23   : > { %s884_s8 = sshll.u32 %s1267_s6, 2  ;;  %v1116_v8 = vmov (!%p885_p10), 0.0  }
  0x24   : > { %s1192_s11 = scalar_lea.vmem %s1256_s1, %s884_s8  ;;  %342 = vst [vmem:[#allocation2] sm:$0xff] (!%p885_p10), %v1116_v8  ;;  %343 = vst [vmem:[#allocation2 + $0x8] sm:$0xff] (!%p885_p10), %v1116_v8 }
  0x25   : > { %344 = vst [vmem:[#allocation2 + $0x10] sm:$0xff] (!%p885_p10), %v1116_v8  ;;  %345 = vst [vmem:[#allocation2 + $0x18] sm:$0xff] (!%p885_p10), %v1116_v8 }
  0x29 PF: > { %v1044_v9 = vld [vmem:[%s1192_s11 + $0x40] sm:$0xff]   ;;  %v1047_v12 = vld [vmem:[%s1192_s11 + $0x48] sm:$0xff]   ;;  %v1050_v15 = vld [vmem:[%s1192_s11 + $0x50] sm:$0xff]   ;;  %p916_p11 = scmp.ne.s32.totalorder %s1106_s17, 2 }
  0x2a   : > { %v1045_v10 = vld [vmem:[%s1192_s11] sm:$0xff]   ;;  %943 = vmatprep.subr.bf16.mxu0 %v1044_v9  ;;  %v1048_v13 = vld [vmem:[%s1192_s11 + $0x8] sm:$0xff]   ;;  %v1051_v16 = vld [vmem:[%s1192_s11 + $0x10] sm:$0xff]  }
  0x2b   : > { %v1046_v11 = vld [vmem:[%s1192_s11 + $0x80] sm:$0xff]   ;;  %944 = vmatpush3.bf16.msra.mxu0 %v1045_v10  ;;  %v1049_v14 = vld [vmem:[%s1192_s11 + $0x88] sm:$0xff]   ;;  %v1052_v17 = vld [vmem:[%s1192_s11 + $0x90] sm:$0xff]  }
  0x2c   : > { %981 = vmatprep.subr.bf16.mxu1 %v1046_v11  ;;  %945 = vmatprep.subr.bf16.mxu0 %v1047_v12  ;;  %v1053_v18 = vld [vmem:[%s1192_s11 + $0x58] sm:$0xff]   ;;  %v1056_v21 = vld [vmem:[%s1192_s11 + $0x60] sm:$0xff]   ;;  %v1059_v24 = vld [vmem:[%s1192_s11 + $0x68] sm:$0xff]  }
  0x2d   : > { %982 = vmatpush3.bf16.msra.mxu1 %v1046_v11  ;;  %v1054_v19 = vld [vmem:[%s1192_s11 + $0x18] sm:$0xff]   ;;  %v1058_v22 = vld [vmem:[%s1192_s11 + $0xa0] sm:$0xff]   ;;  %v1061_v25 = vld [vmem:[%s1192_s11 + $0xa8] sm:$0xff]  }
  0x2e   : > { %983 = vmatprep.subr.bf16.mxu1 %v1049_v14  ;;  %v1055_v20 = vld [vmem:[%s1192_s11 + $0x98] sm:$0xff]   ;;  %v1057_v23 = vld [vmem:[%s1192_s11 + $0x20] sm:$0xff]   ;;  %v1060_v26 = vld [vmem:[%s1192_s11 + $0x28] sm:$0xff]  }
  0x2f   : > { %946 = vmatpush3.bf16.msra.mxu0 %v1048_v13  ;;  %v1062_v27 = vld [vmem:[%s1192_s11 + $0x70] sm:$0xff]   ;;  %v1065_v30 = vld [vmem:[%s1192_s11 + $0x78] sm:$0xff]   ;;  %v346_v45 = vld [vmem:[#allocation2] sm:$0xff] }
  0x30   : > { %947 = vmatprep.subr.bf16.mxu0 %v1050_v15  ;;  %v1063_v28 = vld [vmem:[%s1192_s11 + $0x30] sm:$0xff]   ;;  %v1067_v31 = vld [vmem:[%s1192_s11 + $0xb8] sm:$0xff]   ;;  %v347_v50 = vld [vmem:[#allocation2 + $0x8] sm:$0xff] }
  0x31   : > { %984 = vmatpush3.bf16.msra.mxu1 %v1049_v14  ;;  %v1064_v29 = vld [vmem:[%s1192_s11 + $0xb0] sm:$0xff]   ;;  %v1066_v34 = vld [vmem:[%s1192_s11 + $0x38] sm:$0xff]   ;;  %v917_v5 = vld [vmem:[%s1257_s2] ss:$0 sm:$0xff] (!%p916_p11) }
  0x32   : > { %985 = vmatprep.subr.bf16.mxu1 %v1052_v17  ;;  %v1070_v32 = vld [vmem:[%s1194_s12 + $0x4] ss:$12 sps:$4 sm:$0xff]   ;;  %v1071_v33 = vld [vmem:[%s1194_s12 + $0x8] ss:$12 sps:$4 sm:$0xff]   ;;  %v1068_v35 = vld [vmem:[%s1194_s12] ss:$12 sps:$4 sm:$0xff]  }
  0x33   : > { %948 = vmatpush3.bf16.msra.mxu0 %v1051_v16  ;;  %614 = vmatprep.mubr.bf16.mxu0 %v1070_v32  ;;  %v1073_v36 = vld [vmem:[%s1194_s12 + $0x1c] ss:$12 sps:$4 sm:$0xff]   ;;  %v1072_v37 = vld [vmem:[%s1194_s12 + $0x20] ss:$12 sps:$4 sm:$0xff]   ;;  %v1075_v38 = vld [vmem:[%s1194_s12 + $0x18] ss:$12 sps:$4 sm:$0xff]  }
  0x34   : > { %949 = vmatprep.subr.bf16.mxu0 %v1053_v18  ;;  %997 = vmatprep.mubr.bf16.mxu1 %v1071_v33  ;;  %v348_v59 = vld [vmem:[#allocation2 + $0x10] sm:$0xff]  ;;  %v349_v63 = vld [vmem:[#allocation2 + $0x18] sm:$0xff]  ;;  %v918_v8 = vld [vmem:[%s1258_s3] ss:$0 sm:$0xff] (!%p916_p11) }
  0x35   : > { %986 = vmatpush3.bf16.msra.mxu1 %v1052_v17 }
  0x36   : > { %987 = vmatprep.subr.bf16.mxu1 %v1055_v20 }
  0x37   : > { %950 = vmatpush3.bf16.msra.mxu0 %v1054_v19 }
  0x38   : > { %951 = vmatprep.subr.bf16.mxu0 %v1056_v21 }
  0x39   : > { %988 = vmatpush3.bf16.msra.mxu1 %v1055_v20 }
  0x3a   : > { %989 = vmatprep.subr.bf16.mxu1 %v1058_v22 }
  0x3b   : > { %952 = vmatpush3.bf16.msra.mxu0 %v1057_v23 }
  0x3c   : > { %953 = vmatprep.subr.bf16.mxu0 %v1059_v24 }
  0x3d   : > { %990 = vmatpush3.bf16.msra.mxu1 %v1058_v22 }
  0x3e   : > { %991 = vmatprep.subr.bf16.mxu1 %v1061_v25 }
  0x3f   : > { %954 = vmatpush3.bf16.msra.mxu0 %v1060_v26 }
  0x40   : > { %955 = vmatprep.subr.bf16.mxu0 %v1062_v27 }
  0x41   : > { %992 = vmatpush3.bf16.msra.mxu1 %v1061_v25 }
  0x42   : > { %993 = vmatprep.subr.bf16.mxu1 %v1064_v29 }
  0x43   : > { %956 = vmatpush3.bf16.msra.mxu0 %v1063_v28 }
  0x44   : > { %957 = vmatprep.subr.bf16.mxu0 %v1065_v30 }
  0x45   : > { %994 = vmatpush3.bf16.msra.mxu1 %v1064_v29 }
  0x46   : > { %995 = vmatprep.subr.bf16.mxu1 %v1067_v31 }
  0x47   : > { %958 = vmatpush3.bf16.msra.mxu0 %v1066_v34 }
  0x49   : > { %996 = vmatpush3.bf16.msra.mxu1 %v1067_v31 }
  0x4a   : > { %615 = vmatmul.mubr.bf16.vlgmr.msra.gmra.mrb[0].mxu0 %v1068_v35 }
  0x4b   : > { %622 = vmatprep.mubr.bf16.mxu0 %v1073_v36 }
  0x4c   : > { %998 = vmatmul.mubr.bf16.vlgmr.msra.gmra.mrb[0].mxu1 %v1072_v37 }
  0x52   : > { %623 = vmatmul.mubr.bf16.gmra.mrb[4].mxu0 %v1075_v38 }
 0x11d   : > { %v959_v39 = vpop.f32.mrb[0].mxu0 }
 0x11e   : > { %v960_v40 = vpop.f32.mrb[1].mxu0 }
 0x11f   : > { %v961_v41 = vadd.f32 %v960_v40, %v959_v39  ;;  %v962_v42 = vpop.f32.mrb[2].mxu0  ;;  %v999_v43 = vpop.f32.mrb[0].mxu1 }
 0x120   : > { %v963_v44 = vpop.f32.mrb[3].mxu0  ;;  %v665_v46 = vpop.f32.mrb[1].mxu1 }
 0x121   : > { %v964_v47 = vadd.f32 %v963_v44, %v962_v42  ;;  %v666_v48 = vadd.f32 %v961_v41, %v665_v46  ;;  %v1000_v49 = vpop.f32.mrb[2].mxu1 }
 0x122   : > { %v668_v51 = vpop.f32.mrb[3].mxu1 }
 0x123   : > { %v680_v52 = vadd.f32 %v666_v48, %v346_v45  ;;  %v669_v53 = vadd.f32 %v964_v47, %v668_v51 }
 0x125   : > { %684 = vst [vmem:[#allocation2] sm:$0xff] %v680_v52  ;;  %v681_v54 = vadd.f32 %v669_v53, %v347_v50  ;;  %v965_v55 = vpop.f32.mrb[4].mxu0 }
 0x126   : > { %v966_v56 = vpop.f32.mrb[5].mxu0 }
 0x127   : > { %685 = vst [vmem:[#allocation2 + $0x8] sm:$0xff] %v681_v54  ;;  %v967_v57 = vadd.f32 %v966_v56, %v965_v55  ;;  %v968_v58 = vpop.f32.mrb[6].mxu0 }
 0x128   : > { %v969_v60 = vpop.f32.mrb[7].mxu0 }
 0x129   : > { %v674_v61 = vadd.f32 %v999_v43, %v967_v57  ;;  %v970_v62 = vadd.f32 %v969_v60, %v968_v58  ;;  %691 = sbr.rel (%p916_p11) target bundleno = 320 (0x140), region = 70 }
 0x12b   : > { %v682_v0 = vadd.f32 %v674_v61, %v348_v59  ;;  %v677_v1 = vadd.f32 %v1000_v49, %v970_v62 }
 0x12c   : > { %v692_v3 = vld [vmem:[#allocation2] sm:$0xff] (!%p916_p11) }
 0x12d   : > { %686 = vst [vmem:[#allocation2 + $0x10] sm:$0xff] %v682_v0  ;;  %v683_v2 = vadd.f32 %v677_v1, %v349_v63  ;;  %v703_v6 = vmul.f32 (!%p916_p11), %v917_v5, %v692_v3 }
 0x12e   : > { %v693_v4 = vld [vmem:[#allocation2 + $0x8] sm:$0xff] (!%p916_p11) }
 0x12f   : > { %687 = vst [vmem:[#allocation2 + $0x18] sm:$0xff] %v683_v2  ;;  %v704_v7 = vmul.f32 (!%p916_p11), %v917_v5, %v693_v4  ;;  %v714_v13 = vadd.f32 (!%p916_p11), %v918_v8, %v703_v6 }
 0x131   : > { %v715_v14 = vadd.f32 %v918_v8, %v704_v7  ;;  %v718_v17 = vmax.f32 %v714_v13, 0.0 }
 0x133   : > { %v719_v18 = vmax.f32 %v715_v14, 0.0 }
 0x134   : > { %v694_v9 = vld [vmem:[#allocation2 + $0x10] sm:$0xff] }
 0x135   : > { %v705_v11 = vmul.f32 %v917_v5, %v694_v9  ;;  %v935_v21 = vpack.c.bf16 %v719_v18, %v718_v17 }
 0x136   : > { %v695_v10 = vld [vmem:[#allocation2 + $0x18] sm:$0xff] }
 0x137   : > { %v706_v12 = vmul.f32 %v917_v5, %v695_v10  ;;  %v716_v15 = vadd.f32 %v918_v8, %v705_v11  ;;  %936 = vst [vmem:[%s1259_s4] sm:$0xff] %v935_v21  }
 0x139   : > { %v717_v16 = vadd.f32 %v918_v8, %v706_v12  ;;  %v720_v19 = vmax.f32 %v716_v15, 0.0 }
 0x13b   : > { %v721_v20 = vmax.f32 %v717_v16, 0.0 }
 0x13d   : > { %v940_v22 = vpack.c.bf16 %v721_v20, %v720_v19 }
 0x13f   : > { %942 = vst [vmem:[%s1259_s4 + $0x8] sm:$0xff] %v940_v22  }
 0x140 PF: > { %s14_s19 = sadd.s32 1, %s1114_s19   ;;  %s1260_s15 = smov %s1102_s16 }
 0x141   : > { %p11_p12 = scmp.ge.s32.totalorder %s14_s19, 5   ;;  %s1261_s16 = smov %s1177_s23 }
 0x142   : > { %s1262_s17 = smov %s1110_s18  ;;  %s1263_s18 = smov %s1265_s20 }
 0x143   :  { %13 = sbr.rel (!%p11_p12) target bundleno = 3 (0x3), region = 120 }

// kernel: mnist_resnet_forward.30
= control target key start
LH: loop header
LB: loop body
LE: loop exit
PB: predicated region body
PF: predicated region fallthrough
CT: control target
= control target key end

     0   :  { %s1247_s18 = smov 0   ;;  %s1249_s19 = smov 0   ;;  %s1366_s0 = inlined_call_operand.vmem [shape: bf16[32,1152], index: 0, kind: input, shape index: {}]   ;;  %s1367_s1 = inlined_call_operand.vmem [shape: bf16[1152,128], index: 1, kind: input, shape index: {}]   ;;  %s1368_s2 = inlined_call_operand.vmem [shape: f32[1,128], index: 2, kind: input, shape index: {}]   ;;  %s1369_s3 = inlined_call_operand.vmem [shape: f32[1,128], index: 3, kind: input, shape index: {}]   ;;  %s1370_s4 = inlined_call_operand.vmem [shape: bf16[32,128], index: 4, kind: input, shape index: {}]   ;;  %s1371_s5 = inlined_call_operand.vmem [shape: bf16[32,128], index: 5, kind: output, shape index: {}]  }
   0x1   :  { %s1251_s20 = smov 0   ;;  %s1253_s21 = smov 0  }
   0x2   :  { %s1255_s22 = smov 0  }
   0x3 LB: > { %s27_s23 = sadd.s32 1, %s1210_s21  ;;  %p50_p1 = scmp.ne.s32.totalorder %s1202_s19, %s1198_s18  ;;  %s1214_s22 = sphi %s1255_s22, %s15_s22   ;;  %s1210_s21 = sphi %s1253_s21, %s1375_s21   ;;  %s1206_s20 = sphi %s1251_s20, %s1374_s20   ;;  %s1202_s19 = sphi %s1249_s19, %s1373_s19   ;;  %s1198_s18 = sphi %s1247_s18, %s1372_s18  }
   0x4   : > { %p28_p0 = scmp.ge.s32.totalorder %s27_s23, 3  ;;  %p51_p2 = scmp.eq.s32.totalorder %s1214_s22, 0 }
   0x5   : > { %s43_s25 = sadd.s32 1, %s1202_s19  ;;  %p964_p5 = scmp.ge.s32.totalorder %s1214_s22, 3 }
   0x6   : > { %s1377_s23 = smov (%p28_p0, %s27_s23), 0  ;;  %p52_p3 = por %p51_p2, %p50_p1 }
   0x7   : > { %s39_s24 = ssub.s32 %s1210_s21, %s1377_s23  ;;  %236 = sbr.rel (%p964_p5) target bundleno = 23 (0x17), region = 28 }
   0x8   : > { %p41_p4 = scmp.eq.s32.totalorder %s39_s24, 0 }
   0xa   : > { %s1282_s26 = scalar_select %p41_p4, %s1202_s19, %s43_s25  }
   0xe   : > { %239 = sbr.rel (!%p52_p3) target bundleno = 23 (0x17), region = 32  ;;  %s241_s27 = sand.u32 (%p52_p3), 1, %s1202_s19  }
   0xf   : > { %s1018_s28 = smul.u32 (%p52_p3), 12, %s1210_s21 }
  0x10   : > { %s1101_s29 = smul.u32 (%p52_p3), 48, %s241_s27 }
  0x11   : > { %s249_s7 = scalar_lea.vmem (%p52_p3), %s1366_s0, %s1018_s28 }
  0x12   : > { %v264_v0 = vld [vmem:[%s249_s7] sm:$0xff] (%p52_p3)  ;;  %v268_v2 = vld [vmem:[%s249_s7 + $0x48] sm:$0xff] (%p52_p3)  ;;  %s243_s8 = scalar_lea.vmem (%p52_p3), [#allocation3], %s1101_s29  ;;  %v970_v6 = vld [vmem:[%s249_s7 + $0x50] sm:$0xf] (%p52_p3) }
  0x13   : > { %v266_v1 = vld [vmem:[%s249_s7 + $0x24] sm:$0xff] (%p52_p3)  ;;  %265 = vst [vmem:[%s243_s8] sm:$0xff] (%p52_p3), %v264_v0  ;;  %269 = vst [vmem:[%s243_s8 + $0x18] sm:$0xff] (%p52_p3), %v268_v2  ;;  %v270_v3 = vld [vmem:[%s249_s7 + $0x6c] sm:$0xff] (%p52_p3) }
  0x14   : > { %267 = vst [vmem:[%s243_s8 + $0xc] sm:$0xff] (%p52_p3), %v266_v1  ;;  %v966_v4 = vld [vmem:[%s249_s7 + $0x8] sm:$0xf] (%p52_p3)  ;;  %v968_v5 = vld [vmem:[%s249_s7 + $0x2c] sm:$0xf] (%p52_p3)  ;;  %271 = vst [vmem:[%s243_s8 + $0x24] sm:$0xff] (%p52_p3), %v270_v3 }
  0x15   : > { %967 = vst [vmem:[%s243_s8 + $0x8] sm:$0xf] %v966_v4  ;;  %969 = vst [vmem:[%s243_s8 + $0x14] sm:$0xf] %v968_v5  ;;  %v972_v7 = vld [vmem:[%s249_s7 + $0x74] sm:$0xf] }
  0x16   : > { %971 = vst [vmem:[%s243_s8 + $0x20] sm:$0xf] %v970_v6  ;;  %973 = vst [vmem:[%s243_s8 + $0x2c] sm:$0xf] %v972_v7 }
  0x17 PF: > { %p974_p6 = scmp.ge.s32.totalorder %s1214_s22, 1  ;;  %p303_p7 = scmp.lt.s32.totalorder %s1214_s22, 4 }
  0x19   : > { %p304_p8 = pnand %p974_p6, %p303_p7 }
  0x1a   : > { %s310_s9 = sand.u32 (!%p304_p8), 1, %s1198_s18   ;;  %s364_s10 = smul.u32 (!%p304_p8), 48, %s1206_s20 }
  0x1b   : > { %307 = sbr.rel (%p304_p8) target bundleno = 322 (0x142), region = 62  ;;  %p976_p10 = scmp.ne.s32.totalorder (!%p304_p8), %s1206_s20, 0 }
  0x1c   : > { %s1102_s11 = smul.u32 (!%p304_p8), 48, %s310_s9  ;;  %p365_p9 = scmp.lt.s32.totalorder (!%p304_p8), %s364_s10, 143 }
  0x1e   : > { %s1299_s16 = scalar_lea.vmem (!%p304_p8), [#allocation3], %s1102_s11 }
  0x22   : > { %s1379_s10 = smov (!%p365_p9, %s364_s10), 143  ;;  %401 = sbr.rel (%p976_p10) target bundleno = 41 (0x29), region = 70 }
  0x23   : > { %s975_s12 = sshll.u32 %s1379_s10, 2  ;;  %v1216_v8 = vmov (!%p976_p10), 0.0  }
  0x24   : > { %s1297_s15 = scalar_lea.vmem %s1367_s1, %s975_s12  ;;  %402 = vst [vmem:[#allocation2] sm:$0xff] (!%p976_p10), %v1216_v8  ;;  %403 = vst [vmem:[#allocation2 + $0x8] sm:$0xff] (!%p976_p10), %v1216_v8 }
  0x25   : > { %404 = vst [vmem:[#allocation2 + $0x10] sm:$0xff] (!%p976_p10), %v1216_v8  ;;  %405 = vst [vmem:[#allocation2 + $0x18] sm:$0xff] (!%p976_p10), %v1216_v8 }
  0x29 PF: > { %v1144_v9 = vld [vmem:[%s1297_s15 + $0x40] sm:$0xff]   ;;  %v1147_v12 = vld [vmem:[%s1297_s15 + $0x48] sm:$0xff]   ;;  %v1150_v15 = vld [vmem:[%s1297_s15 + $0x50] sm:$0xff]   ;;  %p1007_p11 = scmp.ne.s32.totalorder %s1206_s20, 2 }
  0x2a   : > { %v1145_v10 = vld [vmem:[%s1297_s15] sm:$0xff]   ;;  %1043 = vmatprep.subr.bf16.mxu0 %v1144_v9  ;;  %v1148_v13 = vld [vmem:[%s1297_s15 + $0x8] sm:$0xff]   ;;  %v1151_v16 = vld [vmem:[%s1297_s15 + $0x10] sm:$0xff]  }
  0x2b   : > { %v1146_v11 = vld [vmem:[%s1297_s15 + $0x80] sm:$0xff]   ;;  %1044 = vmatpush3.bf16.msra.mxu0 %v1145_v10  ;;  %v1149_v14 = vld [vmem:[%s1297_s15 + $0x88] sm:$0xff]   ;;  %v1152_v17 = vld [vmem:[%s1297_s15 + $0x90] sm:$0xff]  }
  0x2c   : > { %1081 = vmatprep.subr.bf16.mxu1 %v1146_v11  ;;  %1045 = vmatprep.subr.bf16.mxu0 %v1147_v12  ;;  %v1153_v18 = vld [vmem:[%s1297_s15 + $0x58] sm:$0xff]   ;;  %v1156_v21 = vld [vmem:[%s1297_s15 + $0x60] sm:$0xff]   ;;  %v1159_v24 = vld [vmem:[%s1297_s15 + $0x68] sm:$0xff]  }
  0x2d   : > { %1082 = vmatpush3.bf16.msra.mxu1 %v1146_v11  ;;  %v1154_v19 = vld [vmem:[%s1297_s15 + $0x18] sm:$0xff]   ;;  %v1158_v22 = vld [vmem:[%s1297_s15 + $0xa0] sm:$0xff]   ;;  %v1161_v25 = vld [vmem:[%s1297_s15 + $0xa8] sm:$0xff]  }
  0x2e   : > { %1083 = vmatprep.subr.bf16.mxu1 %v1149_v14  ;;  %v1155_v20 = vld [vmem:[%s1297_s15 + $0x98] sm:$0xff]   ;;  %v1157_v23 = vld [vmem:[%s1297_s15 + $0x20] sm:$0xff]   ;;  %v1160_v26 = vld [vmem:[%s1297_s15 + $0x28] sm:$0xff]  }
  0x2f   : > { %1046 = vmatpush3.bf16.msra.mxu0 %v1148_v13  ;;  %v1162_v27 = vld [vmem:[%s1297_s15 + $0x70] sm:$0xff]   ;;  %v1165_v30 = vld [vmem:[%s1297_s15 + $0x78] sm:$0xff]   ;;  %v406_v45 = vld [vmem:[#allocation2] sm:$0xff] }
  0x30   : > { %1047 = vmatprep.subr.bf16.mxu0 %v1150_v15  ;;  %v1163_v28 = vld [vmem:[%s1297_s15 + $0x30] sm:$0xff]   ;;  %v1167_v31 = vld [vmem:[%s1297_s15 + $0xb8] sm:$0xff]   ;;  %v407_v50 = vld [vmem:[#allocation2 + $0x8] sm:$0xff] }
  0x31   : > { %1084 = vmatpush3.bf16.msra.mxu1 %v1149_v14  ;;  %v1164_v29 = vld [vmem:[%s1297_s15 + $0xb0] sm:$0xff]   ;;  %v1166_v34 = vld [vmem:[%s1297_s15 + $0x38] sm:$0xff]   ;;  %v1008_v5 = vld [vmem:[%s1368_s2] ss:$0 sm:$0xff] (!%p1007_p11) }
  0x32   : > { %1085 = vmatprep.subr.bf16.mxu1 %v1152_v17  ;;  %v1170_v32 = vld [vmem:[%s1299_s16 + $0x4] ss:$12 sps:$4 sm:$0xff]   ;;  %v1171_v33 = vld [vmem:[%s1299_s16 + $0x8] ss:$12 sps:$4 sm:$0xff]   ;;  %v1168_v35 = vld [vmem:[%s1299_s16] ss:$12 sps:$4 sm:$0xff]  }
  0x33   : > { %1048 = vmatpush3.bf16.msra.mxu0 %v1151_v16  ;;  %674 = vmatprep.mubr.bf16.mxu0 %v1170_v32  ;;  %v1173_v36 = vld [vmem:[%s1299_s16 + $0x1c] ss:$12 sps:$4 sm:$0xff]   ;;  %v1172_v37 = vld [vmem:[%s1299_s16 + $0x20] ss:$12 sps:$4 sm:$0xff]   ;;  %v1175_v38 = vld [vmem:[%s1299_s16 + $0x18] ss:$12 sps:$4 sm:$0xff]  }
  0x34   : > { %1049 = vmatprep.subr.bf16.mxu0 %v1153_v18  ;;  %1097 = vmatprep.mubr.bf16.mxu1 %v1171_v33  ;;  %v408_v59 = vld [vmem:[#allocation2 + $0x10] sm:$0xff]  ;;  %v409_v63 = vld [vmem:[#allocation2 + $0x18] sm:$0xff]  ;;  %v1009_v8 = vld [vmem:[%s1369_s3] ss:$0 sm:$0xff] (!%p1007_p11) }
  0x35   : > { %1086 = vmatpush3.bf16.msra.mxu1 %v1152_v17  ;;  %v1024_v9 = vld [vmem:[%s1370_s4] sm:$0xff] (!%p1007_p11)   ;;  %v1041_v15 = vld [vmem:[%s1370_s4 + $0x8] sm:$0xff] (!%p1007_p11)  }
  0x36   : > { %1087 = vmatprep.subr.bf16.mxu1 %v1155_v20  ;;  %v1025_v11 = vunpack.c.l.bf16 (!%p1007_p11), %v1024_v9  ;;  %v1026_v12 = vunpack.c.h.bf16 (!%p1007_p11), %v1024_v9 }
  0x37   : > { %1050 = vmatpush3.bf16.msra.mxu0 %v1154_v19  ;;  %v1029_v19 = vunpack.c.l.bf16 (!%p1007_p11), %v1041_v15 }
  0x38   : > { %1051 = vmatprep.subr.bf16.mxu0 %v1156_v21  ;;  %v1030_v21 = vunpack.c.h.bf16 (!%p1007_p11), %v1041_v15 }
  0x39   : > { %1088 = vmatpush3.bf16.msra.mxu1 %v1155_v20 }
  0x3a   : > { %1089 = vmatprep.subr.bf16.mxu1 %v1158_v22 }
  0x3b   : > { %1052 = vmatpush3.bf16.msra.mxu0 %v1157_v23 }
  0x3c   : > { %1053 = vmatprep.subr.bf16.mxu0 %v1159_v24 }
  0x3d   : > { %1090 = vmatpush3.bf16.msra.mxu1 %v1158_v22 }
  0x3e   : > { %1091 = vmatprep.subr.bf16.mxu1 %v1161_v25 }
  0x3f   : > { %1054 = vmatpush3.bf16.msra.mxu0 %v1160_v26 }
  0x40   : > { %1055 = vmatprep.subr.bf16.mxu0 %v1162_v27 }
  0x41   : > { %1092 = vmatpush3.bf16.msra.mxu1 %v1161_v25 }
  0x42   : > { %1093 = vmatprep.subr.bf16.mxu1 %v1164_v29 }
  0x43   : > { %1056 = vmatpush3.bf16.msra.mxu0 %v1163_v28 }
  0x44   : > { %1057 = vmatprep.subr.bf16.mxu0 %v1165_v30 }
  0x45   : > { %1094 = vmatpush3.bf16.msra.mxu1 %v1164_v29 }
  0x46   : > { %1095 = vmatprep.subr.bf16.mxu1 %v1167_v31 }
  0x47   : > { %1058 = vmatpush3.bf16.msra.mxu0 %v1166_v34 }
  0x49   : > { %1096 = vmatpush3.bf16.msra.mxu1 %v1167_v31 }
  0x4a   : > { %675 = vmatmul.mubr.bf16.vlgmr.msra.gmra.mrb[0].mxu0 %v1168_v35 }
  0x4b   : > { %682 = vmatprep.mubr.bf16.mxu0 %v1173_v36 }
  0x4c   : > { %1098 = vmatmul.mubr.bf16.vlgmr.msra.gmra.mrb[0].mxu1 %v1172_v37 }
  0x52   : > { %683 = vmatmul.mubr.bf16.gmra.mrb[4].mxu0 %v1175_v38 }
 0x11d   : > { %v1059_v39 = vpop.f32.mrb[0].mxu0 }
 0x11e   : > { %v1060_v40 = vpop.f32.mrb[1].mxu0 }
 0x11f   : > { %v1061_v41 = vadd.f32 %v1060_v40, %v1059_v39  ;;  %v1062_v42 = vpop.f32.mrb[2].mxu0  ;;  %v1099_v43 = vpop.f32.mrb[0].mxu1 }
 0x120   : > { %v1063_v44 = vpop.f32.mrb[3].mxu0  ;;  %v725_v46 = vpop.f32.mrb[1].mxu1 }
 0x121   : > { %v1064_v47 = vadd.f32 %v1063_v44, %v1062_v42  ;;  %v726_v48 = vadd.f32 %v1061_v41, %v725_v46  ;;  %v1100_v49 = vpop.f32.mrb[2].mxu1 }
 0x122   : > { %v728_v51 = vpop.f32.mrb[3].mxu1 }
 0x123   : > { %v740_v52 = vadd.f32 %v726_v48, %v406_v45  ;;  %v729_v53 = vadd.f32 %v1064_v47, %v728_v51 }
 0x125   : > { %744 = vst [vmem:[#allocation2] sm:$0xff] %v740_v52  ;;  %v741_v54 = vadd.f32 %v729_v53, %v407_v50  ;;  %v1065_v55 = vpop.f32.mrb[4].mxu0 }
 0x126   : > { %v1066_v56 = vpop.f32.mrb[5].mxu0 }
 0x127   : > { %745 = vst [vmem:[#allocation2 + $0x8] sm:$0xff] %v741_v54  ;;  %v1067_v57 = vadd.f32 %v1066_v56, %v1065_v55  ;;  %v1068_v58 = vpop.f32.mrb[6].mxu0 }
 0x128   : > { %v1069_v60 = vpop.f32.mrb[7].mxu0 }
 0x129   : > { %v734_v61 = vadd.f32 %v1099_v43, %v1067_v57  ;;  %v1070_v62 = vadd.f32 %v1069_v60, %v1068_v58  ;;  %751 = sbr.rel (%p1007_p11) target bundleno = 322 (0x142), region = 74 }
 0x12b   : > { %v742_v0 = vadd.f32 %v734_v61, %v408_v59  ;;  %v737_v1 = vadd.f32 %v1100_v49, %v1070_v62 }
 0x12c   : > { %v752_v3 = vld [vmem:[#allocation2] sm:$0xff] (!%p1007_p11) }
 0x12d   : > { %746 = vst [vmem:[#allocation2 + $0x10] sm:$0xff] %v742_v0  ;;  %v743_v2 = vadd.f32 %v737_v1, %v409_v63  ;;  %v763_v6 = vmul.f32 (!%p1007_p11), %v1008_v5, %v752_v3 }
 0x12e   : > { %v753_v4 = vld [vmem:[#allocation2 + $0x8] sm:$0xff] (!%p1007_p11) }
 0x12f   : > { %747 = vst [vmem:[#allocation2 + $0x18] sm:$0xff] %v743_v2  ;;  %v764_v7 = vmul.f32 (!%p1007_p11), %v1008_v5, %v753_v4  ;;  %v774_v16 = vadd.f32 (!%p1007_p11), %v1009_v8, %v763_v6 }
 0x131   : > { %v775_v17 = vadd.f32 %v1009_v8, %v764_v7  ;;  %v786_v22 = vadd.f32 %v1025_v11, %v774_v16 }
 0x133   : > { %v787_v23 = vadd.f32 %v1026_v12, %v775_v17  ;;  %v790_v26 = vmax.f32 %v786_v22, 0.0 }
 0x134   : > { %v754_v10 = vld [vmem:[#allocation2 + $0x10] sm:$0xff] }
 0x135   : > { %v765_v14 = vmul.f32 %v1008_v5, %v754_v10  ;;  %v791_v27 = vmax.f32 %v787_v23, 0.0 }
 0x136   : > { %v755_v13 = vld [vmem:[#allocation2 + $0x18] sm:$0xff] }
 0x137   : > { %v766_v18 = vmul.f32 %v1008_v5, %v755_v13  ;;  %v776_v20 = vadd.f32 %v1009_v8, %v765_v14  ;;  %v1034_v30 = vpack.c.bf16 %v791_v27, %v790_v26 }
 0x139   : > { %v777_v24 = vadd.f32 %v1009_v8, %v766_v18  ;;  %v788_v25 = vadd.f32 %v1029_v19, %v776_v20  ;;  %1035 = vst [vmem:[%s1371_s5] sm:$0xff] %v1034_v30  }
 0x13b   : > { %v789_v28 = vadd.f32 %v1030_v21, %v777_v24  ;;  %v792_v29 = vmax.f32 %v788_v25, 0.0 }
 0x13d   : > { %v793_v31 = vmax.f32 %v789_v28, 0.0 }
 0x13f   : > { %v1039_v32 = vpack.c.bf16 %v793_v31, %v792_v29 }
 0x141   : > { %1042 = vst [vmem:[%s1371_s5 + $0x8] sm:$0xff] %v1039_v32  }
 0x142 PF: > { %s15_s22 = sadd.s32 1, %s1214_s22   ;;  %s1372_s18 = smov %s1202_s19 }
 0x143   : > { %p12_p12 = scmp.ge.s32.totalorder %s15_s22, 5   ;;  %s1373_s19 = smov %s1282_s26 }
 0x144   : > { %s1374_s20 = smov %s1210_s21  ;;  %s1375_s21 = smov %s1377_s23 }
 0x145   :  { %14 = sbr.rel (!%p12_p12) target bundleno = 3 (0x3), region = 127 }

// kernel: mnist_resnet_forward.34
= control target key start
LH: loop header
LB: loop body
LE: loop exit
PB: predicated region body
PF: predicated region fallthrough
CT: control target
= control target key end

     0   :  { %s1231_s15 = smov 0   ;;  %s1233_s16 = smov 0   ;;  %s1365_s0 = inlined_call_operand.vmem [shape: bf16[16,1152], index: 0, kind: input, shape index: {}]   ;;  %s1366_s1 = inlined_call_operand.vmem [shape: bf16[1152,256], index: 1, kind: input, shape index: {}]   ;;  %s1367_s2 = inlined_call_operand.vmem [shape: f32[1,256], index: 2, kind: input, shape index: {}]   ;;  %s1368_s3 = inlined_call_operand.vmem [shape: f32[1,256], index: 3, kind: input, shape index: {}]   ;;  %s1369_s4 = inlined_call_operand.vmem [shape: bf16[16,256], index: 4, kind: output, shape index: {}]  }
   0x1   :  { %s1235_s17 = smov 0   ;;  %s1237_s18 = smov 0  }
   0x2   :  { %s1239_s19 = smov 0  }
   0x3 LB: > { %s26_s20 = sadd.s32 1, %s1198_s18  ;;  %p49_p1 = scmp.ne.s32.totalorder %s1190_s16, %s1186_s15  ;;  %s1202_s19 = sphi %s1239_s19, %s14_s19   ;;  %s1198_s18 = sphi %s1237_s18, %s1373_s18   ;;  %s1194_s17 = sphi %s1235_s17, %s1372_s17   ;;  %s1190_s16 = sphi %s1233_s16, %s1371_s16   ;;  %s1186_s15 = sphi %s1231_s15, %s1370_s15  }
   0x4   : > { %p27_p0 = scmp.ge.s32.totalorder %s26_s20, 3  ;;  %p50_p2 = scmp.eq.s32.totalorder %s1202_s19, 0 }
   0x5   : > { %s42_s22 = sadd.s32 1, %s1190_s16  ;;  %p968_p5 = scmp.ge.s32.totalorder %s1202_s19, 3 }
   0x6   : > { %s1375_s20 = smov (%p27_p0, %s26_s20), 0  ;;  %p51_p3 = por %p50_p2, %p49_p1 }
   0x7   : > { %s38_s21 = ssub.s32 %s1198_s18, %s1375_s20  ;;  %199 = sbr.rel (%p968_p5) target bundleno = 21 (0x15), region = 24 }
   0x8   : > { %p40_p4 = scmp.eq.s32.totalorder %s38_s21, 0 }
   0xa   : > { %s1266_s23 = scalar_select %p40_p4, %s1190_s16, %s42_s22  }
   0xe   : > { %202 = sbr.rel (!%p51_p3) target bundleno = 21 (0x15), region = 28  ;;  %s204_s24 = sand.u32 (%p51_p3), 1, %s1190_s16  }
   0xf   : > { %s1036_s25 = smul.u32 (%p51_p3), 12, %s1198_s18 }
  0x10   : > { %s1044_s26 = smul.u32 (%p51_p3), 24, %s204_s24 }
  0x11   : > { %s212_s29 = scalar_lea.vmem (%p51_p3), %s1365_s0, %s1036_s25 }
  0x12   : > { %v227_v0 = vld [vmem:[%s212_s29] sm:$0xff] (%p51_p3)  ;;  %v970_v2 = vld [vmem:[%s212_s29 + $0x8] sm:$0xf] (%p51_p3)  ;;  %s206_s30 = scalar_lea.vmem (%p51_p3), [#allocation3], %s1044_s26  ;;  %v972_v3 = vld [vmem:[%s212_s29 + $0x2c] sm:$0xf] (%p51_p3) }
  0x13   : > { %v229_v1 = vld [vmem:[%s212_s29 + $0x24] sm:$0xff] (%p51_p3)  ;;  %228 = vst [vmem:[%s206_s30] sm:$0xff] (%p51_p3), %v227_v0  ;;  %971 = vst [vmem:[%s206_s30 + $0x8] sm:$0xf] (%p51_p3), %v970_v2 }
  0x14   : > { %230 = vst [vmem:[%s206_s30 + $0xc] sm:$0xff] (%p51_p3), %v229_v1  ;;  %973 = vst [vmem:[%s206_s30 + $0x14] sm:$0xf] (%p51_p3), %v972_v3 }
  0x15 PF: > { %p974_p6 = scmp.ge.s32.totalorder %s1202_s19, 1  ;;  %p261_p7 = scmp.lt.s32.totalorder %s1202_s19, 4 }
  0x17   : > { %p262_p8 = pnand %p974_p6, %p261_p7 }
  0x18   : > { %s268_s5 = sand.u32 (!%p262_p8), 1, %s1186_s15   ;;  %s318_s6 = smul.u32 (!%p262_p8), 48, %s1194_s17 }
  0x19   : > { %265 = sbr.rel (%p262_p8) target bundleno = 340 (0x154), region = 58  ;;  %p977_p10 = scmp.ne.s32.totalorder (!%p262_p8), %s1194_s17, 0 }
  0x1a   : > { %s1045_s7 = smul.u32 (!%p262_p8), 24, %s268_s5  ;;  %p320_p9 = scmp.lt.s32.totalorder (!%p262_p8), %s318_s6, 143 }
  0x1c   : > { %s1283_s12 = scalar_lea.vmem (!%p262_p8), [#allocation3], %s1045_s7 }
  0x20   : > { %s1377_s6 = smov (!%p320_p9, %s318_s6), 143  ;;  %356 = sbr.rel (%p977_p10) target bundleno = 39 (0x27), region = 66 }
  0x21   : > { %s1037_s8 = sshll.u32 %s1377_s6, 3  ;;  %v1204_v4 = vmov (!%p977_p10), 0.0  }
  0x22   : > { %s1281_s11 = scalar_lea.vmem %s1366_s1, %s1037_s8  ;;  %357 = vst [vmem:[#allocation2] sm:$0xff] (!%p977_p10), %v1204_v4  ;;  %358 = vst [vmem:[#allocation2 + $0x8] sm:$0xff] (!%p977_p10), %v1204_v4 }
  0x23   : > { %359 = vst [vmem:[#allocation2 + $0x10] sm:$0xff] (!%p977_p10), %v1204_v4  ;;  %360 = vst [vmem:[#allocation2 + $0x18] sm:$0xff] (!%p977_p10), %v1204_v4 }
  0x27 PF: > { %v1088_v5 = vld [vmem:[%s1281_s11 + $0x4] ss:$8 sps:$4 sm:$0xff]   ;;  %v1090_v6 = vld [vmem:[%s1281_s11] ss:$8 sps:$4 sm:$0xff]   ;;  %v1205_v7 = vmov 0   ;;  %p1029_p11 = scmp.ne.s32.totalorder %s1194_s17, 2 }
  0x28   : > { %748 = vmatprep.mubr.bf16.mxu0 %v1205_v7  ;;  %673 = vmatprep.subr.bf16.mxu1 %v1088_v5  ;;  %v1091_v8 = vld [vmem:[%s1281_s11 + $0x14] ss:$8 sps:$4 sm:$0xff]   ;;  %v1093_v9 = vld [vmem:[%s1281_s11 + $0x10] ss:$8 sps:$4 sm:$0xff]   ;;  %v1094_v10 = vld [vmem:[%s1281_s11 + $0x24] ss:$8 sps:$4 sm:$0xff]  }
  0x29   : > { %674 = vmatpush1.bf16.msra.mxu1 %v1090_v6  ;;  %v1096_v11 = vld [vmem:[%s1281_s11 + $0x20] ss:$8 sps:$4 sm:$0xff]   ;;  %v1097_v12 = vld [vmem:[%s1281_s11 + $0x34] ss:$8 sps:$4 sm:$0xff]   ;;  %v1099_v13 = vld [vmem:[%s1281_s11 + $0x30] ss:$8 sps:$4 sm:$0xff]  }
  0x2a   : > { %675 = vmatprep.subr.bf16.mxu1 %v1091_v8  ;;  %v1112_v14 = vld [vmem:[%s1281_s11 + $0x104] ss:$8 sps:$4 sm:$0xff]   ;;  %v1114_v15 = vld [vmem:[%s1281_s11 + $0x100] ss:$8 sps:$4 sm:$0xff]   ;;  %v1118_v17 = vld [vmem:[%s1281_s11 + $0x114] ss:$8 sps:$4 sm:$0xff]  }
  0x2b   : > { %v1100_v16 = vld [vmem:[%s1281_s11 + $0x44] ss:$8 sps:$4 sm:$0xff]   ;;  %716 = vmatprep.subr.bf16.mxu0 %v1112_v14  ;;  %v1120_v18 = vld [vmem:[%s1281_s11 + $0x110] ss:$8 sps:$4 sm:$0xff]   ;;  %v1102_v19 = vld [vmem:[%s1281_s11 + $0x40] ss:$8 sps:$4 sm:$0xff]  }
  0x2c   : > { %717 = vmatpush1.bf16.msra.mxu0 %v1114_v15  ;;  %v1103_v20 = vld [vmem:[%s1281_s11 + $0x54] ss:$8 sps:$4 sm:$0xff]   ;;  %v1124_v21 = vld [vmem:[%s1281_s11 + $0x124] ss:$8 sps:$4 sm:$0xff]   ;;  %v1126_v22 = vld [vmem:[%s1281_s11 + $0x120] ss:$8 sps:$4 sm:$0xff]  }
  0x2d   : > { %676 = vmatpush1.bf16.msra.mxu1 %v1093_v9  ;;  %718 = vmatprep.subr.bf16.mxu0 %v1118_v17  ;;  %v1105_v23 = vld [vmem:[%s1281_s11 + $0x50] ss:$8 sps:$4 sm:$0xff]   ;;  %v1130_v24 = vld [vmem:[%s1281_s11 + $0x134] ss:$8 sps:$4 sm:$0xff]   ;;  %v1106_v25 = vld [vmem:[%s1281_s11 + $0x64] ss:$8 sps:$4 sm:$0xff]  }
  0x2e   : > { %677 = vmatprep.subr.bf16.mxu1 %v1094_v10  ;;  %v1132_v26 = vld [vmem:[%s1281_s11 + $0x130] ss:$8 sps:$4 sm:$0xff]   ;;  %v1108_v27 = vld [vmem:[%s1281_s11 + $0x60] ss:$8 sps:$4 sm:$0xff]   ;;  %v1136_v28 = vld [vmem:[%s1281_s11 + $0x144] ss:$8 sps:$4 sm:$0xff]  }
  0x2f   : > { %v1109_v29 = vld [vmem:[%s1281_s11 + $0x74] ss:$8 sps:$4 sm:$0xff]   ;;  %v1138_v30 = vld [vmem:[%s1281_s11 + $0x140] ss:$8 sps:$4 sm:$0xff]   ;;  %v1111_v31 = vld [vmem:[%s1281_s11 + $0x70] ss:$8 sps:$4 sm:$0xff]  }
  0x30   : > { %719 = vmatpush1.bf16.msra.mxu0 %v1120_v18  ;;  %v1142_v32 = vld [vmem:[%s1281_s11 + $0x154] ss:$8 sps:$4 sm:$0xff]   ;;  %v1115_v33 = vld [vmem:[%s1281_s11 + $0x84] ss:$8 sps:$4 sm:$0xff]   ;;  %v1144_v34 = vld [vmem:[%s1281_s11 + $0x150] ss:$8 sps:$4 sm:$0xff]  }
  0x31   : > { %678 = vmatpush1.bf16.msra.mxu1 %v1096_v11  ;;  %720 = vmatprep.subr.bf16.mxu0 %v1124_v21  ;;  %v1117_v35 = vld [vmem:[%s1281_s11 + $0x80] ss:$8 sps:$4 sm:$0xff]   ;;  %v1148_v36 = vld [vmem:[%s1281_s11 + $0x164] ss:$8 sps:$4 sm:$0xff]   ;;  %v1121_v37 = vld [vmem:[%s1281_s11 + $0x94] ss:$8 sps:$4 sm:$0xff]  }
  0x32   : > { %679 = vmatprep.subr.bf16.mxu1 %v1097_v12  ;;  %v1150_v38 = vld [vmem:[%s1281_s11 + $0x160] ss:$8 sps:$4 sm:$0xff]   ;;  %v1123_v40 = vld [vmem:[%s1281_s11 + $0x90] ss:$8 sps:$4 sm:$0xff]   ;;  %v1154_v41 = vld [vmem:[%s1281_s11 + $0x174] ss:$8 sps:$4 sm:$0xff]  }
  0x33   : > { %v1163_v39 = vld [vmem:[%s1283_s12 + $0x4] ss:$12 sps:$4 sm:$0xff]   ;;  %v1160_v46 = vld [vmem:[%s1283_s12 + $0x8] ss:$12 sps:$4 sm:$0xff]   ;;  %v1161_v56 = vld [vmem:[%s1283_s12] ss:$12 sps:$4 sm:$0xff]  }
  0x34   : > { %721 = vmatpush1.bf16.msra.mxu0 %v1126_v22  ;;  %v1127_v42 = vld [vmem:[%s1281_s11 + $0xa4] ss:$8 sps:$4 sm:$0xff]   ;;  %705 = vmatprep.mubr.bf16.mxu1 %v1163_v39  ;;  %v1156_v43 = vld [vmem:[%s1281_s11 + $0x170] ss:$8 sps:$4 sm:$0xff]   ;;  %v1129_v44 = vld [vmem:[%s1281_s11 + $0xa0] ss:$8 sps:$4 sm:$0xff]  }
  0x35   : > { %680 = vmatpush1.bf16.msra.mxu1 %v1099_v13  ;;  %722 = vmatprep.subr.bf16.mxu0 %v1130_v24  ;;  %v1133_v45 = vld [vmem:[%s1281_s11 + $0xb4] ss:$8 sps:$4 sm:$0xff]   ;;  %v1135_v47 = vld [vmem:[%s1281_s11 + $0xb0] ss:$8 sps:$4 sm:$0xff]   ;;  %v1139_v48 = vld [vmem:[%s1281_s11 + $0xc4] ss:$8 sps:$4 sm:$0xff]   ;;  %v777_v13 = vlaneseq (!%p1029_p11) }
  0x36   : > { %681 = vmatprep.subr.bf16.mxu1 %v1100_v16  ;;  %v1141_v49 = vld [vmem:[%s1281_s11 + $0xc0] ss:$8 sps:$4 sm:$0xff]   ;;  %v1145_v50 = vld [vmem:[%s1281_s11 + $0xd4] ss:$8 sps:$4 sm:$0xff]   ;;  %v1147_v51 = vld [vmem:[%s1281_s11 + $0xd0] ss:$8 sps:$4 sm:$0xff]  }
  0x37   : > { %v1151_v52 = vld [vmem:[%s1281_s11 + $0xe4] ss:$8 sps:$4 sm:$0xff]   ;;  %v1153_v53 = vld [vmem:[%s1281_s11 + $0xe0] ss:$8 sps:$4 sm:$0xff]   ;;  %v1157_v54 = vld [vmem:[%s1281_s11 + $0xf4] ss:$8 sps:$4 sm:$0xff]  }
  0x38   : > { %723 = vmatpush1.bf16.msra.mxu0 %v1132_v26  ;;  %v1159_v55 = vld [vmem:[%s1281_s11 + $0xf0] ss:$8 sps:$4 sm:$0xff]   ;;  %v361_v61 = vld [vmem:[#allocation2] sm:$0xff]  ;;  %v362_v0 = vld [vmem:[#allocation2 + $0x8] sm:$0xff]  ;;  %v778_v14 = vshrl.u32 (!%p1029_p11), %v777_v13, 7 }
  0x39   : > { %682 = vmatpush1.bf16.msra.mxu1 %v1102_v19  ;;  %724 = vmatprep.subr.bf16.mxu0 %v1136_v28  ;;  %v363_v3 = vld [vmem:[#allocation2 + $0x10] sm:$0xff]  ;;  %v364_v7 = vld [vmem:[#allocation2 + $0x18] sm:$0xff]  ;;  %v775_v15 = vld [vmem:[%s1367_s2] sm:$0x3] (!%p1029_p11) }
  0x3a   : > { %683 = vmatprep.subr.bf16.mxu1 %v1103_v20  ;;  %v791_v16 = vld [vmem:[%s1368_s3] sm:$0x3] (!%p1029_p11)  ;;  %v779_v18 = vsub.s32 (!%p1029_p11), 0, %v778_v14  ;;  %v783_v19 = vsub.s32 (!%p1029_p11), 1, %v778_v14 }
  0x3c   : > { %725 = vmatpush1.bf16.msra.mxu0 %v1138_v30  ;;  %v784_v24 = vrot.slane (!%p1029_p11), %v775_v15, %v783_v19  ;;  %v800_v26 = vrot.slane (!%p1029_p11), %v791_v16, %v783_v19 }
  0x3d   : > { %684 = vmatpush1.bf16.msra.mxu1 %v1105_v23  ;;  %726 = vmatprep.subr.bf16.mxu0 %v1142_v32  ;;  %v780_v23 = vrot.slane (!%p1029_p11), %v775_v15, %v779_v18 }
  0x3e   : > { %685 = vmatprep.subr.bf16.mxu1 %v1106_v25  ;;  %v796_v25 = vrot.slane (!%p1029_p11), %v791_v16, %v779_v18 }
  0x40   : > { %727 = vmatpush1.bf16.msra.mxu0 %v1144_v34 }
  0x41   : > { %686 = vmatpush1.bf16.msra.mxu1 %v1108_v27  ;;  %728 = vmatprep.subr.bf16.mxu0 %v1148_v36 }
  0x42   : > { %687 = vmatprep.subr.bf16.mxu1 %v1109_v29 }
  0x44   : > { %729 = vmatpush1.bf16.msra.mxu0 %v1150_v38 }
  0x45   : > { %688 = vmatpush1.bf16.msra.mxu1 %v1111_v31  ;;  %730 = vmatprep.subr.bf16.mxu0 %v1154_v41 }
  0x46   : > { %689 = vmatprep.subr.bf16.mxu1 %v1115_v33 }
  0x48   : > { %731 = vmatpush1.bf16.msra.mxu0 %v1156_v43 }
  0x49   : > { %690 = vmatpush1.bf16.msra.mxu1 %v1117_v35 }
  0x4a   : > { %691 = vmatprep.subr.bf16.mxu1 %v1121_v37 }
  0x4b   : > { %749 = vmatmul.mubr.bf16.vlgmr.msra.gmra.mrb[0].mxu0 %v1160_v46 }
  0x4d   : > { %692 = vmatpush1.bf16.msra.mxu1 %v1123_v40 }
  0x4e   : > { %693 = vmatprep.subr.bf16.mxu1 %v1127_v42 }
  0x51   : > { %694 = vmatpush1.bf16.msra.mxu1 %v1129_v44 }
  0x52   : > { %695 = vmatprep.subr.bf16.mxu1 %v1133_v45 }
  0x55   : > { %696 = vmatpush1.bf16.msra.mxu1 %v1135_v47 }
  0x56   : > { %697 = vmatprep.subr.bf16.mxu1 %v1139_v48 }
  0x59   : > { %698 = vmatpush1.bf16.msra.mxu1 %v1141_v49 }
  0x5a   : > { %699 = vmatprep.subr.bf16.mxu1 %v1145_v50 }
  0x5d   : > { %700 = vmatpush1.bf16.msra.mxu1 %v1147_v51 }
  0x5e   : > { %701 = vmatprep.subr.bf16.mxu1 %v1151_v52 }
  0x61   : > { %702 = vmatpush1.bf16.msra.mxu1 %v1153_v53 }
  0x62   : > { %703 = vmatprep.subr.bf16.mxu1 %v1157_v54 }
  0x65   : > { %704 = vmatpush1.bf16.msra.mxu1 %v1159_v55 }
  0x68   : > { %706 = vmatmul.mubr.bf16.vlgmr.msra.gmra.mrb[0].mxu1 %v1161_v56 }
 0x11e   : > { %v750_v57 = vpop.f32.mrb[0].mxu0 }
 0x11f   : > { %v752_v58 = vpop.f32.mrb[1].mxu0 }
 0x120   : > { %v754_v59 = vpop.f32.mrb[2].mxu0 }
 0x121   : > { %v756_v60 = vpop.f32.mrb[3].mxu0 }
 0x13b   : > { %v707_v62 = vpop.f32.mrb[0].mxu1 }
 0x13c   : > { %v751_v63 = vadd.f32 %v750_v57, %v707_v62  ;;  %v709_v1 = vpop.f32.mrb[1].mxu1 }
 0x13d   : > { %v753_v2 = vadd.f32 %v752_v58, %v709_v1  ;;  %v711_v4 = vpop.f32.mrb[2].mxu1  ;;  %770 = sbr.rel (%p1029_p11) target bundleno = 340 (0x154), region = 70 }
 0x13e   : > { %v759_v5 = vadd.f32 %v751_v63, %v361_v61  ;;  %v755_v6 = vadd.f32 %v754_v59, %v711_v4  ;;  %v713_v8 = vpop.f32.mrb[3].mxu1 }
 0x13f   : > { %v760_v9 = vadd.f32 %v753_v2, %v362_v0  ;;  %v757_v10 = vadd.f32 %v756_v60, %v713_v8 }
 0x140   : > { %763 = vst [vmem:[#allocation2] sm:$0xff] %v759_v5  ;;  %v761_v11 = vadd.f32 %v755_v6, %v363_v3 }
 0x141   : > { %764 = vst [vmem:[#allocation2 + $0x8] sm:$0xff] %v760_v9  ;;  %v762_v12 = vadd.f32 %v757_v10, %v364_v7 }
 0x142   : > { %765 = vst [vmem:[#allocation2 + $0x10] sm:$0xff] %v761_v11 }
 0x143   : > { %766 = vst [vmem:[#allocation2 + $0x18] sm:$0xff] %v762_v12 }
 0x147   : > { %v771_v17 = vld [vmem:[#allocation2] sm:$0xff] }
 0x148   : > { %v772_v20 = vld [vmem:[#allocation2 + $0x8] sm:$0xff]  ;;  %v787_v27 = vmul.f32 %v780_v23, %v771_v17 }
 0x149   : > { %v773_v21 = vld [vmem:[#allocation2 + $0x10] sm:$0xff]  ;;  %v788_v28 = vmul.f32 %v784_v24, %v772_v20 }
 0x14a   : > { %v774_v22 = vld [vmem:[#allocation2 + $0x18] sm:$0xff]  ;;  %v789_v29 = vmul.f32 %v780_v23, %v773_v21  ;;  %v803_v31 = vadd.f32 %v796_v25, %v787_v27 }
 0x14b   : > { %v790_v30 = vmul.f32 %v784_v24, %v774_v22  ;;  %v804_v32 = vadd.f32 %v800_v26, %v788_v28 }
 0x14c   : > { %v805_v33 = vadd.f32 %v796_v25, %v789_v29  ;;  %v807_v35 = vmax.f32 %v803_v31, 0.0 }
 0x14d   : > { %v806_v34 = vadd.f32 %v800_v26, %v790_v30  ;;  %v808_v36 = vmax.f32 %v804_v32, 0.0 }
 0x14e   : > { %v809_v37 = vmax.f32 %v805_v33, 0.0 }
 0x14f   : > { %v810_v38 = vmax.f32 %v806_v34, 0.0  ;;  %v1038_v39 = vpack.c.bf16 %v808_v36, %v807_v35 }
 0x151   : > { %v1039_v40 = vpack.c.bf16 %v810_v38, %v809_v37  ;;  %823 = vst [vmem:[%s1369_s4] sm:$0xff] %v1038_v39 }
 0x153   : > { %824 = vst [vmem:[%s1369_s4 + $0x8] sm:$0xff] %v1039_v40 }
 0x154 PF: > { %s14_s19 = sadd.s32 1, %s1202_s19   ;;  %s1370_s15 = smov %s1190_s16 }
 0x155   : > { %p11_p12 = scmp.ge.s32.totalorder %s14_s19, 5   ;;  %s1371_s16 = smov %s1266_s23 }
 0x156   : > { %s1372_s17 = smov %s1198_s18  ;;  %s1373_s18 = smov %s1375_s20 }
 0x157   :  { %13 = sbr.rel (!%p11_p12) target bundleno = 3 (0x3), region = 120 }

// kernel: mnist_resnet_forward.33
= control target key start
LH: loop header
LB: loop body
LE: loop exit
PB: predicated region body
PF: predicated region fallthrough
CT: control target
= control target key end

     0   :  { %v289_v1 = vmov 0   ;;  %v194_v18 = vlaneseq  ;;  %s378_s1 = inlined_call_operand.vmem [shape: bf16[128,256], index: 1, kind: input, shape index: {}]   ;;  %s379_s0 = inlined_call_operand.vmem [shape: bf16[16,128], index: 0, kind: input, shape index: {}]   ;;  %s380_s2 = inlined_call_operand.vmem [shape: f32[1,256], index: 2, kind: input, shape index: {}]   ;;  %s381_s3 = inlined_call_operand.vmem [shape: f32[1,256], index: 3, kind: input, shape index: {}]   ;;  %s382_s4 = inlined_call_operand.vmem [shape: bf16[16,256], index: 4, kind: output, shape index: {}]  }
   0x1   :  { %v264_v0 = vld [vmem:[%s378_s1 + $0x4] ss:$8 sps:$4 sm:$0xff]   ;;  %166 = vmatprep.mubr.bf16.mxu0 %v289_v1  ;;  %v266_v2 = vld [vmem:[%s378_s1] ss:$8 sps:$4 sm:$0xff]   ;;  %v267_v3 = vld [vmem:[%s378_s1 + $0x14] ss:$8 sps:$4 sm:$0xff]  }
   0x2   :  { %134 = vmatprep.subr.bf16.mxu0 %v264_v0  ;;  %v269_v4 = vld [vmem:[%s378_s1 + $0x10] ss:$8 sps:$4 sm:$0xff]   ;;  %v270_v5 = vld [vmem:[%s378_s1 + $0x24] ss:$8 sps:$4 sm:$0xff]   ;;  %v272_v6 = vld [vmem:[%s378_s1 + $0x20] ss:$8 sps:$4 sm:$0xff]  }
   0x3   :  { %135 = vmatpush1.bf16.msra.mxu0 %v266_v2  ;;  %v273_v7 = vld [vmem:[%s378_s1 + $0x34] ss:$8 sps:$4 sm:$0xff]   ;;  %v275_v8 = vld [vmem:[%s378_s1 + $0x30] ss:$8 sps:$4 sm:$0xff]   ;;  %v276_v9 = vld [vmem:[%s378_s1 + $0x44] ss:$8 sps:$4 sm:$0xff]  }
   0x4   :  { %136 = vmatprep.subr.bf16.mxu0 %v267_v3  ;;  %v278_v10 = vld [vmem:[%s378_s1 + $0x40] ss:$8 sps:$4 sm:$0xff]   ;;  %v279_v11 = vld [vmem:[%s378_s1 + $0x54] ss:$8 sps:$4 sm:$0xff]   ;;  %v281_v12 = vld [vmem:[%s378_s1 + $0x50] ss:$8 sps:$4 sm:$0xff]  }
   0x5   :  { %v282_v13 = vld [vmem:[%s378_s1 + $0x64] ss:$8 sps:$4 sm:$0xff]   ;;  %v284_v14 = vld [vmem:[%s378_s1 + $0x60] ss:$8 sps:$4 sm:$0xff]   ;;  %v285_v15 = vld [vmem:[%s378_s1 + $0x74] ss:$8 sps:$4 sm:$0xff]  }
   0x6   :  { %v287_v16 = vld [vmem:[%s378_s1 + $0x70] ss:$8 sps:$4 sm:$0xff]   ;;  %v288_v17 = vld [vmem:[%s379_s0] sm:$0xff]   ;;  %v195_v19 = vshrl.u32 %v194_v18, 7 }
   0x7   :  { %137 = vmatpush1.bf16.msra.mxu0 %v269_v4  ;;  %v192_v21 = vld [vmem:[%s380_s2] sm:$0x3] }
   0x8   :  { %138 = vmatprep.subr.bf16.mxu0 %v270_v5  ;;  %v196_v20 = vsub.s32 0, %v195_v19  ;;  %v200_v22 = vsub.s32 1, %v195_v19  ;;  %v208_v23 = vld [vmem:[%s381_s3] sm:$0x3] }
   0xa   :  { %v197_v24 = vrot.slane %v192_v21, %v196_v20  ;;  %v201_v25 = vrot.slane %v192_v21, %v200_v22  ;;  %v213_v26 = vrot.slane %v208_v23, %v196_v20  ;;  %v217_v28 = vrot.slane %v208_v23, %v200_v22 }
   0xb   :  { %139 = vmatpush1.bf16.msra.mxu0 %v272_v6 }
   0xc   :  { %140 = vmatprep.subr.bf16.mxu0 %v273_v7 }
   0xf   :  { %141 = vmatpush1.bf16.msra.mxu0 %v275_v8 }
  0x10   :  { %142 = vmatprep.subr.bf16.mxu0 %v276_v9 }
  0x13   :  { %143 = vmatpush1.bf16.msra.mxu0 %v278_v10 }
  0x14   :  { %144 = vmatprep.subr.bf16.mxu0 %v279_v11 }
  0x17   :  { %145 = vmatpush1.bf16.msra.mxu0 %v281_v12 }
  0x18   :  { %146 = vmatprep.subr.bf16.mxu0 %v282_v13 }
  0x1b   :  { %147 = vmatpush1.bf16.msra.mxu0 %v284_v14 }
  0x1c   :  { %148 = vmatprep.subr.bf16.mxu0 %v285_v15 }
  0x1f   :  { %149 = vmatpush1.bf16.msra.mxu0 %v287_v16 }
  0x22   :  { %167 = vmatmul.mubr.bf16.vlgmr.msra.gmra.mrb[0].mxu0 %v288_v17 }
  0xf5   :  { %v168_v27 = vpop.f32.mrb[0].mxu0 }
  0xf6   :  { %v204_v29 = vmul.f32 %v197_v24, %v168_v27  ;;  %v170_v30 = vpop.f32.mrb[1].mxu0 }
  0xf7   :  { %v205_v31 = vmul.f32 %v201_v25, %v170_v30  ;;  %v172_v32 = vpop.f32.mrb[2].mxu0 }
  0xf8   :  { %v220_v33 = vadd.f32 %v213_v26, %v204_v29  ;;  %v206_v34 = vmul.f32 %v197_v24, %v172_v32  ;;  %v174_v35 = vpop.f32.mrb[3].mxu0 }
  0xf9   :  { %v221_v36 = vadd.f32 %v217_v28, %v205_v31  ;;  %v207_v37 = vmul.f32 %v201_v25, %v174_v35 }
  0xfa   :  { %v222_v38 = vadd.f32 %v213_v26, %v206_v34 }
  0xfb   :  { %v261_v39 = vpack.c.bf16 %v221_v36, %v220_v33  ;;  %v223_v40 = vadd.f32 %v217_v28, %v207_v37 }
  0xfd   :  { %236 = vst [vmem:[%s382_s4] sm:$0xff] %v261_v39  ;;  %v262_v41 = vpack.c.bf16 %v223_v40, %v222_v38 }
  0xff   :  { %237 = vst [vmem:[%s382_s4 + $0x8] sm:$0xff] %v262_v41 }

// kernel: mnist_resnet_forward.35
= control target key start
LH: loop header
LB: loop body
LE: loop exit
PB: predicated region body
PF: predicated region fallthrough
CT: control target
= control target key end

     0   :  { %s1461_s18 = smov 0   ;;  %s1463_s19 = smov 0   ;;  %s1618_s0 = inlined_call_operand.vmem [shape: bf16[16,2560], index: 0, kind: input, shape index: {}]   ;;  %s1619_s1 = inlined_call_operand.vmem [shape: bf16[2560,256], index: 1, kind: input, shape index: {}]   ;;  %s1620_s2 = inlined_call_operand.vmem [shape: f32[1,256], index: 2, kind: input, shape index: {}]   ;;  %s1621_s3 = inlined_call_operand.vmem [shape: f32[1,256], index: 3, kind: input, shape index: {}]   ;;  %s1622_s4 = inlined_call_operand.vmem [shape: bf16[16,256], index: 4, kind: input, shape index: {}]   ;;  %s1623_s5 = inlined_call_operand.vmem [shape: bf16[16,256], index: 5, kind: output, shape index: {}]  }
   0x1   :  { %s1465_s20 = smov 0   ;;  %s1467_s21 = smov 0  }
   0x2   :  { %s1469_s22 = smov 0  }
   0x3 LB: > { %s27_s23 = sadd.s32 1, %s1424_s21  ;;  %p50_p1 = scmp.ne.s32.totalorder %s1416_s19, %s1412_s18  ;;  %s1428_s22 = sphi %s1469_s22, %s15_s22   ;;  %s1424_s21 = sphi %s1467_s21, %s1627_s21   ;;  %s1420_s20 = sphi %s1465_s20, %s1626_s20   ;;  %s1416_s19 = sphi %s1463_s19, %s1625_s19   ;;  %s1412_s18 = sphi %s1461_s18, %s1624_s18  }
   0x4   : > { %p28_p0 = scmp.ge.s32.totalorder %s27_s23, 5  ;;  %p51_p2 = scmp.eq.s32.totalorder %s1428_s22, 0 }
   0x5   : > { %s43_s25 = sadd.s32 1, %s1416_s19  ;;  %p1154_p5 = scmp.ge.s32.totalorder %s1428_s22, 5 }
   0x6   : > { %s1629_s23 = smov (%p28_p0, %s27_s23), 0  ;;  %p52_p3 = por %p51_p2, %p50_p1 }
   0x7   : > { %s39_s24 = ssub.s32 %s1424_s21, %s1629_s23  ;;  %243 = sbr.rel (%p1154_p5) target bundleno = 21 (0x15), region = 28 }
   0x8   : > { %p41_p4 = scmp.eq.s32.totalorder %s39_s24, 0 }
   0xa   : > { %s1496_s26 = scalar_select %p41_p4, %s1416_s19, %s43_s25  }
   0xe   : > { %246 = sbr.rel (!%p52_p3) target bundleno = 21 (0x15), region = 32  ;;  %s248_s27 = sand.u32 (%p52_p3), 1, %s1416_s19  }
   0xf   : > { %s1239_s28 = sshll.u32 (%p52_p3), %s1424_s21, 4  ;;  %s1155_s29 = sshll.u32 (%p52_p3), %s248_s27, 5 }
  0x10   : > { %s256_s7 = scalar_lea.vmem (%p52_p3), %s1618_s0, %s1239_s28  ;;  %s250_s8 = scalar_lea.vmem (%p52_p3), [#allocation3], %s1155_s29 }
  0x11   : > { %v269_v0 = vld [vmem:[%s256_s7] sm:$0xff] (%p52_p3)  ;;  %v271_v1 = vld [vmem:[%s256_s7 + $0x8] sm:$0xff] (%p52_p3)  ;;  %v273_v2 = vld [vmem:[%s256_s7 + $0x50] sm:$0xff] (%p52_p3) }
  0x12   : > { %270 = vst [vmem:[%s250_s8] sm:$0xff] (%p52_p3), %v269_v0  ;;  %272 = vst [vmem:[%s250_s8 + $0x8] sm:$0xff] (%p52_p3), %v271_v1  ;;  %v275_v3 = vld [vmem:[%s256_s7 + $0x58] sm:$0xff] (%p52_p3) }
  0x13   : > { %274 = vst [vmem:[%s250_s8 + $0x10] sm:$0xff] (%p52_p3), %v273_v2  ;;  %276 = vst [vmem:[%s250_s8 + $0x18] sm:$0xff] (%p52_p3), %v275_v3 }
  0x15 PF: > { %p1158_p6 = scmp.ge.s32.totalorder %s1428_s22, 1  ;;  %p296_p7 = scmp.lt.s32.totalorder %s1428_s22, 6 }
  0x17   : > { %p297_p8 = pnand %p1158_p6, %p296_p7 }
  0x18   : > { %s303_s9 = sand.u32 (!%p297_p8), 1, %s1412_s18   ;;  %s1160_s10 = sshll.u32 (!%p297_p8), %s1420_s20, 6 }
  0x19   : > { %300 = sbr.rel (%p297_p8) target bundleno = 343 (0x157), region = 59  ;;  %s1159_s11 = sshll.u32 (!%p297_p8), %s303_s9, 5 }
  0x1a   : > { %p367_p9 = scmp.lt.s32.totalorder (!%p297_p8), %s1160_s10, 319  ;;  %s1513_s16 = scalar_lea.vmem (!%p297_p8), [#allocation3], %s1159_s11 }
  0x1b   : > { %p1163_p10 = scmp.ne.s32.totalorder (!%p297_p8), %s1420_s20, 0 }
  0x20   : > { %s1631_s10 = smov (!%p367_p9, %s1160_s10), 319  ;;  %414 = sbr.rel (%p1163_p10) target bundleno = 39 (0x27), region = 67 }
  0x21   : > { %s1240_s12 = sshll.u32 %s1631_s10, 3  ;;  %v1430_v4 = vmov (!%p1163_p10), 0.0  }
  0x22   : > { %s1511_s15 = scalar_lea.vmem %s1619_s1, %s1240_s12  ;;  %415 = vst [vmem:[#allocation2] sm:$0xff] (!%p1163_p10), %v1430_v4  ;;  %416 = vst [vmem:[#allocation2 + $0x8] sm:$0xff] (!%p1163_p10), %v1430_v4 }
  0x23   : > { %417 = vst [vmem:[#allocation2 + $0x10] sm:$0xff] (!%p1163_p10), %v1430_v4  ;;  %418 = vst [vmem:[#allocation2 + $0x18] sm:$0xff] (!%p1163_p10), %v1430_v4 }
  0x27 PF: > { %v1288_v5 = vld [vmem:[%s1511_s15 + $0x4] ss:$8 sps:$4 sm:$0xff]   ;;  %v1292_v7 = vld [vmem:[%s1511_s15] ss:$8 sps:$4 sm:$0xff]   ;;  %v1294_v9 = vld [vmem:[%s1511_s15 + $0x14] ss:$8 sps:$4 sm:$0xff]  }
  0x28   : > { %v1290_v6 = vld [vmem:[%s1511_s15 + $0x104] ss:$8 sps:$4 sm:$0xff]   ;;  %831 = vmatprep.subr.bf16.mxu1 %v1288_v5  ;;  %v1293_v8 = vld [vmem:[%s1511_s15 + $0x100] ss:$8 sps:$4 sm:$0xff]   ;;  %v1296_v10 = vld [vmem:[%s1511_s15 + $0x114] ss:$8 sps:$4 sm:$0xff]  }
  0x29   : > { %874 = vmatprep.subr.bf16.mxu0 %v1290_v6  ;;  %832 = vmatpush1.bf16.msra.mxu1 %v1292_v7  ;;  %v1298_v11 = vld [vmem:[%s1511_s15 + $0x10] ss:$8 sps:$4 sm:$0xff]   ;;  %v1300_v13 = vld [vmem:[%s1511_s15 + $0x24] ss:$8 sps:$4 sm:$0xff]   ;;  %v1304_v15 = vld [vmem:[%s1511_s15 + $0x20] ss:$8 sps:$4 sm:$0xff]  }
  0x2a   : > { %875 = vmatpush1.bf16.msra.mxu0 %v1293_v8  ;;  %833 = vmatprep.subr.bf16.mxu1 %v1294_v9  ;;  %v1299_v12 = vld [vmem:[%s1511_s15 + $0x110] ss:$8 sps:$4 sm:$0xff]   ;;  %v1302_v14 = vld [vmem:[%s1511_s15 + $0x124] ss:$8 sps:$4 sm:$0xff]   ;;  %v1305_v16 = vld [vmem:[%s1511_s15 + $0x120] ss:$8 sps:$4 sm:$0xff]  }
  0x2b   : > { %876 = vmatprep.subr.bf16.mxu0 %v1296_v10  ;;  %v1306_v17 = vld [vmem:[%s1511_s15 + $0x34] ss:$8 sps:$4 sm:$0xff]   ;;  %v1310_v19 = vld [vmem:[%s1511_s15 + $0x30] ss:$8 sps:$4 sm:$0xff]   ;;  %v1312_v21 = vld [vmem:[%s1511_s15 + $0x44] ss:$8 sps:$4 sm:$0xff]  }
  0x2c   : > { %v1308_v18 = vld [vmem:[%s1511_s15 + $0x134] ss:$8 sps:$4 sm:$0xff]   ;;  %v1311_v20 = vld [vmem:[%s1511_s15 + $0x130] ss:$8 sps:$4 sm:$0xff]   ;;  %v1314_v22 = vld [vmem:[%s1511_s15 + $0x144] ss:$8 sps:$4 sm:$0xff]  }
  0x2d   : > { %834 = vmatpush1.bf16.msra.mxu1 %v1298_v11  ;;  %v1316_v23 = vld [vmem:[%s1511_s15 + $0x40] ss:$8 sps:$4 sm:$0xff]   ;;  %v1318_v25 = vld [vmem:[%s1511_s15 + $0x54] ss:$8 sps:$4 sm:$0xff]   ;;  %v1322_v27 = vld [vmem:[%s1511_s15 + $0x50] ss:$8 sps:$4 sm:$0xff]  }
  0x2e   : > { %877 = vmatpush1.bf16.msra.mxu0 %v1299_v12  ;;  %835 = vmatprep.subr.bf16.mxu1 %v1300_v13  ;;  %v1317_v24 = vld [vmem:[%s1511_s15 + $0x140] ss:$8 sps:$4 sm:$0xff]   ;;  %v1320_v26 = vld [vmem:[%s1511_s15 + $0x154] ss:$8 sps:$4 sm:$0xff]   ;;  %v1323_v28 = vld [vmem:[%s1511_s15 + $0x150] ss:$8 sps:$4 sm:$0xff]  }
  0x2f   : > { %878 = vmatprep.subr.bf16.mxu0 %v1302_v14  ;;  %v1324_v29 = vld [vmem:[%s1511_s15 + $0x64] ss:$8 sps:$4 sm:$0xff]   ;;  %v1328_v31 = vld [vmem:[%s1511_s15 + $0x60] ss:$8 sps:$4 sm:$0xff]   ;;  %v1330_v33 = vld [vmem:[%s1511_s15 + $0x74] ss:$8 sps:$4 sm:$0xff]  }
  0x30   : > { %v1326_v30 = vld [vmem:[%s1511_s15 + $0x164] ss:$8 sps:$4 sm:$0xff]   ;;  %v1329_v32 = vld [vmem:[%s1511_s15 + $0x160] ss:$8 sps:$4 sm:$0xff]   ;;  %v1332_v34 = vld [vmem:[%s1511_s15 + $0x174] ss:$8 sps:$4 sm:$0xff]  }
  0x31   : > { %836 = vmatpush1.bf16.msra.mxu1 %v1304_v15  ;;  %v1334_v35 = vld [vmem:[%s1511_s15 + $0x70] ss:$8 sps:$4 sm:$0xff]   ;;  %v1336_v37 = vld [vmem:[%s1511_s15 + $0x84] ss:$8 sps:$4 sm:$0xff]   ;;  %v1340_v39 = vld [vmem:[%s1511_s15 + $0x80] ss:$8 sps:$4 sm:$0xff]  }
  0x32   : > { %879 = vmatpush1.bf16.msra.mxu0 %v1305_v16  ;;  %837 = vmatprep.subr.bf16.mxu1 %v1306_v17  ;;  %v1335_v36 = vld [vmem:[%s1511_s15 + $0x170] ss:$8 sps:$4 sm:$0xff]   ;;  %v1338_v38 = vld [vmem:[%s1511_s15 + $0x184] ss:$8 sps:$4 sm:$0xff]   ;;  %v1341_v40 = vld [vmem:[%s1511_s15 + $0x180] ss:$8 sps:$4 sm:$0xff]  }
  0x33   : > { %880 = vmatprep.subr.bf16.mxu0 %v1308_v18  ;;  %v1342_v41 = vld [vmem:[%s1511_s15 + $0x94] ss:$8 sps:$4 sm:$0xff]   ;;  %v1346_v43 = vld [vmem:[%s1511_s15 + $0x90] ss:$8 sps:$4 sm:$0xff]   ;;  %v1348_v45 = vld [vmem:[%s1511_s15 + $0xa4] ss:$8 sps:$4 sm:$0xff]  }
  0x34   : > { %v1344_v42 = vld [vmem:[%s1511_s15 + $0x194] ss:$8 sps:$4 sm:$0xff]   ;;  %v1347_v44 = vld [vmem:[%s1511_s15 + $0x190] ss:$8 sps:$4 sm:$0xff]   ;;  %v1350_v46 = vld [vmem:[%s1511_s15 + $0x1a4] ss:$8 sps:$4 sm:$0xff]  }
  0x35   : > { %838 = vmatpush1.bf16.msra.mxu1 %v1310_v19  ;;  %v1352_v47 = vld [vmem:[%s1511_s15 + $0xa0] ss:$8 sps:$4 sm:$0xff]   ;;  %v1354_v49 = vld [vmem:[%s1511_s15 + $0xb4] ss:$8 sps:$4 sm:$0xff]   ;;  %v1358_v51 = vld [vmem:[%s1511_s15 + $0xb0] ss:$8 sps:$4 sm:$0xff]  }
  0x36   : > { %881 = vmatpush1.bf16.msra.mxu0 %v1311_v20  ;;  %839 = vmatprep.subr.bf16.mxu1 %v1312_v21  ;;  %v1353_v48 = vld [vmem:[%s1511_s15 + $0x1a0] ss:$8 sps:$4 sm:$0xff]   ;;  %v1356_v50 = vld [vmem:[%s1511_s15 + $0x1b4] ss:$8 sps:$4 sm:$0xff]   ;;  %v1359_v53 = vld [vmem:[%s1511_s15 + $0x1b0] ss:$8 sps:$4 sm:$0xff]  }
  0x37   : > { %882 = vmatprep.subr.bf16.mxu0 %v1314_v22  ;;  %v1386_v52 = vld [vmem:[%s1513_s16 + $0x4] ss:$16 sps:$4 sm:$0xff]   ;;  %v1389_v56 = vld [vmem:[%s1513_s16 + $0xc] ss:$16 sps:$4 sm:$0xff]   ;;  %v1364_v57 = vld [vmem:[%s1511_s15 + $0xc0] ss:$8 sps:$4 sm:$0xff]  }
  0x38   : > { %v1360_v54 = vld [vmem:[%s1511_s15 + $0xc4] ss:$8 sps:$4 sm:$0xff]   ;;  %863 = vmatprep.mubr.bf16.mxu1 %v1386_v52  ;;  %906 = vmatprep.mubr.bf16.mxu0 %v1389_v56  ;;  %v1365_v58 = vld [vmem:[%s1511_s15 + $0x1c0] ss:$8 sps:$4 sm:$0xff]   ;;  %v1366_v59 = vld [vmem:[%s1511_s15 + $0xd4] ss:$8 sps:$4 sm:$0xff]  }
  0x39   : > { %840 = vmatpush1.bf16.msra.mxu1 %v1316_v23  ;;  %v1362_v55 = vld [vmem:[%s1511_s15 + $0x1c4] ss:$8 sps:$4 sm:$0xff]   ;;  %v1368_v60 = vld [vmem:[%s1511_s15 + $0x1d4] ss:$8 sps:$4 sm:$0xff]   ;;  %v1370_v61 = vld [vmem:[%s1511_s15 + $0xd0] ss:$8 sps:$4 sm:$0xff]  }
  0x3a   : > { %883 = vmatpush1.bf16.msra.mxu0 %v1317_v24  ;;  %841 = vmatprep.subr.bf16.mxu1 %v1318_v25  ;;  %v1371_v62 = vld [vmem:[%s1511_s15 + $0x1d0] ss:$8 sps:$4 sm:$0xff]   ;;  %v1372_v63 = vld [vmem:[%s1511_s15 + $0xe4] ss:$8 sps:$4 sm:$0xff]   ;;  %v1376_v1 = vld [vmem:[%s1511_s15 + $0xe0] ss:$8 sps:$4 sm:$0xff]  }
  0x3b   : > { %884 = vmatprep.subr.bf16.mxu0 %v1320_v26  ;;  %v1374_v0 = vld [vmem:[%s1511_s15 + $0x1e4] ss:$8 sps:$4 sm:$0xff]   ;;  %v1377_v2 = vld [vmem:[%s1511_s15 + $0x1e0] ss:$8 sps:$4 sm:$0xff]   ;;  %v1378_v3 = vld [vmem:[%s1511_s15 + $0xf4] ss:$8 sps:$4 sm:$0xff]  }
  0x3c   : > { %v1380_v4 = vld [vmem:[%s1511_s15 + $0x1f4] ss:$8 sps:$4 sm:$0xff]   ;;  %v1382_v5 = vld [vmem:[%s1511_s15 + $0xf0] ss:$8 sps:$4 sm:$0xff]   ;;  %v419_v10 = vld [vmem:[#allocation2] sm:$0xff]  ;;  %p1232_p11 = scmp.ne.s32.totalorder %s1420_s20, 4 }
  0x3d   : > { %842 = vmatpush1.bf16.msra.mxu1 %v1322_v27  ;;  %v1383_v6 = vld [vmem:[%s1511_s15 + $0x1f0] ss:$8 sps:$4 sm:$0xff]   ;;  %v420_v14 = vld [vmem:[#allocation2 + $0x8] sm:$0xff] }
  0x3e   : > { %885 = vmatpush1.bf16.msra.mxu0 %v1323_v28  ;;  %843 = vmatprep.subr.bf16.mxu1 %v1324_v29  ;;  %v1384_v7 = vld [vmem:[%s1513_s16] ss:$16 sps:$4 sm:$0xff]   ;;  %v1387_v8 = vld [vmem:[%s1513_s16 + $0x8] ss:$16 sps:$4 sm:$0xff]   ;;  %v935_v29 = vlaneseq (!%p1232_p11) }
  0x3f   : > { %886 = vmatprep.subr.bf16.mxu0 %v1326_v30  ;;  %v421_v18 = vld [vmem:[#allocation2 + $0x10] sm:$0xff]  ;;  %v422_v23 = vld [vmem:[#allocation2 + $0x18] sm:$0xff] }
  0x40   : > { %v936_v30 = vshrl.u32 (!%p1232_p11), %v935_v29, 7 }
  0x41   : > { %844 = vmatpush1.bf16.msra.mxu1 %v1328_v31  ;;  %v933_v31 = vld [vmem:[%s1620_s2] sm:$0x3] (!%p1232_p11) }
  0x42   : > { %887 = vmatpush1.bf16.msra.mxu0 %v1329_v32  ;;  %845 = vmatprep.subr.bf16.mxu1 %v1330_v33  ;;  %v949_v32 = vld [vmem:[%s1621_s3] sm:$0x3] (!%p1232_p11) }
  0x43   : > { %888 = vmatprep.subr.bf16.mxu0 %v1332_v34  ;;  %v937_v34 = vsub.s32 (!%p1232_p11), 0, %v936_v30 }
  0x45   : > { %846 = vmatpush1.bf16.msra.mxu1 %v1334_v35  ;;  %v941_v35 = vsub.s32 (!%p1232_p11), 1, %v936_v30 }
  0x46   : > { %889 = vmatpush1.bf16.msra.mxu0 %v1335_v36  ;;  %847 = vmatprep.subr.bf16.mxu1 %v1336_v37  ;;  %v965_v36 = vld [vmem:[%s1622_s4] sm:$0xff] (!%p1232_p11)  ;;  %v966_v37 = vld [vmem:[%s1622_s4 + $0x8] sm:$0xff] (!%p1232_p11) }
  0x47   : > { %890 = vmatprep.subr.bf16.mxu0 %v1338_v38 }
  0x49   : > { %848 = vmatpush1.bf16.msra.mxu1 %v1340_v39 }
  0x4a   : > { %891 = vmatpush1.bf16.msra.mxu0 %v1341_v40  ;;  %849 = vmatprep.subr.bf16.mxu1 %v1342_v41  ;;  %v938_v41 = vrot.slane (!%p1232_p11), %v933_v31, %v937_v34 }
  0x4b   : > { %892 = vmatprep.subr.bf16.mxu0 %v1344_v42  ;;  %v942_v42 = vrot.slane (!%p1232_p11), %v933_v31, %v941_v35 }
  0x4d   : > { %850 = vmatpush1.bf16.msra.mxu1 %v1346_v43  ;;  %v954_v43 = vrot.slane (!%p1232_p11), %v949_v32, %v937_v34 }
  0x4e   : > { %893 = vmatpush1.bf16.msra.mxu0 %v1347_v44  ;;  %851 = vmatprep.subr.bf16.mxu1 %v1348_v45  ;;  %v958_v44 = vrot.slane (!%p1232_p11), %v949_v32, %v941_v35  ;;  %v967_v45 = vunpack.c.l.bf16 (!%p1232_p11), %v965_v36 }
  0x4f   : > { %894 = vmatprep.subr.bf16.mxu0 %v1350_v46  ;;  %v968_v46 = vunpack.c.h.bf16 (!%p1232_p11), %v965_v36 }
  0x51   : > { %852 = vmatpush1.bf16.msra.mxu1 %v1352_v47  ;;  %v969_v47 = vunpack.c.l.bf16 (!%p1232_p11), %v966_v37 }
  0x52   : > { %895 = vmatpush1.bf16.msra.mxu0 %v1353_v48  ;;  %853 = vmatprep.subr.bf16.mxu1 %v1354_v49  ;;  %v970_v48 = vunpack.c.h.bf16 (!%p1232_p11), %v966_v37 }
  0x53   : > { %896 = vmatprep.subr.bf16.mxu0 %v1356_v50 }
  0x55   : > { %854 = vmatpush1.bf16.msra.mxu1 %v1358_v51 }
  0x56   : > { %897 = vmatpush1.bf16.msra.mxu0 %v1359_v53  ;;  %855 = vmatprep.subr.bf16.mxu1 %v1360_v54 }
  0x57   : > { %898 = vmatprep.subr.bf16.mxu0 %v1362_v55 }
  0x59   : > { %856 = vmatpush1.bf16.msra.mxu1 %v1364_v57 }
  0x5a   : > { %899 = vmatpush1.bf16.msra.mxu0 %v1365_v58  ;;  %857 = vmatprep.subr.bf16.mxu1 %v1366_v59 }
  0x5b   : > { %900 = vmatprep.subr.bf16.mxu0 %v1368_v60 }
  0x5d   : > { %858 = vmatpush1.bf16.msra.mxu1 %v1370_v61 }
  0x5e   : > { %901 = vmatpush1.bf16.msra.mxu0 %v1371_v62  ;;  %859 = vmatprep.subr.bf16.mxu1 %v1372_v63 }
  0x5f   : > { %902 = vmatprep.subr.bf16.mxu0 %v1374_v0 }
  0x61   : > { %860 = vmatpush1.bf16.msra.mxu1 %v1376_v1 }
  0x62   : > { %903 = vmatpush1.bf16.msra.mxu0 %v1377_v2  ;;  %861 = vmatprep.subr.bf16.mxu1 %v1378_v3 }
  0x63   : > { %904 = vmatprep.subr.bf16.mxu0 %v1380_v4 }
  0x65   : > { %862 = vmatpush1.bf16.msra.mxu1 %v1382_v5 }
  0x66   : > { %905 = vmatpush1.bf16.msra.mxu0 %v1383_v6 }
  0x68   : > { %864 = vmatmul.mubr.bf16.vlgmr.msra.gmra.mrb[0].mxu1 %v1384_v7 }
  0x69   : > { %907 = vmatmul.mubr.bf16.vlgmr.msra.gmra.mrb[0].mxu0 %v1387_v8 }
 0x13b   : > { %v865_v9 = vpop.f32.mrb[0].mxu1 }
 0x13c   : > { %v908_v11 = vpop.f32.mrb[0].mxu0  ;;  %v867_v13 = vpop.f32.mrb[1].mxu1 }
 0x13d   : > { %v909_v12 = vadd.f32 %v908_v11, %v865_v9  ;;  %v910_v15 = vpop.f32.mrb[1].mxu0  ;;  %v869_v17 = vpop.f32.mrb[2].mxu1 }
 0x13e   : > { %v911_v16 = vadd.f32 %v910_v15, %v867_v13  ;;  %v912_v19 = vpop.f32.mrb[2].mxu0  ;;  %v871_v22 = vpop.f32.mrb[3].mxu1  ;;  %928 = sbr.rel (%p1232_p11) target bundleno = 343 (0x157), region = 71 }
 0x13f   : > { %v917_v20 = vadd.f32 %v909_v12, %v419_v10  ;;  %v913_v21 = vadd.f32 %v912_v19, %v869_v17  ;;  %v914_v24 = vpop.f32.mrb[3].mxu0 }
 0x140   : > { %v918_v25 = vadd.f32 %v911_v16, %v420_v14  ;;  %v915_v26 = vadd.f32 %v914_v24, %v871_v22 }
 0x141   : > { %921 = vst [vmem:[#allocation2] sm:$0xff] %v917_v20  ;;  %v919_v27 = vadd.f32 %v913_v21, %v421_v18 }
 0x142   : > { %922 = vst [vmem:[#allocation2 + $0x8] sm:$0xff] %v918_v25  ;;  %v920_v28 = vadd.f32 %v915_v26, %v422_v23 }
 0x143   : > { %923 = vst [vmem:[#allocation2 + $0x10] sm:$0xff] %v919_v27 }
 0x144   : > { %924 = vst [vmem:[#allocation2 + $0x18] sm:$0xff] %v920_v28 }
 0x148   : > { %v929_v33 = vld [vmem:[#allocation2] sm:$0xff] }
 0x149   : > { %v930_v38 = vld [vmem:[#allocation2 + $0x8] sm:$0xff]  ;;  %v945_v49 = vmul.f32 %v938_v41, %v929_v33 }
 0x14a   : > { %v931_v39 = vld [vmem:[#allocation2 + $0x10] sm:$0xff]  ;;  %v946_v50 = vmul.f32 %v942_v42, %v930_v38 }
 0x14b   : > { %v932_v40 = vld [vmem:[#allocation2 + $0x18] sm:$0xff]  ;;  %v947_v51 = vmul.f32 %v938_v41, %v931_v39  ;;  %v961_v53 = vadd.f32 %v954_v43, %v945_v49 }
 0x14c   : > { %v948_v52 = vmul.f32 %v942_v42, %v932_v40  ;;  %v962_v54 = vadd.f32 %v958_v44, %v946_v50 }
 0x14d   : > { %v963_v55 = vadd.f32 %v954_v43, %v947_v51  ;;  %v971_v57 = vadd.f32 %v967_v45, %v961_v53 }
 0x14e   : > { %v964_v56 = vadd.f32 %v958_v44, %v948_v52  ;;  %v972_v58 = vadd.f32 %v968_v46, %v962_v54 }
 0x14f   : > { %v973_v59 = vadd.f32 %v969_v47, %v963_v55  ;;  %v975_v61 = vmax.f32 %v971_v57, 0.0 }
 0x150   : > { %v974_v60 = vadd.f32 %v970_v48, %v964_v56  ;;  %v976_v62 = vmax.f32 %v972_v58, 0.0 }
 0x151   : > { %v977_v63 = vmax.f32 %v973_v59, 0.0 }
 0x152   : > { %v978_v0 = vmax.f32 %v974_v60, 0.0  ;;  %v1241_v1 = vpack.c.bf16 %v976_v62, %v975_v61 }
 0x154   : > { %v1242_v2 = vpack.c.bf16 %v978_v0, %v977_v63  ;;  %991 = vst [vmem:[%s1623_s5] sm:$0xff] %v1241_v1 }
 0x156   : > { %992 = vst [vmem:[%s1623_s5 + $0x8] sm:$0xff] %v1242_v2 }
 0x157 PF: > { %s15_s22 = sadd.s32 1, %s1428_s22   ;;  %s1624_s18 = smov %s1416_s19 }
 0x158   : > { %p12_p12 = scmp.ge.s32.totalorder %s15_s22, 7   ;;  %s1625_s19 = smov %s1496_s26 }
 0x159   : > { %s1626_s20 = smov %s1424_s21  ;;  %s1627_s21 = smov %s1629_s23 }
 0x15a   :  { %14 = sbr.rel (!%p12_p12) target bundleno = 3 (0x3), region = 118 }

// kernel: mnist_resnet_forward.36
= control target key start
LH: loop header
LB: loop body
LE: loop exit
PB: predicated region body
PF: predicated region fallthrough
CT: control target
= control target key end

     0   :  { %s1356_s15 = smov 0   ;;  %s1358_s16 = smov 0   ;;  %s1507_s0 = inlined_call_operand.vmem [shape: bf16[16,2560], index: 0, kind: input, shape index: {}]   ;;  %s1508_s1 = inlined_call_operand.vmem [shape: bf16[2560,256], index: 1, kind: input, shape index: {}]   ;;  %s1509_s2 = inlined_call_operand.vmem [shape: f32[1,256], index: 2, kind: input, shape index: {}]   ;;  %s1510_s3 = inlined_call_operand.vmem [shape: f32[1,256], index: 3, kind: input, shape index: {}]   ;;  %s1511_s4 = inlined_call_operand.vmem [shape: bf16[16,256], index: 4, kind: output, shape index: {}]  }
   0x1   :  { %s1360_s17 = smov 0   ;;  %s1362_s18 = smov 0  }
   0x2   :  { %s1364_s19 = smov 0  }
   0x3 LB: > { %s26_s20 = sadd.s32 1, %s1324_s18  ;;  %p49_p1 = scmp.ne.s32.totalorder %s1316_s16, %s1312_s15  ;;  %s1328_s19 = sphi %s1364_s19, %s14_s19   ;;  %s1324_s18 = sphi %s1362_s18, %s1515_s18   ;;  %s1320_s17 = sphi %s1360_s17, %s1514_s17   ;;  %s1316_s16 = sphi %s1358_s16, %s1513_s16   ;;  %s1312_s15 = sphi %s1356_s15, %s1512_s15  }
   0x4   : > { %p27_p0 = scmp.ge.s32.totalorder %s26_s20, 5  ;;  %p50_p2 = scmp.eq.s32.totalorder %s1328_s19, 0 }
   0x5   : > { %s42_s22 = sadd.s32 1, %s1316_s16  ;;  %p1054_p5 = scmp.ge.s32.totalorder %s1328_s19, 5 }
   0x6   : > { %s1517_s20 = smov (%p27_p0, %s26_s20), 0  ;;  %p51_p3 = por %p50_p2, %p49_p1 }
   0x7   : > { %s38_s21 = ssub.s32 %s1324_s18, %s1517_s20  ;;  %199 = sbr.rel (%p1054_p5) target bundleno = 21 (0x15), region = 24 }
   0x8   : > { %p40_p4 = scmp.eq.s32.totalorder %s38_s21, 0 }
   0xa   : > { %s1391_s23 = scalar_select %p40_p4, %s1316_s16, %s42_s22  }
   0xe   : > { %202 = sbr.rel (!%p51_p3) target bundleno = 21 (0x15), region = 28  ;;  %s204_s24 = sand.u32 (%p51_p3), 1, %s1316_s16  }
   0xf   : > { %s1139_s25 = sshll.u32 (%p51_p3), %s1324_s18, 4  ;;  %s1055_s26 = sshll.u32 (%p51_p3), %s204_s24, 5 }
  0x10   : > { %s212_s29 = scalar_lea.vmem (%p51_p3), %s1507_s0, %s1139_s25  ;;  %s206_s30 = scalar_lea.vmem (%p51_p3), [#allocation3], %s1055_s26 }
  0x11   : > { %v225_v0 = vld [vmem:[%s212_s29] sm:$0xff] (%p51_p3)  ;;  %v227_v1 = vld [vmem:[%s212_s29 + $0x8] sm:$0xff] (%p51_p3)  ;;  %v229_v2 = vld [vmem:[%s212_s29 + $0x50] sm:$0xff] (%p51_p3) }
  0x12   : > { %226 = vst [vmem:[%s206_s30] sm:$0xff] (%p51_p3), %v225_v0  ;;  %228 = vst [vmem:[%s206_s30 + $0x8] sm:$0xff] (%p51_p3), %v227_v1  ;;  %v231_v3 = vld [vmem:[%s212_s29 + $0x58] sm:$0xff] (%p51_p3) }
  0x13   : > { %230 = vst [vmem:[%s206_s30 + $0x10] sm:$0xff] (%p51_p3), %v229_v2  ;;  %232 = vst [vmem:[%s206_s30 + $0x18] sm:$0xff] (%p51_p3), %v231_v3 }
  0x15 PF: > { %p1058_p6 = scmp.ge.s32.totalorder %s1328_s19, 1  ;;  %p252_p7 = scmp.lt.s32.totalorder %s1328_s19, 6 }
  0x17   : > { %p253_p8 = pnand %p1058_p6, %p252_p7 }
  0x18   : > { %s259_s5 = sand.u32 (!%p253_p8), 1, %s1312_s15   ;;  %s1060_s6 = sshll.u32 (!%p253_p8), %s1320_s17, 6 }
  0x19   : > { %256 = sbr.rel (%p253_p8) target bundleno = 341 (0x155), region = 55  ;;  %s1059_s7 = sshll.u32 (!%p253_p8), %s259_s5, 5 }
  0x1a   : > { %p311_p9 = scmp.lt.s32.totalorder (!%p253_p8), %s1060_s6, 319  ;;  %s1408_s12 = scalar_lea.vmem (!%p253_p8), [#allocation3], %s1059_s7 }
  0x1b   : > { %p1063_p10 = scmp.ne.s32.totalorder (!%p253_p8), %s1320_s17, 0 }
  0x20   : > { %s1519_s6 = smov (!%p311_p9, %s1060_s6), 319  ;;  %346 = sbr.rel (%p1063_p10) target bundleno = 39 (0x27), region = 63 }
  0x21   : > { %s1140_s8 = sshll.u32 %s1519_s6, 3  ;;  %v1330_v4 = vmov (!%p1063_p10), 0.0  }
  0x22   : > { %s1406_s11 = scalar_lea.vmem %s1508_s1, %s1140_s8  ;;  %347 = vst [vmem:[#allocation2] sm:$0xff] (!%p1063_p10), %v1330_v4  ;;  %348 = vst [vmem:[#allocation2 + $0x8] sm:$0xff] (!%p1063_p10), %v1330_v4 }
  0x23   : > { %349 = vst [vmem:[#allocation2 + $0x10] sm:$0xff] (!%p1063_p10), %v1330_v4  ;;  %350 = vst [vmem:[#allocation2 + $0x18] sm:$0xff] (!%p1063_p10), %v1330_v4 }
  0x27 PF: > { %v1188_v5 = vld [vmem:[%s1406_s11 + $0x4] ss:$8 sps:$4 sm:$0xff]   ;;  %v1192_v7 = vld [vmem:[%s1406_s11] ss:$8 sps:$4 sm:$0xff]   ;;  %v1194_v9 = vld [vmem:[%s1406_s11 + $0x14] ss:$8 sps:$4 sm:$0xff]  }
  0x28   : > { %v1190_v6 = vld [vmem:[%s1406_s11 + $0x104] ss:$8 sps:$4 sm:$0xff]   ;;  %763 = vmatprep.subr.bf16.mxu1 %v1188_v5  ;;  %v1193_v8 = vld [vmem:[%s1406_s11 + $0x100] ss:$8 sps:$4 sm:$0xff]   ;;  %v1196_v10 = vld [vmem:[%s1406_s11 + $0x114] ss:$8 sps:$4 sm:$0xff]  }
  0x29   : > { %806 = vmatprep.subr.bf16.mxu0 %v1190_v6  ;;  %764 = vmatpush1.bf16.msra.mxu1 %v1192_v7  ;;  %v1198_v11 = vld [vmem:[%s1406_s11 + $0x10] ss:$8 sps:$4 sm:$0xff]   ;;  %v1200_v13 = vld [vmem:[%s1406_s11 + $0x24] ss:$8 sps:$4 sm:$0xff]   ;;  %v1204_v15 = vld [vmem:[%s1406_s11 + $0x20] ss:$8 sps:$4 sm:$0xff]  }
  0x2a   : > { %807 = vmatpush1.bf16.msra.mxu0 %v1193_v8  ;;  %765 = vmatprep.subr.bf16.mxu1 %v1194_v9  ;;  %v1199_v12 = vld [vmem:[%s1406_s11 + $0x110] ss:$8 sps:$4 sm:$0xff]   ;;  %v1202_v14 = vld [vmem:[%s1406_s11 + $0x124] ss:$8 sps:$4 sm:$0xff]   ;;  %v1205_v16 = vld [vmem:[%s1406_s11 + $0x120] ss:$8 sps:$4 sm:$0xff]  }
  0x2b   : > { %808 = vmatprep.subr.bf16.mxu0 %v1196_v10  ;;  %v1206_v17 = vld [vmem:[%s1406_s11 + $0x34] ss:$8 sps:$4 sm:$0xff]   ;;  %v1210_v19 = vld [vmem:[%s1406_s11 + $0x30] ss:$8 sps:$4 sm:$0xff]   ;;  %v1212_v21 = vld [vmem:[%s1406_s11 + $0x44] ss:$8 sps:$4 sm:$0xff]  }
  0x2c   : > { %v1208_v18 = vld [vmem:[%s1406_s11 + $0x134] ss:$8 sps:$4 sm:$0xff]   ;;  %v1211_v20 = vld [vmem:[%s1406_s11 + $0x130] ss:$8 sps:$4 sm:$0xff]   ;;  %v1214_v22 = vld [vmem:[%s1406_s11 + $0x144] ss:$8 sps:$4 sm:$0xff]  }
  0x2d   : > { %766 = vmatpush1.bf16.msra.mxu1 %v1198_v11  ;;  %v1216_v23 = vld [vmem:[%s1406_s11 + $0x40] ss:$8 sps:$4 sm:$0xff]   ;;  %v1218_v25 = vld [vmem:[%s1406_s11 + $0x54] ss:$8 sps:$4 sm:$0xff]   ;;  %v1222_v27 = vld [vmem:[%s1406_s11 + $0x50] ss:$8 sps:$4 sm:$0xff]  }
  0x2e   : > { %809 = vmatpush1.bf16.msra.mxu0 %v1199_v12  ;;  %767 = vmatprep.subr.bf16.mxu1 %v1200_v13  ;;  %v1217_v24 = vld [vmem:[%s1406_s11 + $0x140] ss:$8 sps:$4 sm:$0xff]   ;;  %v1220_v26 = vld [vmem:[%s1406_s11 + $0x154] ss:$8 sps:$4 sm:$0xff]   ;;  %v1223_v28 = vld [vmem:[%s1406_s11 + $0x150] ss:$8 sps:$4 sm:$0xff]  }
  0x2f   : > { %810 = vmatprep.subr.bf16.mxu0 %v1202_v14  ;;  %v1224_v29 = vld [vmem:[%s1406_s11 + $0x64] ss:$8 sps:$4 sm:$0xff]   ;;  %v1228_v31 = vld [vmem:[%s1406_s11 + $0x60] ss:$8 sps:$4 sm:$0xff]   ;;  %v1230_v33 = vld [vmem:[%s1406_s11 + $0x74] ss:$8 sps:$4 sm:$0xff]  }
  0x30   : > { %v1226_v30 = vld [vmem:[%s1406_s11 + $0x164] ss:$8 sps:$4 sm:$0xff]   ;;  %v1229_v32 = vld [vmem:[%s1406_s11 + $0x160] ss:$8 sps:$4 sm:$0xff]   ;;  %v1232_v34 = vld [vmem:[%s1406_s11 + $0x174] ss:$8 sps:$4 sm:$0xff]  }
  0x31   : > { %768 = vmatpush1.bf16.msra.mxu1 %v1204_v15  ;;  %v1234_v35 = vld [vmem:[%s1406_s11 + $0x70] ss:$8 sps:$4 sm:$0xff]   ;;  %v1236_v37 = vld [vmem:[%s1406_s11 + $0x84] ss:$8 sps:$4 sm:$0xff]   ;;  %v1240_v39 = vld [vmem:[%s1406_s11 + $0x80] ss:$8 sps:$4 sm:$0xff]  }
  0x32   : > { %811 = vmatpush1.bf16.msra.mxu0 %v1205_v16  ;;  %769 = vmatprep.subr.bf16.mxu1 %v1206_v17  ;;  %v1235_v36 = vld [vmem:[%s1406_s11 + $0x170] ss:$8 sps:$4 sm:$0xff]   ;;  %v1238_v38 = vld [vmem:[%s1406_s11 + $0x184] ss:$8 sps:$4 sm:$0xff]   ;;  %v1241_v40 = vld [vmem:[%s1406_s11 + $0x180] ss:$8 sps:$4 sm:$0xff]  }
  0x33   : > { %812 = vmatprep.subr.bf16.mxu0 %v1208_v18  ;;  %v1242_v41 = vld [vmem:[%s1406_s11 + $0x94] ss:$8 sps:$4 sm:$0xff]   ;;  %v1246_v43 = vld [vmem:[%s1406_s11 + $0x90] ss:$8 sps:$4 sm:$0xff]   ;;  %v1248_v45 = vld [vmem:[%s1406_s11 + $0xa4] ss:$8 sps:$4 sm:$0xff]  }
  0x34   : > { %v1244_v42 = vld [vmem:[%s1406_s11 + $0x194] ss:$8 sps:$4 sm:$0xff]   ;;  %v1247_v44 = vld [vmem:[%s1406_s11 + $0x190] ss:$8 sps:$4 sm:$0xff]   ;;  %v1250_v46 = vld [vmem:[%s1406_s11 + $0x1a4] ss:$8 sps:$4 sm:$0xff]  }
  0x35   : > { %770 = vmatpush1.bf16.msra.mxu1 %v1210_v19  ;;  %v1252_v47 = vld [vmem:[%s1406_s11 + $0xa0] ss:$8 sps:$4 sm:$0xff]   ;;  %v1254_v49 = vld [vmem:[%s1406_s11 + $0xb4] ss:$8 sps:$4 sm:$0xff]   ;;  %v1258_v51 = vld [vmem:[%s1406_s11 + $0xb0] ss:$8 sps:$4 sm:$0xff]  }
  0x36   : > { %813 = vmatpush1.bf16.msra.mxu0 %v1211_v20  ;;  %771 = vmatprep.subr.bf16.mxu1 %v1212_v21  ;;  %v1253_v48 = vld [vmem:[%s1406_s11 + $0x1a0] ss:$8 sps:$4 sm:$0xff]   ;;  %v1256_v50 = vld [vmem:[%s1406_s11 + $0x1b4] ss:$8 sps:$4 sm:$0xff]   ;;  %v1259_v53 = vld [vmem:[%s1406_s11 + $0x1b0] ss:$8 sps:$4 sm:$0xff]  }
  0x37   : > { %814 = vmatprep.subr.bf16.mxu0 %v1214_v22  ;;  %v1286_v52 = vld [vmem:[%s1408_s12 + $0x4] ss:$16 sps:$4 sm:$0xff]   ;;  %v1289_v56 = vld [vmem:[%s1408_s12 + $0xc] ss:$16 sps:$4 sm:$0xff]   ;;  %v1264_v57 = vld [vmem:[%s1406_s11 + $0xc0] ss:$8 sps:$4 sm:$0xff]  }
  0x38   : > { %v1260_v54 = vld [vmem:[%s1406_s11 + $0xc4] ss:$8 sps:$4 sm:$0xff]   ;;  %795 = vmatprep.mubr.bf16.mxu1 %v1286_v52  ;;  %838 = vmatprep.mubr.bf16.mxu0 %v1289_v56  ;;  %v1265_v58 = vld [vmem:[%s1406_s11 + $0x1c0] ss:$8 sps:$4 sm:$0xff]   ;;  %v1266_v59 = vld [vmem:[%s1406_s11 + $0xd4] ss:$8 sps:$4 sm:$0xff]  }
  0x39   : > { %772 = vmatpush1.bf16.msra.mxu1 %v1216_v23  ;;  %v1262_v55 = vld [vmem:[%s1406_s11 + $0x1c4] ss:$8 sps:$4 sm:$0xff]   ;;  %v1268_v60 = vld [vmem:[%s1406_s11 + $0x1d4] ss:$8 sps:$4 sm:$0xff]   ;;  %v1270_v61 = vld [vmem:[%s1406_s11 + $0xd0] ss:$8 sps:$4 sm:$0xff]  }
  0x3a   : > { %815 = vmatpush1.bf16.msra.mxu0 %v1217_v24  ;;  %773 = vmatprep.subr.bf16.mxu1 %v1218_v25  ;;  %v1271_v62 = vld [vmem:[%s1406_s11 + $0x1d0] ss:$8 sps:$4 sm:$0xff]   ;;  %v1272_v63 = vld [vmem:[%s1406_s11 + $0xe4] ss:$8 sps:$4 sm:$0xff]   ;;  %v1276_v1 = vld [vmem:[%s1406_s11 + $0xe0] ss:$8 sps:$4 sm:$0xff]  }
  0x3b   : > { %816 = vmatprep.subr.bf16.mxu0 %v1220_v26  ;;  %v1274_v0 = vld [vmem:[%s1406_s11 + $0x1e4] ss:$8 sps:$4 sm:$0xff]   ;;  %v1277_v2 = vld [vmem:[%s1406_s11 + $0x1e0] ss:$8 sps:$4 sm:$0xff]   ;;  %v1278_v3 = vld [vmem:[%s1406_s11 + $0xf4] ss:$8 sps:$4 sm:$0xff]  }
  0x3c   : > { %v1280_v4 = vld [vmem:[%s1406_s11 + $0x1f4] ss:$8 sps:$4 sm:$0xff]   ;;  %v1282_v5 = vld [vmem:[%s1406_s11 + $0xf0] ss:$8 sps:$4 sm:$0xff]   ;;  %v351_v10 = vld [vmem:[#allocation2] sm:$0xff]  ;;  %p1132_p11 = scmp.ne.s32.totalorder %s1320_s17, 4 }
  0x3d   : > { %774 = vmatpush1.bf16.msra.mxu1 %v1222_v27  ;;  %v1283_v6 = vld [vmem:[%s1406_s11 + $0x1f0] ss:$8 sps:$4 sm:$0xff]   ;;  %v352_v14 = vld [vmem:[#allocation2 + $0x8] sm:$0xff] }
  0x3e   : > { %817 = vmatpush1.bf16.msra.mxu0 %v1223_v28  ;;  %775 = vmatprep.subr.bf16.mxu1 %v1224_v29  ;;  %v1284_v7 = vld [vmem:[%s1408_s12] ss:$16 sps:$4 sm:$0xff]   ;;  %v1287_v8 = vld [vmem:[%s1408_s12 + $0x8] ss:$16 sps:$4 sm:$0xff]   ;;  %v867_v29 = vlaneseq (!%p1132_p11) }
  0x3f   : > { %818 = vmatprep.subr.bf16.mxu0 %v1226_v30  ;;  %v353_v18 = vld [vmem:[#allocation2 + $0x10] sm:$0xff]  ;;  %v354_v23 = vld [vmem:[#allocation2 + $0x18] sm:$0xff] }
  0x40   : > { %v868_v30 = vshrl.u32 (!%p1132_p11), %v867_v29, 7 }
  0x41   : > { %776 = vmatpush1.bf16.msra.mxu1 %v1228_v31  ;;  %v865_v31 = vld [vmem:[%s1509_s2] sm:$0x3] (!%p1132_p11) }
  0x42   : > { %819 = vmatpush1.bf16.msra.mxu0 %v1229_v32  ;;  %777 = vmatprep.subr.bf16.mxu1 %v1230_v33  ;;  %v881_v32 = vld [vmem:[%s1510_s3] sm:$0x3] (!%p1132_p11) }
  0x43   : > { %820 = vmatprep.subr.bf16.mxu0 %v1232_v34  ;;  %v869_v34 = vsub.s32 (!%p1132_p11), 0, %v868_v30 }
  0x45   : > { %778 = vmatpush1.bf16.msra.mxu1 %v1234_v35  ;;  %v873_v35 = vsub.s32 (!%p1132_p11), 1, %v868_v30 }
  0x46   : > { %821 = vmatpush1.bf16.msra.mxu0 %v1235_v36  ;;  %779 = vmatprep.subr.bf16.mxu1 %v1236_v37 }
  0x47   : > { %822 = vmatprep.subr.bf16.mxu0 %v1238_v38 }
  0x49   : > { %780 = vmatpush1.bf16.msra.mxu1 %v1240_v39  ;;  %v870_v39 = vrot.slane (!%p1132_p11), %v865_v31, %v869_v34 }
  0x4a   : > { %823 = vmatpush1.bf16.msra.mxu0 %v1241_v40  ;;  %781 = vmatprep.subr.bf16.mxu1 %v1242_v41  ;;  %v874_v40 = vrot.slane (!%p1132_p11), %v865_v31, %v873_v35  ;;  %v886_v41 = vrot.slane (!%p1132_p11), %v881_v32, %v869_v34 }
  0x4b   : > { %824 = vmatprep.subr.bf16.mxu0 %v1244_v42  ;;  %v890_v42 = vrot.slane (!%p1132_p11), %v881_v32, %v873_v35 }
  0x4d   : > { %782 = vmatpush1.bf16.msra.mxu1 %v1246_v43 }
  0x4e   : > { %825 = vmatpush1.bf16.msra.mxu0 %v1247_v44  ;;  %783 = vmatprep.subr.bf16.mxu1 %v1248_v45 }
  0x4f   : > { %826 = vmatprep.subr.bf16.mxu0 %v1250_v46 }
  0x51   : > { %784 = vmatpush1.bf16.msra.mxu1 %v1252_v47 }
  0x52   : > { %827 = vmatpush1.bf16.msra.mxu0 %v1253_v48  ;;  %785 = vmatprep.subr.bf16.mxu1 %v1254_v49 }
  0x53   : > { %828 = vmatprep.subr.bf16.mxu0 %v1256_v50 }
  0x55   : > { %786 = vmatpush1.bf16.msra.mxu1 %v1258_v51 }
  0x56   : > { %829 = vmatpush1.bf16.msra.mxu0 %v1259_v53  ;;  %787 = vmatprep.subr.bf16.mxu1 %v1260_v54 }
  0x57   : > { %830 = vmatprep.subr.bf16.mxu0 %v1262_v55 }
  0x59   : > { %788 = vmatpush1.bf16.msra.mxu1 %v1264_v57 }
  0x5a   : > { %831 = vmatpush1.bf16.msra.mxu0 %v1265_v58  ;;  %789 = vmatprep.subr.bf16.mxu1 %v1266_v59 }
  0x5b   : > { %832 = vmatprep.subr.bf16.mxu0 %v1268_v60 }
  0x5d   : > { %790 = vmatpush1.bf16.msra.mxu1 %v1270_v61 }
  0x5e   : > { %833 = vmatpush1.bf16.msra.mxu0 %v1271_v62  ;;  %791 = vmatprep.subr.bf16.mxu1 %v1272_v63 }
  0x5f   : > { %834 = vmatprep.subr.bf16.mxu0 %v1274_v0 }
  0x61   : > { %792 = vmatpush1.bf16.msra.mxu1 %v1276_v1 }
  0x62   : > { %835 = vmatpush1.bf16.msra.mxu0 %v1277_v2  ;;  %793 = vmatprep.subr.bf16.mxu1 %v1278_v3 }
  0x63   : > { %836 = vmatprep.subr.bf16.mxu0 %v1280_v4 }
  0x65   : > { %794 = vmatpush1.bf16.msra.mxu1 %v1282_v5 }
  0x66   : > { %837 = vmatpush1.bf16.msra.mxu0 %v1283_v6 }
  0x68   : > { %796 = vmatmul.mubr.bf16.vlgmr.msra.gmra.mrb[0].mxu1 %v1284_v7 }
  0x69   : > { %839 = vmatmul.mubr.bf16.vlgmr.msra.gmra.mrb[0].mxu0 %v1287_v8 }
 0x13b   : > { %v797_v9 = vpop.f32.mrb[0].mxu1 }
 0x13c   : > { %v840_v11 = vpop.f32.mrb[0].mxu0  ;;  %v799_v13 = vpop.f32.mrb[1].mxu1 }
 0x13d   : > { %v841_v12 = vadd.f32 %v840_v11, %v797_v9  ;;  %v842_v15 = vpop.f32.mrb[1].mxu0  ;;  %v801_v17 = vpop.f32.mrb[2].mxu1 }
 0x13e   : > { %v843_v16 = vadd.f32 %v842_v15, %v799_v13  ;;  %v844_v19 = vpop.f32.mrb[2].mxu0  ;;  %v803_v22 = vpop.f32.mrb[3].mxu1  ;;  %860 = sbr.rel (%p1132_p11) target bundleno = 341 (0x155), region = 67 }
 0x13f   : > { %v849_v20 = vadd.f32 %v841_v12, %v351_v10  ;;  %v845_v21 = vadd.f32 %v844_v19, %v801_v17  ;;  %v846_v24 = vpop.f32.mrb[3].mxu0 }
 0x140   : > { %v850_v25 = vadd.f32 %v843_v16, %v352_v14  ;;  %v847_v26 = vadd.f32 %v846_v24, %v803_v22 }
 0x141   : > { %853 = vst [vmem:[#allocation2] sm:$0xff] %v849_v20  ;;  %v851_v27 = vadd.f32 %v845_v21, %v353_v18 }
 0x142   : > { %854 = vst [vmem:[#allocation2 + $0x8] sm:$0xff] %v850_v25  ;;  %v852_v28 = vadd.f32 %v847_v26, %v354_v23 }
 0x143   : > { %855 = vst [vmem:[#allocation2 + $0x10] sm:$0xff] %v851_v27 }
 0x144   : > { %856 = vst [vmem:[#allocation2 + $0x18] sm:$0xff] %v852_v28 }
 0x148   : > { %v861_v33 = vld [vmem:[#allocation2] sm:$0xff] }
 0x149   : > { %v862_v36 = vld [vmem:[#allocation2 + $0x8] sm:$0xff]  ;;  %v877_v43 = vmul.f32 %v870_v39, %v861_v33 }
 0x14a   : > { %v863_v37 = vld [vmem:[#allocation2 + $0x10] sm:$0xff]  ;;  %v878_v44 = vmul.f32 %v874_v40, %v862_v36 }
 0x14b   : > { %v864_v38 = vld [vmem:[#allocation2 + $0x18] sm:$0xff]  ;;  %v879_v45 = vmul.f32 %v870_v39, %v863_v37  ;;  %v893_v47 = vadd.f32 %v886_v41, %v877_v43 }
 0x14c   : > { %v880_v46 = vmul.f32 %v874_v40, %v864_v38  ;;  %v894_v48 = vadd.f32 %v890_v42, %v878_v44 }
 0x14d   : > { %v895_v49 = vadd.f32 %v886_v41, %v879_v45  ;;  %v897_v51 = vmax.f32 %v893_v47, 0.0 }
 0x14e   : > { %v896_v50 = vadd.f32 %v890_v42, %v880_v46  ;;  %v898_v52 = vmax.f32 %v894_v48, 0.0 }
 0x14f   : > { %v899_v53 = vmax.f32 %v895_v49, 0.0 }
 0x150   : > { %v900_v54 = vmax.f32 %v896_v50, 0.0  ;;  %v1141_v55 = vpack.c.bf16 %v898_v52, %v897_v51 }
 0x152   : > { %v1142_v56 = vpack.c.bf16 %v900_v54, %v899_v53  ;;  %913 = vst [vmem:[%s1511_s4] sm:$0xff] %v1141_v55 }
 0x154   : > { %914 = vst [vmem:[%s1511_s4 + $0x8] sm:$0xff] %v1142_v56 }
 0x155 PF: > { %s14_s19 = sadd.s32 1, %s1328_s19   ;;  %s1512_s15 = smov %s1316_s16 }
 0x156   : > { %p11_p12 = scmp.ge.s32.totalorder %s14_s19, 7   ;;  %s1513_s16 = smov %s1391_s23 }
 0x157   : > { %s1514_s17 = smov %s1324_s18  ;;  %s1515_s18 = smov %s1517_s20 }
 0x158   :  { %13 = sbr.rel (!%p11_p12) target bundleno = 3 (0x3), region = 111 }

// kernel: mnist_resnet_forward.39
= control target key start
LH: loop header
LB: loop body
LE: loop exit
PB: predicated region body
PF: predicated region fallthrough
CT: control target
= control target key end

     0   :  { %s2137_s0 = inlined_call_operand.vmem [shape: bf16[16,2560], index: 0, kind: input, shape index: {}]   ;;  %s2138_s1 = inlined_call_operand.vmem [shape: bf16[2560,512], index: 1, kind: input, shape index: {}]   ;;  %s2139_s2 = inlined_call_operand.vmem [shape: f32[1,512], index: 2, kind: input, shape index: {}]   ;;  %s2140_s3 = inlined_call_operand.vmem [shape: f32[1,512], index: 3, kind: input, shape index: {}]   ;;  %s2141_s4 = inlined_call_operand.vmem [shape: bf16[16,512], index: 4, kind: output, shape index: {}]  }
   0x1   :  { %2144 = sst [smem:[#allocation8_spill]] %s2137_s0 }
   0x2   :  { %2145 = sst [smem:[#allocation9_spill]] %s2138_s1 }
   0x3   :  { %s1746_s15 = smov 0   ;;  %s1748_s16 = smov 0  }
   0x4   :  { %s1750_s17 = smov 0   ;;  %s1752_s18 = smov 0  }
   0x5   :  { %s1754_s19 = smov 0   ;;  %s1756_s20 = smov 0  }
   0x6   :  { %s1758_s21 = smov 0   ;;  %s1760_s22 = smov 0  }
   0x7   :  { %s1762_s23 = smov 0   ;;  %s1764_s24 = smov 0  }
   0x8   :  { %s1766_s25 = smov 0  }
   0x9 LB: > { %s1337_s26 = sadd.s32 4294967295, %s1718_s25   ;;  %s26_s27 = sadd.s32 1, %s1710_s23  ;;  %s1718_s25 = sphi %s1766_s25, %s14_s25   ;;  %s1714_s24 = sphi %s1764_s24, %s2164_s24   ;;  %s1710_s23 = sphi %s1762_s23, %s2163_s23   ;;  %s1706_s22 = sphi %s1760_s22, %s2162_s22   ;;  %s1702_s21 = sphi %s1758_s21, %s2161_s21   ;;  %s1698_s20 = sphi %s1756_s20, %s2160_s20   ;;  %s1694_s19 = sphi %s1754_s19, %s2159_s19   ;;  %s1690_s18 = sphi %s1752_s18, %s2158_s18   ;;  %s1686_s17 = sphi %s1750_s17, %s2157_s17   ;;  %s1682_s16 = sphi %s1748_s16, %s2156_s16   ;;  %s1678_s15 = sphi %s1746_s15, %s2155_s15  }
   0xa   : > { %p27_p0 = scmp.ge.s32.totalorder %s26_s27, 5  ;;  %s29_s28 = sadd.s32 1, %s1714_s24 }
   0xb   : > { %s42_s29 = sadd.s32 1, %s1698_s20  ;;  %p49_p1 = scmp.ne.s32.totalorder %s1698_s20, %s1694_s19 }
   0xc   : > { %s2166_s27 = smov (%p27_p0, %s26_s27), 0  ;;  %s2168_s28 = smov (!%p27_p0, %s29_s28), %s1714_s24 }
   0xd   : > { %2146 = sst [smem:[#allocation6_spill]] %s2166_s27  ;;  %s38_s30 = ssub.s32 %s1710_s23, %s2166_s27 }
   0xe   : > { %p50_p2 = scmp.eq.s32.totalorder %s1718_s25, 0  ;;  %p31_p3 = scmp.ge.s32.totalorder %s2168_s28, 2 }
   0xf   : > { %p40_p4 = scmp.eq.s32.totalorder %s38_s30, 0  ;;  %s70_s6 = sadd.s32 1, %s1690_s18 }
  0x10   : > { %p1813_p5 = por %p50_p2, %p49_p1  ;;  %s2170_s28 = smov (%p31_p3, %s2168_s28), 0 }
  0x11   : > { %2148 = sst [smem:[#allocation7_spill]] %s2170_s28  ;;  %s66_s8 = ssub.s32 %s1714_s24, %s2170_s28 }
  0x12   : > { %s1821_s7 = scalar_select %p40_p4, %s1698_s20, %s42_s29  }
  0x13   : > { %p77_p6 = scmp.ne.s32.totalorder %s1690_s18, %s1686_s17  ;;  %s67_s9 = sor.u32 %s66_s8, %s38_s30 }
  0x14   : > { %p148_p7 = scmp.eq.s32.totalorder %s66_s8, 0  ;;  %p68_p8 = scmp.eq.s32.totalorder %s67_s9, 0 }
  0x15   : > { %p1827_p9 = por %p77_p6, %p50_p2  ;;  %s150_s11 = sadd.s32 1, %s1682_s16 }
  0x16   : > { %p160_p10 = scmp.ne.s32.totalorder %s1682_s16, %s1678_s15  ;;  %p161_p11 = scmp.eq.s32.totalorder %s1337_s26, 9 }
  0x17   : > { %s1835_s12 = scalar_select %p68_p8, %s1690_s18, %s70_s6  }
  0x18   : > { %s1838_s13 = scalar_select %p148_p7, %s1682_s16, %s150_s11  }
  0x19   : > { %p1840_p12 = por %p161_p11, %p160_p10  ;;  %p1340_p13 = scmp.ge.s32.totalorder %s1718_s25, 10 }
  0x1b   : > { %183 = sbr.rel (%p1340_p13) target bundleno = 88 (0x58), region = 16 }
  0x22   : > { %186 = sbr.rel (!%p1813_p5) target bundleno = 46 (0x2e), region = 20  ;;  %s188_s29 = sand.u32 (%p1813_p5), 1, %s1698_s20  }
  0x23   : > { %s1432_s30 = sshll.u32 (%p1813_p5), %s1710_s23, 4  ;;  %s1341_s8 = sshll.u32 (%p1813_p5), %s188_s29, 5 }
  0x24   : > { %s2151_s0 = sld [smem:[#allocation8_spill]] (%p1813_p5)  ;;  %s190_s26 = scalar_lea.vmem (%p1813_p5), [#allocation3], %s1341_s8 }
  0x2a   : > { %s196_s11 = scalar_lea.vmem %s2151_s0, %s1432_s30 }
  0x2b   : > { %v209_v0 = vld [vmem:[%s196_s11] sm:$0xff]  ;;  %v211_v1 = vld [vmem:[%s196_s11 + $0x8] sm:$0xff]  ;;  %v213_v2 = vld [vmem:[%s196_s11 + $0x50] sm:$0xff] }
  0x2c   : > { %210 = vst [vmem:[%s190_s26] sm:$0xff] %v209_v0  ;;  %212 = vst [vmem:[%s190_s26 + $0x8] sm:$0xff] %v211_v1  ;;  %v215_v3 = vld [vmem:[%s196_s11 + $0x58] sm:$0xff] }
  0x2d   : > { %214 = vst [vmem:[%s190_s26 + $0x10] sm:$0xff] %v213_v2  ;;  %216 = vst [vmem:[%s190_s26 + $0x18] sm:$0xff] %v215_v3 }
  0x2e PF: > { %222 = sbr.rel (!%p1827_p9) target bundleno = 88 (0x58), region = 43  ;;  %s224_s5 = sand.u32 (%p1827_p9), 1, %s1690_s18  }
  0x2f   : > { %s1346_s29 = sshll.u32 (%p1827_p9), %s1714_s24, 1  ;;  %s1344_s6 = sshll.u32 (%p1827_p9), %s224_s5, 9 }
  0x30   : > { %s1433_s30 = sshll.u32 (%p1827_p9), %s1710_s23, 8  ;;  %s2152_s1 = sld [smem:[#allocation9_spill]] (%p1827_p9) }
  0x31   : > { %s230_s9 = sadd.s32 (%p1827_p9), %s1433_s30, %s1346_s29  ;;  %s1865_s10 = scalar_lea.vmem (%p1827_p9), [#allocation4], %s1344_s6 }
  0x32   : > { %s1348_s0 = sshll.u32 (%p1827_p9), %s230_s9, 2 }
  0x36   : > { %s1860_s27 = scalar_lea.vmem %s2152_s1, %s1348_s0 }
  0x37   : > { %v386_v4 = vld [vmem:[%s1860_s27] sm:$0xff]  ;;  %v388_v5 = vld [vmem:[%s1860_s27 + $0x10] sm:$0xff] }
  0x38   : > { %v390_v6 = vld [vmem:[%s1860_s27 + $0x20] sm:$0xff]  ;;  %387 = vst [vmem:[%s1865_s10] sm:$0xff] %v386_v4  ;;  %389 = vst [vmem:[%s1865_s10 + $0x8] sm:$0xff] %v388_v5  ;;  %v392_v7 = vld [vmem:[%s1860_s27 + $0x30] sm:$0xff] }
  0x39   : > { %391 = vst [vmem:[%s1865_s10 + $0x10] sm:$0xff] %v390_v6  ;;  %v394_v8 = vld [vmem:[%s1860_s27 + $0x40] sm:$0xff]  ;;  %v396_v9 = vld [vmem:[%s1860_s27 + $0x50] sm:$0xff]  ;;  %393 = vst [vmem:[%s1865_s10 + $0x18] sm:$0xff] %v392_v7 }
  0x3a   : > { %395 = vst [vmem:[%s1865_s10 + $0x20] sm:$0xff] %v394_v8  ;;  %397 = vst [vmem:[%s1865_s10 + $0x28] sm:$0xff] %v396_v9  ;;  %v398_v10 = vld [vmem:[%s1860_s27 + $0x60] sm:$0xff]  ;;  %v400_v11 = vld [vmem:[%s1860_s27 + $0x70] sm:$0xff] }
  0x3b   : > { %v402_v12 = vld [vmem:[%s1860_s27 + $0x80] sm:$0xff]  ;;  %399 = vst [vmem:[%s1865_s10 + $0x30] sm:$0xff] %v398_v10  ;;  %401 = vst [vmem:[%s1865_s10 + $0x38] sm:$0xff] %v400_v11  ;;  %v404_v13 = vld [vmem:[%s1860_s27 + $0x90] sm:$0xff] }
  0x3c   : > { %403 = vst [vmem:[%s1865_s10 + $0x40] sm:$0xff] %v402_v12  ;;  %v406_v14 = vld [vmem:[%s1860_s27 + $0xa0] sm:$0xff]  ;;  %v408_v15 = vld [vmem:[%s1860_s27 + $0xb0] sm:$0xff]  ;;  %405 = vst [vmem:[%s1865_s10 + $0x48] sm:$0xff] %v404_v13 }
  0x3d   : > { %407 = vst [vmem:[%s1865_s10 + $0x50] sm:$0xff] %v406_v14  ;;  %409 = vst [vmem:[%s1865_s10 + $0x58] sm:$0xff] %v408_v15  ;;  %v410_v16 = vld [vmem:[%s1860_s27 + $0xc0] sm:$0xff]  ;;  %v412_v17 = vld [vmem:[%s1860_s27 + $0xd0] sm:$0xff] }
  0x3e   : > { %v414_v18 = vld [vmem:[%s1860_s27 + $0xe0] sm:$0xff]  ;;  %411 = vst [vmem:[%s1865_s10 + $0x60] sm:$0xff] %v410_v16  ;;  %413 = vst [vmem:[%s1865_s10 + $0x68] sm:$0xff] %v412_v17  ;;  %v416_v19 = vld [vmem:[%s1860_s27 + $0xf0] sm:$0xff] }
  0x3f   : > { %415 = vst [vmem:[%s1865_s10 + $0x70] sm:$0xff] %v414_v18  ;;  %v418_v20 = vld [vmem:[%s1860_s27 + $0x100] sm:$0xff]  ;;  %v420_v21 = vld [vmem:[%s1860_s27 + $0x110] sm:$0xff]  ;;  %417 = vst [vmem:[%s1865_s10 + $0x78] sm:$0xff] %v416_v19 }
  0x40   : > { %419 = vst [vmem:[%s1865_s10 + $0x80] sm:$0xff] %v418_v20  ;;  %421 = vst [vmem:[%s1865_s10 + $0x88] sm:$0xff] %v420_v21  ;;  %v422_v22 = vld [vmem:[%s1860_s27 + $0x120] sm:$0xff]  ;;  %v424_v23 = vld [vmem:[%s1860_s27 + $0x130] sm:$0xff] }
  0x41   : > { %v426_v24 = vld [vmem:[%s1860_s27 + $0x140] sm:$0xff]  ;;  %423 = vst [vmem:[%s1865_s10 + $0x90] sm:$0xff] %v422_v22  ;;  %425 = vst [vmem:[%s1865_s10 + $0x98] sm:$0xff] %v424_v23  ;;  %v428_v25 = vld [vmem:[%s1860_s27 + $0x150] sm:$0xff] }
  0x42   : > { %427 = vst [vmem:[%s1865_s10 + $0xa0] sm:$0xff] %v426_v24  ;;  %v430_v26 = vld [vmem:[%s1860_s27 + $0x160] sm:$0xff]  ;;  %v432_v27 = vld [vmem:[%s1860_s27 + $0x170] sm:$0xff]  ;;  %429 = vst [vmem:[%s1865_s10 + $0xa8] sm:$0xff] %v428_v25 }
  0x43   : > { %431 = vst [vmem:[%s1865_s10 + $0xb0] sm:$0xff] %v430_v26  ;;  %433 = vst [vmem:[%s1865_s10 + $0xb8] sm:$0xff] %v432_v27  ;;  %v434_v28 = vld [vmem:[%s1860_s27 + $0x180] sm:$0xff]  ;;  %v436_v29 = vld [vmem:[%s1860_s27 + $0x190] sm:$0xff] }
  0x44   : > { %v438_v30 = vld [vmem:[%s1860_s27 + $0x1a0] sm:$0xff]  ;;  %435 = vst [vmem:[%s1865_s10 + $0xc0] sm:$0xff] %v434_v28  ;;  %437 = vst [vmem:[%s1865_s10 + $0xc8] sm:$0xff] %v436_v29  ;;  %v440_v31 = vld [vmem:[%s1860_s27 + $0x1b0] sm:$0xff] }
  0x45   : > { %439 = vst [vmem:[%s1865_s10 + $0xd0] sm:$0xff] %v438_v30  ;;  %v442_v32 = vld [vmem:[%s1860_s27 + $0x1c0] sm:$0xff]  ;;  %v444_v33 = vld [vmem:[%s1860_s27 + $0x1d0] sm:$0xff]  ;;  %441 = vst [vmem:[%s1865_s10 + $0xd8] sm:$0xff] %v440_v31 }
  0x46   : > { %443 = vst [vmem:[%s1865_s10 + $0xe0] sm:$0xff] %v442_v32  ;;  %445 = vst [vmem:[%s1865_s10 + $0xe8] sm:$0xff] %v444_v33  ;;  %v446_v34 = vld [vmem:[%s1860_s27 + $0x1e0] sm:$0xff]  ;;  %v448_v35 = vld [vmem:[%s1860_s27 + $0x1f0] sm:$0xff] }
  0x47   : > { %v450_v36 = vld [vmem:[%s1860_s27 + $0x200] sm:$0xff]  ;;  %447 = vst [vmem:[%s1865_s10 + $0xf0] sm:$0xff] %v446_v34  ;;  %449 = vst [vmem:[%s1865_s10 + $0xf8] sm:$0xff] %v448_v35  ;;  %v452_v37 = vld [vmem:[%s1860_s27 + $0x210] sm:$0xff] }
  0x48   : > { %451 = vst [vmem:[%s1865_s10 + $0x100] sm:$0xff] %v450_v36  ;;  %v454_v38 = vld [vmem:[%s1860_s27 + $0x220] sm:$0xff]  ;;  %v456_v39 = vld [vmem:[%s1860_s27 + $0x230] sm:$0xff]  ;;  %453 = vst [vmem:[%s1865_s10 + $0x108] sm:$0xff] %v452_v37 }
  0x49   : > { %455 = vst [vmem:[%s1865_s10 + $0x110] sm:$0xff] %v454_v38  ;;  %457 = vst [vmem:[%s1865_s10 + $0x118] sm:$0xff] %v456_v39  ;;  %v458_v40 = vld [vmem:[%s1860_s27 + $0x240] sm:$0xff]  ;;  %v460_v41 = vld [vmem:[%s1860_s27 + $0x250] sm:$0xff] }
  0x4a   : > { %v462_v42 = vld [vmem:[%s1860_s27 + $0x260] sm:$0xff]  ;;  %459 = vst [vmem:[%s1865_s10 + $0x120] sm:$0xff] %v458_v40  ;;  %461 = vst [vmem:[%s1865_s10 + $0x128] sm:$0xff] %v460_v41  ;;  %v464_v43 = vld [vmem:[%s1860_s27 + $0x270] sm:$0xff] }
  0x4b   : > { %463 = vst [vmem:[%s1865_s10 + $0x130] sm:$0xff] %v462_v42  ;;  %v466_v44 = vld [vmem:[%s1860_s27 + $0x280] sm:$0xff]  ;;  %v468_v45 = vld [vmem:[%s1860_s27 + $0x290] sm:$0xff]  ;;  %465 = vst [vmem:[%s1865_s10 + $0x138] sm:$0xff] %v464_v43 }
  0x4c   : > { %467 = vst [vmem:[%s1865_s10 + $0x140] sm:$0xff] %v466_v44  ;;  %469 = vst [vmem:[%s1865_s10 + $0x148] sm:$0xff] %v468_v45  ;;  %v470_v46 = vld [vmem:[%s1860_s27 + $0x2a0] sm:$0xff]  ;;  %v472_v47 = vld [vmem:[%s1860_s27 + $0x2b0] sm:$0xff] }
  0x4d   : > { %v474_v48 = vld [vmem:[%s1860_s27 + $0x2c0] sm:$0xff]  ;;  %471 = vst [vmem:[%s1865_s10 + $0x150] sm:$0xff] %v470_v46  ;;  %473 = vst [vmem:[%s1865_s10 + $0x158] sm:$0xff] %v472_v47  ;;  %v476_v49 = vld [vmem:[%s1860_s27 + $0x2d0] sm:$0xff] }
  0x4e   : > { %475 = vst [vmem:[%s1865_s10 + $0x160] sm:$0xff] %v474_v48  ;;  %v478_v50 = vld [vmem:[%s1860_s27 + $0x2e0] sm:$0xff]  ;;  %v480_v51 = vld [vmem:[%s1860_s27 + $0x2f0] sm:$0xff]  ;;  %477 = vst [vmem:[%s1865_s10 + $0x168] sm:$0xff] %v476_v49 }
  0x4f   : > { %479 = vst [vmem:[%s1865_s10 + $0x170] sm:$0xff] %v478_v50  ;;  %481 = vst [vmem:[%s1865_s10 + $0x178] sm:$0xff] %v480_v51  ;;  %v482_v52 = vld [vmem:[%s1860_s27 + $0x300] sm:$0xff]  ;;  %v484_v53 = vld [vmem:[%s1860_s27 + $0x310] sm:$0xff] }
  0x50   : > { %v486_v54 = vld [vmem:[%s1860_s27 + $0x320] sm:$0xff]  ;;  %483 = vst [vmem:[%s1865_s10 + $0x180] sm:$0xff] %v482_v52  ;;  %485 = vst [vmem:[%s1865_s10 + $0x188] sm:$0xff] %v484_v53  ;;  %v488_v55 = vld [vmem:[%s1860_s27 + $0x330] sm:$0xff] }
  0x51   : > { %487 = vst [vmem:[%s1865_s10 + $0x190] sm:$0xff] %v486_v54  ;;  %v490_v56 = vld [vmem:[%s1860_s27 + $0x340] sm:$0xff]  ;;  %v492_v57 = vld [vmem:[%s1860_s27 + $0x350] sm:$0xff]  ;;  %489 = vst [vmem:[%s1865_s10 + $0x198] sm:$0xff] %v488_v55 }
  0x52   : > { %491 = vst [vmem:[%s1865_s10 + $0x1a0] sm:$0xff] %v490_v56  ;;  %493 = vst [vmem:[%s1865_s10 + $0x1a8] sm:$0xff] %v492_v57  ;;  %v494_v58 = vld [vmem:[%s1860_s27 + $0x360] sm:$0xff]  ;;  %v496_v59 = vld [vmem:[%s1860_s27 + $0x370] sm:$0xff] }
  0x53   : > { %v498_v60 = vld [vmem:[%s1860_s27 + $0x380] sm:$0xff]  ;;  %495 = vst [vmem:[%s1865_s10 + $0x1b0] sm:$0xff] %v494_v58  ;;  %497 = vst [vmem:[%s1865_s10 + $0x1b8] sm:$0xff] %v496_v59  ;;  %v500_v61 = vld [vmem:[%s1860_s27 + $0x390] sm:$0xff] }
  0x54   : > { %499 = vst [vmem:[%s1865_s10 + $0x1c0] sm:$0xff] %v498_v60  ;;  %v502_v62 = vld [vmem:[%s1860_s27 + $0x3a0] sm:$0xff]  ;;  %v504_v63 = vld [vmem:[%s1860_s27 + $0x3b0] sm:$0xff]  ;;  %501 = vst [vmem:[%s1865_s10 + $0x1c8] sm:$0xff] %v500_v61 }
  0x55   : > { %503 = vst [vmem:[%s1865_s10 + $0x1d0] sm:$0xff] %v502_v62  ;;  %505 = vst [vmem:[%s1865_s10 + $0x1d8] sm:$0xff] %v504_v63  ;;  %v506_v0 = vld [vmem:[%s1860_s27 + $0x3c0] sm:$0xff]  ;;  %v508_v1 = vld [vmem:[%s1860_s27 + $0x3d0] sm:$0xff] }
  0x56   : > { %v510_v2 = vld [vmem:[%s1860_s27 + $0x3e0] sm:$0xff]  ;;  %507 = vst [vmem:[%s1865_s10 + $0x1e0] sm:$0xff] %v506_v0  ;;  %509 = vst [vmem:[%s1865_s10 + $0x1e8] sm:$0xff] %v508_v1  ;;  %v512_v3 = vld [vmem:[%s1860_s27 + $0x3f0] sm:$0xff] }
  0x57   : > { %511 = vst [vmem:[%s1865_s10 + $0x1f0] sm:$0xff] %v510_v2  ;;  %513 = vst [vmem:[%s1865_s10 + $0x1f8] sm:$0xff] %v512_v3 }
  0x58 PF: > { %p1349_p0 = scmp.ge.s32.totalorder %s1718_s25, 1  ;;  %p534_p1 = scmp.lt.s32.totalorder %s1718_s25, 11 }
  0x5a   : > { %p535_p2 = pnand %p1349_p0, %p534_p1 }
  0x5b   : > { %s541_s0 = sand.u32 (!%p535_p2), 1, %s1694_s19   ;;  %s548_s28 = sand.u32 (!%p535_p2), 1, %s1686_s17  }
  0x5c   : > { %538 = sbr.rel (%p535_p2) target bundleno = 416 (0x1a0), region = 89  ;;  %s1350_s11 = sshll.u32 (!%p535_p2), %s541_s0, 5 }
  0x5d   : > { %s1351_s26 = sshll.u32 (!%p535_p2), %s548_s28, 9  ;;  %s581_s5 = sand.u32 (!%p535_p2), 1, %s1678_s15  }
  0x5e   : > { %s1353_s29 = sshll.u32 (!%p535_p2), %s1706_s22, 1  ;;  %s1352_s27 = sshll.u32 (!%p535_p2), %s581_s5, 4 }
  0x5f   : > { %p589_p3 = scmp.lt.s32.totalorder (!%p535_p2), %s1353_s29, 3  ;;  %s2008_s19 = scalar_lea.vmem (!%p535_p2), [#allocation3], %s1350_s11 }
  0x60   : > { %s2010_s17 = scalar_lea.vmem (!%p535_p2), [#allocation4], %s1351_s26  ;;  %s2012_s15 = scalar_lea.vmem (!%p535_p2), [#allocation5], %s1352_s27 }
  0x61   : > { %p1355_p4 = scmp.ne.s32.totalorder (!%p535_p2), %s1702_s21, 0 }
  0x63   : > { %s2172_s29 = smov (!%p589_p3, %s1353_s29), 3  ;;  %603 = sbr.rel (%p1355_p4) target bundleno = 106 (0x6a), region = 101 }
  0x64   : > { %s591_s9 = scalar_lea.vmem %s2139_s2, %s2172_s29  ;;  %s596_s1 = scalar_lea.vmem %s2140_s3, %s2172_s29  ;;  %v1720_v4 = vmov (!%p1355_p4), 0.0  }
  0x65   : > { %604 = vst [vmem:[#allocation2] sm:$0xff] (!%p1355_p4), %v1720_v4  ;;  %605 = vst [vmem:[#allocation2 + $0x8] sm:$0xff] (!%p1355_p4), %v1720_v4 }
  0x66   : > { %606 = vst [vmem:[#allocation2 + $0x10] sm:$0xff] (!%p1355_p4), %v1720_v4  ;;  %607 = vst [vmem:[#allocation2 + $0x18] sm:$0xff] (!%p1355_p4), %v1720_v4 }
  0x6a PF: > { %v1530_v5 = vld [vmem:[%s2010_s17 + $0x4] ss:$8 sps:$4 sm:$0xff]   ;;  %v1534_v7 = vld [vmem:[%s2010_s17] ss:$8 sps:$4 sm:$0xff]   ;;  %v1536_v9 = vld [vmem:[%s2010_s17 + $0x14] ss:$8 sps:$4 sm:$0xff]  }
  0x6b   : > { %v1532_v6 = vld [vmem:[%s2010_s17 + $0x104] ss:$8 sps:$4 sm:$0xff]   ;;  %1020 = vmatprep.subr.bf16.mxu1 %v1530_v5  ;;  %v1535_v8 = vld [vmem:[%s2010_s17 + $0x100] ss:$8 sps:$4 sm:$0xff]   ;;  %v1538_v10 = vld [vmem:[%s2010_s17 + $0x114] ss:$8 sps:$4 sm:$0xff]  }
  0x6c   : > { %1063 = vmatprep.subr.bf16.mxu0 %v1532_v6  ;;  %1021 = vmatpush1.bf16.msra.mxu1 %v1534_v7  ;;  %v1540_v11 = vld [vmem:[%s2010_s17 + $0x10] ss:$8 sps:$4 sm:$0xff]   ;;  %v1542_v13 = vld [vmem:[%s2010_s17 + $0x24] ss:$8 sps:$4 sm:$0xff]   ;;  %v1546_v15 = vld [vmem:[%s2010_s17 + $0x20] ss:$8 sps:$4 sm:$0xff]  }
  0x6d   : > { %1064 = vmatpush1.bf16.msra.mxu0 %v1535_v8  ;;  %1022 = vmatprep.subr.bf16.mxu1 %v1536_v9  ;;  %v1541_v12 = vld [vmem:[%s2010_s17 + $0x110] ss:$8 sps:$4 sm:$0xff]   ;;  %v1544_v14 = vld [vmem:[%s2010_s17 + $0x124] ss:$8 sps:$4 sm:$0xff]   ;;  %v1547_v16 = vld [vmem:[%s2010_s17 + $0x120] ss:$8 sps:$4 sm:$0xff]  }
  0x6e   : > { %1065 = vmatprep.subr.bf16.mxu0 %v1538_v10  ;;  %v1548_v17 = vld [vmem:[%s2010_s17 + $0x34] ss:$8 sps:$4 sm:$0xff]   ;;  %v1552_v19 = vld [vmem:[%s2010_s17 + $0x30] ss:$8 sps:$4 sm:$0xff]   ;;  %v1554_v21 = vld [vmem:[%s2010_s17 + $0x44] ss:$8 sps:$4 sm:$0xff]  }
  0x6f   : > { %v1550_v18 = vld [vmem:[%s2010_s17 + $0x134] ss:$8 sps:$4 sm:$0xff]   ;;  %v1553_v20 = vld [vmem:[%s2010_s17 + $0x130] ss:$8 sps:$4 sm:$0xff]   ;;  %v1556_v22 = vld [vmem:[%s2010_s17 + $0x144] ss:$8 sps:$4 sm:$0xff]  }
  0x70   : > { %1023 = vmatpush1.bf16.msra.mxu1 %v1540_v11  ;;  %v1558_v23 = vld [vmem:[%s2010_s17 + $0x40] ss:$8 sps:$4 sm:$0xff]   ;;  %v1560_v25 = vld [vmem:[%s2010_s17 + $0x54] ss:$8 sps:$4 sm:$0xff]   ;;  %v1564_v27 = vld [vmem:[%s2010_s17 + $0x50] ss:$8 sps:$4 sm:$0xff]  }
  0x71   : > { %1066 = vmatpush1.bf16.msra.mxu0 %v1541_v12  ;;  %1024 = vmatprep.subr.bf16.mxu1 %v1542_v13  ;;  %v1559_v24 = vld [vmem:[%s2010_s17 + $0x140] ss:$8 sps:$4 sm:$0xff]   ;;  %v1562_v26 = vld [vmem:[%s2010_s17 + $0x154] ss:$8 sps:$4 sm:$0xff]   ;;  %v1565_v28 = vld [vmem:[%s2010_s17 + $0x150] ss:$8 sps:$4 sm:$0xff]  }
  0x72   : > { %1067 = vmatprep.subr.bf16.mxu0 %v1544_v14  ;;  %v1566_v29 = vld [vmem:[%s2010_s17 + $0x64] ss:$8 sps:$4 sm:$0xff]   ;;  %v1570_v31 = vld [vmem:[%s2010_s17 + $0x60] ss:$8 sps:$4 sm:$0xff]   ;;  %v1572_v33 = vld [vmem:[%s2010_s17 + $0x74] ss:$8 sps:$4 sm:$0xff]  }
  0x73   : > { %v1568_v30 = vld [vmem:[%s2010_s17 + $0x164] ss:$8 sps:$4 sm:$0xff]   ;;  %v1571_v32 = vld [vmem:[%s2010_s17 + $0x160] ss:$8 sps:$4 sm:$0xff]   ;;  %v1574_v34 = vld [vmem:[%s2010_s17 + $0x174] ss:$8 sps:$4 sm:$0xff]  }
  0x74   : > { %1025 = vmatpush1.bf16.msra.mxu1 %v1546_v15  ;;  %v1576_v35 = vld [vmem:[%s2010_s17 + $0x70] ss:$8 sps:$4 sm:$0xff]   ;;  %v1578_v37 = vld [vmem:[%s2010_s17 + $0x84] ss:$8 sps:$4 sm:$0xff]   ;;  %v1582_v39 = vld [vmem:[%s2010_s17 + $0x80] ss:$8 sps:$4 sm:$0xff]  }
  0x75   : > { %1068 = vmatpush1.bf16.msra.mxu0 %v1547_v16  ;;  %1026 = vmatprep.subr.bf16.mxu1 %v1548_v17  ;;  %v1577_v36 = vld [vmem:[%s2010_s17 + $0x170] ss:$8 sps:$4 sm:$0xff]   ;;  %v1580_v38 = vld [vmem:[%s2010_s17 + $0x184] ss:$8 sps:$4 sm:$0xff]   ;;  %v1583_v40 = vld [vmem:[%s2010_s17 + $0x180] ss:$8 sps:$4 sm:$0xff]  }
  0x76   : > { %1069 = vmatprep.subr.bf16.mxu0 %v1550_v18  ;;  %v1584_v41 = vld [vmem:[%s2010_s17 + $0x94] ss:$8 sps:$4 sm:$0xff]   ;;  %v1588_v43 = vld [vmem:[%s2010_s17 + $0x90] ss:$8 sps:$4 sm:$0xff]   ;;  %v1590_v45 = vld [vmem:[%s2010_s17 + $0xa4] ss:$8 sps:$4 sm:$0xff]  }
  0x77   : > { %v1586_v42 = vld [vmem:[%s2010_s17 + $0x194] ss:$8 sps:$4 sm:$0xff]   ;;  %v1589_v44 = vld [vmem:[%s2010_s17 + $0x190] ss:$8 sps:$4 sm:$0xff]   ;;  %v1592_v46 = vld [vmem:[%s2010_s17 + $0x1a4] ss:$8 sps:$4 sm:$0xff]  }
  0x78   : > { %1027 = vmatpush1.bf16.msra.mxu1 %v1552_v19  ;;  %v1594_v47 = vld [vmem:[%s2010_s17 + $0xa0] ss:$8 sps:$4 sm:$0xff]   ;;  %v1596_v49 = vld [vmem:[%s2010_s17 + $0xb4] ss:$8 sps:$4 sm:$0xff]   ;;  %v1600_v51 = vld [vmem:[%s2010_s17 + $0xb0] ss:$8 sps:$4 sm:$0xff]  }
  0x79   : > { %1070 = vmatpush1.bf16.msra.mxu0 %v1553_v20  ;;  %1028 = vmatprep.subr.bf16.mxu1 %v1554_v21  ;;  %v1595_v48 = vld [vmem:[%s2010_s17 + $0x1a0] ss:$8 sps:$4 sm:$0xff]   ;;  %v1598_v50 = vld [vmem:[%s2010_s17 + $0x1b4] ss:$8 sps:$4 sm:$0xff]   ;;  %v1601_v53 = vld [vmem:[%s2010_s17 + $0x1b0] ss:$8 sps:$4 sm:$0xff]  }
  0x7a   : > { %1071 = vmatprep.subr.bf16.mxu0 %v1556_v22  ;;  %v1628_v52 = vld [vmem:[%s2008_s19 + $0x4] ss:$16 sps:$4 sm:$0xff]   ;;  %v1631_v56 = vld [vmem:[%s2008_s19 + $0xc] ss:$16 sps:$4 sm:$0xff]   ;;  %v1606_v57 = vld [vmem:[%s2010_s17 + $0xc0] ss:$8 sps:$4 sm:$0xff]  }
  0x7b   : > { %v1602_v54 = vld [vmem:[%s2010_s17 + $0xc4] ss:$8 sps:$4 sm:$0xff]   ;;  %1052 = vmatprep.mubr.bf16.mxu1 %v1628_v52  ;;  %1095 = vmatprep.mubr.bf16.mxu0 %v1631_v56  ;;  %v1607_v58 = vld [vmem:[%s2010_s17 + $0x1c0] ss:$8 sps:$4 sm:$0xff]   ;;  %v1608_v59 = vld [vmem:[%s2010_s17 + $0xd4] ss:$8 sps:$4 sm:$0xff]  }
  0x7c   : > { %1029 = vmatpush1.bf16.msra.mxu1 %v1558_v23  ;;  %v1604_v55 = vld [vmem:[%s2010_s17 + $0x1c4] ss:$8 sps:$4 sm:$0xff]   ;;  %v1610_v60 = vld [vmem:[%s2010_s17 + $0x1d4] ss:$8 sps:$4 sm:$0xff]   ;;  %v1612_v61 = vld [vmem:[%s2010_s17 + $0xd0] ss:$8 sps:$4 sm:$0xff]  }
  0x7d   : > { %1072 = vmatpush1.bf16.msra.mxu0 %v1559_v24  ;;  %1030 = vmatprep.subr.bf16.mxu1 %v1560_v25  ;;  %v1613_v62 = vld [vmem:[%s2010_s17 + $0x1d0] ss:$8 sps:$4 sm:$0xff]   ;;  %v1614_v63 = vld [vmem:[%s2010_s17 + $0xe4] ss:$8 sps:$4 sm:$0xff]   ;;  %v1618_v1 = vld [vmem:[%s2010_s17 + $0xe0] ss:$8 sps:$4 sm:$0xff]  }
  0x7e   : > { %1073 = vmatprep.subr.bf16.mxu0 %v1562_v26  ;;  %v1616_v0 = vld [vmem:[%s2010_s17 + $0x1e4] ss:$8 sps:$4 sm:$0xff]   ;;  %v1619_v2 = vld [vmem:[%s2010_s17 + $0x1e0] ss:$8 sps:$4 sm:$0xff]   ;;  %v1620_v3 = vld [vmem:[%s2010_s17 + $0xf4] ss:$8 sps:$4 sm:$0xff]  }
  0x7f   : > { %v1622_v4 = vld [vmem:[%s2010_s17 + $0x1f4] ss:$8 sps:$4 sm:$0xff]   ;;  %v1624_v5 = vld [vmem:[%s2010_s17 + $0xf0] ss:$8 sps:$4 sm:$0xff]   ;;  %v608_v10 = vld [vmem:[#allocation2] sm:$0xff]  ;;  %p1424_p5 = scmp.ne.s32.totalorder %s1702_s21, 4 }
  0x80   : > { %1031 = vmatpush1.bf16.msra.mxu1 %v1564_v27  ;;  %v1625_v6 = vld [vmem:[%s2010_s17 + $0x1f0] ss:$8 sps:$4 sm:$0xff]   ;;  %v609_v14 = vld [vmem:[#allocation2 + $0x8] sm:$0xff] }
  0x81   : > { %1074 = vmatpush1.bf16.msra.mxu0 %v1565_v28  ;;  %1032 = vmatprep.subr.bf16.mxu1 %v1566_v29  ;;  %v1626_v7 = vld [vmem:[%s2008_s19] ss:$16 sps:$4 sm:$0xff]   ;;  %v1629_v8 = vld [vmem:[%s2008_s19 + $0x8] ss:$16 sps:$4 sm:$0xff]   ;;  %v1124_v29 = vlaneseq (!%p1424_p5) }
  0x82   : > { %1075 = vmatprep.subr.bf16.mxu0 %v1568_v30  ;;  %v610_v18 = vld [vmem:[#allocation2 + $0x10] sm:$0xff]  ;;  %v611_v23 = vld [vmem:[#allocation2 + $0x18] sm:$0xff] }
  0x83   : > { %v1125_v30 = vshrl.u32 (!%p1424_p5), %v1124_v29, 7 }
  0x84   : > { %1033 = vmatpush1.bf16.msra.mxu1 %v1570_v31  ;;  %v1122_v31 = vld [vmem:[%s591_s9] sm:$0x3] (!%p1424_p5) }
  0x85   : > { %1076 = vmatpush1.bf16.msra.mxu0 %v1571_v32  ;;  %1034 = vmatprep.subr.bf16.mxu1 %v1572_v33  ;;  %v1138_v32 = vld [vmem:[%s596_s1] sm:$0x3] (!%p1424_p5) }
  0x86   : > { %1077 = vmatprep.subr.bf16.mxu0 %v1574_v34  ;;  %v1126_v34 = vsub.s32 (!%p1424_p5), 0, %v1125_v30 }
  0x88   : > { %1035 = vmatpush1.bf16.msra.mxu1 %v1576_v35  ;;  %v1130_v35 = vsub.s32 (!%p1424_p5), 1, %v1125_v30 }
  0x89   : > { %1078 = vmatpush1.bf16.msra.mxu0 %v1577_v36  ;;  %1036 = vmatprep.subr.bf16.mxu1 %v1578_v37 }
  0x8a   : > { %1079 = vmatprep.subr.bf16.mxu0 %v1580_v38 }
  0x8c   : > { %1037 = vmatpush1.bf16.msra.mxu1 %v1582_v39  ;;  %v1127_v39 = vrot.slane (!%p1424_p5), %v1122_v31, %v1126_v34 }
  0x8d   : > { %1080 = vmatpush1.bf16.msra.mxu0 %v1583_v40  ;;  %1038 = vmatprep.subr.bf16.mxu1 %v1584_v41  ;;  %v1131_v40 = vrot.slane (!%p1424_p5), %v1122_v31, %v1130_v35  ;;  %v1143_v41 = vrot.slane (!%p1424_p5), %v1138_v32, %v1126_v34 }
  0x8e   : > { %1081 = vmatprep.subr.bf16.mxu0 %v1586_v42  ;;  %v1147_v42 = vrot.slane (!%p1424_p5), %v1138_v32, %v1130_v35 }
  0x90   : > { %1039 = vmatpush1.bf16.msra.mxu1 %v1588_v43 }
  0x91   : > { %1082 = vmatpush1.bf16.msra.mxu0 %v1589_v44  ;;  %1040 = vmatprep.subr.bf16.mxu1 %v1590_v45 }
  0x92   : > { %1083 = vmatprep.subr.bf16.mxu0 %v1592_v46 }
  0x94   : > { %1041 = vmatpush1.bf16.msra.mxu1 %v1594_v47 }
  0x95   : > { %1084 = vmatpush1.bf16.msra.mxu0 %v1595_v48  ;;  %1042 = vmatprep.subr.bf16.mxu1 %v1596_v49 }
  0x96   : > { %1085 = vmatprep.subr.bf16.mxu0 %v1598_v50 }
  0x98   : > { %1043 = vmatpush1.bf16.msra.mxu1 %v1600_v51 }
  0x99   : > { %1086 = vmatpush1.bf16.msra.mxu0 %v1601_v53  ;;  %1044 = vmatprep.subr.bf16.mxu1 %v1602_v54 }
  0x9a   : > { %1087 = vmatprep.subr.bf16.mxu0 %v1604_v55 }
  0x9c   : > { %1045 = vmatpush1.bf16.msra.mxu1 %v1606_v57 }
  0x9d   : > { %1088 = vmatpush1.bf16.msra.mxu0 %v1607_v58  ;;  %1046 = vmatprep.subr.bf16.mxu1 %v1608_v59 }
  0x9e   : > { %1089 = vmatprep.subr.bf16.mxu0 %v1610_v60 }
  0xa0   : > { %1047 = vmatpush1.bf16.msra.mxu1 %v1612_v61 }
  0xa1   : > { %1090 = vmatpush1.bf16.msra.mxu0 %v1613_v62  ;;  %1048 = vmatprep.subr.bf16.mxu1 %v1614_v63 }
  0xa2   : > { %1091 = vmatprep.subr.bf16.mxu0 %v1616_v0 }
  0xa4   : > { %1049 = vmatpush1.bf16.msra.mxu1 %v1618_v1 }
  0xa5   : > { %1092 = vmatpush1.bf16.msra.mxu0 %v1619_v2  ;;  %1050 = vmatprep.subr.bf16.mxu1 %v1620_v3 }
  0xa6   : > { %1093 = vmatprep.subr.bf16.mxu0 %v1622_v4 }
  0xa8   : > { %1051 = vmatpush1.bf16.msra.mxu1 %v1624_v5 }
  0xa9   : > { %1094 = vmatpush1.bf16.msra.mxu0 %v1625_v6 }
  0xab   : > { %1053 = vmatmul.mubr.bf16.vlgmr.msra.gmra.mrb[0].mxu1 %v1626_v7 }
  0xac   : > { %1096 = vmatmul.mubr.bf16.vlgmr.msra.gmra.mrb[0].mxu0 %v1629_v8 }
 0x17e   : > { %v1054_v9 = vpop.f32.mrb[0].mxu1 }
 0x17f   : > { %v1097_v11 = vpop.f32.mrb[0].mxu0  ;;  %v1056_v13 = vpop.f32.mrb[1].mxu1 }
 0x180   : > { %v1098_v12 = vadd.f32 %v1097_v11, %v1054_v9  ;;  %v1099_v15 = vpop.f32.mrb[1].mxu0  ;;  %v1058_v17 = vpop.f32.mrb[2].mxu1 }
 0x181   : > { %v1100_v16 = vadd.f32 %v1099_v15, %v1056_v13  ;;  %v1101_v19 = vpop.f32.mrb[2].mxu0  ;;  %v1060_v22 = vpop.f32.mrb[3].mxu1  ;;  %1117 = sbr.rel (%p1424_p5) target bundleno = 408 (0x198), region = 105 }
 0x182   : > { %v1106_v20 = vadd.f32 %v1098_v12, %v608_v10  ;;  %v1102_v21 = vadd.f32 %v1101_v19, %v1058_v17  ;;  %v1103_v24 = vpop.f32.mrb[3].mxu0 }
 0x183   : > { %v1107_v25 = vadd.f32 %v1100_v16, %v609_v14  ;;  %v1104_v26 = vadd.f32 %v1103_v24, %v1060_v22 }
 0x184   : > { %1110 = vst [vmem:[#allocation2] sm:$0xff] %v1106_v20  ;;  %v1108_v27 = vadd.f32 %v1102_v21, %v610_v18 }
 0x185   : > { %1111 = vst [vmem:[#allocation2 + $0x8] sm:$0xff] %v1107_v25  ;;  %v1109_v28 = vadd.f32 %v1104_v26, %v611_v23 }
 0x186   : > { %1112 = vst [vmem:[#allocation2 + $0x10] sm:$0xff] %v1108_v27 }
 0x187   : > { %1113 = vst [vmem:[#allocation2 + $0x18] sm:$0xff] %v1109_v28 }
 0x18b   : > { %v1118_v33 = vld [vmem:[#allocation2] sm:$0xff] }
 0x18c   : > { %v1119_v36 = vld [vmem:[#allocation2 + $0x8] sm:$0xff]  ;;  %v1134_v43 = vmul.f32 %v1127_v39, %v1118_v33 }
 0x18d   : > { %v1120_v37 = vld [vmem:[#allocation2 + $0x10] sm:$0xff]  ;;  %v1135_v44 = vmul.f32 %v1131_v40, %v1119_v36 }
 0x18e   : > { %v1121_v38 = vld [vmem:[#allocation2 + $0x18] sm:$0xff]  ;;  %v1136_v45 = vmul.f32 %v1127_v39, %v1120_v37  ;;  %v1150_v47 = vadd.f32 %v1143_v41, %v1134_v43 }
 0x18f   : > { %v1137_v46 = vmul.f32 %v1131_v40, %v1121_v38  ;;  %v1151_v48 = vadd.f32 %v1147_v42, %v1135_v44 }
 0x190   : > { %v1152_v49 = vadd.f32 %v1143_v41, %v1136_v45  ;;  %v1154_v51 = vmax.f32 %v1150_v47, 0.0 }
 0x191   : > { %v1153_v50 = vadd.f32 %v1147_v42, %v1137_v46  ;;  %v1155_v52 = vmax.f32 %v1151_v48, 0.0 }
 0x192   : > { %v1156_v53 = vmax.f32 %v1152_v49, 0.0 }
 0x193   : > { %v1157_v54 = vmax.f32 %v1153_v50, 0.0  ;;  %v1434_v55 = vpack.c.bf16 %v1155_v52, %v1154_v51 }
 0x195   : > { %v1435_v56 = vpack.c.bf16 %v1157_v54, %v1156_v53  ;;  %1170 = vst [vmem:[%s2012_s15] sm:$0xff] %v1434_v55 }
 0x197   : > { %1171 = vst [vmem:[%s2012_s15 + $0x8] sm:$0xff] %v1435_v56 }
 0x198 PF: > { %1178 = sbr.rel (!%p1840_p12) target bundleno = 416 (0x1a0), region = 109  ;;  %s1436_s1 = sshll.u32 (%p1840_p12), %s1706_s22, 3 }
 0x199   : > { %s1184_s29 = scalar_lea.vmem (%p1840_p12), %s2141_s4, %s1436_s1 }
 0x19c   : > { %v1214_v57 = vld [vmem:[%s2012_s15] sm:$0xff] (%p1840_p12) }
 0x19d   : > { %1215 = vst [vmem:[%s1184_s29] sm:$0xff] (%p1840_p12), %v1214_v57 }
 0x19e   : > { %v1216_v58 = vld [vmem:[%s2012_s15 + $0x8] sm:$0xff] (%p1840_p12) }
 0x19f   : > { %1217 = vst [vmem:[%s1184_s29 + $0x10] sm:$0xff] %v1216_v58 }
 0x1a0 PF: > { %s14_s25 = sadd.s32 1, %s1718_s25   ;;  %s2153_s14 = sld [smem:[#allocation6_spill]] }
 0x1a1   : > { %p11_p6 = scmp.ge.s32.totalorder %s14_s25, 12   ;;  %s2154_s27 = sld [smem:[#allocation7_spill]] }
 0x1a2   : > { %s2155_s15 = smov %s1682_s16  ;;  %s2156_s16 = smov %s1838_s13 }
 0x1a3   : > { %s2157_s17 = smov %s1690_s18  ;;  %s2158_s18 = smov %s1835_s12 }
 0x1a4   : > { %s2159_s19 = smov %s1698_s20  ;;  %s2160_s20 = smov %s1821_s7 }
 0x1a5   : > { %s2161_s21 = smov %s1710_s23  ;;  %s2162_s22 = smov %s1714_s24 }
 0x1a6   : > { %s2163_s23 = smov %s2153_s14  ;;  %13 = sbr.rel (!%p11_p6) target bundleno = 9 (0x9), region = 192 }
 0x1a7   : > { %s2164_s24 = smov %s2154_s27 }

// kernel: mnist_resnet_forward.38
= control target key start
LH: loop header
LB: loop body
LE: loop exit
PB: predicated region body
PF: predicated region fallthrough
CT: control target
= control target key end

     0   :  { %s1156_s15 = smov 0   ;;  %s1158_s16 = smov 0   ;;  %s1347_s0 = inlined_call_operand.vmem [shape: bf16[16,256], index: 0, kind: input, shape index: {}]   ;;  %s1348_s1 = inlined_call_operand.vmem [shape: bf16[256,512], index: 1, kind: input, shape index: {}]   ;;  %s1349_s2 = inlined_call_operand.vmem [shape: f32[1,512], index: 2, kind: input, shape index: {}]   ;;  %s1350_s3 = inlined_call_operand.vmem [shape: f32[1,512], index: 3, kind: input, shape index: {}]   ;;  %s1351_s4 = inlined_call_operand.vmem [shape: bf16[16,512], index: 4, kind: output, shape index: {}]  }
   0x1   :  { %s1160_s17 = smov 0   ;;  %s1162_s18 = smov 0  }
   0x2   :  { %s1164_s19 = smov 0  }
   0x3 LB: > { %s29_s20 = sadd.s32 1, %s1125_s18  ;;  %s942_s21 = sadd.s32 4294967295, %s1129_s19   ;;  %s1129_s19 = sphi %s1164_s19, %s14_s19   ;;  %s1125_s18 = sphi %s1162_s18, %s1356_s18   ;;  %s1121_s17 = sphi %s1160_s17, %s1355_s17   ;;  %s1117_s16 = sphi %s1158_s16, %s1354_s16   ;;  %s1113_s15 = sphi %s1156_s15, %s1353_s15  }
   0x4   : > { %p31_p0 = scmp.ge.s32.totalorder %s29_s20, 2  ;;  %p77_p1 = scmp.ne.s32.totalorder %s1117_s16, %s1113_s15 }
   0x5   : > { %p78_p2 = scmp.eq.s32.totalorder %s1129_s19, 0  ;;  %p161_p4 = scmp.eq.s32.totalorder %s942_s21, 1 }
   0x6   : > { %s1358_s20 = smov (%p31_p0, %s29_s20), 0  ;;  %s70_s23 = sadd.s32 1, %s1117_s16 }
   0x7   : > { %p79_p3 = por %p78_p2, %p77_p1  ;;  %s66_s22 = ssub.s32 %s1125_s18, %s1358_s20 }
   0x8   : > { %p68_p5 = scmp.eq.s32.totalorder %s66_s22, 0  ;;  %p1191_p6 = por %p161_p4, %p77_p1 }
   0x9   : > { %p946_p7 = scmp.ge.s32.totalorder %s1129_s19, 2 }
   0xa   : > { %s1196_s25 = scalar_select %p68_p5, %s1117_s16, %s70_s23  }
   0xb   : > { %198 = sbr.rel (%p946_p7) target bundleno = 38 (0x26), region = 20 }
  0x12   : > { %201 = sbr.rel (!%p79_p3) target bundleno = 38 (0x26), region = 24  ;;  %s203_s26 = sand.u32 (%p79_p3), 1, %s1117_s16  }
  0x13   : > { %s996_s27 = sshll.u32 (%p79_p3), %s1125_s18, 3  ;;  %s947_s28 = sshll.u32 (%p79_p3), %s203_s26, 8 }
  0x14   : > { %s1204_s5 = scalar_lea.vmem (%p79_p3), %s1348_s1, %s996_s27  ;;  %s1209_s6 = scalar_lea.vmem (%p79_p3), [#allocation3], %s947_s28 }
  0x15   : > { %v301_v0 = vld [vmem:[%s1204_s5] sm:$0xff] (%p79_p3)  ;;  %v303_v1 = vld [vmem:[%s1204_s5 + $0x10] sm:$0xff] (%p79_p3) }
  0x16   : > { %v305_v2 = vld [vmem:[%s1204_s5 + $0x20] sm:$0xff] (%p79_p3)  ;;  %302 = vst [vmem:[%s1209_s6] sm:$0xff] (%p79_p3), %v301_v0  ;;  %304 = vst [vmem:[%s1209_s6 + $0x8] sm:$0xff] (%p79_p3), %v303_v1  ;;  %v307_v3 = vld [vmem:[%s1204_s5 + $0x30] sm:$0xff] (%p79_p3) }
  0x17   : > { %306 = vst [vmem:[%s1209_s6 + $0x10] sm:$0xff] (%p79_p3), %v305_v2  ;;  %v309_v4 = vld [vmem:[%s1204_s5 + $0x40] sm:$0xff] (%p79_p3)  ;;  %v311_v5 = vld [vmem:[%s1204_s5 + $0x50] sm:$0xff] (%p79_p3)  ;;  %308 = vst [vmem:[%s1209_s6 + $0x18] sm:$0xff] (%p79_p3), %v307_v3 }
  0x18   : > { %310 = vst [vmem:[%s1209_s6 + $0x20] sm:$0xff] (%p79_p3), %v309_v4  ;;  %312 = vst [vmem:[%s1209_s6 + $0x28] sm:$0xff] (%p79_p3), %v311_v5  ;;  %v313_v6 = vld [vmem:[%s1204_s5 + $0x60] sm:$0xff] (%p79_p3)  ;;  %v315_v7 = vld [vmem:[%s1204_s5 + $0x70] sm:$0xff] (%p79_p3) }
  0x19   : > { %v317_v8 = vld [vmem:[%s1204_s5 + $0x80] sm:$0xff]  ;;  %314 = vst [vmem:[%s1209_s6 + $0x30] sm:$0xff] %v313_v6  ;;  %316 = vst [vmem:[%s1209_s6 + $0x38] sm:$0xff] %v315_v7  ;;  %v319_v9 = vld [vmem:[%s1204_s5 + $0x90] sm:$0xff] }
  0x1a   : > { %318 = vst [vmem:[%s1209_s6 + $0x40] sm:$0xff] %v317_v8  ;;  %v321_v10 = vld [vmem:[%s1204_s5 + $0xa0] sm:$0xff]  ;;  %v323_v11 = vld [vmem:[%s1204_s5 + $0xb0] sm:$0xff]  ;;  %320 = vst [vmem:[%s1209_s6 + $0x48] sm:$0xff] %v319_v9 }
  0x1b   : > { %322 = vst [vmem:[%s1209_s6 + $0x50] sm:$0xff] %v321_v10  ;;  %324 = vst [vmem:[%s1209_s6 + $0x58] sm:$0xff] %v323_v11  ;;  %v325_v12 = vld [vmem:[%s1204_s5 + $0xc0] sm:$0xff]  ;;  %v327_v13 = vld [vmem:[%s1204_s5 + $0xd0] sm:$0xff] }
  0x1c   : > { %v329_v14 = vld [vmem:[%s1204_s5 + $0xe0] sm:$0xff]  ;;  %326 = vst [vmem:[%s1209_s6 + $0x60] sm:$0xff] %v325_v12  ;;  %328 = vst [vmem:[%s1209_s6 + $0x68] sm:$0xff] %v327_v13  ;;  %v331_v15 = vld [vmem:[%s1204_s5 + $0xf0] sm:$0xff] }
  0x1d   : > { %330 = vst [vmem:[%s1209_s6 + $0x70] sm:$0xff] %v329_v14  ;;  %v333_v16 = vld [vmem:[%s1204_s5 + $0x100] sm:$0xff]  ;;  %v335_v17 = vld [vmem:[%s1204_s5 + $0x110] sm:$0xff]  ;;  %332 = vst [vmem:[%s1209_s6 + $0x78] sm:$0xff] %v331_v15 }
  0x1e   : > { %334 = vst [vmem:[%s1209_s6 + $0x80] sm:$0xff] %v333_v16  ;;  %336 = vst [vmem:[%s1209_s6 + $0x88] sm:$0xff] %v335_v17  ;;  %v337_v18 = vld [vmem:[%s1204_s5 + $0x120] sm:$0xff]  ;;  %v339_v19 = vld [vmem:[%s1204_s5 + $0x130] sm:$0xff] }
  0x1f   : > { %v341_v20 = vld [vmem:[%s1204_s5 + $0x140] sm:$0xff]  ;;  %338 = vst [vmem:[%s1209_s6 + $0x90] sm:$0xff] %v337_v18  ;;  %340 = vst [vmem:[%s1209_s6 + $0x98] sm:$0xff] %v339_v19  ;;  %v343_v21 = vld [vmem:[%s1204_s5 + $0x150] sm:$0xff] }
  0x20   : > { %342 = vst [vmem:[%s1209_s6 + $0xa0] sm:$0xff] %v341_v20  ;;  %v345_v22 = vld [vmem:[%s1204_s5 + $0x160] sm:$0xff]  ;;  %v347_v23 = vld [vmem:[%s1204_s5 + $0x170] sm:$0xff]  ;;  %344 = vst [vmem:[%s1209_s6 + $0xa8] sm:$0xff] %v343_v21 }
  0x21   : > { %346 = vst [vmem:[%s1209_s6 + $0xb0] sm:$0xff] %v345_v22  ;;  %348 = vst [vmem:[%s1209_s6 + $0xb8] sm:$0xff] %v347_v23  ;;  %v349_v24 = vld [vmem:[%s1204_s5 + $0x180] sm:$0xff]  ;;  %v351_v25 = vld [vmem:[%s1204_s5 + $0x190] sm:$0xff] }
  0x22   : > { %v353_v26 = vld [vmem:[%s1204_s5 + $0x1a0] sm:$0xff]  ;;  %350 = vst [vmem:[%s1209_s6 + $0xc0] sm:$0xff] %v349_v24  ;;  %352 = vst [vmem:[%s1209_s6 + $0xc8] sm:$0xff] %v351_v25  ;;  %v355_v27 = vld [vmem:[%s1204_s5 + $0x1b0] sm:$0xff] }
  0x23   : > { %354 = vst [vmem:[%s1209_s6 + $0xd0] sm:$0xff] %v353_v26  ;;  %v357_v28 = vld [vmem:[%s1204_s5 + $0x1c0] sm:$0xff]  ;;  %v359_v29 = vld [vmem:[%s1204_s5 + $0x1d0] sm:$0xff]  ;;  %356 = vst [vmem:[%s1209_s6 + $0xd8] sm:$0xff] %v355_v27 }
  0x24   : > { %358 = vst [vmem:[%s1209_s6 + $0xe0] sm:$0xff] %v357_v28  ;;  %360 = vst [vmem:[%s1209_s6 + $0xe8] sm:$0xff] %v359_v29  ;;  %v361_v30 = vld [vmem:[%s1204_s5 + $0x1e0] sm:$0xff]  ;;  %v363_v31 = vld [vmem:[%s1204_s5 + $0x1f0] sm:$0xff] }
  0x25   : > { %362 = vst [vmem:[%s1209_s6 + $0xf0] sm:$0xff] %v361_v30  ;;  %364 = vst [vmem:[%s1209_s6 + $0xf8] sm:$0xff] %v363_v31 }
  0x26 PF: > { %p950_p8 = scmp.ge.s32.totalorder %s1129_s19, 1  ;;  %p385_p9 = scmp.lt.s32.totalorder %s1129_s19, 3 }
  0x28   : > { %p386_p10 = pnand %p950_p8, %p385_p9 }
  0x29   : > { %s392_s7 = sand.u32 (!%p386_p10), 1, %s1113_s15   ;;  %v1090_v32 = vld [vmem:[%s1347_s0 + $0x4] ss:$8 sps:$4 sm:$0xff] (!%p386_p10)   ;;  %v1088_v1 = vld [vmem:[%s1347_s0] ss:$8 sps:$4 sm:$0xff] (!%p386_p10)   ;;  %s953_s14 = sshll.u32 (!%p386_p10), %s1121_s17, 1  ;;  %v736_v2 = vlaneseq (!%p386_p10) }
  0x2a   : > { %389 = sbr.rel (%p386_p10) target bundleno = 339 (0x153), region = 70  ;;  %s951_s8 = sshll.u32 (!%p386_p10), %s392_s7, 8  ;;  %708 = vmatprep.mubr.bf16.mxu0 (!%p386_p10), %v1090_v32 }
  0x2b   : > { %s1280_s11 = scalar_lea.vmem (!%p386_p10), [#allocation3], %s951_s8  ;;  %p449_p11 = scmp.lt.s32.totalorder (!%p386_p10), %s953_s14, 3  ;;  %v737_v3 = vshrl.u32 (!%p386_p10), %v736_v2, 7 }
  0x2c   : > { %v1040_v33 = vld [vmem:[%s1280_s11 + $0x4] ss:$8 sps:$4 sm:$0xff] (!%p386_p10)   ;;  %v1042_v34 = vld [vmem:[%s1280_s11] ss:$8 sps:$4 sm:$0xff] (!%p386_p10)   ;;  %v1043_v35 = vld [vmem:[%s1280_s11 + $0x14] ss:$8 sps:$4 sm:$0xff] (!%p386_p10)  }
  0x2d   : > { %676 = vmatprep.subr.bf16.mxu0 (!%p386_p10), %v1040_v33  ;;  %v1045_v36 = vld [vmem:[%s1280_s11 + $0x10] ss:$8 sps:$4 sm:$0xff] (!%p386_p10)   ;;  %v1046_v37 = vld [vmem:[%s1280_s11 + $0x24] ss:$8 sps:$4 sm:$0xff] (!%p386_p10)   ;;  %v1048_v38 = vld [vmem:[%s1280_s11 + $0x20] ss:$8 sps:$4 sm:$0xff] (!%p386_p10)  }
  0x2e   : > { %677 = vmatpush1.bf16.msra.mxu0 (!%p386_p10), %v1042_v34  ;;  %v1049_v39 = vld [vmem:[%s1280_s11 + $0x34] ss:$8 sps:$4 sm:$0xff] (!%p386_p10)   ;;  %v1051_v40 = vld [vmem:[%s1280_s11 + $0x30] ss:$8 sps:$4 sm:$0xff] (!%p386_p10)   ;;  %v1052_v41 = vld [vmem:[%s1280_s11 + $0x44] ss:$8 sps:$4 sm:$0xff] (!%p386_p10)  }
  0x2f   : > { %678 = vmatprep.subr.bf16.mxu0 (!%p386_p10), %v1043_v35  ;;  %v1054_v42 = vld [vmem:[%s1280_s11 + $0x40] ss:$8 sps:$4 sm:$0xff] (!%p386_p10)   ;;  %v1055_v43 = vld [vmem:[%s1280_s11 + $0x54] ss:$8 sps:$4 sm:$0xff] (!%p386_p10)   ;;  %v1057_v44 = vld [vmem:[%s1280_s11 + $0x50] ss:$8 sps:$4 sm:$0xff] (!%p386_p10)  }
  0x30   : > { %v1058_v45 = vld [vmem:[%s1280_s11 + $0x64] ss:$8 sps:$4 sm:$0xff] (!%p386_p10)   ;;  %v1060_v46 = vld [vmem:[%s1280_s11 + $0x60] ss:$8 sps:$4 sm:$0xff] (!%p386_p10)   ;;  %v1061_v47 = vld [vmem:[%s1280_s11 + $0x74] ss:$8 sps:$4 sm:$0xff] (!%p386_p10)  }
  0x31   : > { %v1063_v48 = vld [vmem:[%s1280_s11 + $0x70] ss:$8 sps:$4 sm:$0xff]   ;;  %v1064_v49 = vld [vmem:[%s1280_s11 + $0x84] ss:$8 sps:$4 sm:$0xff]   ;;  %v1066_v50 = vld [vmem:[%s1280_s11 + $0x80] ss:$8 sps:$4 sm:$0xff]  }
  0x32   : > { %679 = vmatpush1.bf16.msra.mxu0 %v1045_v36  ;;  %v1067_v51 = vld [vmem:[%s1280_s11 + $0x94] ss:$8 sps:$4 sm:$0xff]   ;;  %v1069_v52 = vld [vmem:[%s1280_s11 + $0x90] ss:$8 sps:$4 sm:$0xff]   ;;  %v1070_v53 = vld [vmem:[%s1280_s11 + $0xa4] ss:$8 sps:$4 sm:$0xff]  }
  0x33   : > { %680 = vmatprep.subr.bf16.mxu0 %v1046_v37  ;;  %v1072_v54 = vld [vmem:[%s1280_s11 + $0xa0] ss:$8 sps:$4 sm:$0xff]   ;;  %v1073_v55 = vld [vmem:[%s1280_s11 + $0xb4] ss:$8 sps:$4 sm:$0xff]   ;;  %v1075_v56 = vld [vmem:[%s1280_s11 + $0xb0] ss:$8 sps:$4 sm:$0xff]  }
  0x34   : > { %v1076_v57 = vld [vmem:[%s1280_s11 + $0xc4] ss:$8 sps:$4 sm:$0xff]   ;;  %v1078_v58 = vld [vmem:[%s1280_s11 + $0xc0] ss:$8 sps:$4 sm:$0xff]   ;;  %v1079_v59 = vld [vmem:[%s1280_s11 + $0xd4] ss:$8 sps:$4 sm:$0xff]  }
  0x35   : > { %v1081_v60 = vld [vmem:[%s1280_s11 + $0xd0] ss:$8 sps:$4 sm:$0xff]   ;;  %v1082_v61 = vld [vmem:[%s1280_s11 + $0xe4] ss:$8 sps:$4 sm:$0xff]   ;;  %v1084_v62 = vld [vmem:[%s1280_s11 + $0xe0] ss:$8 sps:$4 sm:$0xff]  }
  0x36   : > { %681 = vmatpush1.bf16.msra.mxu0 %v1048_v38  ;;  %v1085_v63 = vld [vmem:[%s1280_s11 + $0xf4] ss:$8 sps:$4 sm:$0xff]   ;;  %v1087_v0 = vld [vmem:[%s1280_s11 + $0xf0] ss:$8 sps:$4 sm:$0xff]   ;;  %s1360_s14 = smov (!%p449_p11, %s953_s14), 3  ;;  %v738_v4 = vsub.s32 0, %v737_v3 }
  0x37   : > { %682 = vmatprep.subr.bf16.mxu0 %v1049_v39  ;;  %s451_s23 = scalar_lea.vmem %s1349_s2, %s1360_s14  ;;  %s456_s28 = scalar_lea.vmem %s1350_s3, %s1360_s14  ;;  %v742_v6 = vsub.s32 1, %v737_v3 }
  0x38   : > { %v734_v5 = vld [vmem:[%s451_s23] sm:$0x3]  ;;  %s952_s29 = sshll.u32 %s392_s7, 4  ;;  %s999_s15 = sshll.u32 (%p1191_p6), %s1121_s17, 3 }
  0x39   : > { %v750_v7 = vld [vmem:[%s456_s28] sm:$0x3]  ;;  %v739_v8 = vrot.slane %v734_v5, %v738_v4  ;;  %v743_v9 = vrot.slane %v734_v5, %v742_v6  ;;  %s433_s30 = scalar_lea.vmem [#allocation4], %s952_s29  ;;  %s792_s7 = scalar_lea.vmem (%p1191_p6), %s1351_s4, %s999_s15 }
  0x3a   : > { %683 = vmatpush1.bf16.msra.mxu0 %v1051_v40  ;;  %v755_v10 = vrot.slane %v750_v7, %v738_v4  ;;  %v759_v12 = vrot.slane %v750_v7, %v742_v6 }
  0x3b   : > { %684 = vmatprep.subr.bf16.mxu0 %v1052_v41 }
  0x3e   : > { %685 = vmatpush1.bf16.msra.mxu0 %v1054_v42 }
  0x3f   : > { %686 = vmatprep.subr.bf16.mxu0 %v1055_v43 }
  0x42   : > { %687 = vmatpush1.bf16.msra.mxu0 %v1057_v44 }
  0x43   : > { %688 = vmatprep.subr.bf16.mxu0 %v1058_v45 }
  0x46   : > { %689 = vmatpush1.bf16.msra.mxu0 %v1060_v46 }
  0x47   : > { %690 = vmatprep.subr.bf16.mxu0 %v1061_v47 }
  0x4a   : > { %691 = vmatpush1.bf16.msra.mxu0 %v1063_v48 }
  0x4b   : > { %692 = vmatprep.subr.bf16.mxu0 %v1064_v49 }
  0x4e   : > { %693 = vmatpush1.bf16.msra.mxu0 %v1066_v50 }
  0x4f   : > { %694 = vmatprep.subr.bf16.mxu0 %v1067_v51 }
  0x52   : > { %695 = vmatpush1.bf16.msra.mxu0 %v1069_v52 }
  0x53   : > { %696 = vmatprep.subr.bf16.mxu0 %v1070_v53 }
  0x56   : > { %697 = vmatpush1.bf16.msra.mxu0 %v1072_v54 }
  0x57   : > { %698 = vmatprep.subr.bf16.mxu0 %v1073_v55 }
  0x5a   : > { %699 = vmatpush1.bf16.msra.mxu0 %v1075_v56 }
  0x5b   : > { %700 = vmatprep.subr.bf16.mxu0 %v1076_v57 }
  0x5e   : > { %701 = vmatpush1.bf16.msra.mxu0 %v1078_v58 }
  0x5f   : > { %702 = vmatprep.subr.bf16.mxu0 %v1079_v59 }
  0x62   : > { %703 = vmatpush1.bf16.msra.mxu0 %v1081_v60 }
  0x63   : > { %704 = vmatprep.subr.bf16.mxu0 %v1082_v61 }
  0x66   : > { %705 = vmatpush1.bf16.msra.mxu0 %v1084_v62 }
  0x67   : > { %706 = vmatprep.subr.bf16.mxu0 %v1085_v63 }
  0x6a   : > { %707 = vmatpush1.bf16.msra.mxu0 %v1087_v0 }
  0x6d   : > { %709 = vmatmul.mubr.bf16.vlgmr.msra.gmra.mrb[0].mxu0 %v1088_v1 }
 0x140   : > { %v710_v11 = vpop.f32.mrb[0].mxu0 }
 0x141   : > { %v746_v13 = vmul.f32 %v739_v8, %v710_v11  ;;  %v712_v14 = vpop.f32.mrb[1].mxu0 }
 0x142   : > { %v747_v15 = vmul.f32 %v743_v9, %v712_v14  ;;  %v714_v16 = vpop.f32.mrb[2].mxu0 }
 0x143   : > { %v762_v17 = vadd.f32 %v755_v10, %v746_v13  ;;  %v748_v18 = vmul.f32 %v739_v8, %v714_v16  ;;  %v716_v19 = vpop.f32.mrb[3].mxu0 }
 0x144   : > { %v763_v20 = vadd.f32 %v759_v12, %v747_v15  ;;  %v749_v21 = vmul.f32 %v743_v9, %v716_v19  ;;  %786 = sbr.rel (!%p1191_p6) target bundleno = 339 (0x153), region = 86 }
 0x145   : > { %v764_v22 = vadd.f32 %v755_v10, %v748_v18 }
 0x146   : > { %v997_v23 = vpack.c.bf16 %v763_v20, %v762_v17  ;;  %v765_v24 = vadd.f32 %v759_v12, %v749_v21 }
 0x148   : > { %778 = vst [vmem:[%s433_s30] sm:$0xff] %v997_v23  ;;  %v998_v25 = vpack.c.bf16 %v765_v24, %v764_v22 }
 0x14a   : > { %779 = vst [vmem:[%s433_s30 + $0x8] sm:$0xff] %v998_v25 }
 0x14f   : > { %v822_v26 = vld [vmem:[%s433_s30] sm:$0xff] }
 0x150   : > { %823 = vst [vmem:[%s792_s7] sm:$0xff] %v822_v26 }
 0x151   : > { %v824_v27 = vld [vmem:[%s433_s30 + $0x8] sm:$0xff] }
 0x152   : > { %825 = vst [vmem:[%s792_s7 + $0x10] sm:$0xff] %v824_v27 }
 0x153 PF: > { %s14_s19 = sadd.s32 1, %s1129_s19   ;;  %s1353_s15 = smov %s1117_s16 }
 0x154   : > { %p11_p12 = scmp.ge.s32.totalorder %s14_s19, 4   ;;  %s1354_s16 = smov %s1196_s25 }
 0x155   : > { %s1355_s17 = smov %s1125_s18  ;;  %s1356_s18 = smov %s1358_s20 }
 0x156   :  { %13 = sbr.rel (!%p11_p12) target bundleno = 3 (0x3), region = 164 }

// kernel: mnist_resnet_forward.40
= control target key start
LH: loop header
LB: loop body
LE: loop exit
PB: predicated region body
PF: predicated region fallthrough
CT: control target
= control target key end

     0   :  { %s2296_s0 = inlined_call_operand.vmem [shape: bf16[16,4608], index: 0, kind: input, shape index: {}]   ;;  %s2297_s1 = inlined_call_operand.vmem [shape: bf16[4608,512], index: 1, kind: input, shape index: {}]   ;;  %s2298_s2 = inlined_call_operand.vmem [shape: f32[1,512], index: 2, kind: input, shape index: {}]   ;;  %s2299_s3 = inlined_call_operand.vmem [shape: f32[1,512], index: 3, kind: input, shape index: {}]   ;;  %s2300_s4 = inlined_call_operand.vmem [shape: bf16[16,512], index: 4, kind: input, shape index: {}]   ;;  %s2301_s5 = inlined_call_operand.vmem [shape: bf16[16,512], index: 5, kind: output, shape index: {}]  }
   0x1   :  { %2305 = sst [smem:[#allocation11_spill]] %s2296_s0 }
   0x2   :  { %s1880_s18 = smov 0   ;;  %s1882_s19 = smov 0  }
   0x3   :  { %s1884_s20 = smov 0   ;;  %s1886_s21 = smov 0  }
   0x4   :  { %s1888_s22 = smov 0   ;;  %s1890_s23 = smov 0  }
   0x5   :  { %s1892_s24 = smov 0   ;;  %s1894_s25 = smov 0  }
   0x6   :  { %s1896_s26 = smov 0   ;;  %s1898_s27 = smov 0  }
   0x7   :  { %s1900_s28 = smov 0  }
   0x8 LB: > { %2306 = sst [smem:[#allocation7_spill]] %s1827_s23  ;;  %s1461_s29 = sadd.s32 4294967295, %s1847_s28   ;;  %s1847_s28 = sphi %s1900_s28, %s15_s28   ;;  %s1843_s27 = sphi %s1898_s27, %s2326_s27   ;;  %s1839_s26 = sphi %s1896_s26, %s2325_s26   ;;  %s1835_s25 = sphi %s1894_s25, %s2324_s25   ;;  %s1831_s24 = sphi %s1892_s24, %s2323_s24   ;;  %s1827_s23 = sphi %s1890_s23, %s2316_s23   ;;  %s1823_s22 = sphi %s1888_s22, %s2315_s22   ;;  %s1819_s21 = sphi %s1886_s21, %s2322_s21   ;;  %s1815_s20 = sphi %s1884_s20, %s2321_s20   ;;  %s1811_s19 = sphi %s1882_s19, %s2320_s19   ;;  %s1807_s18 = sphi %s1880_s18, %s2319_s18  }
   0x9   : > { %s27_s30 = sadd.s32 1, %s1839_s26  ;;  %s30_s6 = sadd.s32 1, %s1843_s27 }
   0xa   : > { %p28_p0 = scmp.ge.s32.totalorder %s27_s30, 9  ;;  %s43_s7 = sadd.s32 1, %s1827_s23 }
   0xb   : > { %p50_p1 = scmp.ne.s32.totalorder %s1827_s23, %s1823_s22  ;;  %p51_p2 = scmp.eq.s32.totalorder %s1847_s28, 0 }
   0xc   : > { %s2328_s30 = smov (%p28_p0, %s27_s30), 0  ;;  %s2330_s6 = smov (!%p28_p0, %s30_s6), %s1843_s27 }
   0xd   : > { %2307 = sst [smem:[#allocation8_spill]] %s2328_s30  ;;  %s39_s8 = ssub.s32 %s1839_s26, %s2328_s30 }
   0xe   : > { %p32_p3 = scmp.ge.s32.totalorder %s2330_s6, 2  ;;  %p41_p4 = scmp.eq.s32.totalorder %s39_s8, 0 }
   0xf   : > { %p1949_p5 = por %p51_p2, %p50_p1  ;;  %s71_s10 = sadd.s32 1, %s1819_s21 }
  0x10   : > { %s2332_s6 = smov (%p32_p3, %s2330_s6), 0  ;;  %p78_p6 = scmp.ne.s32.totalorder %s1819_s21, %s1815_s20 }
  0x11   : > { %2309 = sst [smem:[#allocation9_spill]] %s2332_s6  ;;  %s67_s12 = ssub.s32 %s1843_s27, %s2332_s6 }
  0x12   : > { %s1957_s11 = scalar_select %p41_p4, %s1827_s23, %s43_s7  }
  0x13   : > { %s68_s13 = sor.u32 %s67_s12, %s39_s8  ;;  %p149_p7 = scmp.eq.s32.totalorder %s67_s12, 0 }
  0x14   : > { %2310 = sst [smem:[#allocation10_spill]] %s1957_s11  ;;  %p69_p8 = scmp.eq.s32.totalorder %s68_s13, 0 }
  0x15   : > { %p1965_p9 = por %p78_p6, %p51_p2  ;;  %s151_s15 = sadd.s32 1, %s1811_s19 }
  0x16   : > { %p158_p10 = scmp.ne.s32.totalorder %s1811_s19, %s1807_s18  ;;  %p190_p12 = scmp.eq.s32.totalorder %s1461_s29, 17 }
  0x17   : > { %s1973_s16 = scalar_select %p69_p8, %s1819_s21, %s71_s10  }
  0x18   : > { %s1976_s17 = scalar_select %p149_p7, %s1811_s19, %s151_s15  }
  0x19   : > { %p1980_p11 = por %p158_p10, %p51_p2  ;;  %p1984_p13 = por %p190_p12, %p158_p10 }
  0x1a   : > { %p1464_p0 = scmp.ge.s32.totalorder %s1847_s28, 18 }
  0x1c   : > { %212 = sbr.rel (%p1464_p0) target bundleno = 93 (0x5d), region = 16 }
  0x23   : > { %215 = sbr.rel (!%p1949_p5) target bundleno = 47 (0x2f), region = 20  ;;  %s217_s10 = sand.u32 (%p1949_p5), 1, %s1827_s23  }
  0x24   : > { %s1560_s12 = sshll.u32 (%p1949_p5), %s1839_s26, 4  ;;  %s1465_s13 = sshll.u32 (%p1949_p5), %s217_s10, 5 }
  0x25   : > { %s2314_s0 = sld [smem:[#allocation11_spill]] (%p1949_p5)  ;;  %s219_s29 = scalar_lea.vmem (%p1949_p5), [#allocation3], %s1465_s13 }
  0x2b   : > { %s225_s30 = scalar_lea.vmem %s2314_s0, %s1560_s12 }
  0x2c   : > { %v238_v0 = vld [vmem:[%s225_s30] sm:$0xff]  ;;  %v240_v1 = vld [vmem:[%s225_s30 + $0x8] sm:$0xff]  ;;  %v242_v2 = vld [vmem:[%s225_s30 + $0x90] sm:$0xff] }
  0x2d   : > { %239 = vst [vmem:[%s219_s29] sm:$0xff] %v238_v0  ;;  %241 = vst [vmem:[%s219_s29 + $0x8] sm:$0xff] %v240_v1  ;;  %v244_v3 = vld [vmem:[%s225_s30 + $0x98] sm:$0xff] }
  0x2e   : > { %243 = vst [vmem:[%s219_s29 + $0x10] sm:$0xff] %v242_v2  ;;  %245 = vst [vmem:[%s219_s29 + $0x18] sm:$0xff] %v244_v3 }
  0x2f PF: > { %251 = sbr.rel (!%p1965_p9) target bundleno = 86 (0x56), region = 43  ;;  %s253_s9 = sand.u32 (%p1965_p9), 1, %s1819_s21  }
  0x30   : > { %s1470_s10 = sshll.u32 (%p1965_p9), %s1843_s27, 1  ;;  %s1468_s6 = sshll.u32 (%p1965_p9), %s253_s9, 9 }
  0x31   : > { %s1561_s12 = sshll.u32 (%p1965_p9), %s1839_s26, 8  ;;  %s2009_s30 = scalar_lea.vmem (%p1965_p9), [#allocation4], %s1468_s6 }
  0x32   : > { %s259_s15 = sadd.s32 (%p1965_p9), %s1561_s12, %s1470_s10 }
  0x33   : > { %s1472_s0 = sshll.u32 (%p1965_p9), %s259_s15, 2 }
  0x34   : > { %s2004_s23 = scalar_lea.vmem (%p1965_p9), %s2297_s1, %s1472_s0 }
  0x35   : > { %v415_v4 = vld [vmem:[%s2004_s23] sm:$0xff] (%p1965_p9)  ;;  %v417_v5 = vld [vmem:[%s2004_s23 + $0x10] sm:$0xff] (%p1965_p9) }
  0x36   : > { %v419_v6 = vld [vmem:[%s2004_s23 + $0x20] sm:$0xff]  ;;  %416 = vst [vmem:[%s2009_s30] sm:$0xff] %v415_v4  ;;  %418 = vst [vmem:[%s2009_s30 + $0x8] sm:$0xff] %v417_v5  ;;  %v421_v7 = vld [vmem:[%s2004_s23 + $0x30] sm:$0xff] }
  0x37   : > { %420 = vst [vmem:[%s2009_s30 + $0x10] sm:$0xff] %v419_v6  ;;  %v423_v8 = vld [vmem:[%s2004_s23 + $0x40] sm:$0xff]  ;;  %v425_v9 = vld [vmem:[%s2004_s23 + $0x50] sm:$0xff]  ;;  %422 = vst [vmem:[%s2009_s30 + $0x18] sm:$0xff] %v421_v7 }
  0x38   : > { %424 = vst [vmem:[%s2009_s30 + $0x20] sm:$0xff] %v423_v8  ;;  %426 = vst [vmem:[%s2009_s30 + $0x28] sm:$0xff] %v425_v9  ;;  %v427_v10 = vld [vmem:[%s2004_s23 + $0x60] sm:$0xff]  ;;  %v429_v11 = vld [vmem:[%s2004_s23 + $0x70] sm:$0xff] }
  0x39   : > { %v431_v12 = vld [vmem:[%s2004_s23 + $0x80] sm:$0xff]  ;;  %428 = vst [vmem:[%s2009_s30 + $0x30] sm:$0xff] %v427_v10  ;;  %430 = vst [vmem:[%s2009_s30 + $0x38] sm:$0xff] %v429_v11  ;;  %v433_v13 = vld [vmem:[%s2004_s23 + $0x90] sm:$0xff] }
  0x3a   : > { %432 = vst [vmem:[%s2009_s30 + $0x40] sm:$0xff] %v431_v12  ;;  %v435_v14 = vld [vmem:[%s2004_s23 + $0xa0] sm:$0xff]  ;;  %v437_v15 = vld [vmem:[%s2004_s23 + $0xb0] sm:$0xff]  ;;  %434 = vst [vmem:[%s2009_s30 + $0x48] sm:$0xff] %v433_v13 }
  0x3b   : > { %436 = vst [vmem:[%s2009_s30 + $0x50] sm:$0xff] %v435_v14  ;;  %438 = vst [vmem:[%s2009_s30 + $0x58] sm:$0xff] %v437_v15  ;;  %v439_v16 = vld [vmem:[%s2004_s23 + $0xc0] sm:$0xff]  ;;  %v441_v17 = vld [vmem:[%s2004_s23 + $0xd0] sm:$0xff] }
  0x3c   : > { %v443_v18 = vld [vmem:[%s2004_s23 + $0xe0] sm:$0xff]  ;;  %440 = vst [vmem:[%s2009_s30 + $0x60] sm:$0xff] %v439_v16  ;;  %442 = vst [vmem:[%s2009_s30 + $0x68] sm:$0xff] %v441_v17  ;;  %v445_v19 = vld [vmem:[%s2004_s23 + $0xf0] sm:$0xff] }
  0x3d   : > { %444 = vst [vmem:[%s2009_s30 + $0x70] sm:$0xff] %v443_v18  ;;  %v447_v20 = vld [vmem:[%s2004_s23 + $0x100] sm:$0xff]  ;;  %v449_v21 = vld [vmem:[%s2004_s23 + $0x110] sm:$0xff]  ;;  %446 = vst [vmem:[%s2009_s30 + $0x78] sm:$0xff] %v445_v19 }
  0x3e   : > { %448 = vst [vmem:[%s2009_s30 + $0x80] sm:$0xff] %v447_v20  ;;  %450 = vst [vmem:[%s2009_s30 + $0x88] sm:$0xff] %v449_v21  ;;  %v451_v22 = vld [vmem:[%s2004_s23 + $0x120] sm:$0xff]  ;;  %v453_v23 = vld [vmem:[%s2004_s23 + $0x130] sm:$0xff] }
  0x3f   : > { %v455_v24 = vld [vmem:[%s2004_s23 + $0x140] sm:$0xff]  ;;  %452 = vst [vmem:[%s2009_s30 + $0x90] sm:$0xff] %v451_v22  ;;  %454 = vst [vmem:[%s2009_s30 + $0x98] sm:$0xff] %v453_v23  ;;  %v457_v25 = vld [vmem:[%s2004_s23 + $0x150] sm:$0xff] }
  0x40   : > { %456 = vst [vmem:[%s2009_s30 + $0xa0] sm:$0xff] %v455_v24  ;;  %v459_v26 = vld [vmem:[%s2004_s23 + $0x160] sm:$0xff]  ;;  %v461_v27 = vld [vmem:[%s2004_s23 + $0x170] sm:$0xff]  ;;  %458 = vst [vmem:[%s2009_s30 + $0xa8] sm:$0xff] %v457_v25 }
  0x41   : > { %460 = vst [vmem:[%s2009_s30 + $0xb0] sm:$0xff] %v459_v26  ;;  %462 = vst [vmem:[%s2009_s30 + $0xb8] sm:$0xff] %v461_v27  ;;  %v463_v28 = vld [vmem:[%s2004_s23 + $0x180] sm:$0xff]  ;;  %v465_v29 = vld [vmem:[%s2004_s23 + $0x190] sm:$0xff] }
  0x42   : > { %v467_v30 = vld [vmem:[%s2004_s23 + $0x1a0] sm:$0xff]  ;;  %464 = vst [vmem:[%s2009_s30 + $0xc0] sm:$0xff] %v463_v28  ;;  %466 = vst [vmem:[%s2009_s30 + $0xc8] sm:$0xff] %v465_v29  ;;  %v469_v31 = vld [vmem:[%s2004_s23 + $0x1b0] sm:$0xff] }
  0x43   : > { %468 = vst [vmem:[%s2009_s30 + $0xd0] sm:$0xff] %v467_v30  ;;  %v471_v32 = vld [vmem:[%s2004_s23 + $0x1c0] sm:$0xff]  ;;  %v473_v33 = vld [vmem:[%s2004_s23 + $0x1d0] sm:$0xff]  ;;  %470 = vst [vmem:[%s2009_s30 + $0xd8] sm:$0xff] %v469_v31 }
  0x44   : > { %472 = vst [vmem:[%s2009_s30 + $0xe0] sm:$0xff] %v471_v32  ;;  %474 = vst [vmem:[%s2009_s30 + $0xe8] sm:$0xff] %v473_v33  ;;  %v475_v34 = vld [vmem:[%s2004_s23 + $0x1e0] sm:$0xff]  ;;  %v477_v35 = vld [vmem:[%s2004_s23 + $0x1f0] sm:$0xff] }
  0x45   : > { %v479_v36 = vld [vmem:[%s2004_s23 + $0x200] sm:$0xff]  ;;  %476 = vst [vmem:[%s2009_s30 + $0xf0] sm:$0xff] %v475_v34  ;;  %478 = vst [vmem:[%s2009_s30 + $0xf8] sm:$0xff] %v477_v35  ;;  %v481_v37 = vld [vmem:[%s2004_s23 + $0x210] sm:$0xff] }
  0x46   : > { %480 = vst [vmem:[%s2009_s30 + $0x100] sm:$0xff] %v479_v36  ;;  %v483_v38 = vld [vmem:[%s2004_s23 + $0x220] sm:$0xff]  ;;  %v485_v39 = vld [vmem:[%s2004_s23 + $0x230] sm:$0xff]  ;;  %482 = vst [vmem:[%s2009_s30 + $0x108] sm:$0xff] %v481_v37 }
  0x47   : > { %484 = vst [vmem:[%s2009_s30 + $0x110] sm:$0xff] %v483_v38  ;;  %486 = vst [vmem:[%s2009_s30 + $0x118] sm:$0xff] %v485_v39  ;;  %v487_v40 = vld [vmem:[%s2004_s23 + $0x240] sm:$0xff]  ;;  %v489_v41 = vld [vmem:[%s2004_s23 + $0x250] sm:$0xff] }
  0x48   : > { %v491_v42 = vld [vmem:[%s2004_s23 + $0x260] sm:$0xff]  ;;  %488 = vst [vmem:[%s2009_s30 + $0x120] sm:$0xff] %v487_v40  ;;  %490 = vst [vmem:[%s2009_s30 + $0x128] sm:$0xff] %v489_v41  ;;  %v493_v43 = vld [vmem:[%s2004_s23 + $0x270] sm:$0xff] }
  0x49   : > { %492 = vst [vmem:[%s2009_s30 + $0x130] sm:$0xff] %v491_v42  ;;  %v495_v44 = vld [vmem:[%s2004_s23 + $0x280] sm:$0xff]  ;;  %v497_v45 = vld [vmem:[%s2004_s23 + $0x290] sm:$0xff]  ;;  %494 = vst [vmem:[%s2009_s30 + $0x138] sm:$0xff] %v493_v43 }
  0x4a   : > { %496 = vst [vmem:[%s2009_s30 + $0x140] sm:$0xff] %v495_v44  ;;  %498 = vst [vmem:[%s2009_s30 + $0x148] sm:$0xff] %v497_v45  ;;  %v499_v46 = vld [vmem:[%s2004_s23 + $0x2a0] sm:$0xff]  ;;  %v501_v47 = vld [vmem:[%s2004_s23 + $0x2b0] sm:$0xff] }
  0x4b   : > { %v503_v48 = vld [vmem:[%s2004_s23 + $0x2c0] sm:$0xff]  ;;  %500 = vst [vmem:[%s2009_s30 + $0x150] sm:$0xff] %v499_v46  ;;  %502 = vst [vmem:[%s2009_s30 + $0x158] sm:$0xff] %v501_v47  ;;  %v505_v49 = vld [vmem:[%s2004_s23 + $0x2d0] sm:$0xff] }
  0x4c   : > { %504 = vst [vmem:[%s2009_s30 + $0x160] sm:$0xff] %v503_v48  ;;  %v507_v50 = vld [vmem:[%s2004_s23 + $0x2e0] sm:$0xff]  ;;  %v509_v51 = vld [vmem:[%s2004_s23 + $0x2f0] sm:$0xff]  ;;  %506 = vst [vmem:[%s2009_s30 + $0x168] sm:$0xff] %v505_v49 }
  0x4d   : > { %508 = vst [vmem:[%s2009_s30 + $0x170] sm:$0xff] %v507_v50  ;;  %510 = vst [vmem:[%s2009_s30 + $0x178] sm:$0xff] %v509_v51  ;;  %v511_v52 = vld [vmem:[%s2004_s23 + $0x300] sm:$0xff]  ;;  %v513_v53 = vld [vmem:[%s2004_s23 + $0x310] sm:$0xff] }
  0x4e   : > { %v515_v54 = vld [vmem:[%s2004_s23 + $0x320] sm:$0xff]  ;;  %512 = vst [vmem:[%s2009_s30 + $0x180] sm:$0xff] %v511_v52  ;;  %514 = vst [vmem:[%s2009_s30 + $0x188] sm:$0xff] %v513_v53  ;;  %v517_v55 = vld [vmem:[%s2004_s23 + $0x330] sm:$0xff] }
  0x4f   : > { %516 = vst [vmem:[%s2009_s30 + $0x190] sm:$0xff] %v515_v54  ;;  %v519_v56 = vld [vmem:[%s2004_s23 + $0x340] sm:$0xff]  ;;  %v521_v57 = vld [vmem:[%s2004_s23 + $0x350] sm:$0xff]  ;;  %518 = vst [vmem:[%s2009_s30 + $0x198] sm:$0xff] %v517_v55 }
  0x50   : > { %520 = vst [vmem:[%s2009_s30 + $0x1a0] sm:$0xff] %v519_v56  ;;  %522 = vst [vmem:[%s2009_s30 + $0x1a8] sm:$0xff] %v521_v57  ;;  %v523_v58 = vld [vmem:[%s2004_s23 + $0x360] sm:$0xff]  ;;  %v525_v59 = vld [vmem:[%s2004_s23 + $0x370] sm:$0xff] }
  0x51   : > { %v527_v60 = vld [vmem:[%s2004_s23 + $0x380] sm:$0xff]  ;;  %524 = vst [vmem:[%s2009_s30 + $0x1b0] sm:$0xff] %v523_v58  ;;  %526 = vst [vmem:[%s2009_s30 + $0x1b8] sm:$0xff] %v525_v59  ;;  %v529_v61 = vld [vmem:[%s2004_s23 + $0x390] sm:$0xff] }
  0x52   : > { %528 = vst [vmem:[%s2009_s30 + $0x1c0] sm:$0xff] %v527_v60  ;;  %v531_v62 = vld [vmem:[%s2004_s23 + $0x3a0] sm:$0xff]  ;;  %v533_v63 = vld [vmem:[%s2004_s23 + $0x3b0] sm:$0xff]  ;;  %530 = vst [vmem:[%s2009_s30 + $0x1c8] sm:$0xff] %v529_v61 }
  0x53   : > { %532 = vst [vmem:[%s2009_s30 + $0x1d0] sm:$0xff] %v531_v62  ;;  %534 = vst [vmem:[%s2009_s30 + $0x1d8] sm:$0xff] %v533_v63  ;;  %v535_v0 = vld [vmem:[%s2004_s23 + $0x3c0] sm:$0xff]  ;;  %v537_v1 = vld [vmem:[%s2004_s23 + $0x3d0] sm:$0xff] }
  0x54   : > { %v539_v2 = vld [vmem:[%s2004_s23 + $0x3e0] sm:$0xff]  ;;  %536 = vst [vmem:[%s2009_s30 + $0x1e0] sm:$0xff] %v535_v0  ;;  %538 = vst [vmem:[%s2009_s30 + $0x1e8] sm:$0xff] %v537_v1  ;;  %v541_v3 = vld [vmem:[%s2004_s23 + $0x3f0] sm:$0xff] }
  0x55   : > { %540 = vst [vmem:[%s2009_s30 + $0x1f0] sm:$0xff] %v539_v2  ;;  %542 = vst [vmem:[%s2009_s30 + $0x1f8] sm:$0xff] %v541_v3 }
  0x56 PF: > { %564 = sbr.rel (!%p1980_p11) target bundleno = 93 (0x5d), region = 89  ;;  %s566_s0 = sand.u32 (%p1980_p11), 1, %s1811_s19  }
  0x57   : > { %s1562_s11 = sshll.u32 (%p1980_p11), %s1843_s27, 3  ;;  %s1473_s14 = sshll.u32 (%p1980_p11), %s566_s0, 4 }
  0x58   : > { %s574_s10 = scalar_lea.vmem (%p1980_p11), %s2300_s4, %s1562_s11  ;;  %s568_s6 = scalar_lea.vmem (%p1980_p11), [#allocation5], %s1473_s14 }
  0x59   : > { %v604_v4 = vld [vmem:[%s574_s10] sm:$0xff] (%p1980_p11)  ;;  %v606_v5 = vld [vmem:[%s574_s10 + $0x10] sm:$0xff] (%p1980_p11) }
  0x5a   : > { %605 = vst [vmem:[%s568_s6] sm:$0xff] (%p1980_p11), %v604_v4  ;;  %607 = vst [vmem:[%s568_s6 + $0x8] sm:$0xff] (%p1980_p11), %v606_v5 }
  0x5d PF: > { %p1476_p1 = scmp.ge.s32.totalorder %s1847_s28, 1  ;;  %p612_p2 = scmp.lt.s32.totalorder %s1847_s28, 19 }
  0x5f   : > { %p613_p3 = pnand %p1476_p1, %p612_p2 }
  0x60   : > { %s619_s23 = sand.u32 (!%p613_p3), 1, %s1823_s22   ;;  %s626_s7 = sand.u32 (!%p613_p3), 1, %s1815_s20  }
  0x61   : > { %616 = sbr.rel (%p613_p3) target bundleno = 423 (0x1a7), region = 127  ;;  %s1477_s12 = sshll.u32 (!%p613_p3), %s619_s23, 5 }
  0x62   : > { %s1478_s15 = sshll.u32 (!%p613_p3), %s626_s7, 9  ;;  %s633_s13 = sand.u32 (!%p613_p3), 1, %s1807_s18  }
  0x63   : > { %s1481_s30 = sshll.u32 (!%p613_p3), %s1835_s25, 1  ;;  %s2149_s0 = sshll.u32 (!%p613_p3), %s633_s13, 4 }
  0x64   : > { %p680_p4 = scmp.lt.s32.totalorder (!%p613_p3), %s1481_s30, 3  ;;  %s2161_s10 = scalar_lea.vmem (!%p613_p3), [#allocation3], %s1477_s12 }
  0x65   : > { %s2163_s18 = scalar_lea.vmem (!%p613_p3), [#allocation4], %s1478_s15  ;;  %s635_s6 = scalar_lea.vmem (!%p613_p3), [#allocation5], %s2149_s0 }
  0x66   : > { %s2167_s23 = scalar_lea.vmem (!%p613_p3), [#allocation6], %s2149_s0  ;;  %p1483_p5 = scmp.ne.s32.totalorder (!%p613_p3), %s1831_s24, 0 }
  0x68   : > { %s2334_s30 = smov (!%p680_p4, %s1481_s30), 3  ;;  %696 = sbr.rel (%p1483_p5) target bundleno = 111 (0x6f), region = 143 }
  0x69   : > { %s682_s29 = scalar_lea.vmem %s2298_s2, %s2334_s30  ;;  %s687_s20 = scalar_lea.vmem %s2299_s3, %s2334_s30  ;;  %v1849_v6 = vmov (!%p1483_p5), 0.0  }
  0x6a   : > { %697 = vst [vmem:[#allocation2] sm:$0xff] (!%p1483_p5), %v1849_v6  ;;  %698 = vst [vmem:[#allocation2 + $0x8] sm:$0xff] (!%p1483_p5), %v1849_v6 }
  0x6b   : > { %699 = vst [vmem:[#allocation2 + $0x10] sm:$0xff] (!%p1483_p5), %v1849_v6  ;;  %700 = vst [vmem:[#allocation2 + $0x18] sm:$0xff] (!%p1483_p5), %v1849_v6 }
  0x6f PF: > { %v1659_v7 = vld [vmem:[%s2163_s18 + $0x4] ss:$8 sps:$4 sm:$0xff]   ;;  %v1663_v9 = vld [vmem:[%s2163_s18] ss:$8 sps:$4 sm:$0xff]   ;;  %v1665_v11 = vld [vmem:[%s2163_s18 + $0x14] ss:$8 sps:$4 sm:$0xff]  }
  0x70   : > { %v1661_v8 = vld [vmem:[%s2163_s18 + $0x104] ss:$8 sps:$4 sm:$0xff]   ;;  %1113 = vmatprep.subr.bf16.mxu1 %v1659_v7  ;;  %v1664_v10 = vld [vmem:[%s2163_s18 + $0x100] ss:$8 sps:$4 sm:$0xff]   ;;  %v1667_v12 = vld [vmem:[%s2163_s18 + $0x114] ss:$8 sps:$4 sm:$0xff]  }
  0x71   : > { %1156 = vmatprep.subr.bf16.mxu0 %v1661_v8  ;;  %1114 = vmatpush1.bf16.msra.mxu1 %v1663_v9  ;;  %v1669_v13 = vld [vmem:[%s2163_s18 + $0x10] ss:$8 sps:$4 sm:$0xff]   ;;  %v1671_v15 = vld [vmem:[%s2163_s18 + $0x24] ss:$8 sps:$4 sm:$0xff]   ;;  %v1675_v17 = vld [vmem:[%s2163_s18 + $0x20] ss:$8 sps:$4 sm:$0xff]  }
  0x72   : > { %1157 = vmatpush1.bf16.msra.mxu0 %v1664_v10  ;;  %1115 = vmatprep.subr.bf16.mxu1 %v1665_v11  ;;  %v1670_v14 = vld [vmem:[%s2163_s18 + $0x110] ss:$8 sps:$4 sm:$0xff]   ;;  %v1673_v16 = vld [vmem:[%s2163_s18 + $0x124] ss:$8 sps:$4 sm:$0xff]   ;;  %v1676_v18 = vld [vmem:[%s2163_s18 + $0x120] ss:$8 sps:$4 sm:$0xff]  }
  0x73   : > { %1158 = vmatprep.subr.bf16.mxu0 %v1667_v12  ;;  %v1677_v19 = vld [vmem:[%s2163_s18 + $0x34] ss:$8 sps:$4 sm:$0xff]   ;;  %v1681_v21 = vld [vmem:[%s2163_s18 + $0x30] ss:$8 sps:$4 sm:$0xff]   ;;  %v1683_v23 = vld [vmem:[%s2163_s18 + $0x44] ss:$8 sps:$4 sm:$0xff]  }
  0x74   : > { %v1679_v20 = vld [vmem:[%s2163_s18 + $0x134] ss:$8 sps:$4 sm:$0xff]   ;;  %v1682_v22 = vld [vmem:[%s2163_s18 + $0x130] ss:$8 sps:$4 sm:$0xff]   ;;  %v1685_v24 = vld [vmem:[%s2163_s18 + $0x144] ss:$8 sps:$4 sm:$0xff]  }
  0x75   : > { %1116 = vmatpush1.bf16.msra.mxu1 %v1669_v13  ;;  %v1687_v25 = vld [vmem:[%s2163_s18 + $0x40] ss:$8 sps:$4 sm:$0xff]   ;;  %v1689_v27 = vld [vmem:[%s2163_s18 + $0x54] ss:$8 sps:$4 sm:$0xff]   ;;  %v1693_v29 = vld [vmem:[%s2163_s18 + $0x50] ss:$8 sps:$4 sm:$0xff]  }
  0x76   : > { %1159 = vmatpush1.bf16.msra.mxu0 %v1670_v14  ;;  %1117 = vmatprep.subr.bf16.mxu1 %v1671_v15  ;;  %v1688_v26 = vld [vmem:[%s2163_s18 + $0x140] ss:$8 sps:$4 sm:$0xff]   ;;  %v1691_v28 = vld [vmem:[%s2163_s18 + $0x154] ss:$8 sps:$4 sm:$0xff]   ;;  %v1694_v30 = vld [vmem:[%s2163_s18 + $0x150] ss:$8 sps:$4 sm:$0xff]  }
  0x77   : > { %1160 = vmatprep.subr.bf16.mxu0 %v1673_v16  ;;  %v1695_v31 = vld [vmem:[%s2163_s18 + $0x64] ss:$8 sps:$4 sm:$0xff]   ;;  %v1699_v33 = vld [vmem:[%s2163_s18 + $0x60] ss:$8 sps:$4 sm:$0xff]   ;;  %v1701_v35 = vld [vmem:[%s2163_s18 + $0x74] ss:$8 sps:$4 sm:$0xff]  }
  0x78   : > { %v1697_v32 = vld [vmem:[%s2163_s18 + $0x164] ss:$8 sps:$4 sm:$0xff]   ;;  %v1700_v34 = vld [vmem:[%s2163_s18 + $0x160] ss:$8 sps:$4 sm:$0xff]   ;;  %v1703_v36 = vld [vmem:[%s2163_s18 + $0x174] ss:$8 sps:$4 sm:$0xff]  }
  0x79   : > { %1118 = vmatpush1.bf16.msra.mxu1 %v1675_v17  ;;  %v1705_v37 = vld [vmem:[%s2163_s18 + $0x70] ss:$8 sps:$4 sm:$0xff]   ;;  %v1707_v39 = vld [vmem:[%s2163_s18 + $0x84] ss:$8 sps:$4 sm:$0xff]   ;;  %v1711_v41 = vld [vmem:[%s2163_s18 + $0x80] ss:$8 sps:$4 sm:$0xff]  }
  0x7a   : > { %1161 = vmatpush1.bf16.msra.mxu0 %v1676_v18  ;;  %1119 = vmatprep.subr.bf16.mxu1 %v1677_v19  ;;  %v1706_v38 = vld [vmem:[%s2163_s18 + $0x170] ss:$8 sps:$4 sm:$0xff]   ;;  %v1709_v40 = vld [vmem:[%s2163_s18 + $0x184] ss:$8 sps:$4 sm:$0xff]   ;;  %v1712_v42 = vld [vmem:[%s2163_s18 + $0x180] ss:$8 sps:$4 sm:$0xff]  }
  0x7b   : > { %1162 = vmatprep.subr.bf16.mxu0 %v1679_v20  ;;  %v1713_v43 = vld [vmem:[%s2163_s18 + $0x94] ss:$8 sps:$4 sm:$0xff]   ;;  %v1717_v45 = vld [vmem:[%s2163_s18 + $0x90] ss:$8 sps:$4 sm:$0xff]   ;;  %v1719_v47 = vld [vmem:[%s2163_s18 + $0xa4] ss:$8 sps:$4 sm:$0xff]  }
  0x7c   : > { %v1715_v44 = vld [vmem:[%s2163_s18 + $0x194] ss:$8 sps:$4 sm:$0xff]   ;;  %v1718_v46 = vld [vmem:[%s2163_s18 + $0x190] ss:$8 sps:$4 sm:$0xff]   ;;  %v1721_v48 = vld [vmem:[%s2163_s18 + $0x1a4] ss:$8 sps:$4 sm:$0xff]  }
  0x7d   : > { %1120 = vmatpush1.bf16.msra.mxu1 %v1681_v21  ;;  %v1723_v49 = vld [vmem:[%s2163_s18 + $0xa0] ss:$8 sps:$4 sm:$0xff]   ;;  %v1725_v51 = vld [vmem:[%s2163_s18 + $0xb4] ss:$8 sps:$4 sm:$0xff]   ;;  %v1729_v53 = vld [vmem:[%s2163_s18 + $0xb0] ss:$8 sps:$4 sm:$0xff]  }
  0x7e   : > { %1163 = vmatpush1.bf16.msra.mxu0 %v1682_v22  ;;  %1121 = vmatprep.subr.bf16.mxu1 %v1683_v23  ;;  %v1724_v50 = vld [vmem:[%s2163_s18 + $0x1a0] ss:$8 sps:$4 sm:$0xff]   ;;  %v1727_v52 = vld [vmem:[%s2163_s18 + $0x1b4] ss:$8 sps:$4 sm:$0xff]   ;;  %v1730_v55 = vld [vmem:[%s2163_s18 + $0x1b0] ss:$8 sps:$4 sm:$0xff]  }
  0x7f   : > { %1164 = vmatprep.subr.bf16.mxu0 %v1685_v24  ;;  %v1757_v54 = vld [vmem:[%s2161_s10 + $0x4] ss:$16 sps:$4 sm:$0xff]   ;;  %v1760_v58 = vld [vmem:[%s2161_s10 + $0xc] ss:$16 sps:$4 sm:$0xff]   ;;  %v1735_v59 = vld [vmem:[%s2163_s18 + $0xc0] ss:$8 sps:$4 sm:$0xff]  }
  0x80   : > { %v1731_v56 = vld [vmem:[%s2163_s18 + $0xc4] ss:$8 sps:$4 sm:$0xff]   ;;  %1145 = vmatprep.mubr.bf16.mxu1 %v1757_v54  ;;  %1188 = vmatprep.mubr.bf16.mxu0 %v1760_v58  ;;  %v1736_v60 = vld [vmem:[%s2163_s18 + $0x1c0] ss:$8 sps:$4 sm:$0xff]   ;;  %v1737_v61 = vld [vmem:[%s2163_s18 + $0xd4] ss:$8 sps:$4 sm:$0xff]  }
  0x81   : > { %1122 = vmatpush1.bf16.msra.mxu1 %v1687_v25  ;;  %v1733_v57 = vld [vmem:[%s2163_s18 + $0x1c4] ss:$8 sps:$4 sm:$0xff]   ;;  %v1739_v62 = vld [vmem:[%s2163_s18 + $0x1d4] ss:$8 sps:$4 sm:$0xff]   ;;  %v1741_v63 = vld [vmem:[%s2163_s18 + $0xd0] ss:$8 sps:$4 sm:$0xff]  }
  0x82   : > { %1165 = vmatpush1.bf16.msra.mxu0 %v1688_v26  ;;  %1123 = vmatprep.subr.bf16.mxu1 %v1689_v27  ;;  %v1742_v0 = vld [vmem:[%s2163_s18 + $0x1d0] ss:$8 sps:$4 sm:$0xff]   ;;  %v1743_v1 = vld [vmem:[%s2163_s18 + $0xe4] ss:$8 sps:$4 sm:$0xff]   ;;  %v1747_v3 = vld [vmem:[%s2163_s18 + $0xe0] ss:$8 sps:$4 sm:$0xff]  }
  0x83   : > { %1166 = vmatprep.subr.bf16.mxu0 %v1691_v28  ;;  %v1745_v2 = vld [vmem:[%s2163_s18 + $0x1e4] ss:$8 sps:$4 sm:$0xff]   ;;  %v1748_v4 = vld [vmem:[%s2163_s18 + $0x1e0] ss:$8 sps:$4 sm:$0xff]   ;;  %v1749_v5 = vld [vmem:[%s2163_s18 + $0xf4] ss:$8 sps:$4 sm:$0xff]  }
  0x84   : > { %v1751_v6 = vld [vmem:[%s2163_s18 + $0x1f4] ss:$8 sps:$4 sm:$0xff]   ;;  %v1753_v7 = vld [vmem:[%s2163_s18 + $0xf0] ss:$8 sps:$4 sm:$0xff]   ;;  %v701_v12 = vld [vmem:[#allocation2] sm:$0xff]  ;;  %p1552_p6 = scmp.ne.s32.totalorder %s1831_s24, 8 }
  0x85   : > { %1124 = vmatpush1.bf16.msra.mxu1 %v1693_v29  ;;  %v1754_v8 = vld [vmem:[%s2163_s18 + $0x1f0] ss:$8 sps:$4 sm:$0xff]   ;;  %v702_v16 = vld [vmem:[#allocation2 + $0x8] sm:$0xff] }
  0x86   : > { %1167 = vmatpush1.bf16.msra.mxu0 %v1694_v30  ;;  %1125 = vmatprep.subr.bf16.mxu1 %v1695_v31  ;;  %v1755_v9 = vld [vmem:[%s2161_s10] ss:$16 sps:$4 sm:$0xff]   ;;  %v1758_v10 = vld [vmem:[%s2161_s10 + $0x8] ss:$16 sps:$4 sm:$0xff]   ;;  %v1217_v31 = vlaneseq (!%p1552_p6) }
  0x87   : > { %1168 = vmatprep.subr.bf16.mxu0 %v1697_v32  ;;  %v703_v20 = vld [vmem:[#allocation2 + $0x10] sm:$0xff]  ;;  %v704_v25 = vld [vmem:[#allocation2 + $0x18] sm:$0xff] }
  0x88   : > { %v1218_v32 = vshrl.u32 (!%p1552_p6), %v1217_v31, 7 }
  0x89   : > { %1126 = vmatpush1.bf16.msra.mxu1 %v1699_v33  ;;  %v1215_v33 = vld [vmem:[%s682_s29] sm:$0x3] (!%p1552_p6) }
  0x8a   : > { %1169 = vmatpush1.bf16.msra.mxu0 %v1700_v34  ;;  %1127 = vmatprep.subr.bf16.mxu1 %v1701_v35  ;;  %v1231_v34 = vld [vmem:[%s687_s20] sm:$0x3] (!%p1552_p6) }
  0x8b   : > { %1170 = vmatprep.subr.bf16.mxu0 %v1703_v36  ;;  %v1219_v36 = vsub.s32 (!%p1552_p6), 0, %v1218_v32 }
  0x8d   : > { %1128 = vmatpush1.bf16.msra.mxu1 %v1705_v37  ;;  %v1223_v37 = vsub.s32 (!%p1552_p6), 1, %v1218_v32 }
  0x8e   : > { %1171 = vmatpush1.bf16.msra.mxu0 %v1706_v38  ;;  %1129 = vmatprep.subr.bf16.mxu1 %v1707_v39  ;;  %v1247_v38 = vld [vmem:[%s635_s6] sm:$0xff] (!%p1552_p6)  ;;  %v1248_v39 = vld [vmem:[%s635_s6 + $0x8] sm:$0xff] (!%p1552_p6) }
  0x8f   : > { %1172 = vmatprep.subr.bf16.mxu0 %v1709_v40 }
  0x91   : > { %1130 = vmatpush1.bf16.msra.mxu1 %v1711_v41 }
  0x92   : > { %1173 = vmatpush1.bf16.msra.mxu0 %v1712_v42  ;;  %1131 = vmatprep.subr.bf16.mxu1 %v1713_v43  ;;  %v1220_v43 = vrot.slane (!%p1552_p6), %v1215_v33, %v1219_v36 }
  0x93   : > { %1174 = vmatprep.subr.bf16.mxu0 %v1715_v44  ;;  %v1224_v44 = vrot.slane (!%p1552_p6), %v1215_v33, %v1223_v37 }
  0x95   : > { %1132 = vmatpush1.bf16.msra.mxu1 %v1717_v45  ;;  %v1236_v45 = vrot.slane (!%p1552_p6), %v1231_v34, %v1219_v36 }
  0x96   : > { %1175 = vmatpush1.bf16.msra.mxu0 %v1718_v46  ;;  %1133 = vmatprep.subr.bf16.mxu1 %v1719_v47  ;;  %v1240_v46 = vrot.slane (!%p1552_p6), %v1231_v34, %v1223_v37  ;;  %v1249_v47 = vunpack.c.l.bf16 (!%p1552_p6), %v1247_v38 }
  0x97   : > { %1176 = vmatprep.subr.bf16.mxu0 %v1721_v48  ;;  %v1250_v48 = vunpack.c.h.bf16 (!%p1552_p6), %v1247_v38 }
  0x99   : > { %1134 = vmatpush1.bf16.msra.mxu1 %v1723_v49  ;;  %v1251_v49 = vunpack.c.l.bf16 (!%p1552_p6), %v1248_v39 }
  0x9a   : > { %1177 = vmatpush1.bf16.msra.mxu0 %v1724_v50  ;;  %1135 = vmatprep.subr.bf16.mxu1 %v1725_v51  ;;  %v1252_v50 = vunpack.c.h.bf16 (!%p1552_p6), %v1248_v39 }
  0x9b   : > { %1178 = vmatprep.subr.bf16.mxu0 %v1727_v52 }
  0x9d   : > { %1136 = vmatpush1.bf16.msra.mxu1 %v1729_v53 }
  0x9e   : > { %1179 = vmatpush1.bf16.msra.mxu0 %v1730_v55  ;;  %1137 = vmatprep.subr.bf16.mxu1 %v1731_v56 }
  0x9f   : > { %1180 = vmatprep.subr.bf16.mxu0 %v1733_v57 }
  0xa1   : > { %1138 = vmatpush1.bf16.msra.mxu1 %v1735_v59 }
  0xa2   : > { %1181 = vmatpush1.bf16.msra.mxu0 %v1736_v60  ;;  %1139 = vmatprep.subr.bf16.mxu1 %v1737_v61 }
  0xa3   : > { %1182 = vmatprep.subr.bf16.mxu0 %v1739_v62 }
  0xa5   : > { %1140 = vmatpush1.bf16.msra.mxu1 %v1741_v63 }
  0xa6   : > { %1183 = vmatpush1.bf16.msra.mxu0 %v1742_v0  ;;  %1141 = vmatprep.subr.bf16.mxu1 %v1743_v1 }
  0xa7   : > { %1184 = vmatprep.subr.bf16.mxu0 %v1745_v2 }
  0xa9   : > { %1142 = vmatpush1.bf16.msra.mxu1 %v1747_v3 }
  0xaa   : > { %1185 = vmatpush1.bf16.msra.mxu0 %v1748_v4  ;;  %1143 = vmatprep.subr.bf16.mxu1 %v1749_v5 }
  0xab   : > { %1186 = vmatprep.subr.bf16.mxu0 %v1751_v6 }
  0xad   : > { %1144 = vmatpush1.bf16.msra.mxu1 %v1753_v7 }
  0xae   : > { %1187 = vmatpush1.bf16.msra.mxu0 %v1754_v8 }
  0xb0   : > { %1146 = vmatmul.mubr.bf16.vlgmr.msra.gmra.mrb[0].mxu1 %v1755_v9 }
  0xb1   : > { %1189 = vmatmul.mubr.bf16.vlgmr.msra.gmra.mrb[0].mxu0 %v1758_v10 }
 0x183   : > { %v1147_v11 = vpop.f32.mrb[0].mxu1 }
 0x184   : > { %v1190_v13 = vpop.f32.mrb[0].mxu0  ;;  %v1149_v15 = vpop.f32.mrb[1].mxu1 }
 0x185   : > { %v1191_v14 = vadd.f32 %v1190_v13, %v1147_v11  ;;  %v1192_v17 = vpop.f32.mrb[1].mxu0  ;;  %v1151_v19 = vpop.f32.mrb[2].mxu1 }
 0x186   : > { %v1193_v18 = vadd.f32 %v1192_v17, %v1149_v15  ;;  %v1194_v21 = vpop.f32.mrb[2].mxu0  ;;  %v1153_v24 = vpop.f32.mrb[3].mxu1  ;;  %1210 = sbr.rel (%p1552_p6) target bundleno = 415 (0x19f), region = 147 }
 0x187   : > { %v1199_v22 = vadd.f32 %v1191_v14, %v701_v12  ;;  %v1195_v23 = vadd.f32 %v1194_v21, %v1151_v19  ;;  %v1196_v26 = vpop.f32.mrb[3].mxu0 }
 0x188   : > { %v1200_v27 = vadd.f32 %v1193_v18, %v702_v16  ;;  %v1197_v28 = vadd.f32 %v1196_v26, %v1153_v24 }
 0x189   : > { %1203 = vst [vmem:[#allocation2] sm:$0xff] %v1199_v22  ;;  %v1201_v29 = vadd.f32 %v1195_v23, %v703_v20 }
 0x18a   : > { %1204 = vst [vmem:[#allocation2 + $0x8] sm:$0xff] %v1200_v27  ;;  %v1202_v30 = vadd.f32 %v1197_v28, %v704_v25 }
 0x18b   : > { %1205 = vst [vmem:[#allocation2 + $0x10] sm:$0xff] %v1201_v29 }
 0x18c   : > { %1206 = vst [vmem:[#allocation2 + $0x18] sm:$0xff] %v1202_v30 }
 0x190   : > { %v1211_v35 = vld [vmem:[#allocation2] sm:$0xff] }
 0x191   : > { %v1212_v40 = vld [vmem:[#allocation2 + $0x8] sm:$0xff]  ;;  %v1227_v51 = vmul.f32 %v1220_v43, %v1211_v35 }
 0x192   : > { %v1213_v41 = vld [vmem:[#allocation2 + $0x10] sm:$0xff]  ;;  %v1228_v52 = vmul.f32 %v1224_v44, %v1212_v40 }
 0x193   : > { %v1214_v42 = vld [vmem:[#allocation2 + $0x18] sm:$0xff]  ;;  %v1229_v53 = vmul.f32 %v1220_v43, %v1213_v41  ;;  %v1243_v55 = vadd.f32 %v1236_v45, %v1227_v51 }
 0x194   : > { %v1230_v54 = vmul.f32 %v1224_v44, %v1214_v42  ;;  %v1244_v56 = vadd.f32 %v1240_v46, %v1228_v52 }
 0x195   : > { %v1245_v57 = vadd.f32 %v1236_v45, %v1229_v53  ;;  %v1253_v59 = vadd.f32 %v1249_v47, %v1243_v55 }
 0x196   : > { %v1246_v58 = vadd.f32 %v1240_v46, %v1230_v54  ;;  %v1254_v60 = vadd.f32 %v1250_v48, %v1244_v56 }
 0x197   : > { %v1255_v61 = vadd.f32 %v1251_v49, %v1245_v57  ;;  %v1257_v63 = vmax.f32 %v1253_v59, 0.0 }
 0x198   : > { %v1256_v62 = vadd.f32 %v1252_v50, %v1246_v58  ;;  %v1258_v0 = vmax.f32 %v1254_v60, 0.0 }
 0x199   : > { %v1259_v1 = vmax.f32 %v1255_v61, 0.0 }
 0x19a   : > { %v1260_v2 = vmax.f32 %v1256_v62, 0.0  ;;  %v1563_v3 = vpack.c.bf16 %v1258_v0, %v1257_v63 }
 0x19c   : > { %v1564_v4 = vpack.c.bf16 %v1260_v2, %v1259_v1  ;;  %1273 = vst [vmem:[%s2167_s23] sm:$0xff] %v1563_v3 }
 0x19e   : > { %1274 = vst [vmem:[%s2167_s23 + $0x8] sm:$0xff] %v1564_v4 }
 0x19f PF: > { %1281 = sbr.rel (!%p1984_p13) target bundleno = 423 (0x1a7), region = 151  ;;  %s1565_s24 = sshll.u32 (%p1984_p13), %s1835_s25, 3 }
 0x1a0   : > { %s1287_s11 = scalar_lea.vmem (%p1984_p13), %s2301_s5, %s1565_s24 }
 0x1a3   : > { %v1317_v5 = vld [vmem:[%s2167_s23] sm:$0xff] (%p1984_p13) }
 0x1a4   : > { %1318 = vst [vmem:[%s1287_s11] sm:$0xff] (%p1984_p13), %v1317_v5 }
 0x1a5   : > { %v1319_v6 = vld [vmem:[%s2167_s23 + $0x8] sm:$0xff] (%p1984_p13) }
 0x1a6   : > { %1320 = vst [vmem:[%s1287_s11 + $0x10] sm:$0xff] %v1319_v6 }
 0x1a7 PF: > { %s15_s28 = sadd.s32 1, %s1847_s28   ;;  %s2315_s22 = sld [smem:[#allocation7_spill]] }
 0x1a8   : > { %p12_p7 = scmp.ge.s32.totalorder %s15_s28, 20   ;;  %s2316_s23 = sld [smem:[#allocation10_spill]] }
 0x1a9   : > { %s2317_s8 = sld [smem:[#allocation8_spill]]  ;;  %s2318_s14 = sld [smem:[#allocation9_spill]] }
 0x1aa   : > { %s2319_s18 = smov %s1811_s19  ;;  %s2320_s19 = smov %s1976_s17 }
 0x1ab   : > { %s2321_s20 = smov %s1819_s21  ;;  %s2322_s21 = smov %s1973_s16 }
 0x1ac   : > { %s2323_s24 = smov %s1839_s26  ;;  %s2324_s25 = smov %s1843_s27 }
 0x1ad   :  { %14 = sbr.rel (!%p12_p7) target bundleno = 8 (0x8), region = 242 }
 0x1af   : > { %s2325_s26 = smov %s2317_s8  ;;  %s2326_s27 = smov %s2318_s14 }

// kernel: mnist_resnet_forward.41
= control target key start
LH: loop header
LB: loop body
LE: loop exit
PB: predicated region body
PF: predicated region fallthrough
CT: control target
= control target key end

     0   :  { %s2137_s0 = inlined_call_operand.vmem [shape: bf16[16,4608], index: 0, kind: input, shape index: {}]   ;;  %s2138_s1 = inlined_call_operand.vmem [shape: bf16[4608,512], index: 1, kind: input, shape index: {}]   ;;  %s2139_s2 = inlined_call_operand.vmem [shape: f32[1,512], index: 2, kind: input, shape index: {}]   ;;  %s2140_s3 = inlined_call_operand.vmem [shape: f32[1,512], index: 3, kind: input, shape index: {}]   ;;  %s2141_s4 = inlined_call_operand.vmem [shape: bf16[16,512], index: 4, kind: output, shape index: {}]  }
   0x1   :  { %2144 = sst [smem:[#allocation8_spill]] %s2137_s0 }
   0x2   :  { %2145 = sst [smem:[#allocation9_spill]] %s2138_s1 }
   0x3   :  { %s1746_s15 = smov 0   ;;  %s1748_s16 = smov 0  }
   0x4   :  { %s1750_s17 = smov 0   ;;  %s1752_s18 = smov 0  }
   0x5   :  { %s1754_s19 = smov 0   ;;  %s1756_s20 = smov 0  }
   0x6   :  { %s1758_s21 = smov 0   ;;  %s1760_s22 = smov 0  }
   0x7   :  { %s1762_s23 = smov 0   ;;  %s1764_s24 = smov 0  }
   0x8   :  { %s1766_s25 = smov 0  }
   0x9 LB: > { %s1337_s26 = sadd.s32 4294967295, %s1718_s25   ;;  %s26_s27 = sadd.s32 1, %s1710_s23  ;;  %s1718_s25 = sphi %s1766_s25, %s14_s25   ;;  %s1714_s24 = sphi %s1764_s24, %s2164_s24   ;;  %s1710_s23 = sphi %s1762_s23, %s2163_s23   ;;  %s1706_s22 = sphi %s1760_s22, %s2162_s22   ;;  %s1702_s21 = sphi %s1758_s21, %s2161_s21   ;;  %s1698_s20 = sphi %s1756_s20, %s2160_s20   ;;  %s1694_s19 = sphi %s1754_s19, %s2159_s19   ;;  %s1690_s18 = sphi %s1752_s18, %s2158_s18   ;;  %s1686_s17 = sphi %s1750_s17, %s2157_s17   ;;  %s1682_s16 = sphi %s1748_s16, %s2156_s16   ;;  %s1678_s15 = sphi %s1746_s15, %s2155_s15  }
   0xa   : > { %p27_p0 = scmp.ge.s32.totalorder %s26_s27, 9  ;;  %s29_s28 = sadd.s32 1, %s1714_s24 }
   0xb   : > { %s42_s29 = sadd.s32 1, %s1698_s20  ;;  %p49_p1 = scmp.ne.s32.totalorder %s1698_s20, %s1694_s19 }
   0xc   : > { %s2166_s27 = smov (%p27_p0, %s26_s27), 0  ;;  %s2168_s28 = smov (!%p27_p0, %s29_s28), %s1714_s24 }
   0xd   : > { %2146 = sst [smem:[#allocation6_spill]] %s2166_s27  ;;  %s38_s30 = ssub.s32 %s1710_s23, %s2166_s27 }
   0xe   : > { %p50_p2 = scmp.eq.s32.totalorder %s1718_s25, 0  ;;  %p31_p3 = scmp.ge.s32.totalorder %s2168_s28, 2 }
   0xf   : > { %p40_p4 = scmp.eq.s32.totalorder %s38_s30, 0  ;;  %s70_s6 = sadd.s32 1, %s1690_s18 }
  0x10   : > { %p1813_p5 = por %p50_p2, %p49_p1  ;;  %s2170_s28 = smov (%p31_p3, %s2168_s28), 0 }
  0x11   : > { %2148 = sst [smem:[#allocation7_spill]] %s2170_s28  ;;  %s66_s8 = ssub.s32 %s1714_s24, %s2170_s28 }
  0x12   : > { %s1821_s7 = scalar_select %p40_p4, %s1698_s20, %s42_s29  }
  0x13   : > { %p77_p6 = scmp.ne.s32.totalorder %s1690_s18, %s1686_s17  ;;  %s67_s9 = sor.u32 %s66_s8, %s38_s30 }
  0x14   : > { %p148_p7 = scmp.eq.s32.totalorder %s66_s8, 0  ;;  %p68_p8 = scmp.eq.s32.totalorder %s67_s9, 0 }
  0x15   : > { %p1827_p9 = por %p77_p6, %p50_p2  ;;  %s150_s11 = sadd.s32 1, %s1682_s16 }
  0x16   : > { %p160_p10 = scmp.ne.s32.totalorder %s1682_s16, %s1678_s15  ;;  %p161_p11 = scmp.eq.s32.totalorder %s1337_s26, 17 }
  0x17   : > { %s1835_s12 = scalar_select %p68_p8, %s1690_s18, %s70_s6  }
  0x18   : > { %s1838_s13 = scalar_select %p148_p7, %s1682_s16, %s150_s11  }
  0x19   : > { %p1840_p12 = por %p161_p11, %p160_p10  ;;  %p1340_p13 = scmp.ge.s32.totalorder %s1718_s25, 18 }
  0x1b   : > { %183 = sbr.rel (%p1340_p13) target bundleno = 88 (0x58), region = 16 }
  0x22   : > { %186 = sbr.rel (!%p1813_p5) target bundleno = 46 (0x2e), region = 20  ;;  %s188_s29 = sand.u32 (%p1813_p5), 1, %s1698_s20  }
  0x23   : > { %s1432_s30 = sshll.u32 (%p1813_p5), %s1710_s23, 4  ;;  %s1341_s8 = sshll.u32 (%p1813_p5), %s188_s29, 5 }
  0x24   : > { %s2151_s0 = sld [smem:[#allocation8_spill]] (%p1813_p5)  ;;  %s190_s26 = scalar_lea.vmem (%p1813_p5), [#allocation3], %s1341_s8 }
  0x2a   : > { %s196_s11 = scalar_lea.vmem %s2151_s0, %s1432_s30 }
  0x2b   : > { %v209_v0 = vld [vmem:[%s196_s11] sm:$0xff]  ;;  %v211_v1 = vld [vmem:[%s196_s11 + $0x8] sm:$0xff]  ;;  %v213_v2 = vld [vmem:[%s196_s11 + $0x90] sm:$0xff] }
  0x2c   : > { %210 = vst [vmem:[%s190_s26] sm:$0xff] %v209_v0  ;;  %212 = vst [vmem:[%s190_s26 + $0x8] sm:$0xff] %v211_v1  ;;  %v215_v3 = vld [vmem:[%s196_s11 + $0x98] sm:$0xff] }
  0x2d   : > { %214 = vst [vmem:[%s190_s26 + $0x10] sm:$0xff] %v213_v2  ;;  %216 = vst [vmem:[%s190_s26 + $0x18] sm:$0xff] %v215_v3 }
  0x2e PF: > { %222 = sbr.rel (!%p1827_p9) target bundleno = 88 (0x58), region = 43  ;;  %s224_s5 = sand.u32 (%p1827_p9), 1, %s1690_s18  }
  0x2f   : > { %s1346_s29 = sshll.u32 (%p1827_p9), %s1714_s24, 1  ;;  %s1344_s6 = sshll.u32 (%p1827_p9), %s224_s5, 9 }
  0x30   : > { %s1433_s30 = sshll.u32 (%p1827_p9), %s1710_s23, 8  ;;  %s2152_s1 = sld [smem:[#allocation9_spill]] (%p1827_p9) }
  0x31   : > { %s230_s9 = sadd.s32 (%p1827_p9), %s1433_s30, %s1346_s29  ;;  %s1865_s10 = scalar_lea.vmem (%p1827_p9), [#allocation4], %s1344_s6 }
  0x32   : > { %s1348_s0 = sshll.u32 (%p1827_p9), %s230_s9, 2 }
  0x36   : > { %s1860_s27 = scalar_lea.vmem %s2152_s1, %s1348_s0 }
  0x37   : > { %v386_v4 = vld [vmem:[%s1860_s27] sm:$0xff]  ;;  %v388_v5 = vld [vmem:[%s1860_s27 + $0x10] sm:$0xff] }
  0x38   : > { %v390_v6 = vld [vmem:[%s1860_s27 + $0x20] sm:$0xff]  ;;  %387 = vst [vmem:[%s1865_s10] sm:$0xff] %v386_v4  ;;  %389 = vst [vmem:[%s1865_s10 + $0x8] sm:$0xff] %v388_v5  ;;  %v392_v7 = vld [vmem:[%s1860_s27 + $0x30] sm:$0xff] }
  0x39   : > { %391 = vst [vmem:[%s1865_s10 + $0x10] sm:$0xff] %v390_v6  ;;  %v394_v8 = vld [vmem:[%s1860_s27 + $0x40] sm:$0xff]  ;;  %v396_v9 = vld [vmem:[%s1860_s27 + $0x50] sm:$0xff]  ;;  %393 = vst [vmem:[%s1865_s10 + $0x18] sm:$0xff] %v392_v7 }
  0x3a   : > { %395 = vst [vmem:[%s1865_s10 + $0x20] sm:$0xff] %v394_v8  ;;  %397 = vst [vmem:[%s1865_s10 + $0x28] sm:$0xff] %v396_v9  ;;  %v398_v10 = vld [vmem:[%s1860_s27 + $0x60] sm:$0xff]  ;;  %v400_v11 = vld [vmem:[%s1860_s27 + $0x70] sm:$0xff] }
  0x3b   : > { %v402_v12 = vld [vmem:[%s1860_s27 + $0x80] sm:$0xff]  ;;  %399 = vst [vmem:[%s1865_s10 + $0x30] sm:$0xff] %v398_v10  ;;  %401 = vst [vmem:[%s1865_s10 + $0x38] sm:$0xff] %v400_v11  ;;  %v404_v13 = vld [vmem:[%s1860_s27 + $0x90] sm:$0xff] }
  0x3c   : > { %403 = vst [vmem:[%s1865_s10 + $0x40] sm:$0xff] %v402_v12  ;;  %v406_v14 = vld [vmem:[%s1860_s27 + $0xa0] sm:$0xff]  ;;  %v408_v15 = vld [vmem:[%s1860_s27 + $0xb0] sm:$0xff]  ;;  %405 = vst [vmem:[%s1865_s10 + $0x48] sm:$0xff] %v404_v13 }
  0x3d   : > { %407 = vst [vmem:[%s1865_s10 + $0x50] sm:$0xff] %v406_v14  ;;  %409 = vst [vmem:[%s1865_s10 + $0x58] sm:$0xff] %v408_v15  ;;  %v410_v16 = vld [vmem:[%s1860_s27 + $0xc0] sm:$0xff]  ;;  %v412_v17 = vld [vmem:[%s1860_s27 + $0xd0] sm:$0xff] }
  0x3e   : > { %v414_v18 = vld [vmem:[%s1860_s27 + $0xe0] sm:$0xff]  ;;  %411 = vst [vmem:[%s1865_s10 + $0x60] sm:$0xff] %v410_v16  ;;  %413 = vst [vmem:[%s1865_s10 + $0x68] sm:$0xff] %v412_v17  ;;  %v416_v19 = vld [vmem:[%s1860_s27 + $0xf0] sm:$0xff] }
  0x3f   : > { %415 = vst [vmem:[%s1865_s10 + $0x70] sm:$0xff] %v414_v18  ;;  %v418_v20 = vld [vmem:[%s1860_s27 + $0x100] sm:$0xff]  ;;  %v420_v21 = vld [vmem:[%s1860_s27 + $0x110] sm:$0xff]  ;;  %417 = vst [vmem:[%s1865_s10 + $0x78] sm:$0xff] %v416_v19 }
  0x40   : > { %419 = vst [vmem:[%s1865_s10 + $0x80] sm:$0xff] %v418_v20  ;;  %421 = vst [vmem:[%s1865_s10 + $0x88] sm:$0xff] %v420_v21  ;;  %v422_v22 = vld [vmem:[%s1860_s27 + $0x120] sm:$0xff]  ;;  %v424_v23 = vld [vmem:[%s1860_s27 + $0x130] sm:$0xff] }
  0x41   : > { %v426_v24 = vld [vmem:[%s1860_s27 + $0x140] sm:$0xff]  ;;  %423 = vst [vmem:[%s1865_s10 + $0x90] sm:$0xff] %v422_v22  ;;  %425 = vst [vmem:[%s1865_s10 + $0x98] sm:$0xff] %v424_v23  ;;  %v428_v25 = vld [vmem:[%s1860_s27 + $0x150] sm:$0xff] }
  0x42   : > { %427 = vst [vmem:[%s1865_s10 + $0xa0] sm:$0xff] %v426_v24  ;;  %v430_v26 = vld [vmem:[%s1860_s27 + $0x160] sm:$0xff]  ;;  %v432_v27 = vld [vmem:[%s1860_s27 + $0x170] sm:$0xff]  ;;  %429 = vst [vmem:[%s1865_s10 + $0xa8] sm:$0xff] %v428_v25 }
  0x43   : > { %431 = vst [vmem:[%s1865_s10 + $0xb0] sm:$0xff] %v430_v26  ;;  %433 = vst [vmem:[%s1865_s10 + $0xb8] sm:$0xff] %v432_v27  ;;  %v434_v28 = vld [vmem:[%s1860_s27 + $0x180] sm:$0xff]  ;;  %v436_v29 = vld [vmem:[%s1860_s27 + $0x190] sm:$0xff] }
  0x44   : > { %v438_v30 = vld [vmem:[%s1860_s27 + $0x1a0] sm:$0xff]  ;;  %435 = vst [vmem:[%s1865_s10 + $0xc0] sm:$0xff] %v434_v28  ;;  %437 = vst [vmem:[%s1865_s10 + $0xc8] sm:$0xff] %v436_v29  ;;  %v440_v31 = vld [vmem:[%s1860_s27 + $0x1b0] sm:$0xff] }
  0x45   : > { %439 = vst [vmem:[%s1865_s10 + $0xd0] sm:$0xff] %v438_v30  ;;  %v442_v32 = vld [vmem:[%s1860_s27 + $0x1c0] sm:$0xff]  ;;  %v444_v33 = vld [vmem:[%s1860_s27 + $0x1d0] sm:$0xff]  ;;  %441 = vst [vmem:[%s1865_s10 + $0xd8] sm:$0xff] %v440_v31 }
  0x46   : > { %443 = vst [vmem:[%s1865_s10 + $0xe0] sm:$0xff] %v442_v32  ;;  %445 = vst [vmem:[%s1865_s10 + $0xe8] sm:$0xff] %v444_v33  ;;  %v446_v34 = vld [vmem:[%s1860_s27 + $0x1e0] sm:$0xff]  ;;  %v448_v35 = vld [vmem:[%s1860_s27 + $0x1f0] sm:$0xff] }
  0x47   : > { %v450_v36 = vld [vmem:[%s1860_s27 + $0x200] sm:$0xff]  ;;  %447 = vst [vmem:[%s1865_s10 + $0xf0] sm:$0xff] %v446_v34  ;;  %449 = vst [vmem:[%s1865_s10 + $0xf8] sm:$0xff] %v448_v35  ;;  %v452_v37 = vld [vmem:[%s1860_s27 + $0x210] sm:$0xff] }
  0x48   : > { %451 = vst [vmem:[%s1865_s10 + $0x100] sm:$0xff] %v450_v36  ;;  %v454_v38 = vld [vmem:[%s1860_s27 + $0x220] sm:$0xff]  ;;  %v456_v39 = vld [vmem:[%s1860_s27 + $0x230] sm:$0xff]  ;;  %453 = vst [vmem:[%s1865_s10 + $0x108] sm:$0xff] %v452_v37 }
  0x49   : > { %455 = vst [vmem:[%s1865_s10 + $0x110] sm:$0xff] %v454_v38  ;;  %457 = vst [vmem:[%s1865_s10 + $0x118] sm:$0xff] %v456_v39  ;;  %v458_v40 = vld [vmem:[%s1860_s27 + $0x240] sm:$0xff]  ;;  %v460_v41 = vld [vmem:[%s1860_s27 + $0x250] sm:$0xff] }
  0x4a   : > { %v462_v42 = vld [vmem:[%s1860_s27 + $0x260] sm:$0xff]  ;;  %459 = vst [vmem:[%s1865_s10 + $0x120] sm:$0xff] %v458_v40  ;;  %461 = vst [vmem:[%s1865_s10 + $0x128] sm:$0xff] %v460_v41  ;;  %v464_v43 = vld [vmem:[%s1860_s27 + $0x270] sm:$0xff] }
  0x4b   : > { %463 = vst [vmem:[%s1865_s10 + $0x130] sm:$0xff] %v462_v42  ;;  %v466_v44 = vld [vmem:[%s1860_s27 + $0x280] sm:$0xff]  ;;  %v468_v45 = vld [vmem:[%s1860_s27 + $0x290] sm:$0xff]  ;;  %465 = vst [vmem:[%s1865_s10 + $0x138] sm:$0xff] %v464_v43 }
  0x4c   : > { %467 = vst [vmem:[%s1865_s10 + $0x140] sm:$0xff] %v466_v44  ;;  %469 = vst [vmem:[%s1865_s10 + $0x148] sm:$0xff] %v468_v45  ;;  %v470_v46 = vld [vmem:[%s1860_s27 + $0x2a0] sm:$0xff]  ;;  %v472_v47 = vld [vmem:[%s1860_s27 + $0x2b0] sm:$0xff] }
  0x4d   : > { %v474_v48 = vld [vmem:[%s1860_s27 + $0x2c0] sm:$0xff]  ;;  %471 = vst [vmem:[%s1865_s10 + $0x150] sm:$0xff] %v470_v46  ;;  %473 = vst [vmem:[%s1865_s10 + $0x158] sm:$0xff] %v472_v47  ;;  %v476_v49 = vld [vmem:[%s1860_s27 + $0x2d0] sm:$0xff] }
  0x4e   : > { %475 = vst [vmem:[%s1865_s10 + $0x160] sm:$0xff] %v474_v48  ;;  %v478_v50 = vld [vmem:[%s1860_s27 + $0x2e0] sm:$0xff]  ;;  %v480_v51 = vld [vmem:[%s1860_s27 + $0x2f0] sm:$0xff]  ;;  %477 = vst [vmem:[%s1865_s10 + $0x168] sm:$0xff] %v476_v49 }
  0x4f   : > { %479 = vst [vmem:[%s1865_s10 + $0x170] sm:$0xff] %v478_v50  ;;  %481 = vst [vmem:[%s1865_s10 + $0x178] sm:$0xff] %v480_v51  ;;  %v482_v52 = vld [vmem:[%s1860_s27 + $0x300] sm:$0xff]  ;;  %v484_v53 = vld [vmem:[%s1860_s27 + $0x310] sm:$0xff] }
  0x50   : > { %v486_v54 = vld [vmem:[%s1860_s27 + $0x320] sm:$0xff]  ;;  %483 = vst [vmem:[%s1865_s10 + $0x180] sm:$0xff] %v482_v52  ;;  %485 = vst [vmem:[%s1865_s10 + $0x188] sm:$0xff] %v484_v53  ;;  %v488_v55 = vld [vmem:[%s1860_s27 + $0x330] sm:$0xff] }
  0x51   : > { %487 = vst [vmem:[%s1865_s10 + $0x190] sm:$0xff] %v486_v54  ;;  %v490_v56 = vld [vmem:[%s1860_s27 + $0x340] sm:$0xff]  ;;  %v492_v57 = vld [vmem:[%s1860_s27 + $0x350] sm:$0xff]  ;;  %489 = vst [vmem:[%s1865_s10 + $0x198] sm:$0xff] %v488_v55 }
  0x52   : > { %491 = vst [vmem:[%s1865_s10 + $0x1a0] sm:$0xff] %v490_v56  ;;  %493 = vst [vmem:[%s1865_s10 + $0x1a8] sm:$0xff] %v492_v57  ;;  %v494_v58 = vld [vmem:[%s1860_s27 + $0x360] sm:$0xff]  ;;  %v496_v59 = vld [vmem:[%s1860_s27 + $0x370] sm:$0xff] }
  0x53   : > { %v498_v60 = vld [vmem:[%s1860_s27 + $0x380] sm:$0xff]  ;;  %495 = vst [vmem:[%s1865_s10 + $0x1b0] sm:$0xff] %v494_v58  ;;  %497 = vst [vmem:[%s1865_s10 + $0x1b8] sm:$0xff] %v496_v59  ;;  %v500_v61 = vld [vmem:[%s1860_s27 + $0x390] sm:$0xff] }
  0x54   : > { %499 = vst [vmem:[%s1865_s10 + $0x1c0] sm:$0xff] %v498_v60  ;;  %v502_v62 = vld [vmem:[%s1860_s27 + $0x3a0] sm:$0xff]  ;;  %v504_v63 = vld [vmem:[%s1860_s27 + $0x3b0] sm:$0xff]  ;;  %501 = vst [vmem:[%s1865_s10 + $0x1c8] sm:$0xff] %v500_v61 }
  0x55   : > { %503 = vst [vmem:[%s1865_s10 + $0x1d0] sm:$0xff] %v502_v62  ;;  %505 = vst [vmem:[%s1865_s10 + $0x1d8] sm:$0xff] %v504_v63  ;;  %v506_v0 = vld [vmem:[%s1860_s27 + $0x3c0] sm:$0xff]  ;;  %v508_v1 = vld [vmem:[%s1860_s27 + $0x3d0] sm:$0xff] }
  0x56   : > { %v510_v2 = vld [vmem:[%s1860_s27 + $0x3e0] sm:$0xff]  ;;  %507 = vst [vmem:[%s1865_s10 + $0x1e0] sm:$0xff] %v506_v0  ;;  %509 = vst [vmem:[%s1865_s10 + $0x1e8] sm:$0xff] %v508_v1  ;;  %v512_v3 = vld [vmem:[%s1860_s27 + $0x3f0] sm:$0xff] }
  0x57   : > { %511 = vst [vmem:[%s1865_s10 + $0x1f0] sm:$0xff] %v510_v2  ;;  %513 = vst [vmem:[%s1865_s10 + $0x1f8] sm:$0xff] %v512_v3 }
  0x58 PF: > { %p1349_p0 = scmp.ge.s32.totalorder %s1718_s25, 1  ;;  %p534_p1 = scmp.lt.s32.totalorder %s1718_s25, 19 }
  0x5a   : > { %p535_p2 = pnand %p1349_p0, %p534_p1 }
  0x5b   : > { %s541_s0 = sand.u32 (!%p535_p2), 1, %s1694_s19   ;;  %s548_s28 = sand.u32 (!%p535_p2), 1, %s1686_s17  }
  0x5c   : > { %538 = sbr.rel (%p535_p2) target bundleno = 416 (0x1a0), region = 89  ;;  %s1350_s11 = sshll.u32 (!%p535_p2), %s541_s0, 5 }
  0x5d   : > { %s1351_s26 = sshll.u32 (!%p535_p2), %s548_s28, 9  ;;  %s581_s5 = sand.u32 (!%p535_p2), 1, %s1678_s15  }
  0x5e   : > { %s1353_s29 = sshll.u32 (!%p535_p2), %s1706_s22, 1  ;;  %s1352_s27 = sshll.u32 (!%p535_p2), %s581_s5, 4 }
  0x5f   : > { %p589_p3 = scmp.lt.s32.totalorder (!%p535_p2), %s1353_s29, 3  ;;  %s2008_s19 = scalar_lea.vmem (!%p535_p2), [#allocation3], %s1350_s11 }
  0x60   : > { %s2010_s17 = scalar_lea.vmem (!%p535_p2), [#allocation4], %s1351_s26  ;;  %s2012_s15 = scalar_lea.vmem (!%p535_p2), [#allocation5], %s1352_s27 }
  0x61   : > { %p1355_p4 = scmp.ne.s32.totalorder (!%p535_p2), %s1702_s21, 0 }
  0x63   : > { %s2172_s29 = smov (!%p589_p3, %s1353_s29), 3  ;;  %603 = sbr.rel (%p1355_p4) target bundleno = 106 (0x6a), region = 101 }
  0x64   : > { %s591_s9 = scalar_lea.vmem %s2139_s2, %s2172_s29  ;;  %s596_s1 = scalar_lea.vmem %s2140_s3, %s2172_s29  ;;  %v1720_v4 = vmov (!%p1355_p4), 0.0  }
  0x65   : > { %604 = vst [vmem:[#allocation2] sm:$0xff] (!%p1355_p4), %v1720_v4  ;;  %605 = vst [vmem:[#allocation2 + $0x8] sm:$0xff] (!%p1355_p4), %v1720_v4 }
  0x66   : > { %606 = vst [vmem:[#allocation2 + $0x10] sm:$0xff] (!%p1355_p4), %v1720_v4  ;;  %607 = vst [vmem:[#allocation2 + $0x18] sm:$0xff] (!%p1355_p4), %v1720_v4 }
  0x6a PF: > { %v1530_v5 = vld [vmem:[%s2010_s17 + $0x4] ss:$8 sps:$4 sm:$0xff]   ;;  %v1534_v7 = vld [vmem:[%s2010_s17] ss:$8 sps:$4 sm:$0xff]   ;;  %v1536_v9 = vld [vmem:[%s2010_s17 + $0x14] ss:$8 sps:$4 sm:$0xff]  }
  0x6b   : > { %v1532_v6 = vld [vmem:[%s2010_s17 + $0x104] ss:$8 sps:$4 sm:$0xff]   ;;  %1020 = vmatprep.subr.bf16.mxu1 %v1530_v5  ;;  %v1535_v8 = vld [vmem:[%s2010_s17 + $0x100] ss:$8 sps:$4 sm:$0xff]   ;;  %v1538_v10 = vld [vmem:[%s2010_s17 + $0x114] ss:$8 sps:$4 sm:$0xff]  }
  0x6c   : > { %1063 = vmatprep.subr.bf16.mxu0 %v1532_v6  ;;  %1021 = vmatpush1.bf16.msra.mxu1 %v1534_v7  ;;  %v1540_v11 = vld [vmem:[%s2010_s17 + $0x10] ss:$8 sps:$4 sm:$0xff]   ;;  %v1542_v13 = vld [vmem:[%s2010_s17 + $0x24] ss:$8 sps:$4 sm:$0xff]   ;;  %v1546_v15 = vld [vmem:[%s2010_s17 + $0x20] ss:$8 sps:$4 sm:$0xff]  }
  0x6d   : > { %1064 = vmatpush1.bf16.msra.mxu0 %v1535_v8  ;;  %1022 = vmatprep.subr.bf16.mxu1 %v1536_v9  ;;  %v1541_v12 = vld [vmem:[%s2010_s17 + $0x110] ss:$8 sps:$4 sm:$0xff]   ;;  %v1544_v14 = vld [vmem:[%s2010_s17 + $0x124] ss:$8 sps:$4 sm:$0xff]   ;;  %v1547_v16 = vld [vmem:[%s2010_s17 + $0x120] ss:$8 sps:$4 sm:$0xff]  }
  0x6e   : > { %1065 = vmatprep.subr.bf16.mxu0 %v1538_v10  ;;  %v1548_v17 = vld [vmem:[%s2010_s17 + $0x34] ss:$8 sps:$4 sm:$0xff]   ;;  %v1552_v19 = vld [vmem:[%s2010_s17 + $0x30] ss:$8 sps:$4 sm:$0xff]   ;;  %v1554_v21 = vld [vmem:[%s2010_s17 + $0x44] ss:$8 sps:$4 sm:$0xff]  }
  0x6f   : > { %v1550_v18 = vld [vmem:[%s2010_s17 + $0x134] ss:$8 sps:$4 sm:$0xff]   ;;  %v1553_v20 = vld [vmem:[%s2010_s17 + $0x130] ss:$8 sps:$4 sm:$0xff]   ;;  %v1556_v22 = vld [vmem:[%s2010_s17 + $0x144] ss:$8 sps:$4 sm:$0xff]  }
  0x70   : > { %1023 = vmatpush1.bf16.msra.mxu1 %v1540_v11  ;;  %v1558_v23 = vld [vmem:[%s2010_s17 + $0x40] ss:$8 sps:$4 sm:$0xff]   ;;  %v1560_v25 = vld [vmem:[%s2010_s17 + $0x54] ss:$8 sps:$4 sm:$0xff]   ;;  %v1564_v27 = vld [vmem:[%s2010_s17 + $0x50] ss:$8 sps:$4 sm:$0xff]  }
  0x71   : > { %1066 = vmatpush1.bf16.msra.mxu0 %v1541_v12  ;;  %1024 = vmatprep.subr.bf16.mxu1 %v1542_v13  ;;  %v1559_v24 = vld [vmem:[%s2010_s17 + $0x140] ss:$8 sps:$4 sm:$0xff]   ;;  %v1562_v26 = vld [vmem:[%s2010_s17 + $0x154] ss:$8 sps:$4 sm:$0xff]   ;;  %v1565_v28 = vld [vmem:[%s2010_s17 + $0x150] ss:$8 sps:$4 sm:$0xff]  }
  0x72   : > { %1067 = vmatprep.subr.bf16.mxu0 %v1544_v14  ;;  %v1566_v29 = vld [vmem:[%s2010_s17 + $0x64] ss:$8 sps:$4 sm:$0xff]   ;;  %v1570_v31 = vld [vmem:[%s2010_s17 + $0x60] ss:$8 sps:$4 sm:$0xff]   ;;  %v1572_v33 = vld [vmem:[%s2010_s17 + $0x74] ss:$8 sps:$4 sm:$0xff]  }
  0x73   : > { %v1568_v30 = vld [vmem:[%s2010_s17 + $0x164] ss:$8 sps:$4 sm:$0xff]   ;;  %v1571_v32 = vld [vmem:[%s2010_s17 + $0x160] ss:$8 sps:$4 sm:$0xff]   ;;  %v1574_v34 = vld [vmem:[%s2010_s17 + $0x174] ss:$8 sps:$4 sm:$0xff]  }
  0x74   : > { %1025 = vmatpush1.bf16.msra.mxu1 %v1546_v15  ;;  %v1576_v35 = vld [vmem:[%s2010_s17 + $0x70] ss:$8 sps:$4 sm:$0xff]   ;;  %v1578_v37 = vld [vmem:[%s2010_s17 + $0x84] ss:$8 sps:$4 sm:$0xff]   ;;  %v1582_v39 = vld [vmem:[%s2010_s17 + $0x80] ss:$8 sps:$4 sm:$0xff]  }
  0x75   : > { %1068 = vmatpush1.bf16.msra.mxu0 %v1547_v16  ;;  %1026 = vmatprep.subr.bf16.mxu1 %v1548_v17  ;;  %v1577_v36 = vld [vmem:[%s2010_s17 + $0x170] ss:$8 sps:$4 sm:$0xff]   ;;  %v1580_v38 = vld [vmem:[%s2010_s17 + $0x184] ss:$8 sps:$4 sm:$0xff]   ;;  %v1583_v40 = vld [vmem:[%s2010_s17 + $0x180] ss:$8 sps:$4 sm:$0xff]  }
  0x76   : > { %1069 = vmatprep.subr.bf16.mxu0 %v1550_v18  ;;  %v1584_v41 = vld [vmem:[%s2010_s17 + $0x94] ss:$8 sps:$4 sm:$0xff]   ;;  %v1588_v43 = vld [vmem:[%s2010_s17 + $0x90] ss:$8 sps:$4 sm:$0xff]   ;;  %v1590_v45 = vld [vmem:[%s2010_s17 + $0xa4] ss:$8 sps:$4 sm:$0xff]  }
  0x77   : > { %v1586_v42 = vld [vmem:[%s2010_s17 + $0x194] ss:$8 sps:$4 sm:$0xff]   ;;  %v1589_v44 = vld [vmem:[%s2010_s17 + $0x190] ss:$8 sps:$4 sm:$0xff]   ;;  %v1592_v46 = vld [vmem:[%s2010_s17 + $0x1a4] ss:$8 sps:$4 sm:$0xff]  }
  0x78   : > { %1027 = vmatpush1.bf16.msra.mxu1 %v1552_v19  ;;  %v1594_v47 = vld [vmem:[%s2010_s17 + $0xa0] ss:$8 sps:$4 sm:$0xff]   ;;  %v1596_v49 = vld [vmem:[%s2010_s17 + $0xb4] ss:$8 sps:$4 sm:$0xff]   ;;  %v1600_v51 = vld [vmem:[%s2010_s17 + $0xb0] ss:$8 sps:$4 sm:$0xff]  }
  0x79   : > { %1070 = vmatpush1.bf16.msra.mxu0 %v1553_v20  ;;  %1028 = vmatprep.subr.bf16.mxu1 %v1554_v21  ;;  %v1595_v48 = vld [vmem:[%s2010_s17 + $0x1a0] ss:$8 sps:$4 sm:$0xff]   ;;  %v1598_v50 = vld [vmem:[%s2010_s17 + $0x1b4] ss:$8 sps:$4 sm:$0xff]   ;;  %v1601_v53 = vld [vmem:[%s2010_s17 + $0x1b0] ss:$8 sps:$4 sm:$0xff]  }
  0x7a   : > { %1071 = vmatprep.subr.bf16.mxu0 %v1556_v22  ;;  %v1628_v52 = vld [vmem:[%s2008_s19 + $0x4] ss:$16 sps:$4 sm:$0xff]   ;;  %v1631_v56 = vld [vmem:[%s2008_s19 + $0xc] ss:$16 sps:$4 sm:$0xff]   ;;  %v1606_v57 = vld [vmem:[%s2010_s17 + $0xc0] ss:$8 sps:$4 sm:$0xff]  }
  0x7b   : > { %v1602_v54 = vld [vmem:[%s2010_s17 + $0xc4] ss:$8 sps:$4 sm:$0xff]   ;;  %1052 = vmatprep.mubr.bf16.mxu1 %v1628_v52  ;;  %1095 = vmatprep.mubr.bf16.mxu0 %v1631_v56  ;;  %v1607_v58 = vld [vmem:[%s2010_s17 + $0x1c0] ss:$8 sps:$4 sm:$0xff]   ;;  %v1608_v59 = vld [vmem:[%s2010_s17 + $0xd4] ss:$8 sps:$4 sm:$0xff]  }
  0x7c   : > { %1029 = vmatpush1.bf16.msra.mxu1 %v1558_v23  ;;  %v1604_v55 = vld [vmem:[%s2010_s17 + $0x1c4] ss:$8 sps:$4 sm:$0xff]   ;;  %v1610_v60 = vld [vmem:[%s2010_s17 + $0x1d4] ss:$8 sps:$4 sm:$0xff]   ;;  %v1612_v61 = vld [vmem:[%s2010_s17 + $0xd0] ss:$8 sps:$4 sm:$0xff]  }
  0x7d   : > { %1072 = vmatpush1.bf16.msra.mxu0 %v1559_v24  ;;  %1030 = vmatprep.subr.bf16.mxu1 %v1560_v25  ;;  %v1613_v62 = vld [vmem:[%s2010_s17 + $0x1d0] ss:$8 sps:$4 sm:$0xff]   ;;  %v1614_v63 = vld [vmem:[%s2010_s17 + $0xe4] ss:$8 sps:$4 sm:$0xff]   ;;  %v1618_v1 = vld [vmem:[%s2010_s17 + $0xe0] ss:$8 sps:$4 sm:$0xff]  }
  0x7e   : > { %1073 = vmatprep.subr.bf16.mxu0 %v1562_v26  ;;  %v1616_v0 = vld [vmem:[%s2010_s17 + $0x1e4] ss:$8 sps:$4 sm:$0xff]   ;;  %v1619_v2 = vld [vmem:[%s2010_s17 + $0x1e0] ss:$8 sps:$4 sm:$0xff]   ;;  %v1620_v3 = vld [vmem:[%s2010_s17 + $0xf4] ss:$8 sps:$4 sm:$0xff]  }
  0x7f   : > { %v1622_v4 = vld [vmem:[%s2010_s17 + $0x1f4] ss:$8 sps:$4 sm:$0xff]   ;;  %v1624_v5 = vld [vmem:[%s2010_s17 + $0xf0] ss:$8 sps:$4 sm:$0xff]   ;;  %v608_v10 = vld [vmem:[#allocation2] sm:$0xff]  ;;  %p1424_p5 = scmp.ne.s32.totalorder %s1702_s21, 8 }
  0x80   : > { %1031 = vmatpush1.bf16.msra.mxu1 %v1564_v27  ;;  %v1625_v6 = vld [vmem:[%s2010_s17 + $0x1f0] ss:$8 sps:$4 sm:$0xff]   ;;  %v609_v14 = vld [vmem:[#allocation2 + $0x8] sm:$0xff] }
  0x81   : > { %1074 = vmatpush1.bf16.msra.mxu0 %v1565_v28  ;;  %1032 = vmatprep.subr.bf16.mxu1 %v1566_v29  ;;  %v1626_v7 = vld [vmem:[%s2008_s19] ss:$16 sps:$4 sm:$0xff]   ;;  %v1629_v8 = vld [vmem:[%s2008_s19 + $0x8] ss:$16 sps:$4 sm:$0xff]   ;;  %v1124_v29 = vlaneseq (!%p1424_p5) }
  0x82   : > { %1075 = vmatprep.subr.bf16.mxu0 %v1568_v30  ;;  %v610_v18 = vld [vmem:[#allocation2 + $0x10] sm:$0xff]  ;;  %v611_v23 = vld [vmem:[#allocation2 + $0x18] sm:$0xff] }
  0x83   : > { %v1125_v30 = vshrl.u32 (!%p1424_p5), %v1124_v29, 7 }
  0x84   : > { %1033 = vmatpush1.bf16.msra.mxu1 %v1570_v31  ;;  %v1122_v31 = vld [vmem:[%s591_s9] sm:$0x3] (!%p1424_p5) }
  0x85   : > { %1076 = vmatpush1.bf16.msra.mxu0 %v1571_v32  ;;  %1034 = vmatprep.subr.bf16.mxu1 %v1572_v33  ;;  %v1138_v32 = vld [vmem:[%s596_s1] sm:$0x3] (!%p1424_p5) }
  0x86   : > { %1077 = vmatprep.subr.bf16.mxu0 %v1574_v34  ;;  %v1126_v34 = vsub.s32 (!%p1424_p5), 0, %v1125_v30 }
  0x88   : > { %1035 = vmatpush1.bf16.msra.mxu1 %v1576_v35  ;;  %v1130_v35 = vsub.s32 (!%p1424_p5), 1, %v1125_v30 }
  0x89   : > { %1078 = vmatpush1.bf16.msra.mxu0 %v1577_v36  ;;  %1036 = vmatprep.subr.bf16.mxu1 %v1578_v37 }
  0x8a   : > { %1079 = vmatprep.subr.bf16.mxu0 %v1580_v38 }
  0x8c   : > { %1037 = vmatpush1.bf16.msra.mxu1 %v1582_v39  ;;  %v1127_v39 = vrot.slane (!%p1424_p5), %v1122_v31, %v1126_v34 }
  0x8d   : > { %1080 = vmatpush1.bf16.msra.mxu0 %v1583_v40  ;;  %1038 = vmatprep.subr.bf16.mxu1 %v1584_v41  ;;  %v1131_v40 = vrot.slane (!%p1424_p5), %v1122_v31, %v1130_v35  ;;  %v1143_v41 = vrot.slane (!%p1424_p5), %v1138_v32, %v1126_v34 }
  0x8e   : > { %1081 = vmatprep.subr.bf16.mxu0 %v1586_v42  ;;  %v1147_v42 = vrot.slane (!%p1424_p5), %v1138_v32, %v1130_v35 }
  0x90   : > { %1039 = vmatpush1.bf16.msra.mxu1 %v1588_v43 }
  0x91   : > { %1082 = vmatpush1.bf16.msra.mxu0 %v1589_v44  ;;  %1040 = vmatprep.subr.bf16.mxu1 %v1590_v45 }
  0x92   : > { %1083 = vmatprep.subr.bf16.mxu0 %v1592_v46 }
  0x94   : > { %1041 = vmatpush1.bf16.msra.mxu1 %v1594_v47 }
  0x95   : > { %1084 = vmatpush1.bf16.msra.mxu0 %v1595_v48  ;;  %1042 = vmatprep.subr.bf16.mxu1 %v1596_v49 }
  0x96   : > { %1085 = vmatprep.subr.bf16.mxu0 %v1598_v50 }
  0x98   : > { %1043 = vmatpush1.bf16.msra.mxu1 %v1600_v51 }
  0x99   : > { %1086 = vmatpush1.bf16.msra.mxu0 %v1601_v53  ;;  %1044 = vmatprep.subr.bf16.mxu1 %v1602_v54 }
  0x9a   : > { %1087 = vmatprep.subr.bf16.mxu0 %v1604_v55 }
  0x9c   : > { %1045 = vmatpush1.bf16.msra.mxu1 %v1606_v57 }
  0x9d   : > { %1088 = vmatpush1.bf16.msra.mxu0 %v1607_v58  ;;  %1046 = vmatprep.subr.bf16.mxu1 %v1608_v59 }
  0x9e   : > { %1089 = vmatprep.subr.bf16.mxu0 %v1610_v60 }
  0xa0   : > { %1047 = vmatpush1.bf16.msra.mxu1 %v1612_v61 }
  0xa1   : > { %1090 = vmatpush1.bf16.msra.mxu0 %v1613_v62  ;;  %1048 = vmatprep.subr.bf16.mxu1 %v1614_v63 }
  0xa2   : > { %1091 = vmatprep.subr.bf16.mxu0 %v1616_v0 }
  0xa4   : > { %1049 = vmatpush1.bf16.msra.mxu1 %v1618_v1 }
  0xa5   : > { %1092 = vmatpush1.bf16.msra.mxu0 %v1619_v2  ;;  %1050 = vmatprep.subr.bf16.mxu1 %v1620_v3 }
  0xa6   : > { %1093 = vmatprep.subr.bf16.mxu0 %v1622_v4 }
  0xa8   : > { %1051 = vmatpush1.bf16.msra.mxu1 %v1624_v5 }
  0xa9   : > { %1094 = vmatpush1.bf16.msra.mxu0 %v1625_v6 }
  0xab   : > { %1053 = vmatmul.mubr.bf16.vlgmr.msra.gmra.mrb[0].mxu1 %v1626_v7 }
  0xac   : > { %1096 = vmatmul.mubr.bf16.vlgmr.msra.gmra.mrb[0].mxu0 %v1629_v8 }
 0x17e   : > { %v1054_v9 = vpop.f32.mrb[0].mxu1 }
 0x17f   : > { %v1097_v11 = vpop.f32.mrb[0].mxu0  ;;  %v1056_v13 = vpop.f32.mrb[1].mxu1 }
 0x180   : > { %v1098_v12 = vadd.f32 %v1097_v11, %v1054_v9  ;;  %v1099_v15 = vpop.f32.mrb[1].mxu0  ;;  %v1058_v17 = vpop.f32.mrb[2].mxu1 }
 0x181   : > { %v1100_v16 = vadd.f32 %v1099_v15, %v1056_v13  ;;  %v1101_v19 = vpop.f32.mrb[2].mxu0  ;;  %v1060_v22 = vpop.f32.mrb[3].mxu1  ;;  %1117 = sbr.rel (%p1424_p5) target bundleno = 408 (0x198), region = 105 }
 0x182   : > { %v1106_v20 = vadd.f32 %v1098_v12, %v608_v10  ;;  %v1102_v21 = vadd.f32 %v1101_v19, %v1058_v17  ;;  %v1103_v24 = vpop.f32.mrb[3].mxu0 }
 0x183   : > { %v1107_v25 = vadd.f32 %v1100_v16, %v609_v14  ;;  %v1104_v26 = vadd.f32 %v1103_v24, %v1060_v22 }
 0x184   : > { %1110 = vst [vmem:[#allocation2] sm:$0xff] %v1106_v20  ;;  %v1108_v27 = vadd.f32 %v1102_v21, %v610_v18 }
 0x185   : > { %1111 = vst [vmem:[#allocation2 + $0x8] sm:$0xff] %v1107_v25  ;;  %v1109_v28 = vadd.f32 %v1104_v26, %v611_v23 }
 0x186   : > { %1112 = vst [vmem:[#allocation2 + $0x10] sm:$0xff] %v1108_v27 }
 0x187   : > { %1113 = vst [vmem:[#allocation2 + $0x18] sm:$0xff] %v1109_v28 }
 0x18b   : > { %v1118_v33 = vld [vmem:[#allocation2] sm:$0xff] }
 0x18c   : > { %v1119_v36 = vld [vmem:[#allocation2 + $0x8] sm:$0xff]  ;;  %v1134_v43 = vmul.f32 %v1127_v39, %v1118_v33 }
 0x18d   : > { %v1120_v37 = vld [vmem:[#allocation2 + $0x10] sm:$0xff]  ;;  %v1135_v44 = vmul.f32 %v1131_v40, %v1119_v36 }
 0x18e   : > { %v1121_v38 = vld [vmem:[#allocation2 + $0x18] sm:$0xff]  ;;  %v1136_v45 = vmul.f32 %v1127_v39, %v1120_v37  ;;  %v1150_v47 = vadd.f32 %v1143_v41, %v1134_v43 }
 0x18f   : > { %v1137_v46 = vmul.f32 %v1131_v40, %v1121_v38  ;;  %v1151_v48 = vadd.f32 %v1147_v42, %v1135_v44 }
 0x190   : > { %v1152_v49 = vadd.f32 %v1143_v41, %v1136_v45  ;;  %v1154_v51 = vmax.f32 %v1150_v47, 0.0 }
 0x191   : > { %v1153_v50 = vadd.f32 %v1147_v42, %v1137_v46  ;;  %v1155_v52 = vmax.f32 %v1151_v48, 0.0 }
 0x192   : > { %v1156_v53 = vmax.f32 %v1152_v49, 0.0 }
 0x193   : > { %v1157_v54 = vmax.f32 %v1153_v50, 0.0  ;;  %v1434_v55 = vpack.c.bf16 %v1155_v52, %v1154_v51 }
 0x195   : > { %v1435_v56 = vpack.c.bf16 %v1157_v54, %v1156_v53  ;;  %1170 = vst [vmem:[%s2012_s15] sm:$0xff] %v1434_v55 }
 0x197   : > { %1171 = vst [vmem:[%s2012_s15 + $0x8] sm:$0xff] %v1435_v56 }
 0x198 PF: > { %1178 = sbr.rel (!%p1840_p12) target bundleno = 416 (0x1a0), region = 109  ;;  %s1436_s1 = sshll.u32 (%p1840_p12), %s1706_s22, 3 }
 0x199   : > { %s1184_s29 = scalar_lea.vmem (%p1840_p12), %s2141_s4, %s1436_s1 }
 0x19c   : > { %v1214_v57 = vld [vmem:[%s2012_s15] sm:$0xff] (%p1840_p12) }
 0x19d   : > { %1215 = vst [vmem:[%s1184_s29] sm:$0xff] (%p1840_p12), %v1214_v57 }
 0x19e   : > { %v1216_v58 = vld [vmem:[%s2012_s15 + $0x8] sm:$0xff] (%p1840_p12) }
 0x19f   : > { %1217 = vst [vmem:[%s1184_s29 + $0x10] sm:$0xff] %v1216_v58 }
 0x1a0 PF: > { %s14_s25 = sadd.s32 1, %s1718_s25   ;;  %s2153_s14 = sld [smem:[#allocation6_spill]] }
 0x1a1   : > { %p11_p6 = scmp.ge.s32.totalorder %s14_s25, 20   ;;  %s2154_s27 = sld [smem:[#allocation7_spill]] }
 0x1a2   : > { %s2155_s15 = smov %s1682_s16  ;;  %s2156_s16 = smov %s1838_s13 }
 0x1a3   : > { %s2157_s17 = smov %s1690_s18  ;;  %s2158_s18 = smov %s1835_s12 }
 0x1a4   : > { %s2159_s19 = smov %s1698_s20  ;;  %s2160_s20 = smov %s1821_s7 }
 0x1a5   : > { %s2161_s21 = smov %s1710_s23  ;;  %s2162_s22 = smov %s1714_s24 }
 0x1a6   : > { %s2163_s23 = smov %s2153_s14  ;;  %13 = sbr.rel (!%p11_p6) target bundleno = 9 (0x9), region = 192 }
 0x1a7   : > { %s2164_s24 = smov %s2154_s27 }

// kernel: mnist_resnet_forward.43
= control target key start
LH: loop header
LB: loop body
LE: loop exit
PB: predicated region body
PF: predicated region fallthrough
CT: control target
= control target key end

     0   :  { %s686_s1 = inlined_call_operand.vmem [shape: bf16[512,128], index: 1, kind: input, shape index: {}]   ;;  %s687_s0 = inlined_call_operand.vmem [shape: bf16[16,512], index: 0, kind: input, shape index: {}]   ;;  %s688_s2 = inlined_call_operand.vmem [shape: f32[1,128], index: 2, kind: input, shape index: {}]   ;;  %s689_s3 = inlined_call_operand.vmem [shape: f32[1,128], index: 3, kind: input, shape index: {}]   ;;  %s690_s4 = inlined_call_operand.vmem [shape: f32[16,128], index: 4, kind: output, shape index: {}]  }
   0x1   :  { %v503_v0 = vld [vmem:[%s686_s1 + $0x40] sm:$0xff]   ;;  %v507_v4 = vld [vmem:[%s686_s1 + $0x48] sm:$0xff]   ;;  %v511_v8 = vld [vmem:[%s686_s1 + $0x50] sm:$0xff]  }
   0x2   :  { %v504_v1 = vld [vmem:[%s686_s1 + $0xc0] sm:$0xff]   ;;  %459 = vmatprep.subr.bf16.mxu0 %v503_v0  ;;  %v508_v5 = vld [vmem:[%s686_s1 + $0xc8] sm:$0xff]   ;;  %v512_v9 = vld [vmem:[%s686_s1 + $0xd0] sm:$0xff]  }
   0x3   :  { %v505_v2 = vld [vmem:[%s686_s1] sm:$0xff]   ;;  %481 = vmatprep.subr.bf16.mxu1 %v504_v1  ;;  %v509_v6 = vld [vmem:[%s686_s1 + $0x8] sm:$0xff]   ;;  %v513_v10 = vld [vmem:[%s686_s1 + $0x10] sm:$0xff]  }
   0x4   :  { %v506_v3 = vld [vmem:[%s686_s1 + $0x80] sm:$0xff]   ;;  %460 = vmatpush3.bf16.msra.mxu0 %v505_v2  ;;  %v510_v7 = vld [vmem:[%s686_s1 + $0x88] sm:$0xff]   ;;  %v514_v11 = vld [vmem:[%s686_s1 + $0x90] sm:$0xff]  }
   0x5   :  { %482 = vmatpush3.bf16.msra.mxu1 %v506_v3  ;;  %461 = vmatprep.subr.bf16.mxu0 %v507_v4  ;;  %v515_v12 = vld [vmem:[%s686_s1 + $0x58] sm:$0xff]   ;;  %v519_v16 = vld [vmem:[%s686_s1 + $0x60] sm:$0xff]   ;;  %v523_v20 = vld [vmem:[%s686_s1 + $0x68] sm:$0xff]  }
   0x6   :  { %483 = vmatprep.subr.bf16.mxu1 %v508_v5  ;;  %v516_v13 = vld [vmem:[%s686_s1 + $0xd8] sm:$0xff]   ;;  %v520_v17 = vld [vmem:[%s686_s1 + $0xe0] sm:$0xff]   ;;  %v524_v21 = vld [vmem:[%s686_s1 + $0xe8] sm:$0xff]  }
   0x7   :  { %v517_v14 = vld [vmem:[%s686_s1 + $0x18] sm:$0xff]   ;;  %v521_v18 = vld [vmem:[%s686_s1 + $0x20] sm:$0xff]   ;;  %v525_v22 = vld [vmem:[%s686_s1 + $0x28] sm:$0xff]  }
   0x8   :  { %462 = vmatpush3.bf16.msra.mxu0 %v509_v6  ;;  %v518_v15 = vld [vmem:[%s686_s1 + $0x98] sm:$0xff]   ;;  %v522_v19 = vld [vmem:[%s686_s1 + $0xa0] sm:$0xff]   ;;  %v526_v23 = vld [vmem:[%s686_s1 + $0xa8] sm:$0xff]  }
   0x9   :  { %484 = vmatpush3.bf16.msra.mxu1 %v510_v7  ;;  %463 = vmatprep.subr.bf16.mxu0 %v511_v8  ;;  %v527_v24 = vld [vmem:[%s686_s1 + $0x70] sm:$0xff]   ;;  %v531_v28 = vld [vmem:[%s686_s1 + $0x78] sm:$0xff]   ;;  %v457_v45 = vld [vmem:[%s688_s2] ss:$0 sm:$0xff] }
   0xa   :  { %485 = vmatprep.subr.bf16.mxu1 %v512_v9  ;;  %v528_v25 = vld [vmem:[%s686_s1 + $0xf0] sm:$0xff]   ;;  %v532_v29 = vld [vmem:[%s686_s1 + $0xf8] sm:$0xff]   ;;  %v458_v50 = vld [vmem:[%s689_s3] ss:$0 sm:$0xff] }
   0xb   :  { %v529_v26 = vld [vmem:[%s686_s1 + $0x30] sm:$0xff]   ;;  %v533_v30 = vld [vmem:[%s686_s1 + $0x38] sm:$0xff]  }
   0xc   :  { %464 = vmatpush3.bf16.msra.mxu0 %v513_v10  ;;  %v530_v27 = vld [vmem:[%s686_s1 + $0xb0] sm:$0xff]   ;;  %v534_v31 = vld [vmem:[%s686_s1 + $0xb8] sm:$0xff]  }
   0xd   :  { %486 = vmatpush3.bf16.msra.mxu1 %v514_v11  ;;  %465 = vmatprep.subr.bf16.mxu0 %v515_v12  ;;  %v535_v32 = vld [vmem:[%s687_s0] ss:$16 sps:$4 sm:$0xff]   ;;  %v537_v33 = vld [vmem:[%s687_s0 + $0x4] ss:$16 sps:$4 sm:$0xff]   ;;  %v538_v34 = vld [vmem:[%s687_s0 + $0x8] ss:$16 sps:$4 sm:$0xff]  }
   0xe   :  { %487 = vmatprep.subr.bf16.mxu1 %v516_v13  ;;  %v540_v35 = vld [vmem:[%s687_s0 + $0xc] ss:$16 sps:$4 sm:$0xff]   ;;  %338 = vmatprep.mubr.bf16.mxu0 %v537_v33 }
   0xf   :  { %379 = vmatprep.mubr.bf16.mxu1 %v540_v35 }
  0x10   :  { %466 = vmatpush3.bf16.msra.mxu0 %v517_v14 }
  0x11   :  { %488 = vmatpush3.bf16.msra.mxu1 %v518_v15  ;;  %467 = vmatprep.subr.bf16.mxu0 %v519_v16 }
  0x12   :  { %489 = vmatprep.subr.bf16.mxu1 %v520_v17 }
  0x14   :  { %468 = vmatpush3.bf16.msra.mxu0 %v521_v18 }
  0x15   :  { %490 = vmatpush3.bf16.msra.mxu1 %v522_v19  ;;  %469 = vmatprep.subr.bf16.mxu0 %v523_v20 }
  0x16   :  { %491 = vmatprep.subr.bf16.mxu1 %v524_v21 }
  0x18   :  { %470 = vmatpush3.bf16.msra.mxu0 %v525_v22 }
  0x19   :  { %492 = vmatpush3.bf16.msra.mxu1 %v526_v23  ;;  %471 = vmatprep.subr.bf16.mxu0 %v527_v24 }
  0x1a   :  { %493 = vmatprep.subr.bf16.mxu1 %v528_v25 }
  0x1c   :  { %472 = vmatpush3.bf16.msra.mxu0 %v529_v26 }
  0x1d   :  { %494 = vmatpush3.bf16.msra.mxu1 %v530_v27  ;;  %473 = vmatprep.subr.bf16.mxu0 %v531_v28 }
  0x1e   :  { %495 = vmatprep.subr.bf16.mxu1 %v532_v29 }
  0x20   :  { %474 = vmatpush3.bf16.msra.mxu0 %v533_v30 }
  0x21   :  { %496 = vmatpush3.bf16.msra.mxu1 %v534_v31 }
  0x23   :  { %339 = vmatmul.mubr.bf16.vlgmr.msra.gmra.mrb[0].mxu0 %v535_v32 }
  0x24   :  { %380 = vmatmul.mubr.bf16.vlgmr.msra.gmra.mrb[0].mxu1 %v538_v34 }
  0xf6   :  { %v475_v36 = vpop.f32.mrb[0].mxu0 }
  0xf7   :  { %v497_v37 = vpop.f32.mrb[0].mxu1  ;;  %v476_v38 = vpop.f32.mrb[1].mxu0 }
  0xf8   :  { %v477_v39 = vadd.f32 %v476_v38, %v475_v36  ;;  %v498_v40 = vpop.f32.mrb[1].mxu1  ;;  %v478_v41 = vpop.f32.mrb[2].mxu0 }
  0xf9   :  { %v499_v42 = vadd.f32 %v498_v40, %v497_v37  ;;  %v500_v43 = vpop.f32.mrb[2].mxu1  ;;  %v479_v44 = vpop.f32.mrb[3].mxu0 }
  0xfa   :  { %v480_v46 = vadd.f32 %v479_v44, %v478_v41  ;;  %v501_v47 = vpop.f32.mrb[3].mxu1 }
  0xfb   :  { %v382_v48 = vadd.f32 %v499_v42, %v477_v39  ;;  %v502_v49 = vadd.f32 %v501_v47, %v500_v43 }
  0xfd   :  { %v404_v51 = vmul.f32 %v457_v45, %v382_v48  ;;  %v385_v52 = vadd.f32 %v502_v49, %v480_v46 }
  0xff   :  { %v413_v53 = vadd.f32 %v458_v50, %v404_v51  ;;  %v405_v54 = vmul.f32 %v457_v45, %v385_v52 }
 0x101   :  { %415 = vst [vmem:[%s690_s4] sm:$0xff] %v413_v53  ;;  %v414_v55 = vadd.f32 %v458_v50, %v405_v54 }
 0x103   :  { %416 = vst [vmem:[%s690_s4 + $0x8] sm:$0xff] %v414_v55 }

</bundles_post_ra>
